<compile_context>
chip_gen: v5e
topology: v5e:2x2
jax: 0.10.0
libtpu: 0.0.40
codegen_flags: <defaults>
</compile_context>

<pallas_src>
import functools
import math

import jax
import jax.numpy as jnp
from jax import lax
from jax.experimental import pallas as pl
from jax.experimental.pallas import tpu as pltpu


# ----------------------------- in-kernel helpers -----------------------------

def _ln(x, g, b, eps=1e-5):
    m = jnp.mean(x, axis=-1, keepdims=True)
    c = x - m
    v = jnp.mean(c * c, axis=-1, keepdims=True)
    return c * lax.rsqrt(v + eps) * g + b


def _gelu(x):
    # TODO(synk): PyTorch nn.GELU defaults to erf; tanh approximation used here.
    return jax.nn.gelu(x, approximate=True)


# ------------------------------- fused kernel --------------------------------

def _fused_kernel(enc_ref, lat_ref, pre_ref, pad_ref, *rest, names, B, n_part,
                  n_enc, n_pos, e_dim, n_embed, hdim, post_depth, res_depth,
                  n_layer, n_head, d_model, dh, loss_scale):
    f32 = jnp.float32
    nw = len(names)
    w = {k: r for k, r in zip(names, rest)}
    out_ref, loss_ref, hs_ref = rest[nw], rest[nw + 1], rest[nw + 2]

    N = B * n_part                    # token rows (batch folded into sublanes)
    M = B * n_enc                     # encoder-memory rows
    dn_t = (((1,), (1,)), ((), ()))   # contract last dims == q @ k^T, no transpose
    NEG = jnp.float32(-1e9)
    scale = 1.0 / math.sqrt(dh)

    # ---------------- PostEncoder (enc_data) ----------------
    # TODO(synk): PostEncoder internals re-implemented from convention:
    # in_fc followed by `deepth` pre-LN residual MLP blocks (dropout = eval).
    e = (jnp.dot(enc_ref[...], w["pe_in_w"][...], preferred_element_type=f32)
         + w["pe_in_b"][...])
    for i in range(post_depth):
        h = _ln(e, w["pe_ln_g"][i], w["pe_ln_b"][i])
        h = _gelu(jnp.dot(h, w["pe_fc1_w"][i], preferred_element_type=f32)
                  + w["pe_fc1_b"][i])
        h = jnp.dot(h, w["pe_fc2_w"][i], preferred_element_type=f32) + w["pe_fc2_b"][i]
        e = e + h
    enc = e                                         # (M, d_model)

    # ------------- latent expand + ResnetBlockFC stack -------------
    # TODO(synk): ResnetBlockFC re-implemented as x + fc1(relu(fc0(relu(x)))).
    x = (jnp.dot(lat_ref[...], w["ex_w"][...], preferred_element_type=f32)
         + w["ex_b"][...])
    for i in range(res_depth):
        h = jnp.maximum(x, 0.0)
        h = jnp.maximum(
            jnp.dot(h, w["rs0_w"][i], preferred_element_type=f32) + w["rs0_b"][i], 0.0)
        h = jnp.dot(h, w["rs1_w"][i], preferred_element_type=f32) + w["rs1_b"][i]
        x = x + h
    # x columns are already position-major (permutation folded into weights).

    # ------------- vector quantization (per position, all in VMEM) -------------
    cb = w["codebook"][...]                         # (n_embed, e_dim)
    cb_sq = w["cb_sq"][...]                         # (1, n_embed) = ||e_k||^2
    zq_parts = []
    sq_err = jnp.zeros((N, 1), f32)
    for pos in range(n_pos):
        zp = x[:, pos * e_dim:(pos + 1) * e_dim]    # (N, e_dim), static lane slice
        # argmin_k ||z - e_k||^2 == argmin_k (-2 z.e_k + ||e_k||^2)
        d = -2.0 * lax.dot_general(zp, cb, dn_t, preferred_element_type=f32) + cb_sq
        col = lax.broadcasted_iota(jnp.int32, d.shape, 1)
        dmin = jnp.min(d, axis=1, keepdims=True)
        idx = jnp.min(jnp.where(d <= dmin, col, n_embed), axis=1, keepdims=True)
        onehot = (col == idx).astype(f32)
        zqp = jnp.dot(onehot, cb, preferred_element_type=f32)   # codebook gather
        zq_parts.append(zqp)
        diff = zqp - zp
        sq_err = sq_err + jnp.sum(diff * diff, axis=1, keepdims=True)
    zq = jnp.concatenate(zq_parts, axis=1)          # (N, n_pos*e_dim), pos-major
    loss_ref[...] = jnp.sum(sq_err, axis=0, keepdims=True) * loss_scale

    # ------------- condition, tokenizer, GRU position embedding -------------
    cond = jnp.dot(zq, w["l2c_w"][...], preferred_element_type=f32) + w["l2c_b"][...]
    # tokenizer fc1 applied as split matmul (no in-kernel lane concat)
    t = _gelu(jnp.dot(pre_ref[...], w["tk1p_w"][...], preferred_element_type=f32)
              + jnp.dot(cond, w["tk1c_w"][...], preferred_element_type=f32)
              + w["tk1_b"][...])
    t = jnp.dot(t, w["tk2_w"][...], preferred_element_type=f32) + w["tk2_b"][...]

    # TODO(synk): PositionGRUEmbedding re-implemented as tokens + proj(GRU(tokens)).
    xg = jnp.dot(t, w["gin_w"][...], preferred_element_type=f32) + w["gin_b"][...]
    whh = w["ghh_w"][...]
    bhh = w["ghh_b"][...]
    h = jnp.zeros((B, hdim), f32)
    for p in range(n_part):            # 8 serial steps, batched across B rows
        xp = jnp.concatenate(
            [xg[b * n_part + p:b * n_part + p + 1, :] for b in range(B)], axis=0)
        hg = jnp.dot(h, whh, preferred_element_type=f32) + bhh
        rg = jax.nn.sigmoid(xp[:, :hdim] + hg[:, :hdim])
        ug = jax.nn.sigmoid(xp[:, hdim:2 * hdim] + hg[:, hdim:2 * hdim])
        ng = jnp.tanh(xp[:, 2 * hdim:] + rg * hg[:, 2 * hdim:])
        h = (1.0 - ug) * ng + ug * h
        for b in range(B):             # direct row writes, no one-hot scatter
            hs_ref[pl.ds(b * n_part + p, 1), :] = h[b:b + 1, :]
    tok = (t + jnp.dot(hs_ref[...], w["gpr_w"][...], preferred_element_type=f32)
           + w["gpr_b"][...])

    # ------------- attention biases (hoisted, built once, no int division) ------
    def seg_ids(shape, axis, seg, nseg):
        it = lax.broadcasted_iota(jnp.int32, shape, axis)
        sid = jnp.zeros(shape, jnp.int32)
        for s in range(1, nseg):
            sid = sid + (it >= s * seg).astype(jnp.int32)
        return sid

    HN, HM = n_head * N, n_head * M
    pad_t = jnp.concatenate([pad_ref[...]] * n_head, axis=1)        # (1, HN)
    ok_self = jnp.logical_and(
        seg_ids((HN, HN), 0, n_part, n_head * B)
        == seg_ids((HN, HN), 1, n_part, n_head * B),
        pad_t > 0.5)
    bias_self = jnp.where(ok_self, 0.0, NEG)                        # (HN, HN)
    bias_cross = jnp.where(
        seg_ids((HN, HM), 0, n_part, n_head * B)
        == seg_ids((HN, HM), 1, n_enc, n_head * B), 0.0, NEG)       # (HN, HM)

    # ------------- multi-head attention, heads stacked along sublanes -----------
    def split_heads(v):        # (n, d_model) -> (n_head*n, dh)
        return jnp.concatenate(
            [v[:, i * dh:(i + 1) * dh] for i in range(n_head)], axis=0)

    def merge_heads(v, n):     # (n_head*n, dh) -> (n, d_model)
        return jnp.concatenate(
            [v[i * n:(i + 1) * n, :] for i in range(n_head)], axis=1)

    def mha(q, k, v, bias):
        qs, ks, vs = split_heads(q), split_heads(k), split_heads(v)
        s = lax.dot_general(qs, ks, dn_t, preferred_element_type=f32) * scale + bias
        s = s - jnp.max(s, axis=-1, keepdims=True)
        pr = jnp.exp(s)
        pr = pr / jnp.sum(pr, axis=-1, keepdims=True)
        return merge_heads(jnp.dot(pr, vs, preferred_element_type=f32), q.shape[0])

    # ------------- decoder layer stack -------------
    # TODO(synk): DecoderLayer re-implemented as pre-LN (self-attn with key
    # padding, cross-attn on encoder memory, FFN) with residuals.
    for l in range(n_layer):
        h1 = _ln(tok, w["ln1_g"][l], w["ln1_b"][l])
        qkv = jnp.dot(h1, w["qkv_w"][l], preferred_element_type=f32) + w["qkv_b"][l]
        a = mha(qkv[:, :d_model], qkv[:, d_model:2 * d_model], qkv[:, 2 * d_model:],
                bias_self)
        tok = tok + jnp.dot(a, w["so_w"][l], preferred_element_type=f32) + w["so_b"][l]

        h2 = _ln(tok, w["ln2_g"][l], w["ln2_b"][l])
        qx = jnp.dot(h2, w["cq_w"][l], preferred_element_type=f32) + w["cq_b"][l]
        kv = jnp.dot(enc, w["ckv_w"][l], preferred_element_type=f32) + w["ckv_b"][l]
        a = mha(qx, kv[:, :d_model], kv[:, d_model:], bias_cross)
        tok = tok + jnp.dot(a, w["co_w"][l], preferred_element_type=f32) + w["co_b"][l]

        h3 = _ln(tok, w["ln3_g"][l], w["ln3_b"][l])
        hf = _gelu(jnp.dot(h3, w["f1_w"][l], preferred_element_type=f32) + w["f1_b"][l])
        tok = tok + jnp.dot(hf, w["f2_w"][l], preferred_element_type=f32) + w["f2_b"][l]

    # ------------- fused output heads -> one lane-dense slab store -------------
    hh = _gelu(jnp.dot(tok, w["h1_w"][...], preferred_element_type=f32)
               + w["h1_b"][...])
    out_ref[...] = (jnp.dot(hh, w["h2_w"][...], preferred_element_type=f32)
                    + w["h2_b"][...])


# ------------------------------ parameter init --------------------------------

def _linear_init(key, din, dout):
    kw, kb = jax.random.split(key)
    wgt = jax.random.normal(kw, (din, dout), jnp.float32) / jnp.sqrt(float(din))
    b = 0.01 * jax.random.normal(kb, (dout,), jnp.float32).reshape(1, dout)
    return {"w": wgt, "b": b}


def _stack(dicts):
    return {k: jnp.stack([d[k] for d in dicts], axis=0) for k in dicts[0]}


def init_params(key, cfg):
    ps = cfg["part_structure"]
    mc = cfg["transformer_model_paramerter"]
    dc = cfg["diff_config"]
    d_model = mc["d_model"]
    dim_latent = ps["latentcode"]
    dim_condition = ps["condition"]
    d_tok_cond = sum(v for k, v in ps.items() if k != "latentcode")
    e_dim, n_pos = mc["vq_expand_dim"]
    expand_dim = e_dim * n_pos
    hid = mc["tokenizer_hidden_dim"]
    hdim = mc["position_embedding_dim_single_emb"]

    keys = iter(jax.random.split(key, 256))
    nk = lambda: next(keys)
    lin = lambda din, dout: _linear_init(nk(), din, dout)
    ln = lambda d: (jnp.ones((1, d), jnp.float32), jnp.zeros((1, d), jnp.float32))

    p = {}
    # PostEncoder
    p["pe_in"] = lin(mc["encoder_kv_dim"], d_model)
    blocks = []
    for _ in range(mc["post_encoder_deepth"]):
        g, b = ln(d_model)
        f1 = lin(d_model, 2 * d_model)
        f2 = lin(2 * d_model, d_model)
        blocks.append({"ln_g": g, "ln_b": b, "fc1_w": f1["w"], "fc1_b": f1["b"],
                       "fc2_w": f2["w"], "fc2_b": f2["b"]})
    p["pe_blocks"] = _stack(blocks)

    # latent path + VQ
    p["expand"] = lin(dim_latent, expand_dim)
    res = []
    for _ in range(mc["before_vq_net_deepth"]):
        f0 = lin(expand_dim, expand_dim)
        f1 = lin(expand_dim, expand_dim)
        res.append({"fc0_w": f0["w"], "fc0_b": f0["b"],
                    "fc1_w": f1["w"], "fc1_b": f1["b"]})
    p["resnet"] = _stack(res)
    p["codebook"] = jax.random.uniform(
        nk(), (mc["n_embed"], e_dim), jnp.float32,
        -1.0 / mc["n_embed"], 1.0 / mc["n_embed"])
    p["l2c"] = lin(expand_dim, dim_condition)

    # tokenizer / untokenizer / GRU position embedding
    p["tok1"] = lin(d_tok_cond, hid)
    p["tok2"] = lin(hid, d_model)
    p["gru_in"] = lin(d_model, 3 * hdim)
    p["gru_hh"] = lin(hdim, 3 * hdim)
    p["gru_proj"] = lin(hdim, d_model)

    # decoder layers, QKV / cross-KV fused
    layers = []
    for _ in range(mc["n_layer"]):
        l = {}
        l["ln1_g"], l["ln1_b"] = ln(d_model)
        qkv = lin(d_model, 3 * d_model); l["qkv_w"], l["qkv_b"] = qkv["w"], qkv["b"]
        so = lin(d_model, d_model);      l["so_w"], l["so_b"] = so["w"], so["b"]
        l["ln2_g"], l["ln2_b"] = ln(d_model)
        cq = lin(d_model, d_model);      l["cq_w"], l["cq_b"] = cq["w"], cq["b"]
        ckv = lin(d_model, 2 * d_model); l["ckv_w"], l["ckv_b"] = ckv["w"], ckv["b"]
        co = lin(d_model, d_model);      l["co_w"], l["co_b"] = co["w"], co["b"]
        l["ln3_g"], l["ln3_b"] = ln(d_model)
        f1 = lin(d_model, 4 * d_model);  l["f1_w"], l["f1_b"] = f1["w"], f1["b"]
        f2 = lin(4 * d_model, d_model);  l["f2_w"], l["f2_b"] = f2["w"], f2["b"]
        layers.append(l)
    p["layers"] = _stack(layers)

    # output heads
    p["et1"] = lin(d_model, d_model)
    p["et2"] = lin(d_model, 1)
    p["ut1"] = lin(d_model, hid)
    p["ut2"] = lin(hid, d_tok_cond)
    p["tth"] = lin(dim_condition, dc["diffusion_model_config"]["text_hat_dim"])
    p["tzl"] = lin(dim_condition,
                   dc["gsemb_num_embeddings"] * dc["gsemb_latent_dim"])
    return p


def prepare_params(params, cfg):
    """One-time (eager) weight permutation / fusion: zero per-call cost."""
    ps = cfg["part_structure"]
    mc = cfg["transformer_model_paramerter"]
    dc = cfg["diff_config"]
    d_model = mc["d_model"]
    dim_condition = ps["condition"]
    d_tok_cond = sum(v for k, v in ps.items() if k != "latentcode")
    prefix_dim = d_tok_cond - dim_condition
    e_dim, n_pos = mc["vq_expand_dim"]
    hid = mc["tokenizer_hidden_dim"]
    th_dim = dc["diffusion_model_config"]["text_hat_dim"]
    z_out = dc["gsemb_num_embeddings"] * dc["gsemb_latent_dim"]

    # (e_dim, n_pos)-major -> (n_pos, e_dim)-major column permutation, folded
    # into the weights so the kernel never permutes the latent tensor.
    perm = jnp.array([c * n_pos + pos for pos in range(n_pos) for c in range(e_dim)],
                     jnp.int32)

    out = {}
    out["pe_in_w"], out["pe_in_b"] = params["pe_in"]["w"], params["pe_in"]["b"]
    pb = params["pe_blocks"]
    out["pe_ln_g"], out["pe_ln_b"] = pb["ln_g"], pb["ln_b"]
    out["pe_fc1_w"], out["pe_fc1_b"] = pb["fc1_w"], pb["fc1_b"]
    out["pe_fc2_w"], out["pe_fc2_b"] = pb["fc2_w"], pb["fc2_b"]

    out["ex_w"] = params["expand"]["w"][:, perm]
    out["ex_b"] = params["expand"]["b"][:, perm]
    rs = params["resnet"]
    out["rs0_w"] = rs["fc0_w"][:, perm, :][:, :, perm]
    out["rs0_b"] = rs["fc0_b"][:, :, perm]
    out["rs1_w"] = rs["fc1_w"][:, perm, :][:, :, perm]
    out["rs1_b"] = rs["fc1_b"][:, :, perm]
    out["codebook"] = params["codebook"]
    out["cb_sq"] = jnp.sum(params["codebook"] ** 2, axis=1)[None, :]
    out["l2c_w"] = params["l2c"]["w"][perm, :]
    out["l2c_b"] = params["l2c"]["b"]

    out["tk1p_w"] = params["tok1"]["w"][:prefix_dim, :]
    out["tk1c_w"] = params["tok1"]["w"][prefix_dim:, :]
    out["tk1_b"] = params["tok1"]["b"]
    out["tk2_w"], out["tk2_b"] = params["tok2"]["w"], params["tok2"]["b"]
    out["gin_w"], out["gin_b"] = params["gru_in"]["w"], params["gru_in"]["b"]
    out["ghh_w"], out["ghh_b"] = params["gru_hh"]["w"], params["gru_hh"]["b"]
    out["gpr_w"], out["gpr_b"] = params["gru_proj"]["w"], params["gru_proj"]["b"]

    for k in ("ln1_g", "ln1_b", "qkv_w", "qkv_b", "so_w", "so_b",
              "ln2_g", "ln2_b", "cq_w", "cq_b", "ckv_w", "ckv_b", "co_w", "co_b",
              "ln3_g", "ln3_b", "f1_w", "f1_b", "f2_w", "f2_b"):
        out[k] = params["layers"][k]

    # Output heads: fuse end-token / untokenizer first layers, compose text_hat
    # and z_logits linears with the untokenizer condition slice, and pack the
    # second stage into one lane-padded (>=128 wide) weight so the kernel's
    # final store is a single unmasked lane-dense slab.
    et1, et2 = params["et1"], params["et2"]
    ut1, ut2 = params["ut1"], params["ut2"]
    tth, tzl = params["tth"], params["tzl"]
    out["h1_w"] = jnp.concatenate([et1["w"], ut1["w"]], axis=1)     # (d_model, d_model+hid)
    out["h1_b"] = jnp.concatenate([et1["b"], ut1["b"]], axis=1)
    w_th = ut2["w"][:, -dim_condition:] @ tth["w"]
    b_th = ut2["b"][:, -dim_condition:] @ tth["w"] + tth["b"]
    w_z = ut2["w"][:, -dim_condition:] @ tzl["w"]
    b_z = ut2["b"][:, -dim_condition:] @ tzl["w"] + tzl["b"]
    total = d_tok_cond + 1 + th_dim + z_out
    slab_w = ((total + 127) // 128) * 128
    pad = slab_w - total
    zc = lambda r, c: jnp.zeros((r, c), jnp.float32)
    blk_tok = jnp.concatenate([zc(d_model, d_tok_cond), ut2["w"]], axis=0)
    blk_end = jnp.concatenate([et2["w"], zc(hid, 1)], axis=0)
    blk_th = jnp.concatenate([zc(d_model, th_dim), w_th], axis=0)
    blk_z = jnp.concatenate([zc(d_model, z_out), w_z], axis=0)
    out["h2_w"] = jnp.concatenate(
        [blk_tok, blk_end, blk_th, blk_z, zc(d_model + hid, pad)], axis=1)
    out["h2_b"] = jnp.concatenate(
        [ut2["b"], et2["b"], b_th, b_z, zc(1, pad)], axis=1)
    return out


# -------------------------------- forward pass --------------------------------

def make_forward(cfg):
    ps = cfg["part_structure"]
    mc = cfg["transformer_model_paramerter"]
    dc = cfg["diff_config"]
    d_model = mc["d_model"]
    n_head = mc["n_head"]
    dh = d_model // n_head
    dim_latent = ps["latentcode"]
    dim_condition = ps["condition"]
    d_tok_in = sum(v for k, v in ps.items() if k != "condition")
    d_tok_cond = sum(v for k, v in ps.items() if k != "latentcode")
    prefix_dim = d_tok_in - dim_latent
    e_dim, n_pos = mc["vq_expand_dim"]
    hdim = mc["position_embedding_dim_single_emb"]
    n_layer = mc["n_layer"]
    n_embed = mc["n_embed"]
    beta = mc["vq_beta"]
    post_depth = mc["post_encoder_deepth"]
    res_depth = mc["before_vq_net_deepth"]
    th_dim = dc["diffusion_model_config"]["text_hat_dim"]
    z_out = dc["gsemb_num_embeddings"] * dc["gsemb_latent_dim"]
    total = d_tok_cond + 1 + th_dim + z_out
    slab_w = ((total + 127) // 128) * 128

    def core(prepared, token, padding_mask, enc_data):
        token = token.astype(jnp.float32)
        enc_data = enc_data.astype(jnp.float32)
        B, n_part, _ = token.shape
        n_enc = enc_data.shape[1]
        N = B * n_part

        latents = token[:, :, -dim_latent:].reshape(N, dim_latent)
        prefix = token[:, :, :prefix_dim].reshape(N, prefix_dim)
        enc_flat = enc_data.reshape(B * n_enc, -1)
        pad_row = padding_mask.astype(jnp.float32).reshape(1, N)

        names = tuple(prepared.keys())
        wvals = [prepared[k] for k in names]

        kernel = functools.partial(
            _fused_kernel, names=names, B=B, n_part=n_part, n_enc=n_enc,
            n_pos=n_pos, e_dim=e_dim, n_embed=n_embed, hdim=hdim,
            post_depth=post_depth, res_depth=res_depth, n_layer=n_layer,
            n_head=n_head, d_model=d_model, dh=dh,
            loss_scale=(1.0 + beta) / float(N * n_pos * e_dim))

        vspec = lambda: pl.BlockSpec(memory_space=pltpu.MemorySpace.VMEM)
        slab, loss = pl.pallas_call(
            kernel,
            out_shape=(jax.ShapeDtypeStruct((N, slab_w), jnp.float32),
                       jax.ShapeDtypeStruct((1, 1), jnp.float32)),
            in_specs=[vspec() for _ in range(4 + len(names))],
            out_specs=(vspec(), vspec()),
            scratch_shapes=[pltpu.VMEM((N, hdim), jnp.float32)],
        )(enc_flat, latents, prefix, pad_row, *wvals)
        return slab, loss[0, 0]

    core_jit = jax.jit(core)

    def forward(prepared, token, padding_mask, enc_data):
        slab, vq_loss = core_jit(prepared, token, padding_mask, enc_data)
        # Data-dependent boolean row-select (tokens[padding_mask > 0.5]) applied
        # eagerly outside the jit; every preceding head op is row-wise, so
        # selecting afterwards is numerically identical.
        valid = jnp.reshape(padding_mask, (-1,)) > 0.5
        slab = slab[valid]
        out_tok = slab[:, :d_tok_cond]
        end_logits = slab[:, d_tok_cond]
        text_hat = slab[:, d_tok_cond + 1:d_tok_cond + 1 + th_dim]
        z_logits = slab[:, d_tok_cond + 1 + th_dim:d_tok_cond + 1 + th_dim + z_out]
        result = {
            "is_end_token_logits": end_logits,
            "articulated_info": out_tok[:, :d_tok_cond - dim_condition],
            "condition": {
                "text_hat": text_hat,
                "z_logits": z_logits.reshape(
                    -1, dc["gsemb_latent_dim"], dc["gsemb_num_embeddings"]),
            },
        }
        return result, vq_loss

    return forward


# ------------------------------------ main ------------------------------------

if __name__ == "__main__":
    cfg = {
        "device": "tpu",
        "part_structure": {"origin": 3, "direction": 3, "bounds": 6,
                           "latentcode": 8, "condition": 16},
        "transformer_model_paramerter": {
            "d_model": 32,
            "n_head": 4,
            "vq_expand_dim": (4, 8),
            "position_embedding_dim_single_emb": 8,
            "position_embedding_dropout": 0.0,
            "before_vq_net_deepth": 2,
            "n_embed": 16,
            "vq_beta": 0.25,
            "tokenizer_hidden_dim": 64,
            "tokenizer_dropout": 0.0,
            "encoder_kv_dim": 24,
            "post_encoder_dropout": 0.0,
            "post_encoder_deepth": 1,
            "n_layer": 2,
        },
        "diff_config": {
            "gsemb_num_embeddings": 8,
            "gsemb_latent_dim": 4,
            "diffusion_model_config": {"text_hat_dim": 16},
        },
    }

    key = jax.random.PRNGKey(0)
    kp, kt, ke = jax.random.split(key, 3)
    params = init_params(kp, cfg)
    prepared = prepare_params(params, cfg)
    forward = make_forward(cfg)

    B, n_part, n_enc = 2, 8, 6
    d_token = sum(v for k, v in cfg["part_structure"].items() if k != "condition")
    token = jax.random.normal(kt, (B, n_part, d_token), jnp.float32)
    padding_mask = jnp.array([[1, 1, 1, 1, 1, 1, 1, 1],
                              [1, 1, 1, 1, 1, 1, 0, 0]], jnp.float32)
    enc_data = jax.random.normal(
        ke, (B, n_enc, cfg["transformer_model_paramerter"]["encoder_kv_dim"]),
        jnp.float32)

    result, vq_loss = forward(prepared, token, padding_mask, enc_data)
    jax.block_until_ready((result, vq_loss))
    print("KERNEL_OK")
</pallas_src>

<mosaic_0001>
module attributes {stable_mosaic.version = 11 : i64} {
  func.func @_fused_kernel(%arg0: memref<12x24xf32, #tpu.memory_space<vmem>>, %arg1: memref<16x8xf32, #tpu.memory_space<vmem>>, %arg2: memref<16x12xf32, #tpu.memory_space<vmem>>, %arg3: memref<1x16xf32, #tpu.memory_space<vmem>>, %arg4: memref<1x16xf32, #tpu.memory_space<vmem>>, %arg5: memref<2x1x64xf32, #tpu.memory_space<vmem>>, %arg6: memref<2x32x64xf32, #tpu.memory_space<vmem>>, %arg7: memref<2x1x32xf32, #tpu.memory_space<vmem>>, %arg8: memref<2x32x32xf32, #tpu.memory_space<vmem>>, %arg9: memref<16x4xf32, #tpu.memory_space<vmem>>, %arg10: memref<2x1x32xf32, #tpu.memory_space<vmem>>, %arg11: memref<2x32x32xf32, #tpu.memory_space<vmem>>, %arg12: memref<1x32xf32, #tpu.memory_space<vmem>>, %arg13: memref<8x32xf32, #tpu.memory_space<vmem>>, %arg14: memref<2x1x128xf32, #tpu.memory_space<vmem>>, %arg15: memref<2x32x128xf32, #tpu.memory_space<vmem>>, %arg16: memref<2x1x32xf32, #tpu.memory_space<vmem>>, %arg17: memref<2x128x32xf32, #tpu.memory_space<vmem>>, %arg18: memref<1x24xf32, #tpu.memory_space<vmem>>, %arg19: memref<8x24xf32, #tpu.memory_space<vmem>>, %arg20: memref<1x24xf32, #tpu.memory_space<vmem>>, %arg21: memref<32x24xf32, #tpu.memory_space<vmem>>, %arg22: memref<1x32xf32, #tpu.memory_space<vmem>>, %arg23: memref<8x32xf32, #tpu.memory_space<vmem>>, %arg24: memref<1x96xf32, #tpu.memory_space<vmem>>, %arg25: memref<32x96xf32, #tpu.memory_space<vmem>>, %arg26: memref<1x128xf32, #tpu.memory_space<vmem>>, %arg27: memref<96x128xf32, #tpu.memory_space<vmem>>, %arg28: memref<1x16xf32, #tpu.memory_space<vmem>>, %arg29: memref<32x16xf32, #tpu.memory_space<vmem>>, %arg30: memref<2x1x32xf32, #tpu.memory_space<vmem>>, %arg31: memref<2x1x32xf32, #tpu.memory_space<vmem>>, %arg32: memref<2x1x32xf32, #tpu.memory_space<vmem>>, %arg33: memref<2x1x32xf32, #tpu.memory_space<vmem>>, %arg34: memref<2x1x32xf32, #tpu.memory_space<vmem>>, %arg35: memref<2x1x32xf32, #tpu.memory_space<vmem>>, %arg36: memref<1x1x64xf32, #tpu.memory_space<vmem>>, %arg37: memref<1x32x64xf32, #tpu.memory_space<vmem>>, %arg38: memref<1x1x32xf32, #tpu.memory_space<vmem>>, %arg39: memref<1x64x32xf32, #tpu.memory_space<vmem>>, %arg40: memref<1x32xf32, #tpu.memory_space<vmem>>, %arg41: memref<24x32xf32, #tpu.memory_space<vmem>>, %arg42: memref<1x1x32xf32, #tpu.memory_space<vmem>>, %arg43: memref<1x1x32xf32, #tpu.memory_space<vmem>>, %arg44: memref<2x1x96xf32, #tpu.memory_space<vmem>>, %arg45: memref<2x32x96xf32, #tpu.memory_space<vmem>>, %arg46: memref<2x1x32xf32, #tpu.memory_space<vmem>>, %arg47: memref<2x32x32xf32, #tpu.memory_space<vmem>>, %arg48: memref<2x1x32xf32, #tpu.memory_space<vmem>>, %arg49: memref<2x32x32xf32, #tpu.memory_space<vmem>>, %arg50: memref<2x1x32xf32, #tpu.memory_space<vmem>>, %arg51: memref<2x32x32xf32, #tpu.memory_space<vmem>>, %arg52: memref<1x64xf32, #tpu.memory_space<vmem>>, %arg53: memref<16x64xf32, #tpu.memory_space<vmem>>, %arg54: memref<12x64xf32, #tpu.memory_space<vmem>>, %arg55: memref<1x32xf32, #tpu.memory_space<vmem>>, %arg56: memref<64x32xf32, #tpu.memory_space<vmem>>, %arg57: memref<16x128xf32, #tpu.memory_space<vmem>>, %arg58: memref<1x1xf32, #tpu.memory_space<vmem>>, %arg59: memref<16x8xf32, #tpu.memory_space<vmem>>) attributes {dimension_semantics = [], scalar_prefetch = 0 : i64, scratch_operands = 1 : i64, tpu.core_type = #tpu.core_type<tc>} {
    %c0 = arith.constant 0 : index
    %c0_0 = arith.constant 0 : index
    %0 = vector.load %arg0[%c0, %c0_0] : memref<12x24xf32, #tpu.memory_space<vmem>>, vector<12x24xf32>
    %c0_1 = arith.constant 0 : index
    %c0_2 = arith.constant 0 : index
    %1 = vector.load %arg41[%c0_1, %c0_2] : memref<24x32xf32, #tpu.memory_space<vmem>>, vector<24x32xf32>
    %cst = arith.constant dense<0.000000e+00> : vector<12x32xf32>
    %2 = tpu.matmul %0, %1, %cst {dimension_numbers = #tpu.dot_dimension_numbers<[1], [0], [0], [1], [0, 0, 1, 1], [], []>} : vector<12x24xf32>, vector<24x32xf32>, vector<12x32xf32> -> vector<12x32xf32>
    %c0_3 = arith.constant 0 : index
    %c0_4 = arith.constant 0 : index
    %3 = vector.load %arg40[%c0_3, %c0_4] : memref<1x32xf32, #tpu.memory_space<vmem>>, vector<1x32xf32>
    %4 = vector.broadcast %3 : vector<1x32xf32> to vector<12x32xf32>
    %5 = arith.addf %2, %4 : vector<12x32xf32>
    %c0_5 = arith.constant 0 : index
    %c0_6 = arith.constant 0 : index
    %c0_7 = arith.constant 0 : index
    %6 = vector.load %arg43[%c0_5, %c0_6, %c0_7] : memref<1x1x32xf32, #tpu.memory_space<vmem>>, vector<1x1x32xf32>
    %7 = vector.shape_cast %6 : vector<1x1x32xf32> to vector<1x32xf32>
    %c0_8 = arith.constant 0 : index
    %c0_9 = arith.constant 0 : index
    %c0_10 = arith.constant 0 : index
    %8 = vector.load %arg42[%c0_8, %c0_9, %c0_10] : memref<1x1x32xf32, #tpu.memory_space<vmem>>, vector<1x1x32xf32>
    %9 = vector.shape_cast %8 : vector<1x1x32xf32> to vector<1x32xf32>
    %cst_11 = arith.constant dense<0.000000e+00> : vector<12xf32>
    %10 = vector.multi_reduction <add>, %5, %cst_11 [1] : vector<12x32xf32> to vector<12xf32>
    %11 = vector.shape_cast %10 : vector<12xf32> to vector<12x1xf32>
    %cst_12 = arith.constant 3.200000e+01 : f32
    %12 = vector.broadcast %cst_12 : f32 to vector<12x1xf32>
    %13 = arith.divf %11, %12 : vector<12x1xf32>
    %14 = vector.broadcast %13 : vector<12x1xf32> to vector<12x32xf32>
    %15 = arith.subf %5, %14 : vector<12x32xf32>
    %16 = arith.mulf %15, %15 : vector<12x32xf32>
    %cst_13 = arith.constant dense<0.000000e+00> : vector<12xf32>
    %17 = vector.multi_reduction <add>, %16, %cst_13 [1] : vector<12x32xf32> to vector<12xf32>
    %18 = vector.shape_cast %17 : vector<12xf32> to vector<12x1xf32>
    %cst_14 = arith.constant 3.200000e+01 : f32
    %19 = vector.broadcast %cst_14 : f32 to vector<12x1xf32>
    %20 = arith.divf %18, %19 : vector<12x1xf32>
    %cst_15 = arith.constant 9.99999974E-6 : f32
    %21 = vector.broadcast %cst_15 : f32 to vector<12x1xf32>
    %22 = arith.addf %20, %21 : vector<12x1xf32>
    %23 = math.rsqrt %22 : vector<12x1xf32>
    %24 = vector.broadcast %23 : vector<12x1xf32> to vector<12x32xf32>
    %25 = arith.mulf %15, %24 : vector<12x32xf32>
    %26 = vector.broadcast %7 : vector<1x32xf32> to vector<12x32xf32>
    %27 = arith.mulf %25, %26 : vector<12x32xf32>
    %28 = vector.broadcast %9 : vector<1x32xf32> to vector<12x32xf32>
    %29 = arith.addf %27, %28 : vector<12x32xf32>
    %c0_16 = arith.constant 0 : index
    %c0_17 = arith.constant 0 : index
    %c0_18 = arith.constant 0 : index
    %30 = vector.load %arg37[%c0_16, %c0_17, %c0_18] : memref<1x32x64xf32, #tpu.memory_space<vmem>>, vector<1x32x64xf32>
    %31 = vector.shape_cast %30 : vector<1x32x64xf32> to vector<32x64xf32>
    %cst_19 = arith.constant dense<0.000000e+00> : vector<12x64xf32>
    %32 = tpu.matmul %29, %31, %cst_19 {dimension_numbers = #tpu.dot_dimension_numbers<[1], [0], [0], [1], [0, 0, 1, 1], [], []>} : vector<12x32xf32>, vector<32x64xf32>, vector<12x64xf32> -> vector<12x64xf32>
    %c0_20 = arith.constant 0 : index
    %c0_21 = arith.constant 0 : index
    %c0_22 = arith.constant 0 : index
    %33 = vector.load %arg36[%c0_20, %c0_21, %c0_22] : memref<1x1x64xf32, #tpu.memory_space<vmem>>, vector<1x1x64xf32>
    %34 = vector.shape_cast %33 : vector<1x1x64xf32> to vector<1x64xf32>
    %35 = vector.broadcast %34 : vector<1x64xf32> to vector<12x64xf32>
    %36 = arith.addf %32, %35 : vector<12x64xf32>
    %37 = arith.mulf %36, %36 : vector<12x64xf32>
    %38 = arith.mulf %36, %37 : vector<12x64xf32>
    %cst_23 = arith.constant 4.471500e-02 : f32
    %39 = vector.broadcast %cst_23 : f32 to vector<12x64xf32>
    %40 = arith.mulf %39, %38 : vector<12x64xf32>
    %41 = arith.addf %36, %40 : vector<12x64xf32>
    %cst_24 = arith.constant 0.797884583 : f32
    %42 = vector.broadcast %cst_24 : f32 to vector<12x64xf32>
    %43 = arith.mulf %42, %41 : vector<12x64xf32>
    %44 = math.tanh %43 : vector<12x64xf32>
    %cst_25 = arith.constant 1.000000e+00 : f32
    %45 = vector.broadcast %cst_25 : f32 to vector<12x64xf32>
    %46 = arith.addf %45, %44 : vector<12x64xf32>
    %cst_26 = arith.constant 5.000000e-01 : f32
    %47 = vector.broadcast %cst_26 : f32 to vector<12x64xf32>
    %48 = arith.mulf %47, %46 : vector<12x64xf32>
    %49 = arith.mulf %36, %48 : vector<12x64xf32>
    %c0_27 = arith.constant 0 : index
    %c0_28 = arith.constant 0 : index
    %c0_29 = arith.constant 0 : index
    %50 = vector.load %arg39[%c0_27, %c0_28, %c0_29] : memref<1x64x32xf32, #tpu.memory_space<vmem>>, vector<1x64x32xf32>
    %51 = vector.shape_cast %50 : vector<1x64x32xf32> to vector<64x32xf32>
    %cst_30 = arith.constant dense<0.000000e+00> : vector<12x32xf32>
    %52 = tpu.matmul %49, %51, %cst_30 {dimension_numbers = #tpu.dot_dimension_numbers<[1], [0], [0], [1], [0, 0, 1, 1], [], []>} : vector<12x64xf32>, vector<64x32xf32>, vector<12x32xf32> -> vector<12x32xf32>
    %c0_31 = arith.constant 0 : index
    %c0_32 = arith.constant 0 : index
    %c0_33 = arith.constant 0 : index
    %53 = vector.load %arg38[%c0_31, %c0_32, %c0_33] : memref<1x1x32xf32, #tpu.memory_space<vmem>>, vector<1x1x32xf32>
    %54 = vector.shape_cast %53 : vector<1x1x32xf32> to vector<1x32xf32>
    %55 = vector.broadcast %54 : vector<1x32xf32> to vector<12x32xf32>
    %56 = arith.addf %52, %55 : vector<12x32xf32>
    %57 = arith.addf %5, %56 : vector<12x32xf32>
    %c0_34 = arith.constant 0 : index
    %c0_35 = arith.constant 0 : index
    %58 = vector.load %arg1[%c0_34, %c0_35] : memref<16x8xf32, #tpu.memory_space<vmem>>, vector<16x8xf32>
    %c0_36 = arith.constant 0 : index
    %c0_37 = arith.constant 0 : index
    %59 = vector.load %arg13[%c0_36, %c0_37] : memref<8x32xf32, #tpu.memory_space<vmem>>, vector<8x32xf32>
    %cst_38 = arith.constant dense<0.000000e+00> : vector<16x32xf32>
    %60 = tpu.matmul %58, %59, %cst_38 {dimension_numbers = #tpu.dot_dimension_numbers<[1], [0], [0], [1], [0, 0, 1, 1], [], []>} : vector<16x8xf32>, vector<8x32xf32>, vector<16x32xf32> -> vector<16x32xf32>
    %c0_39 = arith.constant 0 : index
    %c0_40 = arith.constant 0 : index
    %61 = vector.load %arg12[%c0_39, %c0_40] : memref<1x32xf32, #tpu.memory_space<vmem>>, vector<1x32xf32>
    %62 = vector.broadcast %61 : vector<1x32xf32> to vector<16x32xf32>
    %63 = arith.addf %60, %62 : vector<16x32xf32>
    %cst_41 = arith.constant 0.000000e+00 : f32
    %64 = vector.broadcast %cst_41 : f32 to vector<16x32xf32>
    %65 = arith.maximumf %63, %64 : vector<16x32xf32>
    %c0_42 = arith.constant 0 : index
    %c0_43 = arith.constant 0 : index
    %c0_44 = arith.constant 0 : index
    %66 = vector.load %arg47[%c0_42, %c0_43, %c0_44] : memref<2x32x32xf32, #tpu.memory_space<vmem>>, vector<1x32x32xf32>
    %67 = vector.shape_cast %66 : vector<1x32x32xf32> to vector<32x32xf32>
    %cst_45 = arith.constant dense<0.000000e+00> : vector<16x32xf32>
    %68 = tpu.matmul %65, %67, %cst_45 {dimension_numbers = #tpu.dot_dimension_numbers<[1], [0], [0], [1], [0, 0, 1, 1], [], []>} : vector<16x32xf32>, vector<32x32xf32>, vector<16x32xf32> -> vector<16x32xf32>
    %c0_46 = arith.constant 0 : index
    %c0_47 = arith.constant 0 : index
    %c0_48 = arith.constant 0 : index
    %69 = vector.load %arg46[%c0_46, %c0_47, %c0_48] : memref<2x1x32xf32, #tpu.memory_space<vmem>>, vector<1x1x32xf32>
    %70 = vector.shape_cast %69 : vector<1x1x32xf32> to vector<1x32xf32>
    %71 = vector.broadcast %70 : vector<1x32xf32> to vector<16x32xf32>
    %72 = arith.addf %68, %71 : vector<16x32xf32>
    %cst_49 = arith.constant 0.000000e+00 : f32
    %73 = vector.broadcast %cst_49 : f32 to vector<16x32xf32>
    %74 = arith.maximumf %72, %73 : vector<16x32xf32>
    %c0_50 = arith.constant 0 : index
    %c0_51 = arith.constant 0 : index
    %c0_52 = arith.constant 0 : index
    %75 = vector.load %arg49[%c0_50, %c0_51, %c0_52] : memref<2x32x32xf32, #tpu.memory_space<vmem>>, vector<1x32x32xf32>
    %76 = vector.shape_cast %75 : vector<1x32x32xf32> to vector<32x32xf32>
    %cst_53 = arith.constant dense<0.000000e+00> : vector<16x32xf32>
    %77 = tpu.matmul %74, %76, %cst_53 {dimension_numbers = #tpu.dot_dimension_numbers<[1], [0], [0], [1], [0, 0, 1, 1], [], []>} : vector<16x32xf32>, vector<32x32xf32>, vector<16x32xf32> -> vector<16x32xf32>
    %c0_54 = arith.constant 0 : index
    %c0_55 = arith.constant 0 : index
    %c0_56 = arith.constant 0 : index
    %78 = vector.load %arg48[%c0_54, %c0_55, %c0_56] : memref<2x1x32xf32, #tpu.memory_space<vmem>>, vector<1x1x32xf32>
    %79 = vector.shape_cast %78 : vector<1x1x32xf32> to vector<1x32xf32>
    %80 = vector.broadcast %79 : vector<1x32xf32> to vector<16x32xf32>
    %81 = arith.addf %77, %80 : vector<16x32xf32>
    %82 = arith.addf %63, %81 : vector<16x32xf32>
    %cst_57 = arith.constant 0.000000e+00 : f32
    %83 = vector.broadcast %cst_57 : f32 to vector<16x32xf32>
    %84 = arith.maximumf %82, %83 : vector<16x32xf32>
    %c1 = arith.constant 1 : index
    %c0_58 = arith.constant 0 : index
    %c0_59 = arith.constant 0 : index
    %85 = vector.load %arg47[%c1, %c0_58, %c0_59] : memref<2x32x32xf32, #tpu.memory_space<vmem>>, vector<1x32x32xf32>
    %86 = vector.shape_cast %85 : vector<1x32x32xf32> to vector<32x32xf32>
    %cst_60 = arith.constant dense<0.000000e+00> : vector<16x32xf32>
    %87 = tpu.matmul %84, %86, %cst_60 {dimension_numbers = #tpu.dot_dimension_numbers<[1], [0], [0], [1], [0, 0, 1, 1], [], []>} : vector<16x32xf32>, vector<32x32xf32>, vector<16x32xf32> -> vector<16x32xf32>
    %c1_61 = arith.constant 1 : index
    %c0_62 = arith.constant 0 : index
    %c0_63 = arith.constant 0 : index
    %88 = vector.load %arg46[%c1_61, %c0_62, %c0_63] : memref<2x1x32xf32, #tpu.memory_space<vmem>>, vector<1x1x32xf32>
    %89 = vector.shape_cast %88 : vector<1x1x32xf32> to vector<1x32xf32>
    %90 = vector.broadcast %89 : vector<1x32xf32> to vector<16x32xf32>
    %91 = arith.addf %87, %90 : vector<16x32xf32>
    %cst_64 = arith.constant 0.000000e+00 : f32
    %92 = vector.broadcast %cst_64 : f32 to vector<16x32xf32>
    %93 = arith.maximumf %91, %92 : vector<16x32xf32>
    %c1_65 = arith.constant 1 : index
    %c0_66 = arith.constant 0 : index
    %c0_67 = arith.constant 0 : index
    %94 = vector.load %arg49[%c1_65, %c0_66, %c0_67] : memref<2x32x32xf32, #tpu.memory_space<vmem>>, vector<1x32x32xf32>
    %95 = vector.shape_cast %94 : vector<1x32x32xf32> to vector<32x32xf32>
    %cst_68 = arith.constant dense<0.000000e+00> : vector<16x32xf32>
    %96 = tpu.matmul %93, %95, %cst_68 {dimension_numbers = #tpu.dot_dimension_numbers<[1], [0], [0], [1], [0, 0, 1, 1], [], []>} : vector<16x32xf32>, vector<32x32xf32>, vector<16x32xf32> -> vector<16x32xf32>
    %c1_69 = arith.constant 1 : index
    %c0_70 = arith.constant 0 : index
    %c0_71 = arith.constant 0 : index
    %97 = vector.load %arg48[%c1_69, %c0_70, %c0_71] : memref<2x1x32xf32, #tpu.memory_space<vmem>>, vector<1x1x32xf32>
    %98 = vector.shape_cast %97 : vector<1x1x32xf32> to vector<1x32xf32>
    %99 = vector.broadcast %98 : vector<1x32xf32> to vector<16x32xf32>
    %100 = arith.addf %96, %99 : vector<16x32xf32>
    %101 = arith.addf %82, %100 : vector<16x32xf32>
    %c0_72 = arith.constant 0 : index
    %c0_73 = arith.constant 0 : index
    %102 = vector.load %arg9[%c0_72, %c0_73] : memref<16x4xf32, #tpu.memory_space<vmem>>, vector<16x4xf32>
    %c0_74 = arith.constant 0 : index
    %c0_75 = arith.constant 0 : index
    %103 = vector.load %arg4[%c0_74, %c0_75] : memref<1x16xf32, #tpu.memory_space<vmem>>, vector<1x16xf32>
    %cst_76 = arith.constant 0.000000e+00 : f32
    %104 = vector.broadcast %cst_76 : f32 to vector<16x1xf32>
    %105 = vector.extract_strided_slice %101 {offsets = [0, 0], sizes = [16, 4], strides = [1, 1]} : vector<16x32xf32> to vector<16x4xf32>
    %cst_77 = arith.constant dense<0.000000e+00> : vector<16x16xf32>
    %106 = tpu.matmul %105, %102, %cst_77 {dimension_numbers = #tpu.dot_dimension_numbers<[1], [1], [0], [0], [0, 0, 1, 0], [], []>} : vector<16x4xf32>, vector<16x4xf32>, vector<16x16xf32> -> vector<16x16xf32>
    %cst_78 = arith.constant -2.000000e+00 : f32
    %107 = vector.broadcast %cst_78 : f32 to vector<16x16xf32>
    %108 = arith.mulf %107, %106 : vector<16x16xf32>
    %109 = vector.broadcast %103 : vector<1x16xf32> to vector<16x16xf32>
    %110 = arith.addf %108, %109 : vector<16x16xf32>
    %111 = tpu.iota {dimensions = array<i32: 1>} : vector<16x16xi32>
    %cst_79 = arith.constant dense<0x7F800000> : vector<16xf32>
    %112 = vector.multi_reduction <minimumf>, %110, %cst_79 [1] : vector<16x16xf32> to vector<16xf32>
    %113 = vector.shape_cast %112 : vector<16xf32> to vector<16x1xf32>
    %114 = vector.broadcast %113 : vector<16x1xf32> to vector<16x16xf32>
    %115 = arith.cmpf ole, %110, %114 : vector<16x16xf32>
    %c16_i32 = arith.constant 16 : i32
    %116 = vector.broadcast %c16_i32 : i32 to vector<16x16xi32>
    %117 = arith.select %115, %111, %116 : vector<16x16xi1>, vector<16x16xi32>
    %cst_80 = arith.constant dense<2147483647> : vector<16xi32>
    %118 = vector.multi_reduction <minsi>, %117, %cst_80 [1] : vector<16x16xi32> to vector<16xi32>
    %119 = vector.shape_cast %118 : vector<16xi32> to vector<16x1xi32>
    %120 = vector.broadcast %119 : vector<16x1xi32> to vector<16x16xi32>
    %121 = arith.cmpi eq, %111, %120 : vector<16x16xi32>
    %122 = arith.extui %121 : vector<16x16xi1> to vector<16x16xi32>
    %123 = arith.sitofp %122 : vector<16x16xi32> to vector<16x16xf32>
    %cst_81 = arith.constant dense<0.000000e+00> : vector<16x4xf32>
    %124 = tpu.matmul %123, %102, %cst_81 {dimension_numbers = #tpu.dot_dimension_numbers<[1], [0], [0], [1], [0, 0, 1, 1], [], []>} : vector<16x16xf32>, vector<16x4xf32>, vector<16x4xf32> -> vector<16x4xf32>
    %125 = arith.subf %124, %105 : vector<16x4xf32>
    %126 = arith.mulf %125, %125 : vector<16x4xf32>
    %cst_82 = arith.constant dense<0.000000e+00> : vector<16xf32>
    %127 = vector.multi_reduction <add>, %126, %cst_82 [1] : vector<16x4xf32> to vector<16xf32>
    %128 = vector.shape_cast %127 : vector<16xf32> to vector<16x1xf32>
    %129 = arith.addf %104, %128 : vector<16x1xf32>
    %130 = vector.extract_strided_slice %101 {offsets = [0, 4], sizes = [16, 4], strides = [1, 1]} : vector<16x32xf32> to vector<16x4xf32>
    %cst_83 = arith.constant dense<0.000000e+00> : vector<16x16xf32>
    %131 = tpu.matmul %130, %102, %cst_83 {dimension_numbers = #tpu.dot_dimension_numbers<[1], [1], [0], [0], [0, 0, 1, 0], [], []>} : vector<16x4xf32>, vector<16x4xf32>, vector<16x16xf32> -> vector<16x16xf32>
    %cst_84 = arith.constant -2.000000e+00 : f32
    %132 = vector.broadcast %cst_84 : f32 to vector<16x16xf32>
    %133 = arith.mulf %132, %131 : vector<16x16xf32>
    %134 = vector.broadcast %103 : vector<1x16xf32> to vector<16x16xf32>
    %135 = arith.addf %133, %134 : vector<16x16xf32>
    %136 = tpu.iota {dimensions = array<i32: 1>} : vector<16x16xi32>
    %cst_85 = arith.constant dense<0x7F800000> : vector<16xf32>
    %137 = vector.multi_reduction <minimumf>, %135, %cst_85 [1] : vector<16x16xf32> to vector<16xf32>
    %138 = vector.shape_cast %137 : vector<16xf32> to vector<16x1xf32>
    %139 = vector.broadcast %138 : vector<16x1xf32> to vector<16x16xf32>
    %140 = arith.cmpf ole, %135, %139 : vector<16x16xf32>
    %c16_i32_86 = arith.constant 16 : i32
    %141 = vector.broadcast %c16_i32_86 : i32 to vector<16x16xi32>
    %142 = arith.select %140, %136, %141 : vector<16x16xi1>, vector<16x16xi32>
    %cst_87 = arith.constant dense<2147483647> : vector<16xi32>
    %143 = vector.multi_reduction <minsi>, %142, %cst_87 [1] : vector<16x16xi32> to vector<16xi32>
    %144 = vector.shape_cast %143 : vector<16xi32> to vector<16x1xi32>
    %145 = vector.broadcast %144 : vector<16x1xi32> to vector<16x16xi32>
    %146 = arith.cmpi eq, %136, %145 : vector<16x16xi32>
    %147 = arith.extui %146 : vector<16x16xi1> to vector<16x16xi32>
    %148 = arith.sitofp %147 : vector<16x16xi32> to vector<16x16xf32>
    %cst_88 = arith.constant dense<0.000000e+00> : vector<16x4xf32>
    %149 = tpu.matmul %148, %102, %cst_88 {dimension_numbers = #tpu.dot_dimension_numbers<[1], [0], [0], [1], [0, 0, 1, 1], [], []>} : vector<16x16xf32>, vector<16x4xf32>, vector<16x4xf32> -> vector<16x4xf32>
    %150 = arith.subf %149, %130 : vector<16x4xf32>
    %151 = arith.mulf %150, %150 : vector<16x4xf32>
    %cst_89 = arith.constant dense<0.000000e+00> : vector<16xf32>
    %152 = vector.multi_reduction <add>, %151, %cst_89 [1] : vector<16x4xf32> to vector<16xf32>
    %153 = vector.shape_cast %152 : vector<16xf32> to vector<16x1xf32>
    %154 = arith.addf %129, %153 : vector<16x1xf32>
    %155 = vector.extract_strided_slice %101 {offsets = [0, 8], sizes = [16, 4], strides = [1, 1]} : vector<16x32xf32> to vector<16x4xf32>
    %cst_90 = arith.constant dense<0.000000e+00> : vector<16x16xf32>
    %156 = tpu.matmul %155, %102, %cst_90 {dimension_numbers = #tpu.dot_dimension_numbers<[1], [1], [0], [0], [0, 0, 1, 0], [], []>} : vector<16x4xf32>, vector<16x4xf32>, vector<16x16xf32> -> vector<16x16xf32>
    %cst_91 = arith.constant -2.000000e+00 : f32
    %157 = vector.broadcast %cst_91 : f32 to vector<16x16xf32>
    %158 = arith.mulf %157, %156 : vector<16x16xf32>
    %159 = vector.broadcast %103 : vector<1x16xf32> to vector<16x16xf32>
    %160 = arith.addf %158, %159 : vector<16x16xf32>
    %161 = tpu.iota {dimensions = array<i32: 1>} : vector<16x16xi32>
    %cst_92 = arith.constant dense<0x7F800000> : vector<16xf32>
    %162 = vector.multi_reduction <minimumf>, %160, %cst_92 [1] : vector<16x16xf32> to vector<16xf32>
    %163 = vector.shape_cast %162 : vector<16xf32> to vector<16x1xf32>
    %164 = vector.broadcast %163 : vector<16x1xf32> to vector<16x16xf32>
    %165 = arith.cmpf ole, %160, %164 : vector<16x16xf32>
    %c16_i32_93 = arith.constant 16 : i32
    %166 = vector.broadcast %c16_i32_93 : i32 to vector<16x16xi32>
    %167 = arith.select %165, %161, %166 : vector<16x16xi1>, vector<16x16xi32>
    %cst_94 = arith.constant dense<2147483647> : vector<16xi32>
    %168 = vector.multi_reduction <minsi>, %167, %cst_94 [1] : vector<16x16xi32> to vector<16xi32>
    %169 = vector.shape_cast %168 : vector<16xi32> to vector<16x1xi32>
    %170 = vector.broadcast %169 : vector<16x1xi32> to vector<16x16xi32>
    %171 = arith.cmpi eq, %161, %170 : vector<16x16xi32>
    %172 = arith.extui %171 : vector<16x16xi1> to vector<16x16xi32>
    %173 = arith.sitofp %172 : vector<16x16xi32> to vector<16x16xf32>
    %cst_95 = arith.constant dense<0.000000e+00> : vector<16x4xf32>
    %174 = tpu.matmul %173, %102, %cst_95 {dimension_numbers = #tpu.dot_dimension_numbers<[1], [0], [0], [1], [0, 0, 1, 1], [], []>} : vector<16x16xf32>, vector<16x4xf32>, vector<16x4xf32> -> vector<16x4xf32>
    %175 = arith.subf %174, %155 : vector<16x4xf32>
    %176 = arith.mulf %175, %175 : vector<16x4xf32>
    %cst_96 = arith.constant dense<0.000000e+00> : vector<16xf32>
    %177 = vector.multi_reduction <add>, %176, %cst_96 [1] : vector<16x4xf32> to vector<16xf32>
    %178 = vector.shape_cast %177 : vector<16xf32> to vector<16x1xf32>
    %179 = arith.addf %154, %178 : vector<16x1xf32>
    %180 = vector.extract_strided_slice %101 {offsets = [0, 12], sizes = [16, 4], strides = [1, 1]} : vector<16x32xf32> to vector<16x4xf32>
    %cst_97 = arith.constant dense<0.000000e+00> : vector<16x16xf32>
    %181 = tpu.matmul %180, %102, %cst_97 {dimension_numbers = #tpu.dot_dimension_numbers<[1], [1], [0], [0], [0, 0, 1, 0], [], []>} : vector<16x4xf32>, vector<16x4xf32>, vector<16x16xf32> -> vector<16x16xf32>
    %cst_98 = arith.constant -2.000000e+00 : f32
    %182 = vector.broadcast %cst_98 : f32 to vector<16x16xf32>
    %183 = arith.mulf %182, %181 : vector<16x16xf32>
    %184 = vector.broadcast %103 : vector<1x16xf32> to vector<16x16xf32>
    %185 = arith.addf %183, %184 : vector<16x16xf32>
    %186 = tpu.iota {dimensions = array<i32: 1>} : vector<16x16xi32>
    %cst_99 = arith.constant dense<0x7F800000> : vector<16xf32>
    %187 = vector.multi_reduction <minimumf>, %185, %cst_99 [1] : vector<16x16xf32> to vector<16xf32>
    %188 = vector.shape_cast %187 : vector<16xf32> to vector<16x1xf32>
    %189 = vector.broadcast %188 : vector<16x1xf32> to vector<16x16xf32>
    %190 = arith.cmpf ole, %185, %189 : vector<16x16xf32>
    %c16_i32_100 = arith.constant 16 : i32
    %191 = vector.broadcast %c16_i32_100 : i32 to vector<16x16xi32>
    %192 = arith.select %190, %186, %191 : vector<16x16xi1>, vector<16x16xi32>
    %cst_101 = arith.constant dense<2147483647> : vector<16xi32>
    %193 = vector.multi_reduction <minsi>, %192, %cst_101 [1] : vector<16x16xi32> to vector<16xi32>
    %194 = vector.shape_cast %193 : vector<16xi32> to vector<16x1xi32>
    %195 = vector.broadcast %194 : vector<16x1xi32> to vector<16x16xi32>
    %196 = arith.cmpi eq, %186, %195 : vector<16x16xi32>
    %197 = arith.extui %196 : vector<16x16xi1> to vector<16x16xi32>
    %198 = arith.sitofp %197 : vector<16x16xi32> to vector<16x16xf32>
    %cst_102 = arith.constant dense<0.000000e+00> : vector<16x4xf32>
    %199 = tpu.matmul %198, %102, %cst_102 {dimension_numbers = #tpu.dot_dimension_numbers<[1], [0], [0], [1], [0, 0, 1, 1], [], []>} : vector<16x16xf32>, vector<16x4xf32>, vector<16x4xf32> -> vector<16x4xf32>
    %200 = arith.subf %199, %180 : vector<16x4xf32>
    %201 = arith.mulf %200, %200 : vector<16x4xf32>
    %cst_103 = arith.constant dense<0.000000e+00> : vector<16xf32>
    %202 = vector.multi_reduction <add>, %201, %cst_103 [1] : vector<16x4xf32> to vector<16xf32>
    %203 = vector.shape_cast %202 : vector<16xf32> to vector<16x1xf32>
    %204 = arith.addf %179, %203 : vector<16x1xf32>
    %205 = vector.extract_strided_slice %101 {offsets = [0, 16], sizes = [16, 4], strides = [1, 1]} : vector<16x32xf32> to vector<16x4xf32>
    %cst_104 = arith.constant dense<0.000000e+00> : vector<16x16xf32>
    %206 = tpu.matmul %205, %102, %cst_104 {dimension_numbers = #tpu.dot_dimension_numbers<[1], [1], [0], [0], [0, 0, 1, 0], [], []>} : vector<16x4xf32>, vector<16x4xf32>, vector<16x16xf32> -> vector<16x16xf32>
    %cst_105 = arith.constant -2.000000e+00 : f32
    %207 = vector.broadcast %cst_105 : f32 to vector<16x16xf32>
    %208 = arith.mulf %207, %206 : vector<16x16xf32>
    %209 = vector.broadcast %103 : vector<1x16xf32> to vector<16x16xf32>
    %210 = arith.addf %208, %209 : vector<16x16xf32>
    %211 = tpu.iota {dimensions = array<i32: 1>} : vector<16x16xi32>
    %cst_106 = arith.constant dense<0x7F800000> : vector<16xf32>
    %212 = vector.multi_reduction <minimumf>, %210, %cst_106 [1] : vector<16x16xf32> to vector<16xf32>
    %213 = vector.shape_cast %212 : vector<16xf32> to vector<16x1xf32>
    %214 = vector.broadcast %213 : vector<16x1xf32> to vector<16x16xf32>
    %215 = arith.cmpf ole, %210, %214 : vector<16x16xf32>
    %c16_i32_107 = arith.constant 16 : i32
    %216 = vector.broadcast %c16_i32_107 : i32 to vector<16x16xi32>
    %217 = arith.select %215, %211, %216 : vector<16x16xi1>, vector<16x16xi32>
    %cst_108 = arith.constant dense<2147483647> : vector<16xi32>
    %218 = vector.multi_reduction <minsi>, %217, %cst_108 [1] : vector<16x16xi32> to vector<16xi32>
    %219 = vector.shape_cast %218 : vector<16xi32> to vector<16x1xi32>
    %220 = vector.broadcast %219 : vector<16x1xi32> to vector<16x16xi32>
    %221 = arith.cmpi eq, %211, %220 : vector<16x16xi32>
    %222 = arith.extui %221 : vector<16x16xi1> to vector<16x16xi32>
    %223 = arith.sitofp %222 : vector<16x16xi32> to vector<16x16xf32>
    %cst_109 = arith.constant dense<0.000000e+00> : vector<16x4xf32>
    %224 = tpu.matmul %223, %102, %cst_109 {dimension_numbers = #tpu.dot_dimension_numbers<[1], [0], [0], [1], [0, 0, 1, 1], [], []>} : vector<16x16xf32>, vector<16x4xf32>, vector<16x4xf32> -> vector<16x4xf32>
    %225 = arith.subf %224, %205 : vector<16x4xf32>
    %226 = arith.mulf %225, %225 : vector<16x4xf32>
    %cst_110 = arith.constant dense<0.000000e+00> : vector<16xf32>
    %227 = vector.multi_reduction <add>, %226, %cst_110 [1] : vector<16x4xf32> to vector<16xf32>
    %228 = vector.shape_cast %227 : vector<16xf32> to vector<16x1xf32>
    %229 = arith.addf %204, %228 : vector<16x1xf32>
    %230 = vector.extract_strided_slice %101 {offsets = [0, 20], sizes = [16, 4], strides = [1, 1]} : vector<16x32xf32> to vector<16x4xf32>
    %cst_111 = arith.constant dense<0.000000e+00> : vector<16x16xf32>
    %231 = tpu.matmul %230, %102, %cst_111 {dimension_numbers = #tpu.dot_dimension_numbers<[1], [1], [0], [0], [0, 0, 1, 0], [], []>} : vector<16x4xf32>, vector<16x4xf32>, vector<16x16xf32> -> vector<16x16xf32>
    %cst_112 = arith.constant -2.000000e+00 : f32
    %232 = vector.broadcast %cst_112 : f32 to vector<16x16xf32>
    %233 = arith.mulf %232, %231 : vector<16x16xf32>
    %234 = vector.broadcast %103 : vector<1x16xf32> to vector<16x16xf32>
    %235 = arith.addf %233, %234 : vector<16x16xf32>
    %236 = tpu.iota {dimensions = array<i32: 1>} : vector<16x16xi32>
    %cst_113 = arith.constant dense<0x7F800000> : vector<16xf32>
    %237 = vector.multi_reduction <minimumf>, %235, %cst_113 [1] : vector<16x16xf32> to vector<16xf32>
    %238 = vector.shape_cast %237 : vector<16xf32> to vector<16x1xf32>
    %239 = vector.broadcast %238 : vector<16x1xf32> to vector<16x16xf32>
    %240 = arith.cmpf ole, %235, %239 : vector<16x16xf32>
    %c16_i32_114 = arith.constant 16 : i32
    %241 = vector.broadcast %c16_i32_114 : i32 to vector<16x16xi32>
    %242 = arith.select %240, %236, %241 : vector<16x16xi1>, vector<16x16xi32>
    %cst_115 = arith.constant dense<2147483647> : vector<16xi32>
    %243 = vector.multi_reduction <minsi>, %242, %cst_115 [1] : vector<16x16xi32> to vector<16xi32>
    %244 = vector.shape_cast %243 : vector<16xi32> to vector<16x1xi32>
    %245 = vector.broadcast %244 : vector<16x1xi32> to vector<16x16xi32>
    %246 = arith.cmpi eq, %236, %245 : vector<16x16xi32>
    %247 = arith.extui %246 : vector<16x16xi1> to vector<16x16xi32>
    %248 = arith.sitofp %247 : vector<16x16xi32> to vector<16x16xf32>
    %cst_116 = arith.constant dense<0.000000e+00> : vector<16x4xf32>
    %249 = tpu.matmul %248, %102, %cst_116 {dimension_numbers = #tpu.dot_dimension_numbers<[1], [0], [0], [1], [0, 0, 1, 1], [], []>} : vector<16x16xf32>, vector<16x4xf32>, vector<16x4xf32> -> vector<16x4xf32>
    %250 = arith.subf %249, %230 : vector<16x4xf32>
    %251 = arith.mulf %250, %250 : vector<16x4xf32>
    %cst_117 = arith.constant dense<0.000000e+00> : vector<16xf32>
    %252 = vector.multi_reduction <add>, %251, %cst_117 [1] : vector<16x4xf32> to vector<16xf32>
    %253 = vector.shape_cast %252 : vector<16xf32> to vector<16x1xf32>
    %254 = arith.addf %229, %253 : vector<16x1xf32>
    %255 = vector.extract_strided_slice %101 {offsets = [0, 24], sizes = [16, 4], strides = [1, 1]} : vector<16x32xf32> to vector<16x4xf32>
    %cst_118 = arith.constant dense<0.000000e+00> : vector<16x16xf32>
    %256 = tpu.matmul %255, %102, %cst_118 {dimension_numbers = #tpu.dot_dimension_numbers<[1], [1], [0], [0], [0, 0, 1, 0], [], []>} : vector<16x4xf32>, vector<16x4xf32>, vector<16x16xf32> -> vector<16x16xf32>
    %cst_119 = arith.constant -2.000000e+00 : f32
    %257 = vector.broadcast %cst_119 : f32 to vector<16x16xf32>
    %258 = arith.mulf %257, %256 : vector<16x16xf32>
    %259 = vector.broadcast %103 : vector<1x16xf32> to vector<16x16xf32>
    %260 = arith.addf %258, %259 : vector<16x16xf32>
    %261 = tpu.iota {dimensions = array<i32: 1>} : vector<16x16xi32>
    %cst_120 = arith.constant dense<0x7F800000> : vector<16xf32>
    %262 = vector.multi_reduction <minimumf>, %260, %cst_120 [1] : vector<16x16xf32> to vector<16xf32>
    %263 = vector.shape_cast %262 : vector<16xf32> to vector<16x1xf32>
    %264 = vector.broadcast %263 : vector<16x1xf32> to vector<16x16xf32>
    %265 = arith.cmpf ole, %260, %264 : vector<16x16xf32>
    %c16_i32_121 = arith.constant 16 : i32
    %266 = vector.broadcast %c16_i32_121 : i32 to vector<16x16xi32>
    %267 = arith.select %265, %261, %266 : vector<16x16xi1>, vector<16x16xi32>
    %cst_122 = arith.constant dense<2147483647> : vector<16xi32>
    %268 = vector.multi_reduction <minsi>, %267, %cst_122 [1] : vector<16x16xi32> to vector<16xi32>
    %269 = vector.shape_cast %268 : vector<16xi32> to vector<16x1xi32>
    %270 = vector.broadcast %269 : vector<16x1xi32> to vector<16x16xi32>
    %271 = arith.cmpi eq, %261, %270 : vector<16x16xi32>
    %272 = arith.extui %271 : vector<16x16xi1> to vector<16x16xi32>
    %273 = arith.sitofp %272 : vector<16x16xi32> to vector<16x16xf32>
    %cst_123 = arith.constant dense<0.000000e+00> : vector<16x4xf32>
    %274 = tpu.matmul %273, %102, %cst_123 {dimension_numbers = #tpu.dot_dimension_numbers<[1], [0], [0], [1], [0, 0, 1, 1], [], []>} : vector<16x16xf32>, vector<16x4xf32>, vector<16x4xf32> -> vector<16x4xf32>
    %275 = arith.subf %274, %255 : vector<16x4xf32>
    %276 = arith.mulf %275, %275 : vector<16x4xf32>
    %cst_124 = arith.constant dense<0.000000e+00> : vector<16xf32>
    %277 = vector.multi_reduction <add>, %276, %cst_124 [1] : vector<16x4xf32> to vector<16xf32>
    %278 = vector.shape_cast %277 : vector<16xf32> to vector<16x1xf32>
    %279 = arith.addf %254, %278 : vector<16x1xf32>
    %280 = vector.extract_strided_slice %101 {offsets = [0, 28], sizes = [16, 4], strides = [1, 1]} : vector<16x32xf32> to vector<16x4xf32>
    %cst_125 = arith.constant dense<0.000000e+00> : vector<16x16xf32>
    %281 = tpu.matmul %280, %102, %cst_125 {dimension_numbers = #tpu.dot_dimension_numbers<[1], [1], [0], [0], [0, 0, 1, 0], [], []>} : vector<16x4xf32>, vector<16x4xf32>, vector<16x16xf32> -> vector<16x16xf32>
    %cst_126 = arith.constant -2.000000e+00 : f32
    %282 = vector.broadcast %cst_126 : f32 to vector<16x16xf32>
    %283 = arith.mulf %282, %281 : vector<16x16xf32>
    %284 = vector.broadcast %103 : vector<1x16xf32> to vector<16x16xf32>
    %285 = arith.addf %283, %284 : vector<16x16xf32>
    %286 = tpu.iota {dimensions = array<i32: 1>} : vector<16x16xi32>
    %cst_127 = arith.constant dense<0x7F800000> : vector<16xf32>
    %287 = vector.multi_reduction <minimumf>, %285, %cst_127 [1] : vector<16x16xf32> to vector<16xf32>
    %288 = vector.shape_cast %287 : vector<16xf32> to vector<16x1xf32>
    %289 = vector.broadcast %288 : vector<16x1xf32> to vector<16x16xf32>
    %290 = arith.cmpf ole, %285, %289 : vector<16x16xf32>
    %c16_i32_128 = arith.constant 16 : i32
    %291 = vector.broadcast %c16_i32_128 : i32 to vector<16x16xi32>
    %292 = arith.select %290, %286, %291 : vector<16x16xi1>, vector<16x16xi32>
    %cst_129 = arith.constant dense<2147483647> : vector<16xi32>
    %293 = vector.multi_reduction <minsi>, %292, %cst_129 [1] : vector<16x16xi32> to vector<16xi32>
    %294 = vector.shape_cast %293 : vector<16xi32> to vector<16x1xi32>
    %295 = vector.broadcast %294 : vector<16x1xi32> to vector<16x16xi32>
    %296 = arith.cmpi eq, %286, %295 : vector<16x16xi32>
    %297 = arith.extui %296 : vector<16x16xi1> to vector<16x16xi32>
    %298 = arith.sitofp %297 : vector<16x16xi32> to vector<16x16xf32>
    %cst_130 = arith.constant dense<0.000000e+00> : vector<16x4xf32>
    %299 = tpu.matmul %298, %102, %cst_130 {dimension_numbers = #tpu.dot_dimension_numbers<[1], [0], [0], [1], [0, 0, 1, 1], [], []>} : vector<16x16xf32>, vector<16x4xf32>, vector<16x4xf32> -> vector<16x4xf32>
    %300 = arith.subf %299, %280 : vector<16x4xf32>
    %301 = arith.mulf %300, %300 : vector<16x4xf32>
    %cst_131 = arith.constant dense<0.000000e+00> : vector<16xf32>
    %302 = vector.multi_reduction <add>, %301, %cst_131 [1] : vector<16x4xf32> to vector<16xf32>
    %303 = vector.shape_cast %302 : vector<16xf32> to vector<16x1xf32>
    %304 = arith.addf %279, %303 : vector<16x1xf32>
    %305 = tpu.concatenate %124, %149, %174, %199, %224, %249, %274, %299 in 1 : vector<16x4xf32>, vector<16x4xf32>, vector<16x4xf32>, vector<16x4xf32>, vector<16x4xf32>, vector<16x4xf32>, vector<16x4xf32>, vector<16x4xf32> -> vector<16x32xf32>
    %cst_132 = arith.constant dense<0.000000e+00> : vector<1xf32>
    %306 = vector.multi_reduction <add>, %304, %cst_132 [0] : vector<16x1xf32> to vector<1xf32>
    %307 = vector.shape_cast %306 : vector<1xf32> to vector<1x1xf32>
    %cst_133 = arith.constant 0.00244140625 : f32
    %308 = vector.broadcast %cst_133 : f32 to vector<1x1xf32>
    %309 = arith.mulf %307, %308 : vector<1x1xf32>
    %c0_134 = arith.constant 0 : index
    %c0_135 = arith.constant 0 : index
    %310 = vector.load %arg58[%c0_134, %c0_135] : memref<1x1xf32, #tpu.memory_space<vmem>>, vector<1x1xf32>
    tpu.vector_store %arg58[%c0_134, %c0_135], %309 {strides = array<i32>} : memref<1x1xf32, #tpu.memory_space<vmem>>, vector<1x1xf32>,
    %c0_136 = arith.constant 0 : index
    %c0_137 = arith.constant 0 : index
    %311 = vector.load %arg29[%c0_136, %c0_137] : memref<32x16xf32, #tpu.memory_space<vmem>>, vector<32x16xf32>
    %cst_138 = arith.constant dense<0.000000e+00> : vector<16x16xf32>
    %312 = tpu.matmul %305, %311, %cst_138 {dimension_numbers = #tpu.dot_dimension_numbers<[1], [0], [0], [1], [0, 0, 1, 1], [], []>} : vector<16x32xf32>, vector<32x16xf32>, vector<16x16xf32> -> vector<16x16xf32>
    %c0_139 = arith.constant 0 : index
    %c0_140 = arith.constant 0 : index
    %313 = vector.load %arg28[%c0_139, %c0_140] : memref<1x16xf32, #tpu.memory_space<vmem>>, vector<1x16xf32>
    %314 = vector.broadcast %313 : vector<1x16xf32> to vector<16x16xf32>
    %315 = arith.addf %312, %314 : vector<16x16xf32>
    %c0_141 = arith.constant 0 : index
    %c0_142 = arith.constant 0 : index
    %316 = vector.load %arg2[%c0_141, %c0_142] : memref<16x12xf32, #tpu.memory_space<vmem>>, vector<16x12xf32>
    %c0_143 = arith.constant 0 : index
    %c0_144 = arith.constant 0 : index
    %317 = vector.load %arg54[%c0_143, %c0_144] : memref<12x64xf32, #tpu.memory_space<vmem>>, vector<12x64xf32>
    %cst_145 = arith.constant dense<0.000000e+00> : vector<16x64xf32>
    %318 = tpu.matmul %316, %317, %cst_145 {dimension_numbers = #tpu.dot_dimension_numbers<[1], [0], [0], [1], [0, 0, 1, 1], [], []>} : vector<16x12xf32>, vector<12x64xf32>, vector<16x64xf32> -> vector<16x64xf32>
    %c0_146 = arith.constant 0 : index
    %c0_147 = arith.constant 0 : index
    %319 = vector.load %arg53[%c0_146, %c0_147] : memref<16x64xf32, #tpu.memory_space<vmem>>, vector<16x64xf32>
    %cst_148 = arith.constant dense<0.000000e+00> : vector<16x64xf32>
    %320 = tpu.matmul %315, %319, %cst_148 {dimension_numbers = #tpu.dot_dimension_numbers<[1], [0], [0], [1], [0, 0, 1, 1], [], []>} : vector<16x16xf32>, vector<16x64xf32>, vector<16x64xf32> -> vector<16x64xf32>
    %321 = arith.addf %318, %320 : vector<16x64xf32>
    %c0_149 = arith.constant 0 : index
    %c0_150 = arith.constant 0 : index
    %322 = vector.load %arg52[%c0_149, %c0_150] : memref<1x64xf32, #tpu.memory_space<vmem>>, vector<1x64xf32>
    %323 = vector.broadcast %322 : vector<1x64xf32> to vector<16x64xf32>
    %324 = arith.addf %321, %323 : vector<16x64xf32>
    %325 = arith.mulf %324, %324 : vector<16x64xf32>
    %326 = arith.mulf %324, %325 : vector<16x64xf32>
    %cst_151 = arith.constant 4.471500e-02 : f32
    %327 = vector.broadcast %cst_151 : f32 to vector<16x64xf32>
    %328 = arith.mulf %327, %326 : vector<16x64xf32>
    %329 = arith.addf %324, %328 : vector<16x64xf32>
    %cst_152 = arith.constant 0.797884583 : f32
    %330 = vector.broadcast %cst_152 : f32 to vector<16x64xf32>
    %331 = arith.mulf %330, %329 : vector<16x64xf32>
    %332 = math.tanh %331 : vector<16x64xf32>
    %cst_153 = arith.constant 1.000000e+00 : f32
    %333 = vector.broadcast %cst_153 : f32 to vector<16x64xf32>
    %334 = arith.addf %333, %332 : vector<16x64xf32>
    %cst_154 = arith.constant 5.000000e-01 : f32
    %335 = vector.broadcast %cst_154 : f32 to vector<16x64xf32>
    %336 = arith.mulf %335, %334 : vector<16x64xf32>
    %337 = arith.mulf %324, %336 : vector<16x64xf32>
    %c0_155 = arith.constant 0 : index
    %c0_156 = arith.constant 0 : index
    %338 = vector.load %arg56[%c0_155, %c0_156] : memref<64x32xf32, #tpu.memory_space<vmem>>, vector<64x32xf32>
    %cst_157 = arith.constant dense<0.000000e+00> : vector<16x32xf32>
    %339 = tpu.matmul %337, %338, %cst_157 {dimension_numbers = #tpu.dot_dimension_numbers<[1], [0], [0], [1], [0, 0, 1, 1], [], []>} : vector<16x64xf32>, vector<64x32xf32>, vector<16x32xf32> -> vector<16x32xf32>
    %c0_158 = arith.constant 0 : index
    %c0_159 = arith.constant 0 : index
    %340 = vector.load %arg55[%c0_158, %c0_159] : memref<1x32xf32, #tpu.memory_space<vmem>>, vector<1x32xf32>
    %341 = vector.broadcast %340 : vector<1x32xf32> to vector<16x32xf32>
    %342 = arith.addf %339, %341 : vector<16x32xf32>
    %c0_160 = arith.constant 0 : index
    %c0_161 = arith.constant 0 : index
    %343 = vector.load %arg21[%c0_160, %c0_161] : memref<32x24xf32, #tpu.memory_space<vmem>>, vector<32x24xf32>
    %cst_162 = arith.constant dense<0.000000e+00> : vector<16x24xf32>
    %344 = tpu.matmul %342, %343, %cst_162 {dimension_numbers = #tpu.dot_dimension_numbers<[1], [0], [0], [1], [0, 0, 1, 1], [], []>} : vector<16x32xf32>, vector<32x24xf32>, vector<16x24xf32> -> vector<16x24xf32>
    %c0_163 = arith.constant 0 : index
    %c0_164 = arith.constant 0 : index
    %345 = vector.load %arg20[%c0_163, %c0_164] : memref<1x24xf32, #tpu.memory_space<vmem>>, vector<1x24xf32>
    %346 = vector.broadcast %345 : vector<1x24xf32> to vector<16x24xf32>
    %347 = arith.addf %344, %346 : vector<16x24xf32>
    %c0_165 = arith.constant 0 : index
    %c0_166 = arith.constant 0 : index
    %348 = vector.load %arg19[%c0_165, %c0_166] : memref<8x24xf32, #tpu.memory_space<vmem>>, vector<8x24xf32>
    %c0_167 = arith.constant 0 : index
    %c0_168 = arith.constant 0 : index
    %349 = vector.load %arg18[%c0_167, %c0_168] : memref<1x24xf32, #tpu.memory_space<vmem>>, vector<1x24xf32>
    %cst_169 = arith.constant 0.000000e+00 : f32
    %350 = vector.broadcast %cst_169 : f32 to vector<2x8xf32>
    %351 = vector.extract_strided_slice %347 {offsets = [0, 0], sizes = [1, 24], strides = [1, 1]} : vector<16x24xf32> to vector<1x24xf32>
    %352 = vector.extract_strided_slice %347 {offsets = [8, 0], sizes = [1, 24], strides = [1, 1]} : vector<16x24xf32> to vector<1x24xf32>
    %353 = tpu.concatenate %351, %352 in 0 : vector<1x24xf32>, vector<1x24xf32> -> vector<2x24xf32>
    %cst_170 = arith.constant dense<0.000000e+00> : vector<2x24xf32>
    %354 = tpu.matmul %350, %348, %cst_170 {dimension_numbers = #tpu.dot_dimension_numbers<[1], [0], [0], [1], [0, 0, 1, 1], [], []>} : vector<2x8xf32>, vector<8x24xf32>, vector<2x24xf32> -> vector<2x24xf32>
    %355 = vector.broadcast %349 : vector<1x24xf32> to vector<2x24xf32>
    %356 = arith.addf %354, %355 : vector<2x24xf32>
    %357 = vector.extract_strided_slice %353 {offsets = [0, 0], sizes = [2, 8], strides = [1, 1]} : vector<2x24xf32> to vector<2x8xf32>
    %358 = vector.extract_strided_slice %356 {offsets = [0, 0], sizes = [2, 8], strides = [1, 1]} : vector<2x24xf32> to vector<2x8xf32>
    %359 = arith.addf %357, %358 : vector<2x8xf32>
    %360 = arith.negf %359 : vector<2x8xf32>
    %361 = math.exp %360 : vector<2x8xf32>
    %cst_171 = arith.constant 1.000000e+00 : f32
    %362 = vector.broadcast %cst_171 : f32 to vector<2x8xf32>
    %363 = arith.addf %362, %361 : vector<2x8xf32>
    %364 = arith.divf %362, %363 : vector<2x8xf32>
    %365 = vector.extract_strided_slice %353 {offsets = [0, 8], sizes = [2, 8], strides = [1, 1]} : vector<2x24xf32> to vector<2x8xf32>
    %366 = vector.extract_strided_slice %356 {offsets = [0, 8], sizes = [2, 8], strides = [1, 1]} : vector<2x24xf32> to vector<2x8xf32>
    %367 = arith.addf %365, %366 : vector<2x8xf32>
    %368 = arith.negf %367 : vector<2x8xf32>
    %369 = math.exp %368 : vector<2x8xf32>
    %cst_172 = arith.constant 1.000000e+00 : f32
    %370 = vector.broadcast %cst_172 : f32 to vector<2x8xf32>
    %371 = arith.addf %370, %369 : vector<2x8xf32>
    %372 = arith.divf %370, %371 : vector<2x8xf32>
    %373 = vector.extract_strided_slice %353 {offsets = [0, 16], sizes = [2, 8], strides = [1, 1]} : vector<2x24xf32> to vector<2x8xf32>
    %374 = vector.extract_strided_slice %356 {offsets = [0, 16], sizes = [2, 8], strides = [1, 1]} : vector<2x24xf32> to vector<2x8xf32>
    %375 = arith.mulf %364, %374 : vector<2x8xf32>
    %376 = arith.addf %373, %375 : vector<2x8xf32>
    %377 = math.tanh %376 : vector<2x8xf32>
    %cst_173 = arith.constant 1.000000e+00 : f32
    %378 = vector.broadcast %cst_173 : f32 to vector<2x8xf32>
    %379 = arith.subf %378, %372 : vector<2x8xf32>
    %380 = arith.mulf %379, %377 : vector<2x8xf32>
    %381 = arith.mulf %372, %350 : vector<2x8xf32>
    %382 = arith.addf %380, %381 : vector<2x8xf32>
    %383 = vector.extract_strided_slice %382 {offsets = [0, 0], sizes = [1, 8], strides = [1, 1]} : vector<2x8xf32> to vector<1x8xf32>
    %c0_174 = arith.constant 0 : index
    %c0_175 = arith.constant 0 : index
    %384 = vector.load %arg59[%c0_174, %c0_175] : memref<16x8xf32, #tpu.memory_space<vmem>>, vector<1x8xf32>
    tpu.vector_store %arg59[%c0_174, %c0_175], %383 {strides = array<i32>} : memref<16x8xf32, #tpu.memory_space<vmem>>, vector<1x8xf32>,
    %385 = vector.extract_strided_slice %382 {offsets = [1, 0], sizes = [1, 8], strides = [1, 1]} : vector<2x8xf32> to vector<1x8xf32>
    %c8 = arith.constant 8 : index
    %c0_176 = arith.constant 0 : index
    %386 = vector.load %arg59[%c8, %c0_176] : memref<16x8xf32, #tpu.memory_space<vmem>>, vector<1x8xf32>
    tpu.vector_store %arg59[%c8, %c0_176], %385 {strides = array<i32>} : memref<16x8xf32, #tpu.memory_space<vmem>>, vector<1x8xf32>,
    %387 = vector.extract_strided_slice %347 {offsets = [1, 0], sizes = [1, 24], strides = [1, 1]} : vector<16x24xf32> to vector<1x24xf32>
    %388 = vector.extract_strided_slice %347 {offsets = [9, 0], sizes = [1, 24], strides = [1, 1]} : vector<16x24xf32> to vector<1x24xf32>
    %389 = tpu.concatenate %387, %388 in 0 : vector<1x24xf32>, vector<1x24xf32> -> vector<2x24xf32>
    %cst_177 = arith.constant dense<0.000000e+00> : vector<2x24xf32>
    %390 = tpu.matmul %382, %348, %cst_177 {dimension_numbers = #tpu.dot_dimension_numbers<[1], [0], [0], [1], [0, 0, 1, 1], [], []>} : vector<2x8xf32>, vector<8x24xf32>, vector<2x24xf32> -> vector<2x24xf32>
    %391 = vector.broadcast %349 : vector<1x24xf32> to vector<2x24xf32>
    %392 = arith.addf %390, %391 : vector<2x24xf32>
    %393 = vector.extract_strided_slice %389 {offsets = [0, 0], sizes = [2, 8], strides = [1, 1]} : vector<2x24xf32> to vector<2x8xf32>
    %394 = vector.extract_strided_slice %392 {offsets = [0, 0], sizes = [2, 8], strides = [1, 1]} : vector<2x24xf32> to vector<2x8xf32>
    %395 = arith.addf %393, %394 : vector<2x8xf32>
    %396 = arith.negf %395 : vector<2x8xf32>
    %397 = math.exp %396 : vector<2x8xf32>
    %cst_178 = arith.constant 1.000000e+00 : f32
    %398 = vector.broadcast %cst_178 : f32 to vector<2x8xf32>
    %399 = arith.addf %398, %397 : vector<2x8xf32>
    %400 = arith.divf %398, %399 : vector<2x8xf32>
    %401 = vector.extract_strided_slice %389 {offsets = [0, 8], sizes = [2, 8], strides = [1, 1]} : vector<2x24xf32> to vector<2x8xf32>
    %402 = vector.extract_strided_slice %392 {offsets = [0, 8], sizes = [2, 8], strides = [1, 1]} : vector<2x24xf32> to vector<2x8xf32>
    %403 = arith.addf %401, %402 : vector<2x8xf32>
    %404 = arith.negf %403 : vector<2x8xf32>
    %405 = math.exp %404 : vector<2x8xf32>
    %cst_179 = arith.constant 1.000000e+00 : f32
    %406 = vector.broadcast %cst_179 : f32 to vector<2x8xf32>
    %407 = arith.addf %406, %405 : vector<2x8xf32>
    %408 = arith.divf %406, %407 : vector<2x8xf32>
    %409 = vector.extract_strided_slice %389 {offsets = [0, 16], sizes = [2, 8], strides = [1, 1]} : vector<2x24xf32> to vector<2x8xf32>
    %410 = vector.extract_strided_slice %392 {offsets = [0, 16], sizes = [2, 8], strides = [1, 1]} : vector<2x24xf32> to vector<2x8xf32>
    %411 = arith.mulf %400, %410 : vector<2x8xf32>
    %412 = arith.addf %409, %411 : vector<2x8xf32>
    %413 = math.tanh %412 : vector<2x8xf32>
    %cst_180 = arith.constant 1.000000e+00 : f32
    %414 = vector.broadcast %cst_180 : f32 to vector<2x8xf32>
    %415 = arith.subf %414, %408 : vector<2x8xf32>
    %416 = arith.mulf %415, %413 : vector<2x8xf32>
    %417 = arith.mulf %408, %382 : vector<2x8xf32>
    %418 = arith.addf %416, %417 : vector<2x8xf32>
    %419 = vector.extract_strided_slice %418 {offsets = [0, 0], sizes = [1, 8], strides = [1, 1]} : vector<2x8xf32> to vector<1x8xf32>
    %c1_181 = arith.constant 1 : index
    %c0_182 = arith.constant 0 : index
    %420 = vector.load %arg59[%c1_181, %c0_182] : memref<16x8xf32, #tpu.memory_space<vmem>>, vector<1x8xf32>
    tpu.vector_store %arg59[%c1_181, %c0_182], %419 {strides = array<i32>} : memref<16x8xf32, #tpu.memory_space<vmem>>, vector<1x8xf32>,
    %421 = vector.extract_strided_slice %418 {offsets = [1, 0], sizes = [1, 8], strides = [1, 1]} : vector<2x8xf32> to vector<1x8xf32>
    %c9 = arith.constant 9 : index
    %c0_183 = arith.constant 0 : index
    %422 = vector.load %arg59[%c9, %c0_183] : memref<16x8xf32, #tpu.memory_space<vmem>>, vector<1x8xf32>
    tpu.vector_store %arg59[%c9, %c0_183], %421 {strides = array<i32>} : memref<16x8xf32, #tpu.memory_space<vmem>>, vector<1x8xf32>,
    %423 = vector.extract_strided_slice %347 {offsets = [2, 0], sizes = [1, 24], strides = [1, 1]} : vector<16x24xf32> to vector<1x24xf32>
    %424 = vector.extract_strided_slice %347 {offsets = [10, 0], sizes = [1, 24], strides = [1, 1]} : vector<16x24xf32> to vector<1x24xf32>
    %425 = tpu.concatenate %423, %424 in 0 : vector<1x24xf32>, vector<1x24xf32> -> vector<2x24xf32>
    %cst_184 = arith.constant dense<0.000000e+00> : vector<2x24xf32>
    %426 = tpu.matmul %418, %348, %cst_184 {dimension_numbers = #tpu.dot_dimension_numbers<[1], [0], [0], [1], [0, 0, 1, 1], [], []>} : vector<2x8xf32>, vector<8x24xf32>, vector<2x24xf32> -> vector<2x24xf32>
    %427 = vector.broadcast %349 : vector<1x24xf32> to vector<2x24xf32>
    %428 = arith.addf %426, %427 : vector<2x24xf32>
    %429 = vector.extract_strided_slice %425 {offsets = [0, 0], sizes = [2, 8], strides = [1, 1]} : vector<2x24xf32> to vector<2x8xf32>
    %430 = vector.extract_strided_slice %428 {offsets = [0, 0], sizes = [2, 8], strides = [1, 1]} : vector<2x24xf32> to vector<2x8xf32>
    %431 = arith.addf %429, %430 : vector<2x8xf32>
    %432 = arith.negf %431 : vector<2x8xf32>
    %433 = math.exp %432 : vector<2x8xf32>
    %cst_185 = arith.constant 1.000000e+00 : f32
    %434 = vector.broadcast %cst_185 : f32 to vector<2x8xf32>
    %435 = arith.addf %434, %433 : vector<2x8xf32>
    %436 = arith.divf %434, %435 : vector<2x8xf32>
    %437 = vector.extract_strided_slice %425 {offsets = [0, 8], sizes = [2, 8], strides = [1, 1]} : vector<2x24xf32> to vector<2x8xf32>
    %438 = vector.extract_strided_slice %428 {offsets = [0, 8], sizes = [2, 8], strides = [1, 1]} : vector<2x24xf32> to vector<2x8xf32>
    %439 = arith.addf %437, %438 : vector<2x8xf32>
    %440 = arith.negf %439 : vector<2x8xf32>
    %441 = math.exp %440 : vector<2x8xf32>
    %cst_186 = arith.constant 1.000000e+00 : f32
    %442 = vector.broadcast %cst_186 : f32 to vector<2x8xf32>
    %443 = arith.addf %442, %441 : vector<2x8xf32>
    %444 = arith.divf %442, %443 : vector<2x8xf32>
    %445 = vector.extract_strided_slice %425 {offsets = [0, 16], sizes = [2, 8], strides = [1, 1]} : vector<2x24xf32> to vector<2x8xf32>
    %446 = vector.extract_strided_slice %428 {offsets = [0, 16], sizes = [2, 8], strides = [1, 1]} : vector<2x24xf32> to vector<2x8xf32>
    %447 = arith.mulf %436, %446 : vector<2x8xf32>
    %448 = arith.addf %445, %447 : vector<2x8xf32>
    %449 = math.tanh %448 : vector<2x8xf32>
    %cst_187 = arith.constant 1.000000e+00 : f32
    %450 = vector.broadcast %cst_187 : f32 to vector<2x8xf32>
    %451 = arith.subf %450, %444 : vector<2x8xf32>
    %452 = arith.mulf %451, %449 : vector<2x8xf32>
    %453 = arith.mulf %444, %418 : vector<2x8xf32>
    %454 = arith.addf %452, %453 : vector<2x8xf32>
    %455 = vector.extract_strided_slice %454 {offsets = [0, 0], sizes = [1, 8], strides = [1, 1]} : vector<2x8xf32> to vector<1x8xf32>
    %c2 = arith.constant 2 : index
    %c0_188 = arith.constant 0 : index
    %456 = vector.load %arg59[%c2, %c0_188] : memref<16x8xf32, #tpu.memory_space<vmem>>, vector<1x8xf32>
    tpu.vector_store %arg59[%c2, %c0_188], %455 {strides = array<i32>} : memref<16x8xf32, #tpu.memory_space<vmem>>, vector<1x8xf32>,
    %457 = vector.extract_strided_slice %454 {offsets = [1, 0], sizes = [1, 8], strides = [1, 1]} : vector<2x8xf32> to vector<1x8xf32>
    %c10 = arith.constant 10 : index
    %c0_189 = arith.constant 0 : index
    %458 = vector.load %arg59[%c10, %c0_189] : memref<16x8xf32, #tpu.memory_space<vmem>>, vector<1x8xf32>
    tpu.vector_store %arg59[%c10, %c0_189], %457 {strides = array<i32>} : memref<16x8xf32, #tpu.memory_space<vmem>>, vector<1x8xf32>,
    %459 = vector.extract_strided_slice %347 {offsets = [3, 0], sizes = [1, 24], strides = [1, 1]} : vector<16x24xf32> to vector<1x24xf32>
    %460 = vector.extract_strided_slice %347 {offsets = [11, 0], sizes = [1, 24], strides = [1, 1]} : vector<16x24xf32> to vector<1x24xf32>
    %461 = tpu.concatenate %459, %460 in 0 : vector<1x24xf32>, vector<1x24xf32> -> vector<2x24xf32>
    %cst_190 = arith.constant dense<0.000000e+00> : vector<2x24xf32>
    %462 = tpu.matmul %454, %348, %cst_190 {dimension_numbers = #tpu.dot_dimension_numbers<[1], [0], [0], [1], [0, 0, 1, 1], [], []>} : vector<2x8xf32>, vector<8x24xf32>, vector<2x24xf32> -> vector<2x24xf32>
    %463 = vector.broadcast %349 : vector<1x24xf32> to vector<2x24xf32>
    %464 = arith.addf %462, %463 : vector<2x24xf32>
    %465 = vector.extract_strided_slice %461 {offsets = [0, 0], sizes = [2, 8], strides = [1, 1]} : vector<2x24xf32> to vector<2x8xf32>
    %466 = vector.extract_strided_slice %464 {offsets = [0, 0], sizes = [2, 8], strides = [1, 1]} : vector<2x24xf32> to vector<2x8xf32>
    %467 = arith.addf %465, %466 : vector<2x8xf32>
    %468 = arith.negf %467 : vector<2x8xf32>
    %469 = math.exp %468 : vector<2x8xf32>
    %cst_191 = arith.constant 1.000000e+00 : f32
    %470 = vector.broadcast %cst_191 : f32 to vector<2x8xf32>
    %471 = arith.addf %470, %469 : vector<2x8xf32>
    %472 = arith.divf %470, %471 : vector<2x8xf32>
    %473 = vector.extract_strided_slice %461 {offsets = [0, 8], sizes = [2, 8], strides = [1, 1]} : vector<2x24xf32> to vector<2x8xf32>
    %474 = vector.extract_strided_slice %464 {offsets = [0, 8], sizes = [2, 8], strides = [1, 1]} : vector<2x24xf32> to vector<2x8xf32>
    %475 = arith.addf %473, %474 : vector<2x8xf32>
    %476 = arith.negf %475 : vector<2x8xf32>
    %477 = math.exp %476 : vector<2x8xf32>
    %cst_192 = arith.constant 1.000000e+00 : f32
    %478 = vector.broadcast %cst_192 : f32 to vector<2x8xf32>
    %479 = arith.addf %478, %477 : vector<2x8xf32>
    %480 = arith.divf %478, %479 : vector<2x8xf32>
    %481 = vector.extract_strided_slice %461 {offsets = [0, 16], sizes = [2, 8], strides = [1, 1]} : vector<2x24xf32> to vector<2x8xf32>
    %482 = vector.extract_strided_slice %464 {offsets = [0, 16], sizes = [2, 8], strides = [1, 1]} : vector<2x24xf32> to vector<2x8xf32>
    %483 = arith.mulf %472, %482 : vector<2x8xf32>
    %484 = arith.addf %481, %483 : vector<2x8xf32>
    %485 = math.tanh %484 : vector<2x8xf32>
    %cst_193 = arith.constant 1.000000e+00 : f32
    %486 = vector.broadcast %cst_193 : f32 to vector<2x8xf32>
    %487 = arith.subf %486, %480 : vector<2x8xf32>
    %488 = arith.mulf %487, %485 : vector<2x8xf32>
    %489 = arith.mulf %480, %454 : vector<2x8xf32>
    %490 = arith.addf %488, %489 : vector<2x8xf32>
    %491 = vector.extract_strided_slice %490 {offsets = [0, 0], sizes = [1, 8], strides = [1, 1]} : vector<2x8xf32> to vector<1x8xf32>
    %c3 = arith.constant 3 : index
    %c0_194 = arith.constant 0 : index
    %492 = vector.load %arg59[%c3, %c0_194] : memref<16x8xf32, #tpu.memory_space<vmem>>, vector<1x8xf32>
    tpu.vector_store %arg59[%c3, %c0_194], %491 {strides = array<i32>} : memref<16x8xf32, #tpu.memory_space<vmem>>, vector<1x8xf32>,
    %493 = vector.extract_strided_slice %490 {offsets = [1, 0], sizes = [1, 8], strides = [1, 1]} : vector<2x8xf32> to vector<1x8xf32>
    %c11 = arith.constant 11 : index
    %c0_195 = arith.constant 0 : index
    %494 = vector.load %arg59[%c11, %c0_195] : memref<16x8xf32, #tpu.memory_space<vmem>>, vector<1x8xf32>
    tpu.vector_store %arg59[%c11, %c0_195], %493 {strides = array<i32>} : memref<16x8xf32, #tpu.memory_space<vmem>>, vector<1x8xf32>,
    %495 = vector.extract_strided_slice %347 {offsets = [4, 0], sizes = [1, 24], strides = [1, 1]} : vector<16x24xf32> to vector<1x24xf32>
    %496 = vector.extract_strided_slice %347 {offsets = [12, 0], sizes = [1, 24], strides = [1, 1]} : vector<16x24xf32> to vector<1x24xf32>
    %497 = tpu.concatenate %495, %496 in 0 : vector<1x24xf32>, vector<1x24xf32> -> vector<2x24xf32>
    %cst_196 = arith.constant dense<0.000000e+00> : vector<2x24xf32>
    %498 = tpu.matmul %490, %348, %cst_196 {dimension_numbers = #tpu.dot_dimension_numbers<[1], [0], [0], [1], [0, 0, 1, 1], [], []>} : vector<2x8xf32>, vector<8x24xf32>, vector<2x24xf32> -> vector<2x24xf32>
    %499 = vector.broadcast %349 : vector<1x24xf32> to vector<2x24xf32>
    %500 = arith.addf %498, %499 : vector<2x24xf32>
    %501 = vector.extract_strided_slice %497 {offsets = [0, 0], sizes = [2, 8], strides = [1, 1]} : vector<2x24xf32> to vector<2x8xf32>
    %502 = vector.extract_strided_slice %500 {offsets = [0, 0], sizes = [2, 8], strides = [1, 1]} : vector<2x24xf32> to vector<2x8xf32>
    %503 = arith.addf %501, %502 : vector<2x8xf32>
    %504 = arith.negf %503 : vector<2x8xf32>
    %505 = math.exp %504 : vector<2x8xf32>
    %cst_197 = arith.constant 1.000000e+00 : f32
    %506 = vector.broadcast %cst_197 : f32 to vector<2x8xf32>
    %507 = arith.addf %506, %505 : vector<2x8xf32>
    %508 = arith.divf %506, %507 : vector<2x8xf32>
    %509 = vector.extract_strided_slice %497 {offsets = [0, 8], sizes = [2, 8], strides = [1, 1]} : vector<2x24xf32> to vector<2x8xf32>
    %510 = vector.extract_strided_slice %500 {offsets = [0, 8], sizes = [2, 8], strides = [1, 1]} : vector<2x24xf32> to vector<2x8xf32>
    %511 = arith.addf %509, %510 : vector<2x8xf32>
    %512 = arith.negf %511 : vector<2x8xf32>
    %513 = math.exp %512 : vector<2x8xf32>
    %cst_198 = arith.constant 1.000000e+00 : f32
    %514 = vector.broadcast %cst_198 : f32 to vector<2x8xf32>
    %515 = arith.addf %514, %513 : vector<2x8xf32>
    %516 = arith.divf %514, %515 : vector<2x8xf32>
    %517 = vector.extract_strided_slice %497 {offsets = [0, 16], sizes = [2, 8], strides = [1, 1]} : vector<2x24xf32> to vector<2x8xf32>
    %518 = vector.extract_strided_slice %500 {offsets = [0, 16], sizes = [2, 8], strides = [1, 1]} : vector<2x24xf32> to vector<2x8xf32>
    %519 = arith.mulf %508, %518 : vector<2x8xf32>
    %520 = arith.addf %517, %519 : vector<2x8xf32>
    %521 = math.tanh %520 : vector<2x8xf32>
    %cst_199 = arith.constant 1.000000e+00 : f32
    %522 = vector.broadcast %cst_199 : f32 to vector<2x8xf32>
    %523 = arith.subf %522, %516 : vector<2x8xf32>
    %524 = arith.mulf %523, %521 : vector<2x8xf32>
    %525 = arith.mulf %516, %490 : vector<2x8xf32>
    %526 = arith.addf %524, %525 : vector<2x8xf32>
    %527 = vector.extract_strided_slice %526 {offsets = [0, 0], sizes = [1, 8], strides = [1, 1]} : vector<2x8xf32> to vector<1x8xf32>
    %c4 = arith.constant 4 : index
    %c0_200 = arith.constant 0 : index
    %528 = vector.load %arg59[%c4, %c0_200] : memref<16x8xf32, #tpu.memory_space<vmem>>, vector<1x8xf32>
    tpu.vector_store %arg59[%c4, %c0_200], %527 {strides = array<i32>} : memref<16x8xf32, #tpu.memory_space<vmem>>, vector<1x8xf32>,
    %529 = vector.extract_strided_slice %526 {offsets = [1, 0], sizes = [1, 8], strides = [1, 1]} : vector<2x8xf32> to vector<1x8xf32>
    %c12 = arith.constant 12 : index
    %c0_201 = arith.constant 0 : index
    %530 = vector.load %arg59[%c12, %c0_201] : memref<16x8xf32, #tpu.memory_space<vmem>>, vector<1x8xf32>
    tpu.vector_store %arg59[%c12, %c0_201], %529 {strides = array<i32>} : memref<16x8xf32, #tpu.memory_space<vmem>>, vector<1x8xf32>,
    %531 = vector.extract_strided_slice %347 {offsets = [5, 0], sizes = [1, 24], strides = [1, 1]} : vector<16x24xf32> to vector<1x24xf32>
    %532 = vector.extract_strided_slice %347 {offsets = [13, 0], sizes = [1, 24], strides = [1, 1]} : vector<16x24xf32> to vector<1x24xf32>
    %533 = tpu.concatenate %531, %532 in 0 : vector<1x24xf32>, vector<1x24xf32> -> vector<2x24xf32>
    %cst_202 = arith.constant dense<0.000000e+00> : vector<2x24xf32>
    %534 = tpu.matmul %526, %348, %cst_202 {dimension_numbers = #tpu.dot_dimension_numbers<[1], [0], [0], [1], [0, 0, 1, 1], [], []>} : vector<2x8xf32>, vector<8x24xf32>, vector<2x24xf32> -> vector<2x24xf32>
    %535 = vector.broadcast %349 : vector<1x24xf32> to vector<2x24xf32>
    %536 = arith.addf %534, %535 : vector<2x24xf32>
    %537 = vector.extract_strided_slice %533 {offsets = [0, 0], sizes = [2, 8], strides = [1, 1]} : vector<2x24xf32> to vector<2x8xf32>
    %538 = vector.extract_strided_slice %536 {offsets = [0, 0], sizes = [2, 8], strides = [1, 1]} : vector<2x24xf32> to vector<2x8xf32>
    %539 = arith.addf %537, %538 : vector<2x8xf32>
    %540 = arith.negf %539 : vector<2x8xf32>
    %541 = math.exp %540 : vector<2x8xf32>
    %cst_203 = arith.constant 1.000000e+00 : f32
    %542 = vector.broadcast %cst_203 : f32 to vector<2x8xf32>
    %543 = arith.addf %542, %541 : vector<2x8xf32>
    %544 = arith.divf %542, %543 : vector<2x8xf32>
    %545 = vector.extract_strided_slice %533 {offsets = [0, 8], sizes = [2, 8], strides = [1, 1]} : vector<2x24xf32> to vector<2x8xf32>
    %546 = vector.extract_strided_slice %536 {offsets = [0, 8], sizes = [2, 8], strides = [1, 1]} : vector<2x24xf32> to vector<2x8xf32>
    %547 = arith.addf %545, %546 : vector<2x8xf32>
    %548 = arith.negf %547 : vector<2x8xf32>
    %549 = math.exp %548 : vector<2x8xf32>
    %cst_204 = arith.constant 1.000000e+00 : f32
    %550 = vector.broadcast %cst_204 : f32 to vector<2x8xf32>
    %551 = arith.addf %550, %549 : vector<2x8xf32>
    %552 = arith.divf %550, %551 : vector<2x8xf32>
    %553 = vector.extract_strided_slice %533 {offsets = [0, 16], sizes = [2, 8], strides = [1, 1]} : vector<2x24xf32> to vector<2x8xf32>
    %554 = vector.extract_strided_slice %536 {offsets = [0, 16], sizes = [2, 8], strides = [1, 1]} : vector<2x24xf32> to vector<2x8xf32>
    %555 = arith.mulf %544, %554 : vector<2x8xf32>
    %556 = arith.addf %553, %555 : vector<2x8xf32>
    %557 = math.tanh %556 : vector<2x8xf32>
    %cst_205 = arith.constant 1.000000e+00 : f32
    %558 = vector.broadcast %cst_205 : f32 to vector<2x8xf32>
    %559 = arith.subf %558, %552 : vector<2x8xf32>
    %560 = arith.mulf %559, %557 : vector<2x8xf32>
    %561 = arith.mulf %552, %526 : vector<2x8xf32>
    %562 = arith.addf %560, %561 : vector<2x8xf32>
    %563 = vector.extract_strided_slice %562 {offsets = [0, 0], sizes = [1, 8], strides = [1, 1]} : vector<2x8xf32> to vector<1x8xf32>
    %c5 = arith.constant 5 : index
    %c0_206 = arith.constant 0 : index
    %564 = vector.load %arg59[%c5, %c0_206] : memref<16x8xf32, #tpu.memory_space<vmem>>, vector<1x8xf32>
    tpu.vector_store %arg59[%c5, %c0_206], %563 {strides = array<i32>} : memref<16x8xf32, #tpu.memory_space<vmem>>, vector<1x8xf32>,
    %565 = vector.extract_strided_slice %562 {offsets = [1, 0], sizes = [1, 8], strides = [1, 1]} : vector<2x8xf32> to vector<1x8xf32>
    %c13 = arith.constant 13 : index
    %c0_207 = arith.constant 0 : index
    %566 = vector.load %arg59[%c13, %c0_207] : memref<16x8xf32, #tpu.memory_space<vmem>>, vector<1x8xf32>
    tpu.vector_store %arg59[%c13, %c0_207], %565 {strides = array<i32>} : memref<16x8xf32, #tpu.memory_space<vmem>>, vector<1x8xf32>,
    %567 = vector.extract_strided_slice %347 {offsets = [6, 0], sizes = [1, 24], strides = [1, 1]} : vector<16x24xf32> to vector<1x24xf32>
    %568 = vector.extract_strided_slice %347 {offsets = [14, 0], sizes = [1, 24], strides = [1, 1]} : vector<16x24xf32> to vector<1x24xf32>
    %569 = tpu.concatenate %567, %568 in 0 : vector<1x24xf32>, vector<1x24xf32> -> vector<2x24xf32>
    %cst_208 = arith.constant dense<0.000000e+00> : vector<2x24xf32>
    %570 = tpu.matmul %562, %348, %cst_208 {dimension_numbers = #tpu.dot_dimension_numbers<[1], [0], [0], [1], [0, 0, 1, 1], [], []>} : vector<2x8xf32>, vector<8x24xf32>, vector<2x24xf32> -> vector<2x24xf32>
    %571 = vector.broadcast %349 : vector<1x24xf32> to vector<2x24xf32>
    %572 = arith.addf %570, %571 : vector<2x24xf32>
    %573 = vector.extract_strided_slice %569 {offsets = [0, 0], sizes = [2, 8], strides = [1, 1]} : vector<2x24xf32> to vector<2x8xf32>
    %574 = vector.extract_strided_slice %572 {offsets = [0, 0], sizes = [2, 8], strides = [1, 1]} : vector<2x24xf32> to vector<2x8xf32>
    %575 = arith.addf %573, %574 : vector<2x8xf32>
    %576 = arith.negf %575 : vector<2x8xf32>
    %577 = math.exp %576 : vector<2x8xf32>
    %cst_209 = arith.constant 1.000000e+00 : f32
    %578 = vector.broadcast %cst_209 : f32 to vector<2x8xf32>
    %579 = arith.addf %578, %577 : vector<2x8xf32>
    %580 = arith.divf %578, %579 : vector<2x8xf32>
    %581 = vector.extract_strided_slice %569 {offsets = [0, 8], sizes = [2, 8], strides = [1, 1]} : vector<2x24xf32> to vector<2x8xf32>
    %582 = vector.extract_strided_slice %572 {offsets = [0, 8], sizes = [2, 8], strides = [1, 1]} : vector<2x24xf32> to vector<2x8xf32>
    %583 = arith.addf %581, %582 : vector<2x8xf32>
    %584 = arith.negf %583 : vector<2x8xf32>
    %585 = math.exp %584 : vector<2x8xf32>
    %cst_210 = arith.constant 1.000000e+00 : f32
    %586 = vector.broadcast %cst_210 : f32 to vector<2x8xf32>
    %587 = arith.addf %586, %585 : vector<2x8xf32>
    %588 = arith.divf %586, %587 : vector<2x8xf32>
    %589 = vector.extract_strided_slice %569 {offsets = [0, 16], sizes = [2, 8], strides = [1, 1]} : vector<2x24xf32> to vector<2x8xf32>
    %590 = vector.extract_strided_slice %572 {offsets = [0, 16], sizes = [2, 8], strides = [1, 1]} : vector<2x24xf32> to vector<2x8xf32>
    %591 = arith.mulf %580, %590 : vector<2x8xf32>
    %592 = arith.addf %589, %591 : vector<2x8xf32>
    %593 = math.tanh %592 : vector<2x8xf32>
    %cst_211 = arith.constant 1.000000e+00 : f32
    %594 = vector.broadcast %cst_211 : f32 to vector<2x8xf32>
    %595 = arith.subf %594, %588 : vector<2x8xf32>
    %596 = arith.mulf %595, %593 : vector<2x8xf32>
    %597 = arith.mulf %588, %562 : vector<2x8xf32>
    %598 = arith.addf %596, %597 : vector<2x8xf32>
    %599 = vector.extract_strided_slice %598 {offsets = [0, 0], sizes = [1, 8], strides = [1, 1]} : vector<2x8xf32> to vector<1x8xf32>
    %c6 = arith.constant 6 : index
    %c0_212 = arith.constant 0 : index
    %600 = vector.load %arg59[%c6, %c0_212] : memref<16x8xf32, #tpu.memory_space<vmem>>, vector<1x8xf32>
    tpu.vector_store %arg59[%c6, %c0_212], %599 {strides = array<i32>} : memref<16x8xf32, #tpu.memory_space<vmem>>, vector<1x8xf32>,
    %601 = vector.extract_strided_slice %598 {offsets = [1, 0], sizes = [1, 8], strides = [1, 1]} : vector<2x8xf32> to vector<1x8xf32>
    %c14 = arith.constant 14 : index
    %c0_213 = arith.constant 0 : index
    %602 = vector.load %arg59[%c14, %c0_213] : memref<16x8xf32, #tpu.memory_space<vmem>>, vector<1x8xf32>
    tpu.vector_store %arg59[%c14, %c0_213], %601 {strides = array<i32>} : memref<16x8xf32, #tpu.memory_space<vmem>>, vector<1x8xf32>,
    %603 = vector.extract_strided_slice %347 {offsets = [7, 0], sizes = [1, 24], strides = [1, 1]} : vector<16x24xf32> to vector<1x24xf32>
    %604 = vector.extract_strided_slice %347 {offsets = [15, 0], sizes = [1, 24], strides = [1, 1]} : vector<16x24xf32> to vector<1x24xf32>
    %605 = tpu.concatenate %603, %604 in 0 : vector<1x24xf32>, vector<1x24xf32> -> vector<2x24xf32>
    %cst_214 = arith.constant dense<0.000000e+00> : vector<2x24xf32>
    %606 = tpu.matmul %598, %348, %cst_214 {dimension_numbers = #tpu.dot_dimension_numbers<[1], [0], [0], [1], [0, 0, 1, 1], [], []>} : vector<2x8xf32>, vector<8x24xf32>, vector<2x24xf32> -> vector<2x24xf32>
    %607 = vector.broadcast %349 : vector<1x24xf32> to vector<2x24xf32>
    %608 = arith.addf %606, %607 : vector<2x24xf32>
    %609 = vector.extract_strided_slice %605 {offsets = [0, 0], sizes = [2, 8], strides = [1, 1]} : vector<2x24xf32> to vector<2x8xf32>
    %610 = vector.extract_strided_slice %608 {offsets = [0, 0], sizes = [2, 8], strides = [1, 1]} : vector<2x24xf32> to vector<2x8xf32>
    %611 = arith.addf %609, %610 : vector<2x8xf32>
    %612 = arith.negf %611 : vector<2x8xf32>
    %613 = math.exp %612 : vector<2x8xf32>
    %cst_215 = arith.constant 1.000000e+00 : f32
    %614 = vector.broadcast %cst_215 : f32 to vector<2x8xf32>
    %615 = arith.addf %614, %613 : vector<2x8xf32>
    %616 = arith.divf %614, %615 : vector<2x8xf32>
    %617 = vector.extract_strided_slice %605 {offsets = [0, 8], sizes = [2, 8], strides = [1, 1]} : vector<2x24xf32> to vector<2x8xf32>
    %618 = vector.extract_strided_slice %608 {offsets = [0, 8], sizes = [2, 8], strides = [1, 1]} : vector<2x24xf32> to vector<2x8xf32>
    %619 = arith.addf %617, %618 : vector<2x8xf32>
    %620 = arith.negf %619 : vector<2x8xf32>
    %621 = math.exp %620 : vector<2x8xf32>
    %cst_216 = arith.constant 1.000000e+00 : f32
    %622 = vector.broadcast %cst_216 : f32 to vector<2x8xf32>
    %623 = arith.addf %622, %621 : vector<2x8xf32>
    %624 = arith.divf %622, %623 : vector<2x8xf32>
    %625 = vector.extract_strided_slice %605 {offsets = [0, 16], sizes = [2, 8], strides = [1, 1]} : vector<2x24xf32> to vector<2x8xf32>
    %626 = vector.extract_strided_slice %608 {offsets = [0, 16], sizes = [2, 8], strides = [1, 1]} : vector<2x24xf32> to vector<2x8xf32>
    %627 = arith.mulf %616, %626 : vector<2x8xf32>
    %628 = arith.addf %625, %627 : vector<2x8xf32>
    %629 = math.tanh %628 : vector<2x8xf32>
    %cst_217 = arith.constant 1.000000e+00 : f32
    %630 = vector.broadcast %cst_217 : f32 to vector<2x8xf32>
    %631 = arith.subf %630, %624 : vector<2x8xf32>
    %632 = arith.mulf %631, %629 : vector<2x8xf32>
    %633 = arith.mulf %624, %598 : vector<2x8xf32>
    %634 = arith.addf %632, %633 : vector<2x8xf32>
    %635 = vector.extract_strided_slice %634 {offsets = [0, 0], sizes = [1, 8], strides = [1, 1]} : vector<2x8xf32> to vector<1x8xf32>
    %c7 = arith.constant 7 : index
    %c0_218 = arith.constant 0 : index
    %636 = vector.load %arg59[%c7, %c0_218] : memref<16x8xf32, #tpu.memory_space<vmem>>, vector<1x8xf32>
    tpu.vector_store %arg59[%c7, %c0_218], %635 {strides = array<i32>} : memref<16x8xf32, #tpu.memory_space<vmem>>, vector<1x8xf32>,
    %637 = vector.extract_strided_slice %634 {offsets = [1, 0], sizes = [1, 8], strides = [1, 1]} : vector<2x8xf32> to vector<1x8xf32>
    %c15 = arith.constant 15 : index
    %c0_219 = arith.constant 0 : index
    %638 = vector.load %arg59[%c15, %c0_219] : memref<16x8xf32, #tpu.memory_space<vmem>>, vector<1x8xf32>
    tpu.vector_store %arg59[%c15, %c0_219], %637 {strides = array<i32>} : memref<16x8xf32, #tpu.memory_space<vmem>>, vector<1x8xf32>,
    %c0_220 = arith.constant 0 : index
    %c0_221 = arith.constant 0 : index
    %639 = vector.load %arg59[%c0_220, %c0_221] : memref<16x8xf32, #tpu.memory_space<vmem>>, vector<16x8xf32>
    %c0_222 = arith.constant 0 : index
    %c0_223 = arith.constant 0 : index
    %640 = vector.load %arg23[%c0_222, %c0_223] : memref<8x32xf32, #tpu.memory_space<vmem>>, vector<8x32xf32>
    %cst_224 = arith.constant dense<0.000000e+00> : vector<16x32xf32>
    %641 = tpu.matmul %639, %640, %cst_224 {dimension_numbers = #tpu.dot_dimension_numbers<[1], [0], [0], [1], [0, 0, 1, 1], [], []>} : vector<16x8xf32>, vector<8x32xf32>, vector<16x32xf32> -> vector<16x32xf32>
    %642 = arith.addf %342, %641 : vector<16x32xf32>
    %c0_225 = arith.constant 0 : index
    %c0_226 = arith.constant 0 : index
    %643 = vector.load %arg22[%c0_225, %c0_226] : memref<1x32xf32, #tpu.memory_space<vmem>>, vector<1x32xf32>
    %644 = vector.broadcast %643 : vector<1x32xf32> to vector<16x32xf32>
    %645 = arith.addf %642, %644 : vector<16x32xf32>
    %c0_227 = arith.constant 0 : index
    %c0_228 = arith.constant 0 : index
    %646 = vector.load %arg3[%c0_227, %c0_228] : memref<1x16xf32, #tpu.memory_space<vmem>>, vector<1x16xf32>
    %647 = tpu.concatenate %646, %646, %646, %646 in 1 : vector<1x16xf32>, vector<1x16xf32>, vector<1x16xf32>, vector<1x16xf32> -> vector<1x64xf32>
    %648 = tpu.iota {dimensions = array<i32: 0>} : vector<64x64xi32>
    %c0_i32 = arith.constant 0 : i32
    %649 = vector.broadcast %c0_i32 : i32 to vector<64x64xi32>
    %c8_i32 = arith.constant 8 : i32
    %650 = vector.broadcast %c8_i32 : i32 to vector<64x64xi32>
    %651 = arith.cmpi sge, %648, %650 : vector<64x64xi32>
    %652 = arith.extui %651 : vector<64x64xi1> to vector<64x64xi32>
    %653 = arith.addi %649, %652 : vector<64x64xi32>
    %c16_i32_229 = arith.constant 16 : i32
    %654 = vector.broadcast %c16_i32_229 : i32 to vector<64x64xi32>
    %655 = arith.cmpi sge, %648, %654 : vector<64x64xi32>
    %656 = arith.extui %655 : vector<64x64xi1> to vector<64x64xi32>
    %657 = arith.addi %653, %656 : vector<64x64xi32>
    %c24_i32 = arith.constant 24 : i32
    %658 = vector.broadcast %c24_i32 : i32 to vector<64x64xi32>
    %659 = arith.cmpi sge, %648, %658 : vector<64x64xi32>
    %660 = arith.extui %659 : vector<64x64xi1> to vector<64x64xi32>
    %661 = arith.addi %657, %660 : vector<64x64xi32>
    %c32_i32 = arith.constant 32 : i32
    %662 = vector.broadcast %c32_i32 : i32 to vector<64x64xi32>
    %663 = arith.cmpi sge, %648, %662 : vector<64x64xi32>
    %664 = arith.extui %663 : vector<64x64xi1> to vector<64x64xi32>
    %665 = arith.addi %661, %664 : vector<64x64xi32>
    %c40_i32 = arith.constant 40 : i32
    %666 = vector.broadcast %c40_i32 : i32 to vector<64x64xi32>
    %667 = arith.cmpi sge, %648, %666 : vector<64x64xi32>
    %668 = arith.extui %667 : vector<64x64xi1> to vector<64x64xi32>
    %669 = arith.addi %665, %668 : vector<64x64xi32>
    %c48_i32 = arith.constant 48 : i32
    %670 = vector.broadcast %c48_i32 : i32 to vector<64x64xi32>
    %671 = arith.cmpi sge, %648, %670 : vector<64x64xi32>
    %672 = arith.extui %671 : vector<64x64xi1> to vector<64x64xi32>
    %673 = arith.addi %669, %672 : vector<64x64xi32>
    %c56_i32 = arith.constant 56 : i32
    %674 = vector.broadcast %c56_i32 : i32 to vector<64x64xi32>
    %675 = arith.cmpi sge, %648, %674 : vector<64x64xi32>
    %676 = arith.extui %675 : vector<64x64xi1> to vector<64x64xi32>
    %677 = arith.addi %673, %676 : vector<64x64xi32>
    %678 = tpu.iota {dimensions = array<i32: 1>} : vector<64x64xi32>
    %c0_i32_230 = arith.constant 0 : i32
    %679 = vector.broadcast %c0_i32_230 : i32 to vector<64x64xi32>
    %c8_i32_231 = arith.constant 8 : i32
    %680 = vector.broadcast %c8_i32_231 : i32 to vector<64x64xi32>
    %681 = arith.cmpi sge, %678, %680 : vector<64x64xi32>
    %682 = arith.extui %681 : vector<64x64xi1> to vector<64x64xi32>
    %683 = arith.addi %679, %682 : vector<64x64xi32>
    %c16_i32_232 = arith.constant 16 : i32
    %684 = vector.broadcast %c16_i32_232 : i32 to vector<64x64xi32>
    %685 = arith.cmpi sge, %678, %684 : vector<64x64xi32>
    %686 = arith.extui %685 : vector<64x64xi1> to vector<64x64xi32>
    %687 = arith.addi %683, %686 : vector<64x64xi32>
    %c24_i32_233 = arith.constant 24 : i32
    %688 = vector.broadcast %c24_i32_233 : i32 to vector<64x64xi32>
    %689 = arith.cmpi sge, %678, %688 : vector<64x64xi32>
    %690 = arith.extui %689 : vector<64x64xi1> to vector<64x64xi32>
    %691 = arith.addi %687, %690 : vector<64x64xi32>
    %c32_i32_234 = arith.constant 32 : i32
    %692 = vector.broadcast %c32_i32_234 : i32 to vector<64x64xi32>
    %693 = arith.cmpi sge, %678, %692 : vector<64x64xi32>
    %694 = arith.extui %693 : vector<64x64xi1> to vector<64x64xi32>
    %695 = arith.addi %691, %694 : vector<64x64xi32>
    %c40_i32_235 = arith.constant 40 : i32
    %696 = vector.broadcast %c40_i32_235 : i32 to vector<64x64xi32>
    %697 = arith.cmpi sge, %678, %696 : vector<64x64xi32>
    %698 = arith.extui %697 : vector<64x64xi1> to vector<64x64xi32>
    %699 = arith.addi %695, %698 : vector<64x64xi32>
    %c48_i32_236 = arith.constant 48 : i32
    %700 = vector.broadcast %c48_i32_236 : i32 to vector<64x64xi32>
    %701 = arith.cmpi sge, %678, %700 : vector<64x64xi32>
    %702 = arith.extui %701 : vector<64x64xi1> to vector<64x64xi32>
    %703 = arith.addi %699, %702 : vector<64x64xi32>
    %c56_i32_237 = arith.constant 56 : i32
    %704 = vector.broadcast %c56_i32_237 : i32 to vector<64x64xi32>
    %705 = arith.cmpi sge, %678, %704 : vector<64x64xi32>
    %706 = arith.extui %705 : vector<64x64xi1> to vector<64x64xi32>
    %707 = arith.addi %703, %706 : vector<64x64xi32>
    %708 = arith.cmpi eq, %677, %707 : vector<64x64xi32>
    %cst_238 = arith.constant 5.000000e-01 : f32
    %709 = vector.broadcast %cst_238 : f32 to vector<1x64xf32>
    %710 = arith.cmpf ogt, %647, %709 : vector<1x64xf32>
    %711 = vector.broadcast %710 : vector<1x64xi1> to vector<64x64xi1>
    %712 = arith.andi %708, %711 : vector<64x64xi1>
    %cst_239 = arith.constant 0.000000e+00 : f32
    %cst_240 = arith.constant -1.000000e+09 : f32
    %713 = vector.broadcast %cst_239 : f32 to vector<64x64xf32>
    %714 = vector.broadcast %cst_240 : f32 to vector<64x64xf32>
    %715 = arith.select %712, %713, %714 : vector<64x64xi1>, vector<64x64xf32>
    %716 = tpu.iota {dimensions = array<i32: 0>} : vector<64x48xi32>
    %c0_i32_241 = arith.constant 0 : i32
    %717 = vector.broadcast %c0_i32_241 : i32 to vector<64x48xi32>
    %c8_i32_242 = arith.constant 8 : i32
    %718 = vector.broadcast %c8_i32_242 : i32 to vector<64x48xi32>
    %719 = arith.cmpi sge, %716, %718 : vector<64x48xi32>
    %720 = arith.extui %719 : vector<64x48xi1> to vector<64x48xi32>
    %721 = arith.addi %717, %720 : vector<64x48xi32>
    %c16_i32_243 = arith.constant 16 : i32
    %722 = vector.broadcast %c16_i32_243 : i32 to vector<64x48xi32>
    %723 = arith.cmpi sge, %716, %722 : vector<64x48xi32>
    %724 = arith.extui %723 : vector<64x48xi1> to vector<64x48xi32>
    %725 = arith.addi %721, %724 : vector<64x48xi32>
    %c24_i32_244 = arith.constant 24 : i32
    %726 = vector.broadcast %c24_i32_244 : i32 to vector<64x48xi32>
    %727 = arith.cmpi sge, %716, %726 : vector<64x48xi32>
    %728 = arith.extui %727 : vector<64x48xi1> to vector<64x48xi32>
    %729 = arith.addi %725, %728 : vector<64x48xi32>
    %c32_i32_245 = arith.constant 32 : i32
    %730 = vector.broadcast %c32_i32_245 : i32 to vector<64x48xi32>
    %731 = arith.cmpi sge, %716, %730 : vector<64x48xi32>
    %732 = arith.extui %731 : vector<64x48xi1> to vector<64x48xi32>
    %733 = arith.addi %729, %732 : vector<64x48xi32>
    %c40_i32_246 = arith.constant 40 : i32
    %734 = vector.broadcast %c40_i32_246 : i32 to vector<64x48xi32>
    %735 = arith.cmpi sge, %716, %734 : vector<64x48xi32>
    %736 = arith.extui %735 : vector<64x48xi1> to vector<64x48xi32>
    %737 = arith.addi %733, %736 : vector<64x48xi32>
    %c48_i32_247 = arith.constant 48 : i32
    %738 = vector.broadcast %c48_i32_247 : i32 to vector<64x48xi32>
    %739 = arith.cmpi sge, %716, %738 : vector<64x48xi32>
    %740 = arith.extui %739 : vector<64x48xi1> to vector<64x48xi32>
    %741 = arith.addi %737, %740 : vector<64x48xi32>
    %c56_i32_248 = arith.constant 56 : i32
    %742 = vector.broadcast %c56_i32_248 : i32 to vector<64x48xi32>
    %743 = arith.cmpi sge, %716, %742 : vector<64x48xi32>
    %744 = arith.extui %743 : vector<64x48xi1> to vector<64x48xi32>
    %745 = arith.addi %741, %744 : vector<64x48xi32>
    %746 = tpu.iota {dimensions = array<i32: 1>} : vector<64x48xi32>
    %c0_i32_249 = arith.constant 0 : i32
    %747 = vector.broadcast %c0_i32_249 : i32 to vector<64x48xi32>
    %c6_i32 = arith.constant 6 : i32
    %748 = vector.broadcast %c6_i32 : i32 to vector<64x48xi32>
    %749 = arith.cmpi sge, %746, %748 : vector<64x48xi32>
    %750 = arith.extui %749 : vector<64x48xi1> to vector<64x48xi32>
    %751 = arith.addi %747, %750 : vector<64x48xi32>
    %c12_i32 = arith.constant 12 : i32
    %752 = vector.broadcast %c12_i32 : i32 to vector<64x48xi32>
    %753 = arith.cmpi sge, %746, %752 : vector<64x48xi32>
    %754 = arith.extui %753 : vector<64x48xi1> to vector<64x48xi32>
    %755 = arith.addi %751, %754 : vector<64x48xi32>
    %c18_i32 = arith.constant 18 : i32
    %756 = vector.broadcast %c18_i32 : i32 to vector<64x48xi32>
    %757 = arith.cmpi sge, %746, %756 : vector<64x48xi32>
    %758 = arith.extui %757 : vector<64x48xi1> to vector<64x48xi32>
    %759 = arith.addi %755, %758 : vector<64x48xi32>
    %c24_i32_250 = arith.constant 24 : i32
    %760 = vector.broadcast %c24_i32_250 : i32 to vector<64x48xi32>
    %761 = arith.cmpi sge, %746, %760 : vector<64x48xi32>
    %762 = arith.extui %761 : vector<64x48xi1> to vector<64x48xi32>
    %763 = arith.addi %759, %762 : vector<64x48xi32>
    %c30_i32 = arith.constant 30 : i32
    %764 = vector.broadcast %c30_i32 : i32 to vector<64x48xi32>
    %765 = arith.cmpi sge, %746, %764 : vector<64x48xi32>
    %766 = arith.extui %765 : vector<64x48xi1> to vector<64x48xi32>
    %767 = arith.addi %763, %766 : vector<64x48xi32>
    %c36_i32 = arith.constant 36 : i32
    %768 = vector.broadcast %c36_i32 : i32 to vector<64x48xi32>
    %769 = arith.cmpi sge, %746, %768 : vector<64x48xi32>
    %770 = arith.extui %769 : vector<64x48xi1> to vector<64x48xi32>
    %771 = arith.addi %767, %770 : vector<64x48xi32>
    %c42_i32 = arith.constant 42 : i32
    %772 = vector.broadcast %c42_i32 : i32 to vector<64x48xi32>
    %773 = arith.cmpi sge, %746, %772 : vector<64x48xi32>
    %774 = arith.extui %773 : vector<64x48xi1> to vector<64x48xi32>
    %775 = arith.addi %771, %774 : vector<64x48xi32>
    %776 = arith.cmpi eq, %745, %775 : vector<64x48xi32>
    %cst_251 = arith.constant 0.000000e+00 : f32
    %cst_252 = arith.constant -1.000000e+09 : f32
    %777 = vector.broadcast %cst_251 : f32 to vector<64x48xf32>
    %778 = vector.broadcast %cst_252 : f32 to vector<64x48xf32>
    %779 = arith.select %776, %777, %778 : vector<64x48xi1>, vector<64x48xf32>
    %c0_253 = arith.constant 0 : index
    %c0_254 = arith.constant 0 : index
    %c0_255 = arith.constant 0 : index
    %780 = vector.load %arg31[%c0_253, %c0_254, %c0_255] : memref<2x1x32xf32, #tpu.memory_space<vmem>>, vector<1x1x32xf32>
    %781 = vector.shape_cast %780 : vector<1x1x32xf32> to vector<1x32xf32>
    %c0_256 = arith.constant 0 : index
    %c0_257 = arith.constant 0 : index
    %c0_258 = arith.constant 0 : index
    %782 = vector.load %arg30[%c0_256, %c0_257, %c0_258] : memref<2x1x32xf32, #tpu.memory_space<vmem>>, vector<1x1x32xf32>
    %783 = vector.shape_cast %782 : vector<1x1x32xf32> to vector<1x32xf32>
    %cst_259 = arith.constant dense<0.000000e+00> : vector<16xf32>
    %784 = vector.multi_reduction <add>, %645, %cst_259 [1] : vector<16x32xf32> to vector<16xf32>
    %785 = vector.shape_cast %784 : vector<16xf32> to vector<16x1xf32>
    %cst_260 = arith.constant 3.200000e+01 : f32
    %786 = vector.broadcast %cst_260 : f32 to vector<16x1xf32>
    %787 = arith.divf %785, %786 : vector<16x1xf32>
    %788 = vector.broadcast %787 : vector<16x1xf32> to vector<16x32xf32>
    %789 = arith.subf %645, %788 : vector<16x32xf32>
    %790 = arith.mulf %789, %789 : vector<16x32xf32>
    %cst_261 = arith.constant dense<0.000000e+00> : vector<16xf32>
    %791 = vector.multi_reduction <add>, %790, %cst_261 [1] : vector<16x32xf32> to vector<16xf32>
    %792 = vector.shape_cast %791 : vector<16xf32> to vector<16x1xf32>
    %cst_262 = arith.constant 3.200000e+01 : f32
    %793 = vector.broadcast %cst_262 : f32 to vector<16x1xf32>
    %794 = arith.divf %792, %793 : vector<16x1xf32>
    %cst_263 = arith.constant 9.99999974E-6 : f32
    %795 = vector.broadcast %cst_263 : f32 to vector<16x1xf32>
    %796 = arith.addf %794, %795 : vector<16x1xf32>
    %797 = math.rsqrt %796 : vector<16x1xf32>
    %798 = vector.broadcast %797 : vector<16x1xf32> to vector<16x32xf32>
    %799 = arith.mulf %789, %798 : vector<16x32xf32>
    %800 = vector.broadcast %781 : vector<1x32xf32> to vector<16x32xf32>
    %801 = arith.mulf %799, %800 : vector<16x32xf32>
    %802 = vector.broadcast %783 : vector<1x32xf32> to vector<16x32xf32>
    %803 = arith.addf %801, %802 : vector<16x32xf32>
    %c0_264 = arith.constant 0 : index
    %c0_265 = arith.constant 0 : index
    %c0_266 = arith.constant 0 : index
    %804 = vector.load %arg45[%c0_264, %c0_265, %c0_266] : memref<2x32x96xf32, #tpu.memory_space<vmem>>, vector<1x32x96xf32>
    %805 = vector.shape_cast %804 : vector<1x32x96xf32> to vector<32x96xf32>
    %cst_267 = arith.constant dense<0.000000e+00> : vector<16x96xf32>
    %806 = tpu.matmul %803, %805, %cst_267 {dimension_numbers = #tpu.dot_dimension_numbers<[1], [0], [0], [1], [0, 0, 1, 1], [], []>} : vector<16x32xf32>, vector<32x96xf32>, vector<16x96xf32> -> vector<16x96xf32>
    %c0_268 = arith.constant 0 : index
    %c0_269 = arith.constant 0 : index
    %c0_270 = arith.constant 0 : index
    %807 = vector.load %arg44[%c0_268, %c0_269, %c0_270] : memref<2x1x96xf32, #tpu.memory_space<vmem>>, vector<1x1x96xf32>
    %808 = vector.shape_cast %807 : vector<1x1x96xf32> to vector<1x96xf32>
    %809 = vector.broadcast %808 : vector<1x96xf32> to vector<16x96xf32>
    %810 = arith.addf %806, %809 : vector<16x96xf32>
    %811 = vector.extract_strided_slice %810 {offsets = [0, 0], sizes = [16, 32], strides = [1, 1]} : vector<16x96xf32> to vector<16x32xf32>
    %812 = vector.extract_strided_slice %810 {offsets = [0, 32], sizes = [16, 32], strides = [1, 1]} : vector<16x96xf32> to vector<16x32xf32>
    %813 = vector.extract_strided_slice %810 {offsets = [0, 64], sizes = [16, 32], strides = [1, 1]} : vector<16x96xf32> to vector<16x32xf32>
    %814 = vector.extract_strided_slice %811 {offsets = [0, 0], sizes = [16, 8], strides = [1, 1]} : vector<16x32xf32> to vector<16x8xf32>
    %815 = vector.extract_strided_slice %811 {offsets = [0, 8], sizes = [16, 8], strides = [1, 1]} : vector<16x32xf32> to vector<16x8xf32>
    %816 = vector.extract_strided_slice %811 {offsets = [0, 16], sizes = [16, 8], strides = [1, 1]} : vector<16x32xf32> to vector<16x8xf32>
    %817 = vector.extract_strided_slice %811 {offsets = [0, 24], sizes = [16, 8], strides = [1, 1]} : vector<16x32xf32> to vector<16x8xf32>
    %818 = tpu.concatenate %814, %815, %816, %817 in 0 : vector<16x8xf32>, vector<16x8xf32>, vector<16x8xf32>, vector<16x8xf32> -> vector<64x8xf32>
    %819 = vector.extract_strided_slice %812 {offsets = [0, 0], sizes = [16, 8], strides = [1, 1]} : vector<16x32xf32> to vector<16x8xf32>
    %820 = vector.extract_strided_slice %812 {offsets = [0, 8], sizes = [16, 8], strides = [1, 1]} : vector<16x32xf32> to vector<16x8xf32>
    %821 = vector.extract_strided_slice %812 {offsets = [0, 16], sizes = [16, 8], strides = [1, 1]} : vector<16x32xf32> to vector<16x8xf32>
    %822 = vector.extract_strided_slice %812 {offsets = [0, 24], sizes = [16, 8], strides = [1, 1]} : vector<16x32xf32> to vector<16x8xf32>
    %823 = tpu.concatenate %819, %820, %821, %822 in 0 : vector<16x8xf32>, vector<16x8xf32>, vector<16x8xf32>, vector<16x8xf32> -> vector<64x8xf32>
    %824 = vector.extract_strided_slice %813 {offsets = [0, 0], sizes = [16, 8], strides = [1, 1]} : vector<16x32xf32> to vector<16x8xf32>
    %825 = vector.extract_strided_slice %813 {offsets = [0, 8], sizes = [16, 8], strides = [1, 1]} : vector<16x32xf32> to vector<16x8xf32>
    %826 = vector.extract_strided_slice %813 {offsets = [0, 16], sizes = [16, 8], strides = [1, 1]} : vector<16x32xf32> to vector<16x8xf32>
    %827 = vector.extract_strided_slice %813 {offsets = [0, 24], sizes = [16, 8], strides = [1, 1]} : vector<16x32xf32> to vector<16x8xf32>
    %828 = tpu.concatenate %824, %825, %826, %827 in 0 : vector<16x8xf32>, vector<16x8xf32>, vector<16x8xf32>, vector<16x8xf32> -> vector<64x8xf32>
    %cst_271 = arith.constant dense<0.000000e+00> : vector<64x64xf32>
    %829 = tpu.matmul %818, %823, %cst_271 {dimension_numbers = #tpu.dot_dimension_numbers<[1], [1], [0], [0], [0, 0, 1, 0], [], []>} : vector<64x8xf32>, vector<64x8xf32>, vector<64x64xf32> -> vector<64x64xf32>
    %cst_272 = arith.constant 0.353553385 : f32
    %830 = vector.broadcast %cst_272 : f32 to vector<64x64xf32>
    %831 = arith.mulf %829, %830 : vector<64x64xf32>
    %832 = arith.addf %831, %715 : vector<64x64xf32>
    %cst_273 = arith.constant dense<0xFF800000> : vector<64xf32>
    %833 = vector.multi_reduction <maximumf>, %832, %cst_273 [1] : vector<64x64xf32> to vector<64xf32>
    %834 = vector.shape_cast %833 : vector<64xf32> to vector<64x1xf32>
    %835 = vector.broadcast %834 : vector<64x1xf32> to vector<64x64xf32>
    %836 = arith.subf %832, %835 : vector<64x64xf32>
    %837 = math.exp %836 : vector<64x64xf32>
    %cst_274 = arith.constant dense<0.000000e+00> : vector<64xf32>
    %838 = vector.multi_reduction <add>, %837, %cst_274 [1] : vector<64x64xf32> to vector<64xf32>
    %839 = vector.shape_cast %838 : vector<64xf32> to vector<64x1xf32>
    %840 = vector.broadcast %839 : vector<64x1xf32> to vector<64x64xf32>
    %841 = arith.divf %837, %840 : vector<64x64xf32>
    %cst_275 = arith.constant dense<0.000000e+00> : vector<64x8xf32>
    %842 = tpu.matmul %841, %828, %cst_275 {dimension_numbers = #tpu.dot_dimension_numbers<[1], [0], [0], [1], [0, 0, 1, 1], [], []>} : vector<64x64xf32>, vector<64x8xf32>, vector<64x8xf32> -> vector<64x8xf32>
    %843 = vector.extract_strided_slice %842 {offsets = [0, 0], sizes = [16, 8], strides = [1, 1]} : vector<64x8xf32> to vector<16x8xf32>
    %844 = vector.extract_strided_slice %842 {offsets = [16, 0], sizes = [16, 8], strides = [1, 1]} : vector<64x8xf32> to vector<16x8xf32>
    %845 = vector.extract_strided_slice %842 {offsets = [32, 0], sizes = [16, 8], strides = [1, 1]} : vector<64x8xf32> to vector<16x8xf32>
    %846 = vector.extract_strided_slice %842 {offsets = [48, 0], sizes = [16, 8], strides = [1, 1]} : vector<64x8xf32> to vector<16x8xf32>
    %847 = tpu.concatenate %843, %844, %845, %846 in 1 : vector<16x8xf32>, vector<16x8xf32>, vector<16x8xf32>, vector<16x8xf32> -> vector<16x32xf32>
    %c0_276 = arith.constant 0 : index
    %c0_277 = arith.constant 0 : index
    %c0_278 = arith.constant 0 : index
    %848 = vector.load %arg51[%c0_276, %c0_277, %c0_278] : memref<2x32x32xf32, #tpu.memory_space<vmem>>, vector<1x32x32xf32>
    %849 = vector.shape_cast %848 : vector<1x32x32xf32> to vector<32x32xf32>
    %cst_279 = arith.constant dense<0.000000e+00> : vector<16x32xf32>
    %850 = tpu.matmul %847, %849, %cst_279 {dimension_numbers = #tpu.dot_dimension_numbers<[1], [0], [0], [1], [0, 0, 1, 1], [], []>} : vector<16x32xf32>, vector<32x32xf32>, vector<16x32xf32> -> vector<16x32xf32>
    %851 = arith.addf %645, %850 : vector<16x32xf32>
    %c0_280 = arith.constant 0 : index
    %c0_281 = arith.constant 0 : index
    %c0_282 = arith.constant 0 : index
    %852 = vector.load %arg50[%c0_280, %c0_281, %c0_282] : memref<2x1x32xf32, #tpu.memory_space<vmem>>, vector<1x1x32xf32>
    %853 = vector.shape_cast %852 : vector<1x1x32xf32> to vector<1x32xf32>
    %854 = vector.broadcast %853 : vector<1x32xf32> to vector<16x32xf32>
    %855 = arith.addf %851, %854 : vector<16x32xf32>
    %c0_283 = arith.constant 0 : index
    %c0_284 = arith.constant 0 : index
    %c0_285 = arith.constant 0 : index
    %856 = vector.load %arg33[%c0_283, %c0_284, %c0_285] : memref<2x1x32xf32, #tpu.memory_space<vmem>>, vector<1x1x32xf32>
    %857 = vector.shape_cast %856 : vector<1x1x32xf32> to vector<1x32xf32>
    %c0_286 = arith.constant 0 : index
    %c0_287 = arith.constant 0 : index
    %c0_288 = arith.constant 0 : index
    %858 = vector.load %arg32[%c0_286, %c0_287, %c0_288] : memref<2x1x32xf32, #tpu.memory_space<vmem>>, vector<1x1x32xf32>
    %859 = vector.shape_cast %858 : vector<1x1x32xf32> to vector<1x32xf32>
    %cst_289 = arith.constant dense<0.000000e+00> : vector<16xf32>
    %860 = vector.multi_reduction <add>, %855, %cst_289 [1] : vector<16x32xf32> to vector<16xf32>
    %861 = vector.shape_cast %860 : vector<16xf32> to vector<16x1xf32>
    %cst_290 = arith.constant 3.200000e+01 : f32
    %862 = vector.broadcast %cst_290 : f32 to vector<16x1xf32>
    %863 = arith.divf %861, %862 : vector<16x1xf32>
    %864 = vector.broadcast %863 : vector<16x1xf32> to vector<16x32xf32>
    %865 = arith.subf %855, %864 : vector<16x32xf32>
    %866 = arith.mulf %865, %865 : vector<16x32xf32>
    %cst_291 = arith.constant dense<0.000000e+00> : vector<16xf32>
    %867 = vector.multi_reduction <add>, %866, %cst_291 [1] : vector<16x32xf32> to vector<16xf32>
    %868 = vector.shape_cast %867 : vector<16xf32> to vector<16x1xf32>
    %cst_292 = arith.constant 3.200000e+01 : f32
    %869 = vector.broadcast %cst_292 : f32 to vector<16x1xf32>
    %870 = arith.divf %868, %869 : vector<16x1xf32>
    %cst_293 = arith.constant 9.99999974E-6 : f32
    %871 = vector.broadcast %cst_293 : f32 to vector<16x1xf32>
    %872 = arith.addf %870, %871 : vector<16x1xf32>
    %873 = math.rsqrt %872 : vector<16x1xf32>
    %874 = vector.broadcast %873 : vector<16x1xf32> to vector<16x32xf32>
    %875 = arith.mulf %865, %874 : vector<16x32xf32>
    %876 = vector.broadcast %857 : vector<1x32xf32> to vector<16x32xf32>
    %877 = arith.mulf %875, %876 : vector<16x32xf32>
    %878 = vector.broadcast %859 : vector<1x32xf32> to vector<16x32xf32>
    %879 = arith.addf %877, %878 : vector<16x32xf32>
    %c0_294 = arith.constant 0 : index
    %c0_295 = arith.constant 0 : index
    %c0_296 = arith.constant 0 : index
    %880 = vector.load %arg11[%c0_294, %c0_295, %c0_296] : memref<2x32x32xf32, #tpu.memory_space<vmem>>, vector<1x32x32xf32>
    %881 = vector.shape_cast %880 : vector<1x32x32xf32> to vector<32x32xf32>
    %cst_297 = arith.constant dense<0.000000e+00> : vector<16x32xf32>
    %882 = tpu.matmul %879, %881, %cst_297 {dimension_numbers = #tpu.dot_dimension_numbers<[1], [0], [0], [1], [0, 0, 1, 1], [], []>} : vector<16x32xf32>, vector<32x32xf32>, vector<16x32xf32> -> vector<16x32xf32>
    %c0_298 = arith.constant 0 : index
    %c0_299 = arith.constant 0 : index
    %c0_300 = arith.constant 0 : index
    %883 = vector.load %arg10[%c0_298, %c0_299, %c0_300] : memref<2x1x32xf32, #tpu.memory_space<vmem>>, vector<1x1x32xf32>
    %884 = vector.shape_cast %883 : vector<1x1x32xf32> to vector<1x32xf32>
    %885 = vector.broadcast %884 : vector<1x32xf32> to vector<16x32xf32>
    %886 = arith.addf %882, %885 : vector<16x32xf32>
    %c0_301 = arith.constant 0 : index
    %c0_302 = arith.constant 0 : index
    %c0_303 = arith.constant 0 : index
    %887 = vector.load %arg6[%c0_301, %c0_302, %c0_303] : memref<2x32x64xf32, #tpu.memory_space<vmem>>, vector<1x32x64xf32>
    %888 = vector.shape_cast %887 : vector<1x32x64xf32> to vector<32x64xf32>
    %cst_304 = arith.constant dense<0.000000e+00> : vector<12x64xf32>
    %889 = tpu.matmul %57, %888, %cst_304 {dimension_numbers = #tpu.dot_dimension_numbers<[1], [0], [0], [1], [0, 0, 1, 1], [], []>} : vector<12x32xf32>, vector<32x64xf32>, vector<12x64xf32> -> vector<12x64xf32>
    %c0_305 = arith.constant 0 : index
    %c0_306 = arith.constant 0 : index
    %c0_307 = arith.constant 0 : index
    %890 = vector.load %arg5[%c0_305, %c0_306, %c0_307] : memref<2x1x64xf32, #tpu.memory_space<vmem>>, vector<1x1x64xf32>
    %891 = vector.shape_cast %890 : vector<1x1x64xf32> to vector<1x64xf32>
    %892 = vector.broadcast %891 : vector<1x64xf32> to vector<12x64xf32>
    %893 = arith.addf %889, %892 : vector<12x64xf32>
    %894 = vector.extract_strided_slice %893 {offsets = [0, 0], sizes = [12, 32], strides = [1, 1]} : vector<12x64xf32> to vector<12x32xf32>
    %895 = vector.extract_strided_slice %893 {offsets = [0, 32], sizes = [12, 32], strides = [1, 1]} : vector<12x64xf32> to vector<12x32xf32>
    %896 = vector.extract_strided_slice %886 {offsets = [0, 0], sizes = [16, 8], strides = [1, 1]} : vector<16x32xf32> to vector<16x8xf32>
    %897 = vector.extract_strided_slice %886 {offsets = [0, 8], sizes = [16, 8], strides = [1, 1]} : vector<16x32xf32> to vector<16x8xf32>
    %898 = vector.extract_strided_slice %886 {offsets = [0, 16], sizes = [16, 8], strides = [1, 1]} : vector<16x32xf32> to vector<16x8xf32>
    %899 = vector.extract_strided_slice %886 {offsets = [0, 24], sizes = [16, 8], strides = [1, 1]} : vector<16x32xf32> to vector<16x8xf32>
    %900 = tpu.concatenate %896, %897, %898, %899 in 0 : vector<16x8xf32>, vector<16x8xf32>, vector<16x8xf32>, vector<16x8xf32> -> vector<64x8xf32>
    %901 = vector.extract_strided_slice %894 {offsets = [0, 0], sizes = [12, 8], strides = [1, 1]} : vector<12x32xf32> to vector<12x8xf32>
    %902 = vector.extract_strided_slice %894 {offsets = [0, 8], sizes = [12, 8], strides = [1, 1]} : vector<12x32xf32> to vector<12x8xf32>
    %903 = vector.extract_strided_slice %894 {offsets = [0, 16], sizes = [12, 8], strides = [1, 1]} : vector<12x32xf32> to vector<12x8xf32>
    %904 = vector.extract_strided_slice %894 {offsets = [0, 24], sizes = [12, 8], strides = [1, 1]} : vector<12x32xf32> to vector<12x8xf32>
    %905 = tpu.concatenate %901, %902, %903, %904 in 0 : vector<12x8xf32>, vector<12x8xf32>, vector<12x8xf32>, vector<12x8xf32> -> vector<48x8xf32>
    %906 = vector.extract_strided_slice %895 {offsets = [0, 0], sizes = [12, 8], strides = [1, 1]} : vector<12x32xf32> to vector<12x8xf32>
    %907 = vector.extract_strided_slice %895 {offsets = [0, 8], sizes = [12, 8], strides = [1, 1]} : vector<12x32xf32> to vector<12x8xf32>
    %908 = vector.extract_strided_slice %895 {offsets = [0, 16], sizes = [12, 8], strides = [1, 1]} : vector<12x32xf32> to vector<12x8xf32>
    %909 = vector.extract_strided_slice %895 {offsets = [0, 24], sizes = [12, 8], strides = [1, 1]} : vector<12x32xf32> to vector<12x8xf32>
    %910 = tpu.concatenate %906, %907, %908, %909 in 0 : vector<12x8xf32>, vector<12x8xf32>, vector<12x8xf32>, vector<12x8xf32> -> vector<48x8xf32>
    %cst_308 = arith.constant dense<0.000000e+00> : vector<64x48xf32>
    %911 = tpu.matmul %900, %905, %cst_308 {dimension_numbers = #tpu.dot_dimension_numbers<[1], [1], [0], [0], [0, 0, 1, 0], [], []>} : vector<64x8xf32>, vector<48x8xf32>, vector<64x48xf32> -> vector<64x48xf32>
    %cst_309 = arith.constant 0.353553385 : f32
    %912 = vector.broadcast %cst_309 : f32 to vector<64x48xf32>
    %913 = arith.mulf %911, %912 : vector<64x48xf32>
    %914 = arith.addf %913, %779 : vector<64x48xf32>
    %cst_310 = arith.constant dense<0xFF800000> : vector<64xf32>
    %915 = vector.multi_reduction <maximumf>, %914, %cst_310 [1] : vector<64x48xf32> to vector<64xf32>
    %916 = vector.shape_cast %915 : vector<64xf32> to vector<64x1xf32>
    %917 = vector.broadcast %916 : vector<64x1xf32> to vector<64x48xf32>
    %918 = arith.subf %914, %917 : vector<64x48xf32>
    %919 = math.exp %918 : vector<64x48xf32>
    %cst_311 = arith.constant dense<0.000000e+00> : vector<64xf32>
    %920 = vector.multi_reduction <add>, %919, %cst_311 [1] : vector<64x48xf32> to vector<64xf32>
    %921 = vector.shape_cast %920 : vector<64xf32> to vector<64x1xf32>
    %922 = vector.broadcast %921 : vector<64x1xf32> to vector<64x48xf32>
    %923 = arith.divf %919, %922 : vector<64x48xf32>
    %cst_312 = arith.constant dense<0.000000e+00> : vector<64x8xf32>
    %924 = tpu.matmul %923, %910, %cst_312 {dimension_numbers = #tpu.dot_dimension_numbers<[1], [0], [0], [1], [0, 0, 1, 1], [], []>} : vector<64x48xf32>, vector<48x8xf32>, vector<64x8xf32> -> vector<64x8xf32>
    %925 = vector.extract_strided_slice %924 {offsets = [0, 0], sizes = [16, 8], strides = [1, 1]} : vector<64x8xf32> to vector<16x8xf32>
    %926 = vector.extract_strided_slice %924 {offsets = [16, 0], sizes = [16, 8], strides = [1, 1]} : vector<64x8xf32> to vector<16x8xf32>
    %927 = vector.extract_strided_slice %924 {offsets = [32, 0], sizes = [16, 8], strides = [1, 1]} : vector<64x8xf32> to vector<16x8xf32>
    %928 = vector.extract_strided_slice %924 {offsets = [48, 0], sizes = [16, 8], strides = [1, 1]} : vector<64x8xf32> to vector<16x8xf32>
    %929 = tpu.concatenate %925, %926, %927, %928 in 1 : vector<16x8xf32>, vector<16x8xf32>, vector<16x8xf32>, vector<16x8xf32> -> vector<16x32xf32>
    %c0_313 = arith.constant 0 : index
    %c0_314 = arith.constant 0 : index
    %c0_315 = arith.constant 0 : index
    %930 = vector.load %arg8[%c0_313, %c0_314, %c0_315] : memref<2x32x32xf32, #tpu.memory_space<vmem>>, vector<1x32x32xf32>
    %931 = vector.shape_cast %930 : vector<1x32x32xf32> to vector<32x32xf32>
    %cst_316 = arith.constant dense<0.000000e+00> : vector<16x32xf32>
    %932 = tpu.matmul %929, %931, %cst_316 {dimension_numbers = #tpu.dot_dimension_numbers<[1], [0], [0], [1], [0, 0, 1, 1], [], []>} : vector<16x32xf32>, vector<32x32xf32>, vector<16x32xf32> -> vector<16x32xf32>
    %933 = arith.addf %855, %932 : vector<16x32xf32>
    %c0_317 = arith.constant 0 : index
    %c0_318 = arith.constant 0 : index
    %c0_319 = arith.constant 0 : index
    %934 = vector.load %arg7[%c0_317, %c0_318, %c0_319] : memref<2x1x32xf32, #tpu.memory_space<vmem>>, vector<1x1x32xf32>
    %935 = vector.shape_cast %934 : vector<1x1x32xf32> to vector<1x32xf32>
    %936 = vector.broadcast %935 : vector<1x32xf32> to vector<16x32xf32>
    %937 = arith.addf %933, %936 : vector<16x32xf32>
    %c0_320 = arith.constant 0 : index
    %c0_321 = arith.constant 0 : index
    %c0_322 = arith.constant 0 : index
    %938 = vector.load %arg35[%c0_320, %c0_321, %c0_322] : memref<2x1x32xf32, #tpu.memory_space<vmem>>, vector<1x1x32xf32>
    %939 = vector.shape_cast %938 : vector<1x1x32xf32> to vector<1x32xf32>
    %c0_323 = arith.constant 0 : index
    %c0_324 = arith.constant 0 : index
    %c0_325 = arith.constant 0 : index
    %940 = vector.load %arg34[%c0_323, %c0_324, %c0_325] : memref<2x1x32xf32, #tpu.memory_space<vmem>>, vector<1x1x32xf32>
    %941 = vector.shape_cast %940 : vector<1x1x32xf32> to vector<1x32xf32>
    %cst_326 = arith.constant dense<0.000000e+00> : vector<16xf32>
    %942 = vector.multi_reduction <add>, %937, %cst_326 [1] : vector<16x32xf32> to vector<16xf32>
    %943 = vector.shape_cast %942 : vector<16xf32> to vector<16x1xf32>
    %cst_327 = arith.constant 3.200000e+01 : f32
    %944 = vector.broadcast %cst_327 : f32 to vector<16x1xf32>
    %945 = arith.divf %943, %944 : vector<16x1xf32>
    %946 = vector.broadcast %945 : vector<16x1xf32> to vector<16x32xf32>
    %947 = arith.subf %937, %946 : vector<16x32xf32>
    %948 = arith.mulf %947, %947 : vector<16x32xf32>
    %cst_328 = arith.constant dense<0.000000e+00> : vector<16xf32>
    %949 = vector.multi_reduction <add>, %948, %cst_328 [1] : vector<16x32xf32> to vector<16xf32>
    %950 = vector.shape_cast %949 : vector<16xf32> to vector<16x1xf32>
    %cst_329 = arith.constant 3.200000e+01 : f32
    %951 = vector.broadcast %cst_329 : f32 to vector<16x1xf32>
    %952 = arith.divf %950, %951 : vector<16x1xf32>
    %cst_330 = arith.constant 9.99999974E-6 : f32
    %953 = vector.broadcast %cst_330 : f32 to vector<16x1xf32>
    %954 = arith.addf %952, %953 : vector<16x1xf32>
    %955 = math.rsqrt %954 : vector<16x1xf32>
    %956 = vector.broadcast %955 : vector<16x1xf32> to vector<16x32xf32>
    %957 = arith.mulf %947, %956 : vector<16x32xf32>
    %958 = vector.broadcast %939 : vector<1x32xf32> to vector<16x32xf32>
    %959 = arith.mulf %957, %958 : vector<16x32xf32>
    %960 = vector.broadcast %941 : vector<1x32xf32> to vector<16x32xf32>
    %961 = arith.addf %959, %960 : vector<16x32xf32>
    %c0_331 = arith.constant 0 : index
    %c0_332 = arith.constant 0 : index
    %c0_333 = arith.constant 0 : index
    %962 = vector.load %arg15[%c0_331, %c0_332, %c0_333] : memref<2x32x128xf32, #tpu.memory_space<vmem>>, vector<1x32x128xf32>
    %963 = vector.shape_cast %962 : vector<1x32x128xf32> to vector<32x128xf32>
    %cst_334 = arith.constant dense<0.000000e+00> : vector<16x128xf32>
    %964 = tpu.matmul %961, %963, %cst_334 {dimension_numbers = #tpu.dot_dimension_numbers<[1], [0], [0], [1], [0, 0, 1, 1], [], []>} : vector<16x32xf32>, vector<32x128xf32>, vector<16x128xf32> -> vector<16x128xf32>
    %c0_335 = arith.constant 0 : index
    %c0_336 = arith.constant 0 : index
    %c0_337 = arith.constant 0 : index
    %965 = vector.load %arg14[%c0_335, %c0_336, %c0_337] : memref<2x1x128xf32, #tpu.memory_space<vmem>>, vector<1x1x128xf32>
    %966 = vector.shape_cast %965 : vector<1x1x128xf32> to vector<1x128xf32>
    %967 = vector.broadcast %966 : vector<1x128xf32> to vector<16x128xf32>
    %968 = arith.addf %964, %967 : vector<16x128xf32>
    %969 = arith.mulf %968, %968 : vector<16x128xf32>
    %970 = arith.mulf %968, %969 : vector<16x128xf32>
    %cst_338 = arith.constant 4.471500e-02 : f32
    %971 = vector.broadcast %cst_338 : f32 to vector<16x128xf32>
    %972 = arith.mulf %971, %970 : vector<16x128xf32>
    %973 = arith.addf %968, %972 : vector<16x128xf32>
    %cst_339 = arith.constant 0.797884583 : f32
    %974 = vector.broadcast %cst_339 : f32 to vector<16x128xf32>
    %975 = arith.mulf %974, %973 : vector<16x128xf32>
    %976 = math.tanh %975 : vector<16x128xf32>
    %cst_340 = arith.constant 1.000000e+00 : f32
    %977 = vector.broadcast %cst_340 : f32 to vector<16x128xf32>
    %978 = arith.addf %977, %976 : vector<16x128xf32>
    %cst_341 = arith.constant 5.000000e-01 : f32
    %979 = vector.broadcast %cst_341 : f32 to vector<16x128xf32>
    %980 = arith.mulf %979, %978 : vector<16x128xf32>
    %981 = arith.mulf %968, %980 : vector<16x128xf32>
    %c0_342 = arith.constant 0 : index
    %c0_343 = arith.constant 0 : index
    %c0_344 = arith.constant 0 : index
    %982 = vector.load %arg17[%c0_342, %c0_343, %c0_344] : memref<2x128x32xf32, #tpu.memory_space<vmem>>, vector<1x128x32xf32>
    %983 = vector.shape_cast %982 : vector<1x128x32xf32> to vector<128x32xf32>
    %cst_345 = arith.constant dense<0.000000e+00> : vector<16x32xf32>
    %984 = tpu.matmul %981, %983, %cst_345 {dimension_numbers = #tpu.dot_dimension_numbers<[1], [0], [0], [1], [0, 0, 1, 1], [], []>} : vector<16x128xf32>, vector<128x32xf32>, vector<16x32xf32> -> vector<16x32xf32>
    %985 = arith.addf %937, %984 : vector<16x32xf32>
    %c0_346 = arith.constant 0 : index
    %c0_347 = arith.constant 0 : index
    %c0_348 = arith.constant 0 : index
    %986 = vector.load %arg16[%c0_346, %c0_347, %c0_348] : memref<2x1x32xf32, #tpu.memory_space<vmem>>, vector<1x1x32xf32>
    %987 = vector.shape_cast %986 : vector<1x1x32xf32> to vector<1x32xf32>
    %988 = vector.broadcast %987 : vector<1x32xf32> to vector<16x32xf32>
    %989 = arith.addf %985, %988 : vector<16x32xf32>
    %c1_349 = arith.constant 1 : index
    %c0_350 = arith.constant 0 : index
    %c0_351 = arith.constant 0 : index
    %990 = vector.load %arg31[%c1_349, %c0_350, %c0_351] : memref<2x1x32xf32, #tpu.memory_space<vmem>>, vector<1x1x32xf32>
    %991 = vector.shape_cast %990 : vector<1x1x32xf32> to vector<1x32xf32>
    %c1_352 = arith.constant 1 : index
    %c0_353 = arith.constant 0 : index
    %c0_354 = arith.constant 0 : index
    %992 = vector.load %arg30[%c1_352, %c0_353, %c0_354] : memref<2x1x32xf32, #tpu.memory_space<vmem>>, vector<1x1x32xf32>
    %993 = vector.shape_cast %992 : vector<1x1x32xf32> to vector<1x32xf32>
    %cst_355 = arith.constant dense<0.000000e+00> : vector<16xf32>
    %994 = vector.multi_reduction <add>, %989, %cst_355 [1] : vector<16x32xf32> to vector<16xf32>
    %995 = vector.shape_cast %994 : vector<16xf32> to vector<16x1xf32>
    %cst_356 = arith.constant 3.200000e+01 : f32
    %996 = vector.broadcast %cst_356 : f32 to vector<16x1xf32>
    %997 = arith.divf %995, %996 : vector<16x1xf32>
    %998 = vector.broadcast %997 : vector<16x1xf32> to vector<16x32xf32>
    %999 = arith.subf %989, %998 : vector<16x32xf32>
    %1000 = arith.mulf %999, %999 : vector<16x32xf32>
    %cst_357 = arith.constant dense<0.000000e+00> : vector<16xf32>
    %1001 = vector.multi_reduction <add>, %1000, %cst_357 [1] : vector<16x32xf32> to vector<16xf32>
    %1002 = vector.shape_cast %1001 : vector<16xf32> to vector<16x1xf32>
    %cst_358 = arith.constant 3.200000e+01 : f32
    %1003 = vector.broadcast %cst_358 : f32 to vector<16x1xf32>
    %1004 = arith.divf %1002, %1003 : vector<16x1xf32>
    %cst_359 = arith.constant 9.99999974E-6 : f32
    %1005 = vector.broadcast %cst_359 : f32 to vector<16x1xf32>
    %1006 = arith.addf %1004, %1005 : vector<16x1xf32>
    %1007 = math.rsqrt %1006 : vector<16x1xf32>
    %1008 = vector.broadcast %1007 : vector<16x1xf32> to vector<16x32xf32>
    %1009 = arith.mulf %999, %1008 : vector<16x32xf32>
    %1010 = vector.broadcast %991 : vector<1x32xf32> to vector<16x32xf32>
    %1011 = arith.mulf %1009, %1010 : vector<16x32xf32>
    %1012 = vector.broadcast %993 : vector<1x32xf32> to vector<16x32xf32>
    %1013 = arith.addf %1011, %1012 : vector<16x32xf32>
    %c1_360 = arith.constant 1 : index
    %c0_361 = arith.constant 0 : index
    %c0_362 = arith.constant 0 : index
    %1014 = vector.load %arg45[%c1_360, %c0_361, %c0_362] : memref<2x32x96xf32, #tpu.memory_space<vmem>>, vector<1x32x96xf32>
    %1015 = vector.shape_cast %1014 : vector<1x32x96xf32> to vector<32x96xf32>
    %cst_363 = arith.constant dense<0.000000e+00> : vector<16x96xf32>
    %1016 = tpu.matmul %1013, %1015, %cst_363 {dimension_numbers = #tpu.dot_dimension_numbers<[1], [0], [0], [1], [0, 0, 1, 1], [], []>} : vector<16x32xf32>, vector<32x96xf32>, vector<16x96xf32> -> vector<16x96xf32>
    %c1_364 = arith.constant 1 : index
    %c0_365 = arith.constant 0 : index
    %c0_366 = arith.constant 0 : index
    %1017 = vector.load %arg44[%c1_364, %c0_365, %c0_366] : memref<2x1x96xf32, #tpu.memory_space<vmem>>, vector<1x1x96xf32>
    %1018 = vector.shape_cast %1017 : vector<1x1x96xf32> to vector<1x96xf32>
    %1019 = vector.broadcast %1018 : vector<1x96xf32> to vector<16x96xf32>
    %1020 = arith.addf %1016, %1019 : vector<16x96xf32>
    %1021 = vector.extract_strided_slice %1020 {offsets = [0, 0], sizes = [16, 32], strides = [1, 1]} : vector<16x96xf32> to vector<16x32xf32>
    %1022 = vector.extract_strided_slice %1020 {offsets = [0, 32], sizes = [16, 32], strides = [1, 1]} : vector<16x96xf32> to vector<16x32xf32>
    %1023 = vector.extract_strided_slice %1020 {offsets = [0, 64], sizes = [16, 32], strides = [1, 1]} : vector<16x96xf32> to vector<16x32xf32>
    %1024 = vector.extract_strided_slice %1021 {offsets = [0, 0], sizes = [16, 8], strides = [1, 1]} : vector<16x32xf32> to vector<16x8xf32>
    %1025 = vector.extract_strided_slice %1021 {offsets = [0, 8], sizes = [16, 8], strides = [1, 1]} : vector<16x32xf32> to vector<16x8xf32>
    %1026 = vector.extract_strided_slice %1021 {offsets = [0, 16], sizes = [16, 8], strides = [1, 1]} : vector<16x32xf32> to vector<16x8xf32>
    %1027 = vector.extract_strided_slice %1021 {offsets = [0, 24], sizes = [16, 8], strides = [1, 1]} : vector<16x32xf32> to vector<16x8xf32>
    %1028 = tpu.concatenate %1024, %1025, %1026, %1027 in 0 : vector<16x8xf32>, vector<16x8xf32>, vector<16x8xf32>, vector<16x8xf32> -> vector<64x8xf32>
    %1029 = vector.extract_strided_slice %1022 {offsets = [0, 0], sizes = [16, 8], strides = [1, 1]} : vector<16x32xf32> to vector<16x8xf32>
    %1030 = vector.extract_strided_slice %1022 {offsets = [0, 8], sizes = [16, 8], strides = [1, 1]} : vector<16x32xf32> to vector<16x8xf32>
    %1031 = vector.extract_strided_slice %1022 {offsets = [0, 16], sizes = [16, 8], strides = [1, 1]} : vector<16x32xf32> to vector<16x8xf32>
    %1032 = vector.extract_strided_slice %1022 {offsets = [0, 24], sizes = [16, 8], strides = [1, 1]} : vector<16x32xf32> to vector<16x8xf32>
    %1033 = tpu.concatenate %1029, %1030, %1031, %1032 in 0 : vector<16x8xf32>, vector<16x8xf32>, vector<16x8xf32>, vector<16x8xf32> -> vector<64x8xf32>
    %1034 = vector.extract_strided_slice %1023 {offsets = [0, 0], sizes = [16, 8], strides = [1, 1]} : vector<16x32xf32> to vector<16x8xf32>
    %1035 = vector.extract_strided_slice %1023 {offsets = [0, 8], sizes = [16, 8], strides = [1, 1]} : vector<16x32xf32> to vector<16x8xf32>
    %1036 = vector.extract_strided_slice %1023 {offsets = [0, 16], sizes = [16, 8], strides = [1, 1]} : vector<16x32xf32> to vector<16x8xf32>
    %1037 = vector.extract_strided_slice %1023 {offsets = [0, 24], sizes = [16, 8], strides = [1, 1]} : vector<16x32xf32> to vector<16x8xf32>
    %1038 = tpu.concatenate %1034, %1035, %1036, %1037 in 0 : vector<16x8xf32>, vector<16x8xf32>, vector<16x8xf32>, vector<16x8xf32> -> vector<64x8xf32>
    %cst_367 = arith.constant dense<0.000000e+00> : vector<64x64xf32>
    %1039 = tpu.matmul %1028, %1033, %cst_367 {dimension_numbers = #tpu.dot_dimension_numbers<[1], [1], [0], [0], [0, 0, 1, 0], [], []>} : vector<64x8xf32>, vector<64x8xf32>, vector<64x64xf32> -> vector<64x64xf32>
    %cst_368 = arith.constant 0.353553385 : f32
    %1040 = vector.broadcast %cst_368 : f32 to vector<64x64xf32>
    %1041 = arith.mulf %1039, %1040 : vector<64x64xf32>
    %1042 = arith.addf %1041, %715 : vector<64x64xf32>
    %cst_369 = arith.constant dense<0xFF800000> : vector<64xf32>
    %1043 = vector.multi_reduction <maximumf>, %1042, %cst_369 [1] : vector<64x64xf32> to vector<64xf32>
    %1044 = vector.shape_cast %1043 : vector<64xf32> to vector<64x1xf32>
    %1045 = vector.broadcast %1044 : vector<64x1xf32> to vector<64x64xf32>
    %1046 = arith.subf %1042, %1045 : vector<64x64xf32>
    %1047 = math.exp %1046 : vector<64x64xf32>
    %cst_370 = arith.constant dense<0.000000e+00> : vector<64xf32>
    %1048 = vector.multi_reduction <add>, %1047, %cst_370 [1] : vector<64x64xf32> to vector<64xf32>
    %1049 = vector.shape_cast %1048 : vector<64xf32> to vector<64x1xf32>
    %1050 = vector.broadcast %1049 : vector<64x1xf32> to vector<64x64xf32>
    %1051 = arith.divf %1047, %1050 : vector<64x64xf32>
    %cst_371 = arith.constant dense<0.000000e+00> : vector<64x8xf32>
    %1052 = tpu.matmul %1051, %1038, %cst_371 {dimension_numbers = #tpu.dot_dimension_numbers<[1], [0], [0], [1], [0, 0, 1, 1], [], []>} : vector<64x64xf32>, vector<64x8xf32>, vector<64x8xf32> -> vector<64x8xf32>
    %1053 = vector.extract_strided_slice %1052 {offsets = [0, 0], sizes = [16, 8], strides = [1, 1]} : vector<64x8xf32> to vector<16x8xf32>
    %1054 = vector.extract_strided_slice %1052 {offsets = [16, 0], sizes = [16, 8], strides = [1, 1]} : vector<64x8xf32> to vector<16x8xf32>
    %1055 = vector.extract_strided_slice %1052 {offsets = [32, 0], sizes = [16, 8], strides = [1, 1]} : vector<64x8xf32> to vector<16x8xf32>
    %1056 = vector.extract_strided_slice %1052 {offsets = [48, 0], sizes = [16, 8], strides = [1, 1]} : vector<64x8xf32> to vector<16x8xf32>
    %1057 = tpu.concatenate %1053, %1054, %1055, %1056 in 1 : vector<16x8xf32>, vector<16x8xf32>, vector<16x8xf32>, vector<16x8xf32> -> vector<16x32xf32>
    %c1_372 = arith.constant 1 : index
    %c0_373 = arith.constant 0 : index
    %c0_374 = arith.constant 0 : index
    %1058 = vector.load %arg51[%c1_372, %c0_373, %c0_374] : memref<2x32x32xf32, #tpu.memory_space<vmem>>, vector<1x32x32xf32>
    %1059 = vector.shape_cast %1058 : vector<1x32x32xf32> to vector<32x32xf32>
    %cst_375 = arith.constant dense<0.000000e+00> : vector<16x32xf32>
    %1060 = tpu.matmul %1057, %1059, %cst_375 {dimension_numbers = #tpu.dot_dimension_numbers<[1], [0], [0], [1], [0, 0, 1, 1], [], []>} : vector<16x32xf32>, vector<32x32xf32>, vector<16x32xf32> -> vector<16x32xf32>
    %1061 = arith.addf %989, %1060 : vector<16x32xf32>
    %c1_376 = arith.constant 1 : index
    %c0_377 = arith.constant 0 : index
    %c0_378 = arith.constant 0 : index
    %1062 = vector.load %arg50[%c1_376, %c0_377, %c0_378] : memref<2x1x32xf32, #tpu.memory_space<vmem>>, vector<1x1x32xf32>
    %1063 = vector.shape_cast %1062 : vector<1x1x32xf32> to vector<1x32xf32>
    %1064 = vector.broadcast %1063 : vector<1x32xf32> to vector<16x32xf32>
    %1065 = arith.addf %1061, %1064 : vector<16x32xf32>
    %c1_379 = arith.constant 1 : index
    %c0_380 = arith.constant 0 : index
    %c0_381 = arith.constant 0 : index
    %1066 = vector.load %arg33[%c1_379, %c0_380, %c0_381] : memref<2x1x32xf32, #tpu.memory_space<vmem>>, vector<1x1x32xf32>
    %1067 = vector.shape_cast %1066 : vector<1x1x32xf32> to vector<1x32xf32>
    %c1_382 = arith.constant 1 : index
    %c0_383 = arith.constant 0 : index
    %c0_384 = arith.constant 0 : index
    %1068 = vector.load %arg32[%c1_382, %c0_383, %c0_384] : memref<2x1x32xf32, #tpu.memory_space<vmem>>, vector<1x1x32xf32>
    %1069 = vector.shape_cast %1068 : vector<1x1x32xf32> to vector<1x32xf32>
    %cst_385 = arith.constant dense<0.000000e+00> : vector<16xf32>
    %1070 = vector.multi_reduction <add>, %1065, %cst_385 [1] : vector<16x32xf32> to vector<16xf32>
    %1071 = vector.shape_cast %1070 : vector<16xf32> to vector<16x1xf32>
    %cst_386 = arith.constant 3.200000e+01 : f32
    %1072 = vector.broadcast %cst_386 : f32 to vector<16x1xf32>
    %1073 = arith.divf %1071, %1072 : vector<16x1xf32>
    %1074 = vector.broadcast %1073 : vector<16x1xf32> to vector<16x32xf32>
    %1075 = arith.subf %1065, %1074 : vector<16x32xf32>
    %1076 = arith.mulf %1075, %1075 : vector<16x32xf32>
    %cst_387 = arith.constant dense<0.000000e+00> : vector<16xf32>
    %1077 = vector.multi_reduction <add>, %1076, %cst_387 [1] : vector<16x32xf32> to vector<16xf32>
    %1078 = vector.shape_cast %1077 : vector<16xf32> to vector<16x1xf32>
    %cst_388 = arith.constant 3.200000e+01 : f32
    %1079 = vector.broadcast %cst_388 : f32 to vector<16x1xf32>
    %1080 = arith.divf %1078, %1079 : vector<16x1xf32>
    %cst_389 = arith.constant 9.99999974E-6 : f32
    %1081 = vector.broadcast %cst_389 : f32 to vector<16x1xf32>
    %1082 = arith.addf %1080, %1081 : vector<16x1xf32>
    %1083 = math.rsqrt %1082 : vector<16x1xf32>
    %1084 = vector.broadcast %1083 : vector<16x1xf32> to vector<16x32xf32>
    %1085 = arith.mulf %1075, %1084 : vector<16x32xf32>
    %1086 = vector.broadcast %1067 : vector<1x32xf32> to vector<16x32xf32>
    %1087 = arith.mulf %1085, %1086 : vector<16x32xf32>
    %1088 = vector.broadcast %1069 : vector<1x32xf32> to vector<16x32xf32>
    %1089 = arith.addf %1087, %1088 : vector<16x32xf32>
    %c1_390 = arith.constant 1 : index
    %c0_391 = arith.constant 0 : index
    %c0_392 = arith.constant 0 : index
    %1090 = vector.load %arg11[%c1_390, %c0_391, %c0_392] : memref<2x32x32xf32, #tpu.memory_space<vmem>>, vector<1x32x32xf32>
    %1091 = vector.shape_cast %1090 : vector<1x32x32xf32> to vector<32x32xf32>
    %cst_393 = arith.constant dense<0.000000e+00> : vector<16x32xf32>
    %1092 = tpu.matmul %1089, %1091, %cst_393 {dimension_numbers = #tpu.dot_dimension_numbers<[1], [0], [0], [1], [0, 0, 1, 1], [], []>} : vector<16x32xf32>, vector<32x32xf32>, vector<16x32xf32> -> vector<16x32xf32>
    %c1_394 = arith.constant 1 : index
    %c0_395 = arith.constant 0 : index
    %c0_396 = arith.constant 0 : index
    %1093 = vector.load %arg10[%c1_394, %c0_395, %c0_396] : memref<2x1x32xf32, #tpu.memory_space<vmem>>, vector<1x1x32xf32>
    %1094 = vector.shape_cast %1093 : vector<1x1x32xf32> to vector<1x32xf32>
    %1095 = vector.broadcast %1094 : vector<1x32xf32> to vector<16x32xf32>
    %1096 = arith.addf %1092, %1095 : vector<16x32xf32>
    %c1_397 = arith.constant 1 : index
    %c0_398 = arith.constant 0 : index
    %c0_399 = arith.constant 0 : index
    %1097 = vector.load %arg6[%c1_397, %c0_398, %c0_399] : memref<2x32x64xf32, #tpu.memory_space<vmem>>, vector<1x32x64xf32>
    %1098 = vector.shape_cast %1097 : vector<1x32x64xf32> to vector<32x64xf32>
    %cst_400 = arith.constant dense<0.000000e+00> : vector<12x64xf32>
    %1099 = tpu.matmul %57, %1098, %cst_400 {dimension_numbers = #tpu.dot_dimension_numbers<[1], [0], [0], [1], [0, 0, 1, 1], [], []>} : vector<12x32xf32>, vector<32x64xf32>, vector<12x64xf32> -> vector<12x64xf32>
    %c1_401 = arith.constant 1 : index
    %c0_402 = arith.constant 0 : index
    %c0_403 = arith.constant 0 : index
    %1100 = vector.load %arg5[%c1_401, %c0_402, %c0_403] : memref<2x1x64xf32, #tpu.memory_space<vmem>>, vector<1x1x64xf32>
    %1101 = vector.shape_cast %1100 : vector<1x1x64xf32> to vector<1x64xf32>
    %1102 = vector.broadcast %1101 : vector<1x64xf32> to vector<12x64xf32>
    %1103 = arith.addf %1099, %1102 : vector<12x64xf32>
    %1104 = vector.extract_strided_slice %1103 {offsets = [0, 0], sizes = [12, 32], strides = [1, 1]} : vector<12x64xf32> to vector<12x32xf32>
    %1105 = vector.extract_strided_slice %1103 {offsets = [0, 32], sizes = [12, 32], strides = [1, 1]} : vector<12x64xf32> to vector<12x32xf32>
    %1106 = vector.extract_strided_slice %1096 {offsets = [0, 0], sizes = [16, 8], strides = [1, 1]} : vector<16x32xf32> to vector<16x8xf32>
    %1107 = vector.extract_strided_slice %1096 {offsets = [0, 8], sizes = [16, 8], strides = [1, 1]} : vector<16x32xf32> to vector<16x8xf32>
    %1108 = vector.extract_strided_slice %1096 {offsets = [0, 16], sizes = [16, 8], strides = [1, 1]} : vector<16x32xf32> to vector<16x8xf32>
    %1109 = vector.extract_strided_slice %1096 {offsets = [0, 24], sizes = [16, 8], strides = [1, 1]} : vector<16x32xf32> to vector<16x8xf32>
    %1110 = tpu.concatenate %1106, %1107, %1108, %1109 in 0 : vector<16x8xf32>, vector<16x8xf32>, vector<16x8xf32>, vector<16x8xf32> -> vector<64x8xf32>
    %1111 = vector.extract_strided_slice %1104 {offsets = [0, 0], sizes = [12, 8], strides = [1, 1]} : vector<12x32xf32> to vector<12x8xf32>
    %1112 = vector.extract_strided_slice %1104 {offsets = [0, 8], sizes = [12, 8], strides = [1, 1]} : vector<12x32xf32> to vector<12x8xf32>
    %1113 = vector.extract_strided_slice %1104 {offsets = [0, 16], sizes = [12, 8], strides = [1, 1]} : vector<12x32xf32> to vector<12x8xf32>
    %1114 = vector.extract_strided_slice %1104 {offsets = [0, 24], sizes = [12, 8], strides = [1, 1]} : vector<12x32xf32> to vector<12x8xf32>
    %1115 = tpu.concatenate %1111, %1112, %1113, %1114 in 0 : vector<12x8xf32>, vector<12x8xf32>, vector<12x8xf32>, vector<12x8xf32> -> vector<48x8xf32>
    %1116 = vector.extract_strided_slice %1105 {offsets = [0, 0], sizes = [12, 8], strides = [1, 1]} : vector<12x32xf32> to vector<12x8xf32>
    %1117 = vector.extract_strided_slice %1105 {offsets = [0, 8], sizes = [12, 8], strides = [1, 1]} : vector<12x32xf32> to vector<12x8xf32>
    %1118 = vector.extract_strided_slice %1105 {offsets = [0, 16], sizes = [12, 8], strides = [1, 1]} : vector<12x32xf32> to vector<12x8xf32>
    %1119 = vector.extract_strided_slice %1105 {offsets = [0, 24], sizes = [12, 8], strides = [1, 1]} : vector<12x32xf32> to vector<12x8xf32>
    %1120 = tpu.concatenate %1116, %1117, %1118, %1119 in 0 : vector<12x8xf32>, vector<12x8xf32>, vector<12x8xf32>, vector<12x8xf32> -> vector<48x8xf32>
    %cst_404 = arith.constant dense<0.000000e+00> : vector<64x48xf32>
    %1121 = tpu.matmul %1110, %1115, %cst_404 {dimension_numbers = #tpu.dot_dimension_numbers<[1], [1], [0], [0], [0, 0, 1, 0], [], []>} : vector<64x8xf32>, vector<48x8xf32>, vector<64x48xf32> -> vector<64x48xf32>
    %cst_405 = arith.constant 0.353553385 : f32
    %1122 = vector.broadcast %cst_405 : f32 to vector<64x48xf32>
    %1123 = arith.mulf %1121, %1122 : vector<64x48xf32>
    %1124 = arith.addf %1123, %779 : vector<64x48xf32>
    %cst_406 = arith.constant dense<0xFF800000> : vector<64xf32>
    %1125 = vector.multi_reduction <maximumf>, %1124, %cst_406 [1] : vector<64x48xf32> to vector<64xf32>
    %1126 = vector.shape_cast %1125 : vector<64xf32> to vector<64x1xf32>
    %1127 = vector.broadcast %1126 : vector<64x1xf32> to vector<64x48xf32>
    %1128 = arith.subf %1124, %1127 : vector<64x48xf32>
    %1129 = math.exp %1128 : vector<64x48xf32>
    %cst_407 = arith.constant dense<0.000000e+00> : vector<64xf32>
    %1130 = vector.multi_reduction <add>, %1129, %cst_407 [1] : vector<64x48xf32> to vector<64xf32>
    %1131 = vector.shape_cast %1130 : vector<64xf32> to vector<64x1xf32>
    %1132 = vector.broadcast %1131 : vector<64x1xf32> to vector<64x48xf32>
    %1133 = arith.divf %1129, %1132 : vector<64x48xf32>
    %cst_408 = arith.constant dense<0.000000e+00> : vector<64x8xf32>
    %1134 = tpu.matmul %1133, %1120, %cst_408 {dimension_numbers = #tpu.dot_dimension_numbers<[1], [0], [0], [1], [0, 0, 1, 1], [], []>} : vector<64x48xf32>, vector<48x8xf32>, vector<64x8xf32> -> vector<64x8xf32>
    %1135 = vector.extract_strided_slice %1134 {offsets = [0, 0], sizes = [16, 8], strides = [1, 1]} : vector<64x8xf32> to vector<16x8xf32>
    %1136 = vector.extract_strided_slice %1134 {offsets = [16, 0], sizes = [16, 8], strides = [1, 1]} : vector<64x8xf32> to vector<16x8xf32>
    %1137 = vector.extract_strided_slice %1134 {offsets = [32, 0], sizes = [16, 8], strides = [1, 1]} : vector<64x8xf32> to vector<16x8xf32>
    %1138 = vector.extract_strided_slice %1134 {offsets = [48, 0], sizes = [16, 8], strides = [1, 1]} : vector<64x8xf32> to vector<16x8xf32>
    %1139 = tpu.concatenate %1135, %1136, %1137, %1138 in 1 : vector<16x8xf32>, vector<16x8xf32>, vector<16x8xf32>, vector<16x8xf32> -> vector<16x32xf32>
    %c1_409 = arith.constant 1 : index
    %c0_410 = arith.constant 0 : index
    %c0_411 = arith.constant 0 : index
    %1140 = vector.load %arg8[%c1_409, %c0_410, %c0_411] : memref<2x32x32xf32, #tpu.memory_space<vmem>>, vector<1x32x32xf32>
    %1141 = vector.shape_cast %1140 : vector<1x32x32xf32> to vector<32x32xf32>
    %cst_412 = arith.constant dense<0.000000e+00> : vector<16x32xf32>
    %1142 = tpu.matmul %1139, %1141, %cst_412 {dimension_numbers = #tpu.dot_dimension_numbers<[1], [0], [0], [1], [0, 0, 1, 1], [], []>} : vector<16x32xf32>, vector<32x32xf32>, vector<16x32xf32> -> vector<16x32xf32>
    %1143 = arith.addf %1065, %1142 : vector<16x32xf32>
    %c1_413 = arith.constant 1 : index
    %c0_414 = arith.constant 0 : index
    %c0_415 = arith.constant 0 : index
    %1144 = vector.load %arg7[%c1_413, %c0_414, %c0_415] : memref<2x1x32xf32, #tpu.memory_space<vmem>>, vector<1x1x32xf32>
    %1145 = vector.shape_cast %1144 : vector<1x1x32xf32> to vector<1x32xf32>
    %1146 = vector.broadcast %1145 : vector<1x32xf32> to vector<16x32xf32>
    %1147 = arith.addf %1143, %1146 : vector<16x32xf32>
    %c1_416 = arith.constant 1 : index
    %c0_417 = arith.constant 0 : index
    %c0_418 = arith.constant 0 : index
    %1148 = vector.load %arg35[%c1_416, %c0_417, %c0_418] : memref<2x1x32xf32, #tpu.memory_space<vmem>>, vector<1x1x32xf32>
    %1149 = vector.shape_cast %1148 : vector<1x1x32xf32> to vector<1x32xf32>
    %c1_419 = arith.constant 1 : index
    %c0_420 = arith.constant 0 : index
    %c0_421 = arith.constant 0 : index
    %1150 = vector.load %arg34[%c1_419, %c0_420, %c0_421] : memref<2x1x32xf32, #tpu.memory_space<vmem>>, vector<1x1x32xf32>
    %1151 = vector.shape_cast %1150 : vector<1x1x32xf32> to vector<1x32xf32>
    %cst_422 = arith.constant dense<0.000000e+00> : vector<16xf32>
    %1152 = vector.multi_reduction <add>, %1147, %cst_422 [1] : vector<16x32xf32> to vector<16xf32>
    %1153 = vector.shape_cast %1152 : vector<16xf32> to vector<16x1xf32>
    %cst_423 = arith.constant 3.200000e+01 : f32
    %1154 = vector.broadcast %cst_423 : f32 to vector<16x1xf32>
    %1155 = arith.divf %1153, %1154 : vector<16x1xf32>
    %1156 = vector.broadcast %1155 : vector<16x1xf32> to vector<16x32xf32>
    %1157 = arith.subf %1147, %1156 : vector<16x32xf32>
    %1158 = arith.mulf %1157, %1157 : vector<16x32xf32>
    %cst_424 = arith.constant dense<0.000000e+00> : vector<16xf32>
    %1159 = vector.multi_reduction <add>, %1158, %cst_424 [1] : vector<16x32xf32> to vector<16xf32>
    %1160 = vector.shape_cast %1159 : vector<16xf32> to vector<16x1xf32>
    %cst_425 = arith.constant 3.200000e+01 : f32
    %1161 = vector.broadcast %cst_425 : f32 to vector<16x1xf32>
    %1162 = arith.divf %1160, %1161 : vector<16x1xf32>
    %cst_426 = arith.constant 9.99999974E-6 : f32
    %1163 = vector.broadcast %cst_426 : f32 to vector<16x1xf32>
    %1164 = arith.addf %1162, %1163 : vector<16x1xf32>
    %1165 = math.rsqrt %1164 : vector<16x1xf32>
    %1166 = vector.broadcast %1165 : vector<16x1xf32> to vector<16x32xf32>
    %1167 = arith.mulf %1157, %1166 : vector<16x32xf32>
    %1168 = vector.broadcast %1149 : vector<1x32xf32> to vector<16x32xf32>
    %1169 = arith.mulf %1167, %1168 : vector<16x32xf32>
    %1170 = vector.broadcast %1151 : vector<1x32xf32> to vector<16x32xf32>
    %1171 = arith.addf %1169, %1170 : vector<16x32xf32>
    %c1_427 = arith.constant 1 : index
    %c0_428 = arith.constant 0 : index
    %c0_429 = arith.constant 0 : index
    %1172 = vector.load %arg15[%c1_427, %c0_428, %c0_429] : memref<2x32x128xf32, #tpu.memory_space<vmem>>, vector<1x32x128xf32>
    %1173 = vector.shape_cast %1172 : vector<1x32x128xf32> to vector<32x128xf32>
    %cst_430 = arith.constant dense<0.000000e+00> : vector<16x128xf32>
    %1174 = tpu.matmul %1171, %1173, %cst_430 {dimension_numbers = #tpu.dot_dimension_numbers<[1], [0], [0], [1], [0, 0, 1, 1], [], []>} : vector<16x32xf32>, vector<32x128xf32>, vector<16x128xf32> -> vector<16x128xf32>
    %c1_431 = arith.constant 1 : index
    %c0_432 = arith.constant 0 : index
    %c0_433 = arith.constant 0 : index
    %1175 = vector.load %arg14[%c1_431, %c0_432, %c0_433] : memref<2x1x128xf32, #tpu.memory_space<vmem>>, vector<1x1x128xf32>
    %1176 = vector.shape_cast %1175 : vector<1x1x128xf32> to vector<1x128xf32>
    %1177 = vector.broadcast %1176 : vector<1x128xf32> to vector<16x128xf32>
    %1178 = arith.addf %1174, %1177 : vector<16x128xf32>
    %1179 = arith.mulf %1178, %1178 : vector<16x128xf32>
    %1180 = arith.mulf %1178, %1179 : vector<16x128xf32>
    %cst_434 = arith.constant 4.471500e-02 : f32
    %1181 = vector.broadcast %cst_434 : f32 to vector<16x128xf32>
    %1182 = arith.mulf %1181, %1180 : vector<16x128xf32>
    %1183 = arith.addf %1178, %1182 : vector<16x128xf32>
    %cst_435 = arith.constant 0.797884583 : f32
    %1184 = vector.broadcast %cst_435 : f32 to vector<16x128xf32>
    %1185 = arith.mulf %1184, %1183 : vector<16x128xf32>
    %1186 = math.tanh %1185 : vector<16x128xf32>
    %cst_436 = arith.constant 1.000000e+00 : f32
    %1187 = vector.broadcast %cst_436 : f32 to vector<16x128xf32>
    %1188 = arith.addf %1187, %1186 : vector<16x128xf32>
    %cst_437 = arith.constant 5.000000e-01 : f32
    %1189 = vector.broadcast %cst_437 : f32 to vector<16x128xf32>
    %1190 = arith.mulf %1189, %1188 : vector<16x128xf32>
    %1191 = arith.mulf %1178, %1190 : vector<16x128xf32>
    %c1_438 = arith.constant 1 : index
    %c0_439 = arith.constant 0 : index
    %c0_440 = arith.constant 0 : index
    %1192 = vector.load %arg17[%c1_438, %c0_439, %c0_440] : memref<2x128x32xf32, #tpu.memory_space<vmem>>, vector<1x128x32xf32>
    %1193 = vector.shape_cast %1192 : vector<1x128x32xf32> to vector<128x32xf32>
    %cst_441 = arith.constant dense<0.000000e+00> : vector<16x32xf32>
    %1194 = tpu.matmul %1191, %1193, %cst_441 {dimension_numbers = #tpu.dot_dimension_numbers<[1], [0], [0], [1], [0, 0, 1, 1], [], []>} : vector<16x128xf32>, vector<128x32xf32>, vector<16x32xf32> -> vector<16x32xf32>
    %1195 = arith.addf %1147, %1194 : vector<16x32xf32>
    %c1_442 = arith.constant 1 : index
    %c0_443 = arith.constant 0 : index
    %c0_444 = arith.constant 0 : index
    %1196 = vector.load %arg16[%c1_442, %c0_443, %c0_444] : memref<2x1x32xf32, #tpu.memory_space<vmem>>, vector<1x1x32xf32>
    %1197 = vector.shape_cast %1196 : vector<1x1x32xf32> to vector<1x32xf32>
    %1198 = vector.broadcast %1197 : vector<1x32xf32> to vector<16x32xf32>
    %1199 = arith.addf %1195, %1198 : vector<16x32xf32>
    %c0_445 = arith.constant 0 : index
    %c0_446 = arith.constant 0 : index
    %1200 = vector.load %arg25[%c0_445, %c0_446] : memref<32x96xf32, #tpu.memory_space<vmem>>, vector<32x96xf32>
    %cst_447 = arith.constant dense<0.000000e+00> : vector<16x96xf32>
    %1201 = tpu.matmul %1199, %1200, %cst_447 {dimension_numbers = #tpu.dot_dimension_numbers<[1], [0], [0], [1], [0, 0, 1, 1], [], []>} : vector<16x32xf32>, vector<32x96xf32>, vector<16x96xf32> -> vector<16x96xf32>
    %c0_448 = arith.constant 0 : index
    %c0_449 = arith.constant 0 : index
    %1202 = vector.load %arg24[%c0_448, %c0_449] : memref<1x96xf32, #tpu.memory_space<vmem>>, vector<1x96xf32>
    %1203 = vector.broadcast %1202 : vector<1x96xf32> to vector<16x96xf32>
    %1204 = arith.addf %1201, %1203 : vector<16x96xf32>
    %1205 = arith.mulf %1204, %1204 : vector<16x96xf32>
    %1206 = arith.mulf %1204, %1205 : vector<16x96xf32>
    %cst_450 = arith.constant 4.471500e-02 : f32
    %1207 = vector.broadcast %cst_450 : f32 to vector<16x96xf32>
    %1208 = arith.mulf %1207, %1206 : vector<16x96xf32>
    %1209 = arith.addf %1204, %1208 : vector<16x96xf32>
    %cst_451 = arith.constant 0.797884583 : f32
    %1210 = vector.broadcast %cst_451 : f32 to vector<16x96xf32>
    %1211 = arith.mulf %1210, %1209 : vector<16x96xf32>
    %1212 = math.tanh %1211 : vector<16x96xf32>
    %cst_452 = arith.constant 1.000000e+00 : f32
    %1213 = vector.broadcast %cst_452 : f32 to vector<16x96xf32>
    %1214 = arith.addf %1213, %1212 : vector<16x96xf32>
    %cst_453 = arith.constant 5.000000e-01 : f32
    %1215 = vector.broadcast %cst_453 : f32 to vector<16x96xf32>
    %1216 = arith.mulf %1215, %1214 : vector<16x96xf32>
    %1217 = arith.mulf %1204, %1216 : vector<16x96xf32>
    %c0_454 = arith.constant 0 : index
    %c0_455 = arith.constant 0 : index
    %1218 = vector.load %arg27[%c0_454, %c0_455] : memref<96x128xf32, #tpu.memory_space<vmem>>, vector<96x128xf32>
    %cst_456 = arith.constant dense<0.000000e+00> : vector<16x128xf32>
    %1219 = tpu.matmul %1217, %1218, %cst_456 {dimension_numbers = #tpu.dot_dimension_numbers<[1], [0], [0], [1], [0, 0, 1, 1], [], []>} : vector<16x96xf32>, vector<96x128xf32>, vector<16x128xf32> -> vector<16x128xf32>
    %c0_457 = arith.constant 0 : index
    %c0_458 = arith.constant 0 : index
    %1220 = vector.load %arg26[%c0_457, %c0_458] : memref<1x128xf32, #tpu.memory_space<vmem>>, vector<1x128xf32>
    %1221 = vector.broadcast %1220 : vector<1x128xf32> to vector<16x128xf32>
    %1222 = arith.addf %1219, %1221 : vector<16x128xf32>
    %c0_459 = arith.constant 0 : index
    %c0_460 = arith.constant 0 : index
    %1223 = vector.load %arg57[%c0_459, %c0_460] : memref<16x128xf32, #tpu.memory_space<vmem>>, vector<16x128xf32>
    tpu.vector_store %arg57[%c0_459, %c0_460], %1222 {strides = array<i32>} : memref<16x128xf32, #tpu.memory_space<vmem>>, vector<16x128xf32>,
    return
  }
}

</mosaic_0001>

<bundles_post_ra>
// kernel: core.1
= control target key start
LH: loop header
LB: loop body
LE: loop exit
PB: predicated region body
PF: predicated region fallthrough
CT: control target
= control target key end

     0   :  { %s7554_s6 = smov 1   ;;  %s7555_s10 = smov 2   ;;  %s10012_s0 = inlined_call_operand.smem [shape: u32[59], index: -1, kind: input, shape index: {}] }
   0x1   :  { %s7673_s5 = sld [smem:[%s10012_s0]]   ;;  %s7556_s14 = smov 3  }
   0x2   :  { %s7678_s9 = sld [smem:[%s10012_s0 + %s7554_s6]]   ;;  %s7557_s18 = smov 4  }
   0x3   :  { %s7683_s13 = sld [smem:[%s10012_s0 + %s7555_s10]]   ;;  %s7558_s22 = smov 5  }
   0x4   :  { %s7688_s17 = sld [smem:[%s10012_s0 + %s7556_s14]]   ;;  %s7559_s26 = smov 6  }
   0x5   :  { %s7693_s21 = sld [smem:[%s10012_s0 + %s7557_s18]]   ;;  %s7560_s30 = smov 7  }
   0x6   :  { %s7698_s25 = sld [smem:[%s10012_s0 + %s7558_s22]]   ;;  %s7561_s4 = smov 8  }
   0x7   :  { %10075 = sst [smem:[#allocation64_spill]] %s7673_s5  ;;  %s7562_s10 = smov 9  }
   0x8   :  { %10076 = sst [smem:[#allocation65_spill]] %s7678_s9  ;;  %s7563_s15 = smov 10  }
   0x9   :  { %10077 = sst [smem:[#allocation66_spill]] %s7683_s13  ;;  %s7564_s20 = smov 11  }
   0xa   :  { %10078 = sst [smem:[#allocation67_spill]] %s7688_s17  ;;  %s7566_s1 = smov 13  }
   0xb   :  { %s7703_s29 = sld [smem:[%s10012_s0 + %s7559_s26]]   ;;  %s7565_s26 = smov 12  }
   0xc   :  { %10079 = sst [smem:[#allocation68_spill]] %s7698_s25  ;;  %s7567_s7 = smov 14  }
   0xd   :  { %s7708_s3 = sld [smem:[%s10012_s0 + %s7560_s30]]   ;;  %s7569_s22 = smov 16  }
   0xe   :  { %s7713_s8 = sld [smem:[%s10012_s0 + %s7561_s4]]   ;;  %s7570_s28 = smov 17  }
   0xf   :  { %s7718_s14 = sld [smem:[%s10012_s0 + %s7562_s10]]  }
  0x10   :  { %s7723_s19 = sld [smem:[%s10012_s0 + %s7563_s15]]   ;;  %s7568_s15 = smov 15  }
  0x11   :  { %10080 = sst [smem:[#allocation69_spill]] %s7703_s29 }
  0x12   :  { %s7728_s24 = sld [smem:[%s10012_s0 + %s7564_s20]]  }
  0x13   :  { %10081 = sst [smem:[#allocation70_spill]] %s7708_s3 }
  0x14   :  { %10082 = sst [smem:[#allocation71_spill]] %s7713_s8 }
  0x15   :  { %10083 = sst [smem:[#allocation72_spill]] %s7718_s14 }
  0x16   :  { %10084 = sst [smem:[#allocation73_spill]] %s7723_s19 }
  0x17   :  { %s7733_s30 = sld [smem:[%s10012_s0 + %s7565_s26]]  }
  0x18   :  { %10085 = sst [smem:[#allocation74_spill]] %s7728_s24 }
  0x19   :  { %s7738_s6 = sld [smem:[%s10012_s0 + %s7566_s1]]  }
  0x1a   :  { %s7743_s12 = sld [smem:[%s10012_s0 + %s7567_s7]]   ;;  %s7571_s7 = smov 18  }
  0x1b   :  { %s7748_s20 = sld [smem:[%s10012_s0 + %s7568_s15]]   ;;  %s7572_s15 = smov 19  }
  0x1c   :  { %s7753_s27 = sld [smem:[%s10012_s0 + %s7569_s22]]   ;;  %s7573_s22 = smov 20  }
  0x1d   :  { %s7758_s4 = sld [smem:[%s10012_s0 + %s7570_s28]]   ;;  %s7574_s28 = smov 21  }
  0x1e   :  { %s7763_s3 = sld [smem:[%s10012_s0 + %s7571_s7]]   ;;  %s7575_s7 = smov 22  }
  0x1f   :  { %10086 = sst [smem:[#allocation75_spill]] %s7738_s6 }
  0x20   :  { %s7773_s8 = sld [smem:[%s10012_s0 + %s7573_s22]]   ;;  %s7577_s22 = smov 24  }
  0x21   :  { %10087 = sst [smem:[#allocation76_spill]] %s7748_s20 }
  0x22   :  { %10088 = sst [smem:[#allocation77_spill]] %s7753_s27 }
  0x23   :  { %10089 = sst [smem:[#allocation78_spill]] %s7758_s4 }
  0x24   :  { %s7768_s20 = sld [smem:[%s10012_s0 + %s7572_s15]]   ;;  %s7576_s15 = smov 23  }
  0x25   :  { %s7778_s4 = sld [smem:[%s10012_s0 + %s7574_s28]]   ;;  %s7578_s28 = smov 25  }
  0x26   :  { %s7783_s19 = sld [smem:[%s10012_s0 + %s7575_s7]]   ;;  %s7579_s7 = smov 26  }
  0x27   :  { %s7788_s24 = sld [smem:[%s10012_s0 + %s7576_s15]]   ;;  %s7580_s15 = smov 27  }
  0x28   :  { %s7793_s25 = sld [smem:[%s10012_s0 + %s7577_s22]]   ;;  %s7581_s22 = smov 28  }
  0x29   :  { %s7798_s29 = sld [smem:[%s10012_s0 + %s7578_s28]]   ;;  %s7582_s28 = smov 29  }
  0x2a   :  { %10090 = sst [smem:[#allocation79_spill]] %s7768_s20 }
  0x2b   :  { %10091 = sst [smem:[#allocation80_spill]] %s7778_s4 }
  0x2c   :  { %10092 = sst [smem:[#allocation81_spill]] %s7783_s19 }
  0x2d   :  { %s7803_s17 = sld [smem:[%s10012_s0 + %s7579_s7]]   ;;  %s7583_s7 = smov 30  }
  0x2e   :  { %10093 = sst [smem:[#allocation82_spill]] %s7793_s25 }
  0x2f   :  { %10094 = sst [smem:[#allocation83_spill]] %s7798_s29 }
  0x30   :  { %s7808_s4 = sld [smem:[%s10012_s0 + %s7580_s15]]   ;;  %s7584_s15 = smov 31  }
  0x31   :  { %s7813_s13 = sld [smem:[%s10012_s0 + %s7581_s22]]   ;;  %s7585_s22 = smov 32  }
  0x32   :  { %s7818_s29 = sld [smem:[%s10012_s0 + %s7582_s28]]   ;;  %s7586_s28 = smov 33  }
  0x33   :  { %s7823_s14 = sld [smem:[%s10012_s0 + %s7583_s7]]   ;;  %s7587_s7 = smov 34  }
  0x34   :  { %s7833_s5 = sld [smem:[%s10012_s0 + %s7585_s22]]   ;;  %s7589_s22 = smov 36  }
  0x36   :  { %10095 = sst [smem:[#allocation84_spill]] %s7808_s4 }
  0x37   :  { %10096 = sst [smem:[#allocation85_spill]] %s7813_s13 }
  0x38   :  { %10097 = sst [smem:[#allocation86_spill]] %s7818_s29 }
  0x39   :  { %10098 = sst [smem:[#allocation87_spill]] %s7823_s14 }
  0x3a   :  { %s7828_s4 = sld [smem:[%s10012_s0 + %s7584_s15]]   ;;  %s7588_s15 = smov 35  }
  0x3b   :  { %10099 = sst [smem:[#allocation88_spill]] %s7833_s5 }
  0x3c   :  { %s7838_s29 = sld [smem:[%s10012_s0 + %s7586_s28]]   ;;  %s7590_s28 = smov 37  }
  0x3d   :  { %s7843_s14 = sld [smem:[%s10012_s0 + %s7587_s7]]   ;;  %s7591_s7 = smov 38  }
  0x3e   :  { %s7848_s9 = sld [smem:[%s10012_s0 + %s7588_s15]]   ;;  %s7592_s15 = smov 39  }
  0x3f   :  { %s7853_s5 = sld [smem:[%s10012_s0 + %s7589_s22]]   ;;  %s7593_s22 = smov 40  }
  0x40   :  { %s7858_s13 = sld [smem:[%s10012_s0 + %s7590_s28]]   ;;  %s7594_s28 = smov 41  }
  0x41   :  { %s7868_s25 = sld [smem:[%s10012_s0 + %s7592_s15]]   ;;  %s7596_s15 = smov 43  }
  0x43   :  { %10100 = sst [smem:[#allocation89_spill]] %s7843_s14 }
  0x44   :  { %s7863_s14 = sld [smem:[%s10012_s0 + %s7591_s7]]   ;;  %s7595_s7 = smov 42  }
  0x45   :  { %10101 = sst [smem:[#allocation90_spill]] %s7853_s5 }
  0x46   :  { %10102 = sst [smem:[#allocation91_spill]] %s7858_s13 }
  0x47   :  { %10103 = sst [smem:[#allocation92_spill]] %s7868_s25 }
  0x48   :  { %s7873_s5 = sld [smem:[%s10012_s0 + %s7593_s22]]   ;;  %s7597_s22 = smov 44  }
  0x49   :  { %s7878_s13 = sld [smem:[%s10012_s0 + %s7594_s28]]   ;;  %s7598_s28 = smov 45  }
  0x4a   :  { %s7883_s19 = sld [smem:[%s10012_s0 + %s7595_s7]]   ;;  %s7599_s7 = smov 46  }
  0x4b   :  { %s7888_s25 = sld [smem:[%s10012_s0 + %s7596_s15]]   ;;  %s7600_s15 = smov 47  }
  0x4c   :  { %s7903_s20 = sld [smem:[%s10012_s0 + %s7599_s7]]   ;;  %s7603_s7 = smov 50  }
  0x4e   :  { %10104 = sst [smem:[#allocation93_spill]] %s7873_s5 }
  0x4f   :  { %10105 = sst [smem:[#allocation94_spill]] %s7878_s13 }
  0x50   :  { %s7893_s5 = sld [smem:[%s10012_s0 + %s7597_s22]]   ;;  %s7601_s22 = smov 48  }
  0x51   :  { %10106 = sst [smem:[#allocation95_spill]] %s7888_s25 }
  0x52   :  { %s7898_s13 = sld [smem:[%s10012_s0 + %s7598_s28]]   ;;  %s7602_s28 = smov 49  }
  0x53   :  { %10108 = sst [smem:[#allocation97_spill]] %s7903_s20 }
  0x54   :  { %s7908_s25 = sld [smem:[%s10012_s0 + %s7600_s15]]   ;;  %s7604_s15 = smov 51  }
  0x55   :  { %s7913_s27 = sld [smem:[%s10012_s0 + %s7601_s22]]   ;;  %s7605_s22 = smov 52  }
  0x56   :  { %s7923_s20 = sld [smem:[%s10012_s0 + %s7603_s7]]   ;;  %s7607_s7 = smov 54  }
  0x58   :  { %10107 = sst [smem:[#allocation96_spill]] %s7898_s13 }
  0x59   :  { %s7918_s13 = sld [smem:[%s10012_s0 + %s7602_s28]]   ;;  %s7606_s28 = smov 53  }
  0x5a   :  { %10109 = sst [smem:[#allocation98_spill]] %s7908_s25 }
  0x5b   :  { %10110 = sst [smem:[#allocation99_spill]] %s7913_s27 }
  0x5c   :  { %10112 = sst [smem:[#allocation101_spill]] %s7923_s20 }
  0x5d   :  { %s7928_s25 = sld [smem:[%s10012_s0 + %s7604_s15]]   ;;  %s7608_s15 = smov 55  }
  0x5e   :  { %s7933_s27 = sld [smem:[%s10012_s0 + %s7605_s22]]   ;;  %s7609_s22 = smov 56  }
  0x5f   :  { %10111 = sst [smem:[#allocation100_spill]] %s7918_s13 }
  0x60   :  { %s7938_s13 = sld [smem:[%s10012_s0 + %s7606_s28]]   ;;  %s7610_s28 = smov 57  }
  0x61   :  { %s7943_s20 = sld [smem:[%s10012_s0 + %s7607_s7]]   ;;  %s7611_s7 = smov 58  }
  0x62   :  { %s7948_s6 = sld [smem:[%s10012_s0 + %s7608_s15]]  }
  0x64   :  { %10113 = sst [smem:[#allocation102_spill]] %s7933_s27 }
  0x65   :  { %s7953_s27 = sld [smem:[%s10012_s0 + %s7609_s22]]  }
  0x66   :  { %10114 = sst [smem:[#allocation103_spill]] %s7938_s13 }
  0x67   :  { %10115 = sst [smem:[#allocation104_spill]] %s7943_s20 }
  0x68   :  { %s7958_s13 = sld [smem:[%s10012_s0 + %s7610_s28]]  }
  0x69   :  { %s7963_s20 = sld [smem:[%s10012_s0 + %s7611_s7]]  }
  0x6a   :  { %123 = vsyncpa [#allocation4], 0 }
  0x6b   :  { %124 = vsyncpa [#allocation7], 0 }
  0x6c   :  { %125 = vsyncpa [#allocation10], 0 }
  0x6d   :  { %126 = vsyncpa [#allocation13], 0 }
  0x6e   :  { %127 = vsyncpa [#allocation16], 0 }
  0x6f   :  { %128 = vsyncpa [#allocation19], 0 }
  0x70   :  { %129 = vsyncpa [#allocation22], 0 }
  0x71   :  { %130 = vsyncpa [#allocation25], 0 }
  0x72   :  { %131 = vsyncpa [#allocation28], 0 }
  0x73   :  { %132 = vsyncpa [#allocation31], 0 }
  0x74   :  { %133 = vsyncpa [#allocation34], 0 }
  0x75   :  { %134 = vsyncpa [#allocation37], 0 }
  0x76   :  { %135 = vsyncpa [#allocation40], 0 }
  0x77   :  { %136 = vsyncpa [#allocation43], 0 }
  0x78   :  { %137 = vsyncpa [#allocation5], 0  ;;  %s177_s15 = sshll.u32 %s7733_s30, 4  ;;  %s178_s15 = int_to_ptr.hbm [resolvable:$true] %s177_s15 }
  0x79   :  { %138 = vsyncpa [#allocation47], 0  ;;  %s7612_s0 = smov [#allocation6]   ;;  %s198_s18 = sshll.u32 %s7743_s12, 4  ;;  %s199_s18 = int_to_ptr.hbm [resolvable:$true] %s198_s18 }
  0x7a   :  { %s179_s16 = sshll.u32 %s7612_s0, 4  ;;  %s6826_s22 = sshra.s32 %s178_s15, 4  ;;  %s180_s16 = int_to_ptr.vmem [resolvable:$true] %s179_s16  ;;  %s6827_s22 = int_to_ptr.hbm [resolvable:$true] %s6826_s22 }
  0x7b   :  { %s6828_s23 = scalar_lea.hbm %s6827_s22, 1  ;;  %s6830_s26 = scalar_lea.hbm %s7733_s30, 1 }
  0x7c   :  { %p6829_p0 = scmp.ne.s32.totalorder %s6827_s22, %s6828_s23  ;;  %p6831_p1 = scmp.lt.s32.totalorder %s6827_s22, %s7733_s30 }
  0x7d   :  { %p6832_p2 = scmp.lt.s32.totalorder %s6830_s26, %s6828_s23 }
  0x7f   :  { %p6833_p3 = por %p6832_p2, %p6831_p1 }
  0x81   :  { %p6834_p4 = pnand %p6833_p3, %p6829_p0 }
  0x83   :  { %6837 = shalt.err (!%p6834_p4)
}
  0x84   :  { %182 = dma.hbm_to_vmem [thread:$0]  %s178_s15, 16, %s180_s16, [#allocation7]  }
  0x85   :  { %s7613_s28 = smov [#allocation9]   ;;  %s6850_s2 = sshra.s32 %s199_s18, 4  ;;  %s6851_s2 = int_to_ptr.hbm [resolvable:$true] %s6850_s2 }
  0x86   :  { %s200_s1 = sshll.u32 %s7613_s28, 4  ;;  %s6852_s7 = scalar_lea.hbm %s6851_s2, 2  ;;  %s201_s1 = int_to_ptr.vmem [resolvable:$true] %s200_s1 }
  0x87   :  { %p6853_p5 = scmp.ne.s32.totalorder %s6851_s2, %s6852_s7  ;;  %s6854_s10 = scalar_lea.hbm %s7743_s12, 2 }
  0x88   :  { %p6855_p6 = scmp.lt.s32.totalorder %s6851_s2, %s7743_s12  ;;  %p6856_p7 = scmp.lt.s32.totalorder %s6854_s10, %s6852_s7 }
  0x8a   :  { %p6857_p8 = por %p6856_p7, %p6855_p6 }
  0x8c   :  { %p6858_p9 = pnand %p6857_p8, %p6853_p5 }
  0x8e   :  { %6861 = shalt.err (!%p6858_p9)
}
  0x8f   :  { %s7614_s30 = smov 16   ;;  %s7615_s11 = smov 1  }
  0x90   :  { %206 = dma.hbm_to_vmem [thread:$0]  %s199_s18, 32, %s201_s1, [#allocation10], %s7614_s30, %s7614_s30, %s7615_s11  }
  0x91   :  { %s229_s15 = sshll.u32 %s7763_s3, 4  ;;  %s7616_s0 = smov [#allocation12]   ;;  %s230_s15 = int_to_ptr.hbm [resolvable:$true] %s229_s15 }
  0x92   :  { %s231_s16 = sshll.u32 %s7616_s0, 4  ;;  %s251_s12 = sshll.u32 %s7773_s8, 4  ;;  %s232_s16 = int_to_ptr.vmem [resolvable:$true] %s231_s16  ;;  %s252_s12 = int_to_ptr.hbm [resolvable:$true] %s251_s12 }
  0x93   :  { %s6874_s22 = sshra.s32 %s230_s15, 4  ;;  %s6878_s26 = scalar_lea.hbm %s7763_s3, 1  ;;  %s6875_s22 = int_to_ptr.hbm [resolvable:$true] %s6874_s22 }
  0x94   :  { %s6876_s23 = scalar_lea.hbm %s6875_s22, 1  ;;  %p6879_p11 = scmp.lt.s32.totalorder %s6875_s22, %s7763_s3 }
  0x95   :  { %p6877_p10 = scmp.ne.s32.totalorder %s6875_s22, %s6876_s23  ;;  %p6880_p12 = scmp.lt.s32.totalorder %s6878_s26, %s6876_s23 }
  0x97   :  { %p6881_p13 = por %p6880_p12, %p6879_p11 }
  0x99   :  { %p6882_p0 = pnand %p6881_p13, %p6877_p10 }
  0x9b   :  { %6885 = shalt.err (!%p6882_p0)
}
  0x9c   :  { %234 = dma.hbm_to_vmem [thread:$0]  %s230_s15, 16, %s232_s16, [#allocation13]  }
  0x9d   :  { %s7617_s18 = smov [#allocation15]   ;;  %s275_s1 = sshll.u32 %s7788_s24, 4  ;;  %s276_s1 = int_to_ptr.hbm [resolvable:$true] %s275_s1 }
  0x9e   :  { %s253_s28 = sshll.u32 %s7617_s18, 4  ;;  %s6898_s2 = sshra.s32 %s252_s12, 4  ;;  %s254_s28 = int_to_ptr.vmem [resolvable:$true] %s253_s28  ;;  %s6899_s2 = int_to_ptr.hbm [resolvable:$true] %s6898_s2 }
  0x9f   :  { %s6900_s7 = scalar_lea.hbm %s6899_s2, 1  ;;  %s6902_s10 = scalar_lea.hbm %s7773_s8, 1 }
  0xa0   :  { %p6901_p1 = scmp.ne.s32.totalorder %s6899_s2, %s6900_s7  ;;  %p6903_p2 = scmp.lt.s32.totalorder %s6899_s2, %s7773_s8 }
  0xa1   :  { %p6904_p3 = scmp.lt.s32.totalorder %s6902_s10, %s6900_s7 }
  0xa3   :  { %p6905_p4 = por %p6904_p3, %p6903_p2 }
  0xa5   :  { %p6906_p5 = pnand %p6905_p4, %p6901_p1 }
  0xa7   :  { %6909 = shalt.err (!%p6906_p5)
}
  0xa8   :  { %256 = dma.hbm_to_vmem [thread:$0]  %s252_s12, 16, %s254_s28, [#allocation16]  }
  0xa9   :  { %s299_s3 = sshll.u32 %s7803_s17, 4  ;;  %s7618_s15 = smov [#allocation18]   ;;  %s300_s3 = int_to_ptr.hbm [resolvable:$true] %s299_s3 }
  0xaa   :  { %s277_s0 = sshll.u32 %s7618_s15, 4  ;;  %s6922_s16 = sshra.s32 %s276_s1, 4  ;;  %s278_s0 = int_to_ptr.vmem [resolvable:$true] %s277_s0  ;;  %s6923_s16 = int_to_ptr.hbm [resolvable:$true] %s6922_s16 }
  0xab   :  { %s6924_s22 = scalar_lea.hbm %s6923_s16, 8  ;;  %s6926_s23 = scalar_lea.hbm %s7788_s24, 8 }
  0xac   :  { %p6925_p6 = scmp.ne.s32.totalorder %s6923_s16, %s6924_s22  ;;  %p6927_p7 = scmp.lt.s32.totalorder %s6923_s16, %s7788_s24 }
  0xad   :  { %p6928_p8 = scmp.lt.s32.totalorder %s6926_s23, %s6924_s22 }
  0xaf   :  { %p6929_p9 = por %p6928_p8, %p6927_p7 }
  0xb1   :  { %p6930_p10 = pnand %p6929_p9, %p6925_p6 }
  0xb3   :  { %6933 = shalt.err (!%p6930_p10)
}
  0xb4   :  { %280 = dma.hbm_to_vmem [thread:$0]  %s276_s1, 128, %s278_s0, [#allocation19]  }
  0xb5   :  { %s7619_s8 = smov [#allocation21]   ;;  %s326_s26 = sshll.u32 %s7828_s4, 4  ;;  %s7985_s26 = int_to_ptr.hbm [resolvable:$true] %s326_s26 }
  0xb6   :  { %s301_s12 = sshll.u32 %s7619_s8, 4  ;;  %s6946_s18 = sshra.s32 %s300_s3, 4  ;;  %s302_s12 = int_to_ptr.vmem [resolvable:$true] %s301_s12  ;;  %s6947_s18 = int_to_ptr.hbm [resolvable:$true] %s6946_s18 }
  0xb7   :  { %s6948_s28 = scalar_lea.hbm %s6947_s18, 1  ;;  %s6950_s2 = scalar_lea.hbm %s7803_s17, 1 }
  0xb8   :  { %p6949_p11 = scmp.ne.s32.totalorder %s6947_s18, %s6948_s28  ;;  %p6951_p12 = scmp.lt.s32.totalorder %s6947_s18, %s7803_s17 }
  0xb9   :  { %p6952_p13 = scmp.lt.s32.totalorder %s6950_s2, %s6948_s28 }
  0xbb   :  { %p6953_p0 = por %p6952_p13, %p6951_p12 }
  0xbd   :  { %p6954_p1 = pnand %p6953_p0, %p6949_p11 }
  0xbf   :  { %6957 = shalt.err (!%p6954_p1)
}
  0xc0   :  { %304 = dma.hbm_to_vmem [thread:$0]  %s300_s3, 16, %s302_s12, [#allocation22]  }
  0xc1   :  { %s352_s24 = sshll.u32 %s7838_s29, 4  ;;  %s7620_s1 = smov [#allocation24]   ;;  %s7990_s24 = int_to_ptr.hbm [resolvable:$true] %s352_s24 }
  0xc2   :  { %s328_s7 = sshll.u32 %s7620_s1, 4  ;;  %s6970_s10 = sshra.s32 %s7985_s26, 4  ;;  %s329_s7 = int_to_ptr.vmem [resolvable:$true] %s328_s7  ;;  %s6971_s10 = int_to_ptr.hbm [resolvable:$true] %s6970_s10 }
  0xc3   :  { %s6972_s15 = scalar_lea.hbm %s6971_s10, 2  ;;  %s6974_s17 = scalar_lea.hbm %s7828_s4, 2 }
  0xc4   :  { %p6973_p2 = scmp.ne.s32.totalorder %s6971_s10, %s6972_s15  ;;  %p6975_p3 = scmp.lt.s32.totalorder %s6971_s10, %s7828_s4 }
  0xc5   :  { %p6976_p4 = scmp.lt.s32.totalorder %s6974_s17, %s6972_s15 }
  0xc7   :  { %p6977_p5 = por %p6976_p4, %p6975_p3 }
  0xc9   :  { %p6978_p6 = pnand %p6977_p5, %p6973_p2 }
  0xcb   :  { %6981 = shalt.err (!%p6978_p6)
}
  0xcc   :  { %334 = dma.hbm_to_vmem [thread:$0]  %s7985_s26, 32, %s329_s7, [#allocation25], %s7614_s30, %s7614_s30, %s7615_s11  }
  0xcd   :  { %s7621_s3 = smov [#allocation27]   ;;  %s378_s16 = sshll.u32 %s7848_s9, 4  ;;  %s8000_s16 = int_to_ptr.hbm [resolvable:$true] %s378_s16 }
  0xce   :  { %s354_s0 = sshll.u32 %s7621_s3, 4  ;;  %s6994_s4 = sshra.s32 %s7990_s24, 4  ;;  %s355_s0 = int_to_ptr.vmem [resolvable:$true] %s354_s0  ;;  %s6995_s4 = int_to_ptr.hbm [resolvable:$true] %s6994_s4 }
  0xcf   :  { %s6996_s22 = scalar_lea.hbm %s6995_s4, 2  ;;  %s6998_s23 = scalar_lea.hbm %s7838_s29, 2 }
  0xd0   :  { %p6997_p7 = scmp.ne.s32.totalorder %s6995_s4, %s6996_s22  ;;  %p6999_p8 = scmp.lt.s32.totalorder %s6995_s4, %s7838_s29 }
  0xd1   :  { %p7000_p9 = scmp.lt.s32.totalorder %s6998_s23, %s6996_s22 }
  0xd3   :  { %p7001_p10 = por %p7000_p9, %p6999_p8 }
  0xd5   :  { %p7002_p11 = pnand %p7001_p10, %p6997_p7 }
  0xd7   :  { %7005 = shalt.err (!%p7002_p11)
}
  0xd8   :  { %360 = dma.hbm_to_vmem [thread:$0]  %s7990_s24, 32, %s355_s0, [#allocation28], %s7614_s30, %s7614_s30, %s7615_s11  }
  0xd9   :  { %s405_s8 = sshll.u32 %s7863_s14, 4  ;;  %s7622_s12 = smov [#allocation30]   ;;  %s406_s8 = int_to_ptr.hbm [resolvable:$true] %s405_s8 }
  0xda   :  { %s380_s26 = sshll.u32 %s7622_s12, 4  ;;  %s7018_s18 = sshra.s32 %s8000_s16, 4  ;;  %s381_s26 = int_to_ptr.vmem [resolvable:$true] %s380_s26  ;;  %s7019_s18 = int_to_ptr.hbm [resolvable:$true] %s7018_s18 }
  0xdb   :  { %s7020_s29 = scalar_lea.hbm %s7019_s18, 2  ;;  %s7022_s28 = scalar_lea.hbm %s7848_s9, 2 }
  0xdc   :  { %p7021_p12 = scmp.ne.s32.totalorder %s7019_s18, %s7020_s29  ;;  %p7023_p13 = scmp.lt.s32.totalorder %s7019_s18, %s7848_s9 }
  0xdd   :  { %p7024_p0 = scmp.lt.s32.totalorder %s7022_s28, %s7020_s29 }
  0xdf   :  { %p7025_p1 = por %p7024_p0, %p7023_p13 }
  0xe1   :  { %p7026_p2 = pnand %p7025_p1, %p7021_p12 }
  0xe3   :  { %7029 = shalt.err (!%p7026_p2)
}
  0xe4   :  { %386 = dma.hbm_to_vmem [thread:$0]  %s8000_s16, 32, %s381_s26, [#allocation31], %s7614_s30, %s7614_s30, %s7615_s11  }
  0xe5   :  { %s7623_s2 = smov [#allocation33]   ;;  %s431_s1 = sshll.u32 %s7883_s19, 4  ;;  %s432_s1 = int_to_ptr.hbm [resolvable:$true] %s431_s1 }
  0xe6   :  { %s407_s24 = sshll.u32 %s7623_s2, 4  ;;  %s7042_s7 = sshra.s32 %s406_s8, 4  ;;  %s408_s24 = int_to_ptr.vmem [resolvable:$true] %s407_s24  ;;  %s7043_s7 = int_to_ptr.hbm [resolvable:$true] %s7042_s7 }
  0xe7   :  { %s7044_s9 = scalar_lea.hbm %s7043_s7, 1  ;;  %s7046_s10 = scalar_lea.hbm %s7863_s14, 1 }
  0xe8   :  { %p7045_p3 = scmp.ne.s32.totalorder %s7043_s7, %s7044_s9  ;;  %p7047_p4 = scmp.lt.s32.totalorder %s7043_s7, %s7863_s14 }
  0xe9   :  { %p7048_p5 = scmp.lt.s32.totalorder %s7046_s10, %s7044_s9 }
  0xeb   :  { %p7049_p6 = por %p7048_p5, %p7047_p4 }
  0xed   :  { %p7050_p7 = pnand %p7049_p6, %p7045_p3 }
  0xef   :  { %7053 = shalt.err (!%p7050_p7)
}
  0xf0   :  { %410 = dma.hbm_to_vmem [thread:$0]  %s406_s8, 16, %s408_s24, [#allocation34]  }
  0xf1   :  { %s452_s15 = sshll.u32 %s7893_s5, 4  ;;  %s7624_s17 = smov [#allocation36]   ;;  %s8021_s15 = int_to_ptr.hbm [resolvable:$true] %s452_s15 }
  0xf2   :  { %s433_s3 = sshll.u32 %s7624_s17, 4  ;;  %s7066_s0 = sshra.s32 %s432_s1, 4  ;;  %s434_s3 = int_to_ptr.vmem [resolvable:$true] %s433_s3  ;;  %s7067_s0 = int_to_ptr.hbm [resolvable:$true] %s7066_s0 }
  0xf3   :  { %s7068_s16 = scalar_lea.hbm %s7067_s0, 1  ;;  %s7070_s4 = scalar_lea.hbm %s7883_s19, 1 }
  0xf4   :  { %p7069_p8 = scmp.ne.s32.totalorder %s7067_s0, %s7068_s16  ;;  %p7071_p9 = scmp.lt.s32.totalorder %s7067_s0, %s7883_s19 }
  0xf5   :  { %p7072_p10 = scmp.lt.s32.totalorder %s7070_s4, %s7068_s16 }
  0xf7   :  { %p7073_p11 = por %p7072_p10, %p7071_p9 }
  0xf9   :  { %p7074_p12 = pnand %p7073_p11, %p7069_p8 }
  0xfb   :  { %7077 = shalt.err (!%p7074_p12)
}
  0xfc   :  { %436 = dma.hbm_to_vmem [thread:$0]  %s432_s1, 16, %s434_s3, [#allocation37]  }
  0xfd   :  { %s7625_s14 = smov [#allocation39]   ;;  %s7090_s23 = sshra.s32 %s8021_s15, 4  ;;  %s7091_s23 = int_to_ptr.hbm [resolvable:$true] %s7090_s23 }
  0xfe   :  { %s454_s22 = sshll.u32 %s7625_s14, 4  ;;  %s7092_s8 = scalar_lea.hbm %s7091_s23, 2  ;;  %s455_s22 = int_to_ptr.vmem [resolvable:$true] %s454_s22 }
  0xff   :  { %p7093_p13 = scmp.ne.s32.totalorder %s7091_s23, %s7092_s8  ;;  %s7094_s12 = scalar_lea.hbm %s7893_s5, 2 }
 0x100   :  { %p7095_p0 = scmp.lt.s32.totalorder %s7091_s23, %s7893_s5  ;;  %p7096_p1 = scmp.lt.s32.totalorder %s7094_s12, %s7092_s8 }
 0x102   :  { %p7097_p2 = por %p7096_p1, %p7095_p0 }
 0x104   :  { %p7098_p3 = pnand %p7097_p2, %p7093_p13 }
 0x106   :  { %7101 = shalt.err (!%p7098_p3)
}
 0x107   :  { %460 = dma.hbm_to_vmem [thread:$0]  %s8021_s15, 32, %s455_s22, [#allocation40], %s7614_s30, %s7614_s30, %s7615_s11  }
 0x108   :  { %s488_s19 = sshll.u32 %s7928_s25, 4  ;;  %s7626_s26 = smov [#allocation42]   ;;  %s489_s19 = int_to_ptr.hbm [resolvable:$true] %s488_s19 }
 0x109   :  { %s490_s18 = sshll.u32 %s7626_s26, 4  ;;  %s152_s29 = sshll.u32 %s7693_s21, 4  ;;  %s491_s18 = int_to_ptr.vmem [resolvable:$true] %s490_s18  ;;  %s153_s29 = int_to_ptr.hbm [resolvable:$true] %s152_s29 }
 0x10a   :  { %s7114_s5 = sshra.s32 %s489_s19, 4  ;;  %s7118_s2 = scalar_lea.hbm %s7928_s25, 64  ;;  %s7115_s5 = int_to_ptr.hbm [resolvable:$true] %s7114_s5 }
 0x10b   :  { %s7116_s28 = scalar_lea.hbm %s7115_s5, 64  ;;  %p7119_p5 = scmp.lt.s32.totalorder %s7115_s5, %s7928_s25 }
 0x10c   :  { %p7117_p4 = scmp.ne.s32.totalorder %s7115_s5, %s7116_s28  ;;  %p7120_p6 = scmp.lt.s32.totalorder %s7118_s2, %s7116_s28 }
 0x10e   :  { %p7121_p7 = por %p7120_p6, %p7119_p5 }
 0x110   :  { %p7122_p8 = pnand %p7121_p7, %p7117_p4 }
 0x112   :  { %7125 = shalt.err (!%p7122_p8)
}
 0x113   :  { %s7627_s24 = smov 128   ;;  %s10116_s1 = sld [smem:[#allocation75_spill]] }
 0x114   :  { %s7628_s7 = smov 8   ;;  %s7629_s9 = smov [#allocation3]  }
 0x115   :  { %496 = dma.hbm_to_vmem [thread:$0]  %s489_s19, 1024, %s491_s18, [#allocation43], %s7627_s24, %s7627_s24, %s7628_s7  }
 0x116   :  { %s154_s10 = sshll.u32 %s7629_s9, 4  ;;  %s7138_s25 = sshra.s32 %s153_s29, 4  ;;  %s155_s10 = int_to_ptr.vmem [resolvable:$true] %s154_s10  ;;  %s7139_s25 = int_to_ptr.hbm [resolvable:$true] %s7138_s25 }
 0x117   :  { %s7140_s17 = scalar_lea.hbm %s7139_s25, 1  ;;  %s7142_s3 = scalar_lea.hbm %s7693_s21, 1 }
 0x118   :  { %p7141_p9 = scmp.ne.s32.totalorder %s7139_s25, %s7140_s17  ;;  %p7143_p10 = scmp.lt.s32.totalorder %s7139_s25, %s7693_s21 }
 0x119   :  { %s188_s15 = sshll.u32 %s10116_s1, 4  ;;  %p7144_p11 = scmp.lt.s32.totalorder %s7142_s3, %s7140_s17  ;;  %s189_s15 = int_to_ptr.hbm [resolvable:$true] %s188_s15 }
 0x11b   :  { %p7145_p12 = por %p7144_p11, %p7143_p10 }
 0x11d   :  { %p7146_p13 = pnand %p7145_p12, %p7141_p9 }
 0x11f   :  { %7149 = shalt.err (!%p7146_p13)
}
 0x120   :  { %157 = dma.hbm_to_vmem [thread:$0]  %s153_s29, 16, %s155_s10, [#allocation4]  }
 0x121   :  { %s10117_s0 = sld [smem:[#allocation77_spill]]  ;;  %s7630_s4 = smov [#allocation8]  }
 0x122   :  { %s190_s14 = sshll.u32 %s7630_s4, 4  ;;  %s7162_s22 = sshra.s32 %s189_s15, 4  ;;  %s191_s14 = int_to_ptr.vmem [resolvable:$true] %s190_s14  ;;  %s7163_s22 = int_to_ptr.hbm [resolvable:$true] %s7162_s22 }
 0x123   :  { %s7164_s23 = scalar_lea.hbm %s7163_s22, 8  ;;  %s7166_s8 = scalar_lea.hbm %s10116_s1, 8 }
 0x124   :  { %p7165_p0 = scmp.ne.s32.totalorder %s7163_s22, %s7164_s23  ;;  %p7167_p1 = scmp.lt.s32.totalorder %s7163_s22, %s10116_s1 }
 0x125   :  { %p7168_p2 = scmp.lt.s32.totalorder %s7166_s8, %s7164_s23 }
 0x127   :  { %s213_s16 = sshll.u32 %s10117_s0, 4  ;;  %p7169_p3 = por %p7168_p2, %p7167_p1  ;;  %s8043_s16 = int_to_ptr.hbm [resolvable:$true] %s213_s16 }
 0x129   :  { %p7170_p4 = pnand %p7169_p3, %p7165_p0 }
 0x12b   :  { %7173 = shalt.err (!%p7170_p4)
}
 0x12c   :  { %193 = dma.hbm_to_vmem [thread:$0]  %s189_s15, 128, %s191_s14, [#allocation7]  }
 0x12d   :  { %s10118_s21 = sld [smem:[#allocation79_spill]]  ;;  %s7631_s12 = smov [#allocation11]  }
 0x12e   :  { %s215_s19 = sshll.u32 %s7631_s12, 4  ;;  %s7186_s18 = sshra.s32 %s8043_s16, 4  ;;  %s216_s19 = int_to_ptr.vmem [resolvable:$true] %s215_s19  ;;  %s7187_s18 = int_to_ptr.hbm [resolvable:$true] %s7186_s18 }
 0x12f   :  { %s7188_s29 = scalar_lea.hbm %s7187_s18, 2  ;;  %s7190_s5 = scalar_lea.hbm %s10117_s0, 2 }
 0x130   :  { %p7189_p5 = scmp.ne.s32.totalorder %s7187_s18, %s7188_s29  ;;  %p7191_p6 = scmp.lt.s32.totalorder %s7187_s18, %s10117_s0 }
 0x131   :  { %p7192_p7 = scmp.lt.s32.totalorder %s7190_s5, %s7188_s29 }
 0x133   :  { %s240_s26 = sshll.u32 %s10118_s21, 4  ;;  %p7193_p8 = por %p7192_p7, %p7191_p6  ;;  %s241_s26 = int_to_ptr.hbm [resolvable:$true] %s240_s26 }
 0x135   :  { %p7194_p9 = pnand %p7193_p8, %p7189_p5 }
 0x137   :  { %7197 = shalt.err (!%p7194_p9)
}
 0x138   :  { %s10119_s28 = sld [smem:[#allocation81_spill]]  ;;  %s7632_s1 = smov [#allocation14]  }
 0x139   :  { %221 = dma.hbm_to_vmem [thread:$0]  %s8043_s16, 32, %s216_s19, [#allocation10], %s7614_s30, %s7614_s30, %s7615_s11  }
 0x13a   :  { %s242_s9 = sshll.u32 %s7632_s1, 4  ;;  %s7210_s10 = sshra.s32 %s241_s26, 4  ;;  %s243_s9 = int_to_ptr.vmem [resolvable:$true] %s242_s9  ;;  %s7211_s10 = int_to_ptr.hbm [resolvable:$true] %s7210_s10 }
 0x13b   :  { %s7212_s15 = scalar_lea.hbm %s7211_s10, 8  ;;  %s7214_s25 = scalar_lea.hbm %s10118_s21, 8 }
 0x13c   :  { %p7213_p10 = scmp.ne.s32.totalorder %s7211_s10, %s7212_s15  ;;  %p7215_p11 = scmp.lt.s32.totalorder %s7211_s10, %s10118_s21 }
 0x13d   :  { %p7216_p12 = scmp.lt.s32.totalorder %s7214_s25, %s7212_s15 }
 0x13e   :  { %s264_s2 = sshll.u32 %s10119_s28, 4  ;;  %s265_s2 = int_to_ptr.hbm [resolvable:$true] %s264_s2 }
 0x13f   :  { %p7217_p13 = por %p7216_p12, %p7215_p11 }
 0x141   :  { %p7218_p0 = pnand %p7217_p13, %p7213_p10 }
 0x143   :  { %7221 = shalt.err (!%p7218_p0)
}
 0x144   :  { %245 = dma.hbm_to_vmem [thread:$0]  %s241_s26, 128, %s243_s9, [#allocation13]  }
 0x145   :  { %s10120_s17 = sld [smem:[#allocation82_spill]]  ;;  %s7633_s3 = smov [#allocation17]  }
 0x146   :  { %s266_s0 = sshll.u32 %s7633_s3, 4  ;;  %s7234_s4 = sshra.s32 %s265_s2, 4  ;;  %s267_s0 = int_to_ptr.vmem [resolvable:$true] %s266_s0  ;;  %s7235_s4 = int_to_ptr.hbm [resolvable:$true] %s7234_s4 }
 0x147   :  { %s7236_s14 = scalar_lea.hbm %s7235_s4, 1  ;;  %s7238_s22 = scalar_lea.hbm %s10119_s28, 1 }
 0x148   :  { %p7237_p1 = scmp.ne.s32.totalorder %s7235_s4, %s7236_s14  ;;  %p7239_p2 = scmp.lt.s32.totalorder %s7235_s4, %s10119_s28 }
 0x149   :  { %p7240_p3 = scmp.lt.s32.totalorder %s7238_s22, %s7236_s14 }
 0x14b   :  { %s286_s16 = sshll.u32 %s10120_s17, 4  ;;  %p7241_p4 = por %p7240_p3, %p7239_p2  ;;  %s287_s16 = int_to_ptr.hbm [resolvable:$true] %s286_s16 }
 0x14d   :  { %p7242_p5 = pnand %p7241_p4, %p7237_p1 }
 0x14f   :  { %7245 = shalt.err (!%p7242_p5)
}
 0x150   :  { %269 = dma.hbm_to_vmem [thread:$0]  %s265_s2, 16, %s267_s0, [#allocation16]  }
 0x151   :  { %s10121_s23 = sld [smem:[#allocation85_spill]]  ;;  %s7634_s21 = smov [#allocation20]  }
 0x152   :  { %s288_s12 = sshll.u32 %s7634_s21, 4  ;;  %s7258_s19 = sshra.s32 %s287_s16, 4  ;;  %s289_s12 = int_to_ptr.vmem [resolvable:$true] %s288_s12  ;;  %s7259_s19 = int_to_ptr.hbm [resolvable:$true] %s7258_s19 }
 0x153   :  { %s7260_s26 = scalar_lea.hbm %s7259_s19, 1  ;;  %s7262_s18 = scalar_lea.hbm %s10120_s17, 1 }
 0x154   :  { %p7261_p6 = scmp.ne.s32.totalorder %s7259_s19, %s7260_s26  ;;  %p7263_p7 = scmp.lt.s32.totalorder %s7259_s19, %s10120_s17 }
 0x155   :  { %p7264_p8 = scmp.lt.s32.totalorder %s7262_s18, %s7260_s26 }
 0x157   :  { %s312_s8 = sshll.u32 %s10121_s23, 4  ;;  %p7265_p9 = por %p7264_p8, %p7263_p7  ;;  %s313_s8 = int_to_ptr.hbm [resolvable:$true] %s312_s8 }
 0x159   :  { %p7266_p10 = pnand %p7265_p9, %p7261_p6 }
 0x15b   :  { %7269 = shalt.err (!%p7266_p10)
}
 0x15c   :  { %291 = dma.hbm_to_vmem [thread:$0]  %s287_s16, 16, %s289_s12, [#allocation19]  }
 0x15d   :  { %s10122_s29 = sld [smem:[#allocation88_spill]]  ;;  %s7635_s5 = smov [#allocation23]  }
 0x15e   :  { %s314_s28 = sshll.u32 %s7635_s5, 4  ;;  %s7282_s1 = sshra.s32 %s313_s8, 4  ;;  %s315_s28 = int_to_ptr.vmem [resolvable:$true] %s314_s28  ;;  %s7283_s1 = int_to_ptr.hbm [resolvable:$true] %s7282_s1 }
 0x15f   :  { %s7284_s9 = scalar_lea.hbm %s7283_s1, 1  ;;  %s7286_s10 = scalar_lea.hbm %s10121_s23, 1 }
 0x160   :  { %p7285_p11 = scmp.ne.s32.totalorder %s7283_s1, %s7284_s9  ;;  %p7287_p12 = scmp.lt.s32.totalorder %s7283_s1, %s10121_s23 }
 0x161   :  { %p7288_p13 = scmp.lt.s32.totalorder %s7286_s10, %s7284_s9 }
 0x163   :  { %s339_s2 = sshll.u32 %s10122_s29, 4  ;;  %p7289_p0 = por %p7288_p13, %p7287_p12  ;;  %s8065_s2 = int_to_ptr.hbm [resolvable:$true] %s339_s2 }
 0x165   :  { %p7290_p1 = pnand %p7289_p0, %p7285_p11 }
 0x167   :  { %7293 = shalt.err (!%p7290_p1)
}
 0x168   :  { %317 = dma.hbm_to_vmem [thread:$0]  %s313_s8, 16, %s315_s28, [#allocation22]  }
 0x169   :  { %s10123_s15 = sld [smem:[#allocation89_spill]]  ;;  %s7636_s17 = smov [#allocation26]  }
 0x16a   :  { %s341_s3 = sshll.u32 %s7636_s17, 4  ;;  %s7306_s0 = sshra.s32 %s8065_s2, 4  ;;  %s342_s3 = int_to_ptr.vmem [resolvable:$true] %s341_s3  ;;  %s7307_s0 = int_to_ptr.hbm [resolvable:$true] %s7306_s0 }
 0x16b   :  { %s7308_s16 = scalar_lea.hbm %s7307_s0, 2  ;;  %s7310_s4 = scalar_lea.hbm %s10122_s29, 2 }
 0x16c   :  { %p7309_p2 = scmp.ne.s32.totalorder %s7307_s0, %s7308_s16  ;;  %p7311_p3 = scmp.lt.s32.totalorder %s7307_s0, %s10122_s29 }
 0x16d   :  { %p7312_p4 = scmp.lt.s32.totalorder %s7310_s4, %s7308_s16 }
 0x16f   :  { %s365_s25 = sshll.u32 %s10123_s15, 4  ;;  %p7313_p5 = por %p7312_p4, %p7311_p3  ;;  %s8070_s25 = int_to_ptr.hbm [resolvable:$true] %s365_s25 }
 0x171   :  { %p7314_p6 = pnand %p7313_p5, %p7309_p2 }
 0x173   :  { %7317 = shalt.err (!%p7314_p6)
}
 0x174   :  { %s10124_s14 = sld [smem:[#allocation90_spill]]  ;;  %s7637_s22 = smov [#allocation29]  }
 0x175   :  { %347 = dma.hbm_to_vmem [thread:$0]  %s8065_s2, 32, %s342_s3, [#allocation25], %s7614_s30, %s7614_s30, %s7615_s11  }
 0x176   :  { %s367_s23 = sshll.u32 %s7637_s22, 4  ;;  %s7330_s21 = sshra.s32 %s8070_s25, 4  ;;  %s368_s23 = int_to_ptr.vmem [resolvable:$true] %s367_s23  ;;  %s7331_s21 = int_to_ptr.hbm [resolvable:$true] %s7330_s21 }
 0x177   :  { %s7332_s12 = scalar_lea.hbm %s7331_s21, 2  ;;  %s7334_s19 = scalar_lea.hbm %s10123_s15, 2 }
 0x178   :  { %p7333_p7 = scmp.ne.s32.totalorder %s7331_s21, %s7332_s12  ;;  %p7335_p8 = scmp.lt.s32.totalorder %s7331_s21, %s10123_s15 }
 0x179   :  { %p7336_p9 = scmp.lt.s32.totalorder %s7334_s19, %s7332_s12 }
 0x17a   :  { %s392_s8 = sshll.u32 %s10124_s14, 4  ;;  %s393_s8 = int_to_ptr.hbm [resolvable:$true] %s392_s8 }
 0x17b   :  { %p7337_p10 = por %p7336_p9, %p7335_p8 }
 0x17d   :  { %p7338_p11 = pnand %p7337_p10, %p7333_p7 }
 0x17f   :  { %7341 = shalt.err (!%p7338_p11)
}
 0x180   :  { %s10125_s26 = sld [smem:[#allocation93_spill]]  ;;  %s7638_s29 = smov [#allocation32]  }
 0x181   :  { %373 = dma.hbm_to_vmem [thread:$0]  %s8070_s25, 32, %s368_s23, [#allocation28], %s7614_s30, %s7614_s30, %s7615_s11  }
 0x182   :  { %s394_s5 = sshll.u32 %s7638_s29, 4  ;;  %s7354_s28 = sshra.s32 %s393_s8, 4  ;;  %s395_s5 = int_to_ptr.vmem [resolvable:$true] %s394_s5  ;;  %s7355_s28 = int_to_ptr.hbm [resolvable:$true] %s7354_s28 }
 0x183   :  { %s7356_s2 = scalar_lea.hbm %s7355_s28, 1  ;;  %s7358_s1 = scalar_lea.hbm %s10124_s14, 1 }
 0x184   :  { %p7357_p12 = scmp.ne.s32.totalorder %s7355_s28, %s7356_s2  ;;  %p7359_p13 = scmp.lt.s32.totalorder %s7355_s28, %s10124_s14 }
 0x185   :  { %p7360_p0 = scmp.lt.s32.totalorder %s7358_s1, %s7356_s2 }
 0x186   :  { %s418_s18 = sshll.u32 %s10125_s26, 4  ;;  %s419_s18 = int_to_ptr.hbm [resolvable:$true] %s418_s18 }
 0x187   :  { %p7361_p1 = por %p7360_p0, %p7359_p13 }
 0x189   :  { %p7362_p2 = pnand %p7361_p1, %p7357_p12 }
 0x18b   :  { %7365 = shalt.err (!%p7362_p2)
}
 0x18c   :  { %397 = dma.hbm_to_vmem [thread:$0]  %s393_s8, 16, %s395_s5, [#allocation31]  }
 0x18d   :  { %s10126_s9 = sld [smem:[#allocation95_spill]]  ;;  %s7639_s11 = smov [#allocation35]  }
 0x18e   :  { %s420_s10 = sshll.u32 %s7639_s11, 4  ;;  %s7378_s25 = sshra.s32 %s419_s18, 4  ;;  %s421_s10 = int_to_ptr.vmem [resolvable:$true] %s420_s10  ;;  %s7379_s25 = int_to_ptr.hbm [resolvable:$true] %s7378_s25 }
 0x18f   :  { %s7380_s17 = scalar_lea.hbm %s7379_s25, 1  ;;  %s7382_s3 = scalar_lea.hbm %s10125_s26, 1 }
 0x190   :  { %p7381_p3 = scmp.ne.s32.totalorder %s7379_s25, %s7380_s17  ;;  %p7383_p4 = scmp.lt.s32.totalorder %s7379_s25, %s10125_s26 }
 0x191   :  { %p7384_p5 = scmp.lt.s32.totalorder %s7382_s3, %s7380_s17 }
 0x193   :  { %s442_s15 = sshll.u32 %s10126_s9, 4  ;;  %p7385_p6 = por %p7384_p5, %p7383_p4  ;;  %s443_s15 = int_to_ptr.hbm [resolvable:$true] %s442_s15 }
 0x195   :  { %p7386_p7 = pnand %p7385_p6, %p7381_p3 }
 0x197   :  { %7389 = shalt.err (!%p7386_p7)
}
 0x198   :  { %423 = dma.hbm_to_vmem [thread:$0]  %s419_s18, 16, %s421_s10, [#allocation34]  }
 0x199   :  { %s10127_s0 = sld [smem:[#allocation100_spill]]  ;;  %s7640_s4 = smov [#allocation38]  }
 0x19a   :  { %s444_s14 = sshll.u32 %s7640_s4, 4  ;;  %s7402_s22 = sshra.s32 %s443_s15, 4  ;;  %s445_s14 = int_to_ptr.vmem [resolvable:$true] %s444_s14  ;;  %s7403_s22 = int_to_ptr.hbm [resolvable:$true] %s7402_s22 }
 0x19b   :  { %s7404_s23 = scalar_lea.hbm %s7403_s22, 1  ;;  %s7406_s8 = scalar_lea.hbm %s10126_s9, 1 }
 0x19c   :  { %p7405_p8 = scmp.ne.s32.totalorder %s7403_s22, %s7404_s23  ;;  %p7407_p9 = scmp.lt.s32.totalorder %s7403_s22, %s10126_s9 }
 0x19d   :  { %p7408_p10 = scmp.lt.s32.totalorder %s7406_s8, %s7404_s23 }
 0x19f   :  { %s473_s16 = sshll.u32 %s10127_s0, 4  ;;  %p7409_p11 = por %p7408_p10, %p7407_p9  ;;  %s8094_s16 = int_to_ptr.hbm [resolvable:$true] %s473_s16 }
 0x1a1   :  { %p7410_p12 = pnand %p7409_p11, %p7405_p8 }
 0x1a3   :  { %7413 = shalt.err (!%p7410_p12)
}
 0x1a4   :  { %447 = dma.hbm_to_vmem [thread:$0]  %s443_s15, 16, %s445_s14, [#allocation37]  }
 0x1a5   :  { %s10128_s21 = sld [smem:[#allocation104_spill]]  ;;  %s7641_s12 = smov [#allocation41]  }
 0x1a6   :  { %s475_s19 = sshll.u32 %s7641_s12, 4  ;;  %s7426_s18 = sshra.s32 %s8094_s16, 4  ;;  %s476_s19 = int_to_ptr.vmem [resolvable:$true] %s475_s19  ;;  %s7427_s18 = int_to_ptr.hbm [resolvable:$true] %s7426_s18 }
 0x1a7   :  { %s7428_s29 = scalar_lea.hbm %s7427_s18, 64  ;;  %s7430_s5 = scalar_lea.hbm %s10127_s0, 64 }
 0x1a8   :  { %p7429_p13 = scmp.ne.s32.totalorder %s7427_s18, %s7428_s29  ;;  %p7431_p0 = scmp.lt.s32.totalorder %s7427_s18, %s10127_s0 }
 0x1a9   :  { %p7432_p1 = scmp.lt.s32.totalorder %s7430_s5, %s7428_s29 }
 0x1ab   :  { %s505_s26 = sshll.u32 %s10128_s21, 4  ;;  %p7433_p2 = por %p7432_p1, %p7431_p0  ;;  %s506_s26 = int_to_ptr.hbm [resolvable:$true] %s505_s26 }
 0x1ad   :  { %p7434_p3 = pnand %p7433_p2, %p7429_p13 }
 0x1af   :  { %7437 = shalt.err (!%p7434_p3)
}
 0x1b0   :  { %481 = dma.hbm_to_vmem [thread:$0]  %s8094_s16, 1024, %s476_s19, [#allocation40], %s7627_s24, %s7627_s24, %s7628_s7  }
 0x1b1   :  { %s7642_s28 = smov [#allocation44]   ;;  %s7450_s1 = sshra.s32 %s506_s26, 4  ;;  %s7451_s1 = int_to_ptr.hbm [resolvable:$true] %s7450_s1 }
 0x1b2   :  { %s507_s2 = sshll.u32 %s7642_s28, 4  ;;  %s7452_s9 = scalar_lea.hbm %s7451_s1, 16  ;;  %s508_s2 = int_to_ptr.vmem [resolvable:$true] %s507_s2 }
 0x1b3   :  { %p7453_p4 = scmp.ne.s32.totalorder %s7451_s1, %s7452_s9  ;;  %s7454_s11 = scalar_lea.hbm %s10128_s21, 16 }
 0x1b4   :  { %p7455_p5 = scmp.lt.s32.totalorder %s7451_s1, %s10128_s21  ;;  %p7456_p6 = scmp.lt.s32.totalorder %s7454_s11, %s7452_s9 }
 0x1b6   :  { %p7457_p7 = por %p7456_p6, %p7455_p5 }
 0x1b8   :  { %p7458_p8 = pnand %p7457_p7, %p7453_p4 }
 0x1ba   :  { %7461 = shalt.err (!%p7458_p8)
}
 0x1bb   :  { %513 = dma.hbm_to_vmem [thread:$0]  %s506_s26, 256, %s508_s2, [#allocation43], %s7627_s24, %s7627_s24, %s7628_s7  }
 0x1bc   :  { %7522 = dma.done.wait [#allocation4], 16  }
 0x1bd   :  { %7523 = vsyncadd [#allocation4], 4294967280 }
 0x1be   :  { %7524 = dma.done.wait [#allocation7], 144  }
 0x1bf   :  { %7525 = vsyncadd [#allocation7], 4294967152 }
 0x1c0   :  { %7526 = dma.done.wait [#allocation10], 64  }
 0x1c1   :  { %7527 = vsyncadd [#allocation10], 4294967232 }
 0x1c2   :  { %7528 = dma.done.wait [#allocation13], 144  }
 0x1c3   :  { %7529 = vsyncadd [#allocation13], 4294967152 }
 0x1c4   :  { %7530 = dma.done.wait [#allocation16], 32  }
 0x1c5   :  { %7531 = vsyncadd [#allocation16], 4294967264 }
 0x1c6   :  { %7532 = dma.done.wait [#allocation19], 144  }
 0x1c7   :  { %7533 = vsyncadd [#allocation19], 4294967152 }
 0x1c8   :  { %7534 = dma.done.wait [#allocation22], 32  }
 0x1c9   :  { %7535 = vsyncadd [#allocation22], 4294967264 }
 0x1ca   :  { %7536 = dma.done.wait [#allocation25], 64  }
 0x1cb   :  { %7537 = vsyncadd [#allocation25], 4294967232 }
 0x1cc   :  { %7538 = dma.done.wait [#allocation28], 64  }
 0x1cd   :  { %7539 = vsyncadd [#allocation28], 4294967232 }
 0x1ce   :  { %7540 = dma.done.wait [#allocation31], 48  }
 0x1cf   :  { %7541 = vsyncadd [#allocation31], 4294967248 }
 0x1d0   :  { %7542 = dma.done.wait [#allocation34], 32  }
 0x1d1   :  { %7543 = vsyncadd [#allocation34], 4294967264 }
 0x1d2   :  { %7544 = dma.done.wait [#allocation37], 32  }
 0x1d3   :  { %7545 = vsyncadd [#allocation37], 4294967264 }
 0x1d4   :  { %7546 = dma.done.wait [#allocation40], 1056  }
 0x1d5   :  { %7547 = vsyncadd [#allocation40], 4294966240 }
 0x1d6   :  { %7548 = dma.done.wait [#allocation43], 1280  }
 0x1d7   :  { %7549 = vsyncadd [#allocation43], 4294966016  ;;  %s10129_s10 = sld [smem:[#allocation94_spill]]  ;;  %vm836_vm0 = vcmask 64512   ;;  %v831_v1 = vld [vmem:[#allocation8] sm:$0xff]  ;;  %vm635_vm1 = vcmask 195584  }
 0x1d8   :  { %s10130_s15 = sld [smem:[#allocation65_spill]]  ;;  %858 = vmatpush.msra.mxu3 %v831_v1  ;;  %v6554_v12 = vld [vmem:[#allocation35] ss:$0 sm:$0xff]  ;;  %v6555_v13 = vld [vmem:[#allocation6] ss:$0 sm:$0xff]  ;;  %vm667_vm2 = vcmask 261120  }
 0x1d9   :  { %s10131_s25 = sld [smem:[#allocation64_spill]]  ;;  %vm671_vm3 = vcmask 257024   ;;  %v7643_v26 = vmov 32.0   ;;  %v910_v29 = vld [vmem:[#allocation41 + $0x18] sm:$0xff]  ;;  %v909_v31 = vld [vmem:[#allocation41 + $0x10] sm:$0xff]  ;;  %v908_v32 = vld [vmem:[#allocation41 + $0x8] sm:$0xff] }
 0x1da   :  { %s10132_s17 = sld [smem:[#allocation98_spill]]  ;;  %6600 = vrcp.f32 %v7643_v26  ;;  %v907_v34 = vld [vmem:[#allocation41] sm:$0xff]  ;;  %vm797_vm11 = vcmask 523264   ;;  %vm1033_vm12 = vcmask 31744   ;;  %s7644_s22 = smov 116   ;;  %vm1078_vm13 = vcmask 130048  }
 0x1db   :  { %s10133_s3 = sld [smem:[#allocation97_spill]]  ;;  %s7645_s23 = smov 120  }
 0x1dc   :  { %s10134_s0 = sld [smem:[#allocation91_spill]]  ;;  %s7646_s8 = smov 124  }
 0x1dd   :  { %v630_v0 = vld [vmem:[%s10129_s10 + $0x10] sm:$0xff]  ;;  %v629_v3 = vld [vmem:[%s10129_s10 + $0x8] sm:$0xff]  ;;  %v628_v4 = vld [vmem:[%s10129_s10] sm:$0xff]  ;;  %s10135_s16 = sld [smem:[#allocation99_spill]]  ;;  %s7647_s21 = smov 108  }
 0x1de   :  { %v829_v2 = vld [vmem:[%s10130_s15] sm:$0xff]  ;;  %655 = vmatpush.msra.mxu0 %v630_v0  ;;  %6370 = vmatpush.msra.mxu1 %v630_v0  ;;  %v830_v7 = vld [vmem:[%s10130_s15 + $0x8] sm:$0xff]  ;;  %s10136_s4 = sld [smem:[#allocation92_spill]]  ;;  %s7648_s12 = smov 104  }
 0x1df   :  { %6085 = vmatmul.msk.f32.vlgmr.msra.gmra.mxu3 %vm836_vm0, %v829_v2  ;;  %v626_v5 = vld [vmem:[%s10131_s25] sm:$0xff]  ;;  %v627_v6 = vld [vmem:[%s10131_s25 + $0x8] sm:$0xf]  ;;  %s10137_s14 = sld [smem:[#allocation72_spill]]  ;;  %s7649_s19 = smov 100  }
 0x1e0   :  { %656 = vmatpush.msra.mxu0 %v629_v3  ;;  %6371 = vmatpush.msra.mxu1 %v629_v3  ;;  %v871_v8 = vld [vmem:[%s10132_s17 + $0x18] sm:$0xff]  ;;  %v870_v9 = vld [vmem:[%s10132_s17 + $0x10] sm:$0xff]  ;;  %v869_v10 = vld [vmem:[%s10132_s17 + $0x8] sm:$0xff]  ;;  %v6601_v27 = vpop.eup %6600  ;;  %s7650_s26 = smov 112   ;;  %s7652_s18 = smov 4  }
 0x1e1   :  { %894 = vmatpush.msrb.mxu3 %v871_v8  ;;  %v868_v11 = vld [vmem:[%s10132_s17] sm:$0xff]  ;;  %v676_v28 = vmul.f32 32.0, %v6601_v27  ;;  %vm680_vm4 = vweird.f32 %v6601_v27  ;;  %v6094_v57 = vld [vmem:[%s10132_s17 + $0x38] sm:$0xff]  ;;  %v6093_v59 = vld [vmem:[%s10132_s17 + $0x30] sm:$0xff]  ;;  %s7653_s29 = smov 12   ;;  %s7654_s5 = smov 20  }
 0x1e2   :  { %657 = vmatpush.msra.mxu0 %v628_v4  ;;  %6372 = vmatpush.msra.mxu1 %v628_v4  ;;  %v6556_v47 = vld [vmem:[%s10133_s3] ss:$0 sm:$0xff]  ;;  %v733_v54 = vld [vmem:[%s10134_s0 + $0x18] sm:$0xff]  ;;  %v732_v55 = vld [vmem:[%s10134_s0 + $0x10] sm:$0xff]  ;;  %s10153_s28 = sld [smem:[#allocation86_spill]]  ;;  %s7655_s2 = smov 24  }
 0x1e3   :  { %6079 = vmatmul.msk.f32.vlgmr.msra.gmra.mxu0 %vm635_vm1, %v626_v5  ;;  %6080 = vmatmul.msk.f32.vlgmr.msra.gmra.mxu1 %vm635_vm1, %v627_v6  ;;  %v677_v30 = vsub.f32 1.0, %v676_v28  ;;  %v731_v56 = vld [vmem:[%s10134_s0 + $0x8] sm:$0xff]  ;;  %v730_v58 = vld [vmem:[%s10134_s0] sm:$0xff]  ;;  %s7656_s1 = smov 28   ;;  %s10157_s9 = sld [smem:[#allocation103_spill]] }
 0x1e4   :  { %895 = vmatpush.msrb.mxu3 %v870_v9  ;;  %933 = vmatpush.msrb.mxu0 %v910_v29  ;;  %v6092_v60 = vld [vmem:[%s10132_s17 + $0x28] sm:$0xff]  ;;  %v6091_v61 = vld [vmem:[%s10132_s17 + $0x20] sm:$0xff]  ;;  %s10158_s11 = sld [smem:[#allocation66_spill]]  ;;  %s7657_s17 = smov 96  }
 0x1e5   :  { %v678_v33 = vmul.f32 %v6601_v27, %v677_v30  ;;  %756 = vmatpush.msra.mxu2 %v733_v54  ;;  %976 = vmatpush.msrb.mxu1 %v6094_v57  ;;  %v990_v54 = vld [vmem:[#allocation41 + $0x20] sm:$0xff]  ;;  %s10159_s10 = sld [smem:[#allocation102_spill]]  ;;  %s7659_s0 = smov 48  }
 0x1e6   :  { %896 = vmatpush.msrb.mxu3 %v869_v10  ;;  %934 = vmatpush.msrb.mxu0 %v909_v31  ;;  %s10160_s15 = sld [smem:[#allocation80_spill]] }
 0x1e7   :  { %6086 = vmatmul.msk.f32.gmra.mxu3 %vm836_vm0, %v830_v7  ;;  %v679_v35 = vadd.f32 %v6601_v27, %v678_v33  ;;  %757 = vmatpush.msra.mxu2 %v732_v55  ;;  %s10163_s25 = sld [smem:[#allocation67_spill]] }
 0x1e8   :  { %897 = vmatpush.msrb.mxu3 %v868_v11  ;;  %935 = vmatpush.msrb.mxu0 %v908_v32 }
 0x1e9   :  { %v8142_v36 = vsel %vm680_vm4, %v6601_v27, %v679_v35  ;;  %758 = vmatpush.msra.mxu2 %v731_v56  ;;  %977 = vmatpush.msrb.mxu1 %v6093_v59 }
 0x1ea   :  { %936 = vmatpush.msrb.mxu0 %v907_v34 }
 0x1eb   :  { %759 = vmatpush.msra.mxu2 %v730_v58  ;;  %978 = vmatpush.msrb.mxu1 %v6092_v60 }
 0x1ed   :  { %979 = vmatpush.msrb.mxu1 %v6091_v61 }
 0x260   :  { %v659_v14 = vpop.f32.mrf.mxu0  ;;  %v662_v17 = vpop.f32.mrf.mxu1 }
 0x261   :  { %v8126_v15 = vadd.f32 %v6554_v12, %v659_v14  ;;  %v8133_v21 = vadd.f32 %v6554_v12, %v662_v17  ;;  %v6558_v12 = vld [vmem:[#allocation38] ss:$0 sm:$0xff] }
 0x262   :  { %v860_v16 = vpop.f32.mrf.mxu3 }
 0x263   :  { %v8128_v18 = vadd.f32 %v6555_v13, %v860_v16  ;;  %v668_v19 = vsel %vm667_vm2, %v8126_v15, 0.0  ;;  %v672_v22 = vsel %vm671_vm3, %v8133_v21, 0.0  ;;  %v6557_v16 = vld [vmem:[%s10135_s16] ss:$0 sm:$0xff] }
 0x264   :  { %669 = vadd.xlane.f32.xlu0 %v668_v19  ;;  %v6559_v19 = vld [vmem:[#allocation36] ss:$0 sm:$0xff] }
 0x265   :  { %v866_v20 = vmax.f32 %v8128_v18, 0.0 }
 0x267   :  { %6087 = vmatmul.msk.f32.vlgmr.msrb.gmra.mxu3 %vm667_vm2, %v866_v20 }
 0x26a   :  { %v863_v23 = vpop.f32.mrf.mxu3 }
 0x26b   :  { %v8138_v24 = vadd.f32 %v6555_v13, %v863_v23 }
 0x26c   :  { %673 = vadd.xlane.f32.xlu0 %v672_v22 }
 0x26d   :  { %v867_v25 = vmax.f32 %v8138_v24, 0.0 }
 0x26f   :  { %6088 = vmatmul.msk.f32.gmra.mxu3 %vm667_vm2, %v867_v25 }
 0x2d7   :  { %v670_v37 = vpop.xlane.xlu0 %669 }
 0x2d8   :  { %v682_v38 = vmul.f32 %v8142_v36, %v670_v37 }
 0x2da   :  { %v684_v39 = vsub.f32 %v8126_v15, %v682_v38 }
 0x2dc   :  { %v686_v40 = vmul.f32 %v684_v39, %v684_v39 }
 0x2de   :  { %v688_v41 = vsel %vm667_vm2, %v686_v40, 0.0  ;;  %v791_v40 = vld [vmem:[%s10136_s4 + $0x30] sm:$0xff] }
 0x2df   :  { %689 = vadd.xlane.f32.xlu1 %v688_v41  ;;  %v674_v42 = vpop.xlane.xlu0 %673  ;;  %v790_v41 = vld [vmem:[%s10136_s4 + $0x28] sm:$0xff] }
 0x2e0   :  { %v683_v43 = vmul.f32 %v8142_v36, %v674_v42  ;;  %v789_v42 = vld [vmem:[%s10136_s4 + $0x20] sm:$0xff] }
 0x2e2   :  { %v8149_v44 = vsub.f32 %v8133_v21, %v683_v43  ;;  %v788_v43 = vld [vmem:[%s10136_s4 + $0x18] sm:$0xff] }
 0x2e4   :  { %v687_v45 = vmul.f32 %v8149_v44, %v8149_v44 }
 0x2e6   :  { %v691_v46 = vsel %vm671_vm3, %v687_v45, 0.0  ;;  %v785_v45 = vld [vmem:[%s10136_s4] sm:$0xff] }
 0x2e7   :  { %692 = vadd.xlane.f32.xlu1 %v691_v46  ;;  %v6561_v46 = vld [vmem:[#allocation32] ss:$0 sm:$0xff] }
 0x2ea   :  { %v899_v48 = vpop.f32.mrf.mxu3 }
 0x2eb   :  { %v900_v49 = vadd.f32 %v6556_v47, %v899_v48 }
 0x2ed   :  { %v905_v50 = vmax.f32 %v900_v49, 0.0  ;;  %v993_v49 = vld [vmem:[#allocation41 + $0x38] sm:$0xff] }
 0x2ef   :  { %6089 = vmatmul.msk.f32.vlgmr.msrb.gmra.mxu0 %vm667_vm2, %v905_v50  ;;  %v992_v50 = vld [vmem:[#allocation41 + $0x30] sm:$0xff] }
 0x2f2   :  { %v902_v51 = vpop.f32.mrf.mxu3 }
 0x2f3   :  { %v903_v52 = vadd.f32 %v6556_v47, %v902_v51 }
 0x2f5   :  { %v906_v53 = vmax.f32 %v903_v52, 0.0  ;;  %v991_v52 = vld [vmem:[#allocation41 + $0x28] sm:$0xff] }
 0x2f7   :  { %6090 = vmatmul.msk.f32.gmra.mxu0 %vm667_vm2, %v906_v53 }
 0x352   :  { %v690_v62 = vpop.xlane.xlu1 %689 }
 0x353   :  { %v694_v63 = vmul.f32 %v690_v62, %v8142_v36 }
 0x355   :  { %v696_v0 = vadd.f32 1e-05, %v694_v63 }
 0x357   :  { %6602 = vrsqrt.f32 %v696_v0  ;;  %vm704_vm6 = vweird.f32 %v696_v0 }
 0x35a   :  { %v693_v1 = vpop.xlane.xlu1 %692 }
 0x35b   :  { %v695_v2 = vmul.f32 %v693_v1, %v8142_v36 }
 0x35d   :  { %v6603_v3 = vpop.eup %6602  ;;  %v697_v4 = vadd.f32 1e-05, %v695_v2 }
 0x35e   :  { %v699_v5 = vmul.f32 %v6603_v3, %v696_v0  ;;  %vm705_vm5 = vweird.f32 %v6603_v3 }
 0x35f   :  { %6604 = vrsqrt.f32 %v697_v4  ;;  %vm706_vm7 = vmor %vm704_vm6, %vm705_vm5  ;;  %vm714_vm9 = vweird.f32 %v697_v4 }
 0x360   :  { %v700_v6 = vmul.f32 %v6603_v3, %v699_v5 }
 0x362   :  { %v701_v7 = vmul.f32 0.5, %v700_v6 }
 0x364   :  { %v702_v8 = vsub.f32 1.5, %v701_v7 }
 0x365   :  { %v6605_v9 = vpop.eup %6604 }
 0x366   :  { %v703_v10 = vmul.f32 %v6603_v3, %v702_v8  ;;  %v709_v11 = vmul.f32 %v6605_v9, %v697_v4  ;;  %vm715_vm8 = vweird.f32 %v6605_v9 }
 0x367   :  { %vm716_vm10 = vmor %vm714_vm9, %vm715_vm8 }
 0x368   :  { %v710_v13 = vmul.f32 %v6605_v9, %v709_v11  ;;  %v707_v14 = vsel %vm706_vm7, %v6603_v3, %v703_v10 }
 0x369   :  { %v718_v17 = vmul.f32 %v707_v14, %v684_v39  ;;  %v792_v39 = vld [vmem:[%s10136_s4 + $0x38] sm:$0xff] }
 0x36a   :  { %v711_v20 = vmul.f32 0.5, %v710_v13  ;;  %812 = vmatpush.msrb.mxu2 %v792_v39  ;;  %v8307_v39 = vld [vmem:[#allocation3] ss:$0 sm:$0xff] }
 0x36b   :  { %v723_v22 = vmul.f32 %v6558_v12, %v718_v17  ;;  %v8195_v17 = vld [vmem:[%s10137_s14 + $0x8] sm:$0xff] }
 0x36c   :  { %v712_v23 = vsub.f32 1.5, %v711_v20  ;;  %v938_v25 = vpop.f32.mrf.mxu0  ;;  %813 = vmatpush.msrb.mxu2 %v791_v40  ;;  %6101 = vmatpush.xpose.msk.msra.mxu3 %vm1033_vm12, %v8195_v17 }
 0x36d   :  { %v939_v26 = vadd.f32 %v6557_v16, %v938_v25  ;;  %v728_v27 = vadd.f32 %v6559_v19, %v723_v22  ;;  %6109 = vmatpush.xpose.msk.msra.mxu1 %vm1033_vm12, %v8195_v17  ;;  %1145 = vmatpush.msra.mxu0 %v8195_v17 }
 0x36e   :  { %v713_v28 = vmul.f32 %v6605_v9, %v712_v23  ;;  %814 = vmatpush.msrb.mxu2 %v790_v41  ;;  %v6563_v23 = vld [vmem:[%s10135_s16 + $0x1] ss:$0 sm:$0xff]  ;;  %s7662_s16 = smov 64  }
 0x36f   :  { %v8169_v29 = vadd.f32 %v939_v26, %v8128_v18  ;;  %6081 = vmatmul.msk.f32.vlgmr.msra.gmra.mxu2 %vm667_vm2, %v728_v27 }
 0x370   :  { %v717_v30 = vsel %vm716_vm10, %v6605_v9, %v713_v28  ;;  %815 = vmatpush.msrb.mxu2 %v789_v42  ;;  %v6560_v9 = vld [vmem:[%s10133_s3 + $0x1] ss:$0 sm:$0xff]  ;;  %s7658_s3 = smov 32  }
 0x371   :  { %v946_v31 = vmax.f32 %v8169_v29, 0.0  ;;  %v719_v32 = vmul.f32 %v717_v30, %v8149_v44  ;;  %v787_v44 = vld [vmem:[%s10136_s4 + $0x10] sm:$0xff] }
 0x372   :  { %816 = vmatpush.msrb.mxu2 %v788_v43 }
 0x373   :  { %6096 = vmatmul.msk.f32.vlgmr.msrb.gmra.mxu1 %vm667_vm2, %v946_v31  ;;  %v724_v33 = vmul.f32 %v6558_v12, %v719_v32 }
 0x374   :  { %v941_v34 = vpop.f32.mrf.mxu0  ;;  %817 = vmatpush.msrb.mxu2 %v787_v44 }
 0x375   :  { %v942_v35 = vadd.f32 %v6557_v16, %v941_v34  ;;  %v729_v37 = vadd.f32 %v6559_v19, %v724_v33  ;;  %v8204_v19 = vld [vmem:[%s10137_s14] sm:$0xff]  ;;  %s10169_s14 = sld [smem:[#allocation101_spill]] }
 0x376   :  { %6102 = vmatpush.xpose.msk.msra.mxu3 %vm1033_vm12, %v8204_v19  ;;  %6110 = vmatpush.xpose.msk.msra.mxu1 %vm1033_vm12, %v8204_v19 }
 0x377   :  { %v8176_v18 = vadd.f32 %v942_v35, %v8138_v24  ;;  %6082 = vmatmul.msk.f32.gmra.mxu2 %vm667_vm2, %v729_v37  ;;  %v786_v24 = vld [vmem:[%s10136_s4 + $0x8] sm:$0xff]  ;;  %1146 = vmatpush.msra.mxu0 %v8204_v19  ;;  %s10168_s4 = sld [smem:[#allocation69_spill]] }
 0x378   :  { %818 = vmatpush.msrb.mxu2 %v786_v24 }
 0x379   :  { %v947_v38 = vmax.f32 %v8176_v18, 0.0  ;;  %1391 = vmatpush.msrb.mxu0 %v8195_v17 }
 0x37a   :  { %819 = vmatpush.msrb.mxu2 %v785_v45  ;;  %6117 = vmatpush.xpose.msk.msrb.mxu3 %vm1033_vm12, %v8195_v17 }
 0x37b   :  { %6097 = vmatmul.msk.f32.gmra.mxu1 %vm667_vm2, %v947_v38  ;;  %1392 = vmatpush.msrb.mxu0 %v8204_v19 }
 0x37c   :  { %1017 = vmatpush.msra.mxu2 %v993_v49  ;;  %6125 = vmatpush.xpose.msk.msrb.mxu1 %vm1033_vm12, %v8195_v17 }
 0x37e   :  { %1018 = vmatpush.msra.mxu2 %v992_v50  ;;  %6118 = vmatpush.xpose.msk.msrb.mxu3 %vm1033_vm12, %v8204_v19 }
 0x380   :  { %1019 = vmatpush.msra.mxu2 %v991_v52  ;;  %6126 = vmatpush.xpose.msk.msrb.mxu1 %vm1033_vm12, %v8204_v19 }
 0x382   :  { %1020 = vmatpush.msra.mxu2 %v990_v54 }
 0x3f0   :  { %v981_v8 = vpop.f32.mrf.mxu1 }
 0x3f1   :  { %v982_v11 = vadd.f32 %v6560_v9, %v981_v8 }
 0x3f2   :  { %v761_v47 = vpop.f32.mrf.mxu2 }
 0x3f3   :  { %v762_v48 = vadd.f32 %v6561_v46, %v761_v47  ;;  %v987_v12 = vmax.f32 %v982_v11, 0.0 }
 0x3f5   :  { %v767_v51 = vmul.f32 %v762_v48, %v762_v48 }
 0x3f7   :  { %v769_v53 = vmul.f32 %v767_v51, %v762_v48 }
 0x3f8   :  { %v984_v13 = vpop.f32.mrf.mxu1 }
 0x3f9   :  { %v771_v55 = vmul.f32 0.044715, %v769_v53  ;;  %v985_v14 = vadd.f32 %v6560_v9, %v984_v13 }
 0x3fa   :  { %v764_v56 = vpop.f32.mrf.mxu2 }
 0x3fb   :  { %v773_v57 = vadd.f32 %v771_v55, %v762_v48  ;;  %v765_v58 = vadd.f32 %v6561_v46, %v764_v56  ;;  %v988_v16 = vmax.f32 %v985_v14, 0.0 }
 0x3fd   :  { %v775_v59 = vmul.f32 0.7978846, %v773_v57  ;;  %v768_v60 = vmul.f32 %v765_v58, %v765_v58 }
 0x3ff   :  { %6606 = vtanh.f32 %v775_v59  ;;  %v770_v61 = vmul.f32 %v768_v60, %v765_v58 }
 0x401   :  { %v772_v62 = vmul.f32 0.044715, %v770_v61 }
 0x403   :  { %v774_v63 = vadd.f32 %v772_v62, %v765_v58 }
 0x405   :  { %v6607_v0 = vpop.eup %6606  ;;  %v776_v1 = vmul.f32 0.7978846, %v774_v63 }
 0x406   :  { %v779_v2 = vadd.f32 1.0, %v6607_v0 }
 0x407   :  { %6608 = vtanh.f32 %v776_v1 }
 0x408   :  { %v781_v3 = vmul.f32 0.5, %v779_v2 }
 0x40a   :  { %v783_v4 = vmul.f32 %v781_v3, %v762_v48 }
 0x40c   :  { %6083 = vmatmul.msk.f32.vlgmr.msrb.gmra.mxu2 %vm797_vm11, %v783_v4 }
 0x40d   :  { %v6609_v5 = vpop.eup %6608  ;;  %1267 = vmatpush.msrb.mxu2 %v8195_v17 }
 0x40e   :  { %v780_v6 = vadd.f32 1.0, %v6609_v5 }
 0x40f   :  { %1268 = vmatpush.msrb.mxu2 %v8204_v19 }
 0x410   :  { %v782_v7 = vmul.f32 0.5, %v780_v6 }
 0x412   :  { %v784_v10 = vmul.f32 %v782_v7, %v765_v58 }
 0x414   :  { %6084 = vmatmul.msk.f32.gmra.mxu2 %vm797_vm11, %v784_v10 }
 0x41c   :  { %6099 = vmatmul.msk.f32.vlgmr.msra.gmra.mxu2 %vm667_vm2, %v987_v12 }
 0x41d   :  { %1515 = vmatpush.msra.mxu2 %v8195_v17 }
 0x41f   :  { %1516 = vmatpush.msra.mxu2 %v8204_v19 }
 0x424   :  { %6100 = vmatmul.msk.f32.gmra.mxu2 %vm667_vm2, %v988_v16 }
 0x48f   :  { %v8224_v20 = vpop.f32.mrf.mxu2 }
 0x497   :  { %v8226_v22 = vpop.f32.mrf.mxu2 }
 0x49f   :  { %v1022_v25 = vpop.f32.mrf.mxu2 }
 0x4a0   :  { %v1023_v26 = vadd.f32 %v6563_v23, %v1022_v25 }
 0x4a2   :  { %v8230_v27 = vadd.f32 %v1023_v26, %v8169_v29 }
 0x4a4   :  { %1414 = vrot.lane.b32.xlu1 %v8230_v27, %s7644_s22  ;;  %1290 = vrot.lane.b32.xlu0 %v8230_v27, %s7645_s23 }
 0x4a5   :  { %1166 = vrot.lane.b32.xlu2 %v8230_v27, %s7646_s8  ;;  %6103 = vmatmul.msk.f32.vlgmr.msra.gmra.mxu3 %vm1033_vm12, %v8230_v27 }
 0x4a6   :  { %6133 = vmatpush.xpose.msk.msra.mxu3 %vm1033_vm12, %v8195_v17 }
 0x4a7   :  { %v1025_v28 = vpop.f32.mrf.mxu2 }
 0x4a8   :  { %v1026_v30 = vadd.f32 %v6563_v23, %v1025_v28  ;;  %v1076_v28 = vlaneseq }
 0x4aa   :  { %v8241_v29 = vadd.f32 %v1026_v30, %v8176_v18  ;;  %6134 = vmatpush.xpose.msk.msra.mxu3 %vm1033_vm12, %v8204_v19 }
 0x4ac   :  { %1664 = vrot.lane.b32.xlu1 %v8241_v29, %s7647_s21  ;;  %1662 = vrot.lane.b32.xlu0 %v8230_v27, %s7647_s21  ;;  %s10172_s21 = sld [smem:[#allocation73_spill]] }
 0x4ad   :  { %1168 = vrot.lane.b32.xlu2 %v8241_v29, %s7646_s8  ;;  %6104 = vmatmul.msk.f32.gmra.mxu3 %vm1033_vm12, %v8241_v29  ;;  %s10171_s8 = sld [smem:[#allocation74_spill]] }
 0x4b4   :  { %1788 = vrot.lane.b32.xlu1 %v8241_v29, %s7648_s12  ;;  %1786 = vrot.lane.b32.xlu0 %v8230_v27, %s7648_s12 }
 0x4b5   :  { %1292 = vrot.lane.b32.xlu2 %v8241_v29, %s7645_s23 }
 0x4bc   :  { %1912 = vrot.lane.b32.xlu0 %v8241_v29, %s7649_s19 }
 0x4bd   :  { %1416 = vrot.lane.b32.xlu2 %v8241_v29, %s7644_s22  ;;  %s10170_s22 = sld [smem:[#allocation68_spill]] }
 0x4c5   :  { %1538 = vrot.lane.b32.xlu2 %v8230_v27, %s7650_s26 }
 0x4cd   :  { %1540 = vrot.lane.b32.xlu2 %v8241_v29, %s7650_s26 }
 0x4d5   :  { %1910 = vrot.lane.b32.xlu2 %v8230_v27, %s7649_s19  ;;  %s10175_s19 = sld [smem:[#allocation71_spill]] }
 0x4ff   :  { %v8263_v31 = vpop.permute.xlu2 %1166 }
 0x500   :  { %10138 = vst [vmem:[#allocation105_spill] sm:$0xff] %v8263_v31  ;;  %6111 = vmatmul.msk.f32.vlgmr.msra.gmra.mxu1 %vm1033_vm12, %v8263_v31 }
 0x501   :  { %6141 = vmatpush.xpose.msk.msra.mxu1 %vm1033_vm12, %v8195_v17 }
 0x505   :  { %6142 = vmatpush.xpose.msk.msra.mxu1 %vm1033_vm12, %v8204_v19 }
 0x507   :  { %v8271_v32 = vpop.permute.xlu2 %1168 }
 0x508   :  { %6112 = vmatmul.msk.f32.gmra.mxu1 %vm1033_vm12, %v8271_v32 }
 0x50f   :  { %v8275_v33 = vpop.permute.xlu2 %1292 }
 0x510   :  { %10139 = vst [vmem:[#allocation106_spill] sm:$0xff] %v8275_v33 }
 0x516   :  { %v8277_v34 = vpop.permute.xlu1 %1414  ;;  %v8279_v35 = vpop.permute.xlu0 %1290 }
 0x517   :  { %10140 = vst [vmem:[#allocation107_spill] sm:$0xff] %v8279_v35  ;;  %6119 = vmatmul.msk.f32.vlgmr.msrb.gmra.mxu3 %vm1033_vm12, %v8279_v35  ;;  %6127 = vmatmul.msk.f32.vlgmr.msrb.gmra.mxu1 %vm1033_vm12, %v8277_v34  ;;  %v8285_v37 = vpop.permute.xlu2 %1416 }
 0x518   :  { %10141 = vst [vmem:[#allocation108_spill] sm:$0xff] %v8285_v37  ;;  %6149 = vmatpush.xpose.msk.msrb.mxu3 %vm1033_vm12, %v8195_v17  ;;  %6157 = vmatpush.xpose.msk.msrb.mxu1 %vm1033_vm12, %v8195_v17 }
 0x51c   :  { %6150 = vmatpush.xpose.msk.msrb.mxu3 %vm1033_vm12, %v8204_v19  ;;  %6158 = vmatpush.xpose.msk.msrb.mxu1 %vm1033_vm12, %v8204_v19 }
 0x51e   :  { %v8301_v38 = vpop.permute.xlu0 %1662  ;;  %v8316_v24 = vpop.permute.xlu1 %1664 }
 0x51f   :  { %6120 = vmatmul.msk.f32.gmra.mxu3 %vm1033_vm12, %v8275_v33  ;;  %6128 = vmatmul.msk.f32.gmra.mxu1 %vm1033_vm12, %v8285_v37  ;;  %v8299_v18 = vpop.permute.xlu2 %1538  ;;  %10143 = vst [vmem:[#allocation110_spill] sm:$0xff] %v8301_v38 }
 0x520   :  { %10142 = vst [vmem:[#allocation109_spill] sm:$0xff] %v8299_v18 }
 0x521   :  { %10144 = vst [vmem:[#allocation111_spill] sm:$0xff] %v8316_v24 }
 0x526   :  { %v8322_v45 = vpop.permute.xlu0 %1786  ;;  %v8330_v47 = vpop.permute.xlu1 %1788 }
 0x527   :  { %6135 = vmatmul.msk.f32.vlgmr.msra.gmra.mxu3 %vm1033_vm12, %v8299_v18  ;;  %6143 = vmatmul.msk.f32.vlgmr.msra.gmra.mxu1 %vm1033_vm12, %v8301_v38  ;;  %v8312_v43 = vpop.permute.xlu2 %1540  ;;  %10146 = vst [vmem:[#allocation113_spill] sm:$0xff] %v8330_v47 }
 0x528   :  { %v1063_v40 = vpop.f32.mrf.mxu3 }
 0x529   :  { %v1069_v41 = vmul.f32 -2.0, %v1063_v40 }
 0x52b   :  { %v8310_v42 = vadd.f32 %v8307_v39, %v1069_v41 }
 0x52d   :  { %v1079_v44 = vsel %vm1078_vm13, %v8310_v42, inf }
 0x52e   :  { %1080 = vmin.xlane.f32.xlu1 %v1079_v44  ;;  %v8332_v48 = vpop.permute.xlu0 %1912 }
 0x52f   :  { %6136 = vmatmul.msk.f32.gmra.mxu3 %vm1033_vm12, %v8312_v43  ;;  %6144 = vmatmul.msk.f32.gmra.mxu1 %vm1033_vm12, %v8316_v24  ;;  %v8324_v46 = vpop.permute.xlu2 %1910 }
 0x530   :  { %10145 = vst [vmem:[#allocation112_spill] sm:$0xff] %v8324_v46  ;;  %v1066_v51 = vpop.f32.mrf.mxu3 }
 0x531   :  { %v1070_v53 = vmul.f32 -2.0, %v1066_v51  ;;  %v8386_v51 = vand.u32 127, %v1076_v28 }
 0x533   :  { %v8344_v57 = vadd.f32 %v8307_v39, %v1070_v53 }
 0x535   :  { %v1082_v60 = vsel %vm1078_vm13, %v8344_v57, inf }
 0x537   :  { %6151 = vmatmul.msk.f32.vlgmr.msrb.gmra.mxu3 %vm1033_vm12, %v8322_v45  ;;  %6159 = vmatmul.msk.f32.vlgmr.msrb.gmra.mxu1 %vm1033_vm12, %v8324_v46 }
 0x53f   :  { %6152 = vmatmul.msk.f32.gmra.mxu3 %vm1033_vm12, %v8330_v47  ;;  %6160 = vmatmul.msk.f32.gmra.mxu1 %vm1033_vm12, %v8332_v48 }
 0x57d   :  { %v1191_v49 = vpop.f32.mrf.mxu1 }
 0x57e   :  { %v1197_v50 = vmul.f32 -2.0, %v1191_v49 }
 0x580   :  { %v8339_v52 = vadd.f32 %v8307_v39, %v1197_v50 }
 0x582   :  { %v1201_v54 = vsel %vm1078_vm13, %v8339_v52, inf }
 0x583   :  { %1202 = vmin.xlane.f32.xlu2 %v1201_v54 }
 0x585   :  { %v1194_v55 = vpop.f32.mrf.mxu1 }
 0x586   :  { %v1198_v56 = vmul.f32 -2.0, %v1194_v55 }
 0x588   :  { %v8347_v58 = vadd.f32 %v8307_v39, %v1198_v56 }
 0x58a   :  { %v1204_v59 = vsel %vm1078_vm13, %v8347_v58, inf }
 0x58b   :  { %1205 = vmin.xlane.f32.xlu0 %v1204_v59  ;;  %1083 = vmin.xlane.f32.xlu2 %v1082_v60 }
 0x594   :  { %v1439_v61 = vpop.f32.mrf.mxu1 }
 0x595   :  { %v1445_v62 = vmul.f32 -2.0, %v1439_v61 }
 0x597   :  { %v8354_v63 = vadd.f32 %v8307_v39, %v1445_v62 }
 0x599   :  { %v1449_v0 = vsel %vm1078_vm13, %v8354_v63, inf }
 0x59a   :  { %1450 = vmin.xlane.f32.xlu1 %v1449_v0  ;;  %v1315_v1 = vpop.f32.mrf.mxu3 }
 0x59b   :  { %v1321_v2 = vmul.f32 -2.0, %v1315_v1 }
 0x59c   :  { %v1442_v3 = vpop.f32.mrf.mxu1 }
 0x59d   :  { %v1446_v4 = vmul.f32 -2.0, %v1442_v3  ;;  %v8359_v5 = vadd.f32 %v8307_v39, %v1321_v2 }
 0x59f   :  { %v1325_v6 = vsel %vm1078_vm13, %v8359_v5, inf  ;;  %v8364_v7 = vadd.f32 %v8307_v39, %v1446_v4 }
 0x5a0   :  { %1326 = vmin.xlane.f32.xlu0 %v1325_v6 }
 0x5a1   :  { %v1452_v8 = vsel %vm1078_vm13, %v8364_v7, inf  ;;  %v1081_v44 = vpop.xlane.xlu1 %1080 }
 0x5a2   :  { %v1318_v9 = vpop.f32.mrf.mxu3  ;;  %1453 = vmin.xlane.f32.xlu2 %v1452_v8  ;;  %vm1085_vm14 = vcmp.le.f32.partialorder %v8310_v42, %v1081_v44 }
 0x5a3   :  { %v1322_v10 = vmul.f32 -2.0, %v1318_v9  ;;  %v1087_v56 = vsel %vm1085_vm14, %v8386_v51, 16 }
 0x5a4   :  { %v1687_v11 = vpop.f32.mrf.mxu1  ;;  %v8401_v42 = vsel %vm1078_vm13, %v1087_v56, 2147483647 }
 0x5a5   :  { %v1693_v12 = vmul.f32 -2.0, %v1687_v11  ;;  %v8369_v13 = vadd.f32 %v8307_v39, %v1322_v10  ;;  %v1091_v2 = vshra.s32 %v8401_v42, 16 }
 0x5a7   :  { %v1328_v14 = vsel %vm1078_vm13, %v8369_v13, inf  ;;  %v8374_v16 = vadd.f32 %v8307_v39, %v1693_v12  ;;  %v8406_v4 = vcvt.s32.f32 %v1091_v2 }
 0x5a8   :  { %1329 = vmin.xlane.f32.xlu1 %v1328_v14 }
 0x5a9   :  { %v1697_v23 = vsel %vm1078_vm13, %v8374_v16, inf }
 0x5aa   :  { %1698 = vmin.xlane.f32.xlu0 %v1697_v23  ;;  %v1563_v25 = vpop.f32.mrf.mxu3 }
 0x5ab   :  { %v1569_v26 = vmul.f32 -2.0, %v1563_v25 }
 0x5ac   :  { %v1690_v30 = vpop.f32.mrf.mxu1 }
 0x5ad   :  { %v1694_v40 = vmul.f32 -2.0, %v1690_v30  ;;  %v8379_v41 = vadd.f32 %v8307_v39, %v1569_v26 }
 0x5af   :  { %v1573_v49 = vsel %vm1078_vm13, %v8379_v41, inf  ;;  %v8384_v50 = vadd.f32 %v8307_v39, %v1694_v40 }
 0x5b0   :  { %1574 = vmin.xlane.f32.xlu2 %v1573_v49 }
 0x5b1   :  { %v1700_v53 = vsel %vm1078_vm13, %v8384_v50, inf }
 0x5b2   :  { %v1566_v54 = vpop.f32.mrf.mxu3  ;;  %1701 = vmin.xlane.f32.xlu1 %v1700_v53 }
 0x5b3   :  { %v1570_v55 = vmul.f32 -2.0, %v1566_v54 }
 0x5b4   :  { %v1935_v59 = vpop.f32.mrf.mxu1 }
 0x5b5   :  { %v1941_v60 = vmul.f32 -2.0, %v1935_v59  ;;  %v8393_v61 = vadd.f32 %v8307_v39, %v1570_v55 }
 0x5b7   :  { %v1576_v62 = vsel %vm1078_vm13, %v8393_v61, inf  ;;  %v8398_v0 = vadd.f32 %v8307_v39, %v1941_v60 }
 0x5b8   :  { %1577 = vmin.xlane.f32.xlu0 %v1576_v62 }
 0x5b9   :  { %v1945_v1 = vsel %vm1078_vm13, %v8398_v0, inf }
 0x5ba   :  { %1946 = vmin.xlane.f32.xlu1 %v1945_v1  ;;  %v1811_v11 = vpop.f32.mrf.mxu3 }
 0x5bb   :  { %v1817_v26 = vmul.f32 -2.0, %v1811_v11 }
 0x5bc   :  { %v1938_v3 = vpop.f32.mrf.mxu1 }
 0x5bd   :  { %v1942_v6 = vmul.f32 -2.0, %v1938_v3  ;;  %v8430_v44 = vadd.f32 %v8307_v39, %v1817_v26 }
 0x5bf   :  { %v8410_v8 = vadd.f32 %v8307_v39, %v1942_v6 }
 0x5c0   :  { %1094 = vmin.xlane.f32.xlu0 %v8406_v4 }
 0x5c1   :  { %v1948_v9 = vsel %vm1078_vm13, %v8410_v8, inf }
 0x5c2   :  { %v1814_v49 = vpop.f32.mrf.mxu3 }
 0x5c3   :  { %v1818_v56 = vmul.f32 -2.0, %v1814_v49 }
 0x5c5   :  { %v8444_v60 = vadd.f32 %v8307_v39, %v1818_v56 }
 0x5c7   :  { %v1824_v2 = vsel %vm1078_vm13, %v8444_v60, inf }
 0x5c8   :  { %1949 = vmin.xlane.f32.xlu0 %v1948_v9 }
 0x5f6   :  { %v1203_v10 = vpop.xlane.xlu2 %1202 }
 0x5f7   :  { %vm1207_vm15 = vcmp.le.f32.partialorder %v8339_v52, %v1203_v10 }
 0x5f8   :  { %v1209_v12 = vsel %vm1207_vm15, %v8386_v51, 16 }
 0x5f9   :  { %v8417_v14 = vsel %vm1078_vm13, %v1209_v12, 2147483647 }
 0x5fa   :  { %v1213_v23 = vshra.s32 %v8417_v14, 16 }
 0x5fc   :  { %v8420_v25 = vcvt.s32.f32 %v1213_v23 }
 0x5fe   :  { %v1206_v28 = vpop.xlane.xlu0 %1205  ;;  %1216 = vmin.xlane.f32.xlu2 %v8420_v25  ;;  %v1084_v30 = vpop.xlane.xlu2 %1083 }
 0x5ff   :  { %vm1208_vm3 = vcmp.le.f32.partialorder %v8347_v58, %v1206_v28  ;;  %vm1086_vm4 = vcmp.le.f32.partialorder %v8344_v57, %v1084_v30  ;;  %v1821_v58 = vsel %vm1078_vm13, %v8430_v44, inf }
 0x600   :  { %v1210_v52 = vsel %vm1208_vm3, %v8386_v51, 16  ;;  %v1088_v53 = vsel %vm1086_vm4, %v8386_v51, 16 }
 0x601   :  { %v8427_v40 = vsel %vm1078_vm13, %v1210_v52, 2147483647  ;;  %v8439_v57 = vsel %vm1078_vm13, %v1088_v53, 2147483647 }
 0x602   :  { %v1228_v54 = vshra.s32 %v8427_v40, 16  ;;  %v1106_v59 = vshra.s32 %v8439_v57, 16 }
 0x604   :  { %v8434_v55 = vcvt.s32.f32 %v1228_v54  ;;  %v8446_v62 = vcvt.s32.f32 %v1106_v59 }
 0x606   :  { %1231 = vmin.xlane.f32.xlu1 %v8434_v55  ;;  %1822 = vmin.xlane.f32.xlu2 %v1821_v58 }
 0x60d   :  { %v1451_v1 = vpop.xlane.xlu1 %1450 }
 0x60e   :  { %vm1455_vm5 = vcmp.le.f32.partialorder %v8354_v63, %v1451_v1  ;;  %1825 = vmin.xlane.f32.xlu1 %v1824_v2  ;;  %1109 = vmin.xlane.f32.xlu2 %v8446_v62 }
 0x60f   :  { %v1457_v3 = vsel %vm1455_vm5, %v8386_v51, 16 }
 0x610   :  { %v8454_v6 = vsel %vm1078_vm13, %v1457_v3, 2147483647 }
 0x611   :  { %v1461_v9 = vshra.s32 %v8454_v6, 16 }
 0x613   :  { %v1327_v39 = vpop.xlane.xlu0 %1326  ;;  %v8457_v10 = vcvt.s32.f32 %v1461_v9 }
 0x614   :  { %vm1331_vm6 = vcmp.le.f32.partialorder %v8359_v5, %v1327_v39 }
 0x615   :  { %v1333_v11 = vsel %vm1331_vm6, %v8386_v51, 16  ;;  %1464 = vmin.xlane.f32.xlu0 %v8457_v10  ;;  %v1454_v63 = vpop.xlane.xlu2 %1453 }
 0x616   :  { %vm1456_vm7 = vcmp.le.f32.partialorder %v8364_v7, %v1454_v63  ;;  %v8464_v12 = vsel %vm1078_vm13, %v1333_v11, 2147483647 }
 0x617   :  { %v1458_v23 = vsel %vm1456_vm7, %v8386_v51, 16  ;;  %v1337_v26 = vshra.s32 %v8464_v12, 16 }
 0x618   :  { %v8469_v28 = vsel %vm1078_vm13, %v1458_v23, 2147483647 }
 0x619   :  { %v8471_v30 = vcvt.s32.f32 %v1337_v26  ;;  %v1476_v5 = vshra.s32 %v8469_v28, 16 }
 0x61b   :  { %v1330_v52 = vpop.xlane.xlu1 %1329  ;;  %1340 = vmin.xlane.f32.xlu2 %v8471_v30  ;;  %v8475_v49 = vcvt.s32.f32 %v1476_v5 }
 0x61c   :  { %vm1332_vm8 = vcmp.le.f32.partialorder %v8369_v13, %v1330_v52 }
 0x61d   :  { %v1334_v7 = vsel %vm1332_vm8, %v8386_v51, 16  ;;  %v1699_v53 = vpop.xlane.xlu0 %1698  ;;  %1479 = vmin.xlane.f32.xlu1 %v8475_v49 }
 0x61e   :  { %vm1703_vm9 = vcmp.le.f32.partialorder %v8374_v16, %v1699_v53  ;;  %v8482_v54 = vsel %vm1078_vm13, %v1334_v7, 2147483647 }
 0x61f   :  { %v1705_v56 = vsel %vm1703_vm9, %v8386_v51, 16  ;;  %v1352_v58 = vshra.s32 %v8482_v54, 16 }
 0x620   :  { %v8487_v59 = vsel %vm1078_vm13, %v1705_v56, 2147483647  ;;  %v1090_v56 = vand.u32 65535, %v8401_v42 }
 0x621   :  { %v8489_v1 = vcvt.s32.f32 %v1352_v58  ;;  %v1709_v13 = vshra.s32 %v8487_v59, 16 }
 0x623   :  { %1355 = vmin.xlane.f32.xlu0 %v8489_v1  ;;  %v1575_v2 = vpop.xlane.xlu2 %1574  ;;  %v8493_v3 = vcvt.s32.f32 %v1709_v13 }
 0x624   :  { %vm1579_vm10 = vcmp.le.f32.partialorder %v8379_v41, %v1575_v2  ;;  %v1092_v2 = vcvt.s32.f32 %v1090_v56 }
 0x625   :  { %v1581_v16 = vsel %vm1579_vm10, %v8386_v51, 16  ;;  %v1702_v9 = vpop.xlane.xlu1 %1701  ;;  %1712 = vmin.xlane.f32.xlu2 %v8493_v3 }
 0x626   :  { %vm1704_vm14 = vcmp.le.f32.partialorder %v8384_v50, %v1702_v9  ;;  %v8500_v39 = vsel %vm1078_vm13, %v1581_v16, 2147483647  ;;  %v1212_v9 = vand.u32 65535, %v8417_v14 }
 0x627   :  { %v1706_v11 = vsel %vm1704_vm14, %v8386_v51, 16  ;;  %v1585_v63 = vshra.s32 %v8500_v39, 16 }
 0x628   :  { %v8505_v23 = vsel %vm1078_vm13, %v1706_v11, 2147483647 }
 0x629   :  { %v8507_v26 = vcvt.s32.f32 %v1585_v63  ;;  %v1724_v41 = vshra.s32 %v8505_v23, 16  ;;  %v1214_v63 = vcvt.s32.f32 %v1212_v9 }
 0x62b   :  { %v1578_v5 = vpop.xlane.xlu0 %1577  ;;  %1588 = vmin.xlane.f32.xlu1 %v8507_v26  ;;  %v8511_v52 = vcvt.s32.f32 %v1724_v41 }
 0x62c   :  { %vm1580_vm15 = vcmp.le.f32.partialorder %v8393_v61, %v1578_v5 }
 0x62d   :  { %v1582_v50 = vsel %vm1580_vm15, %v8386_v51, 16  ;;  %1727 = vmin.xlane.f32.xlu0 %v8511_v52  ;;  %v1947_v16 = vpop.xlane.xlu1 %1946 }
 0x62e   :  { %v8517_v7 = vsel %vm1078_vm13, %v1582_v50, 2147483647  ;;  %vm1951_vm4 = vcmp.le.f32.partialorder %v8398_v0, %v1947_v16  ;;  %v1227_v0 = vand.u32 65535, %v8427_v40 }
 0x62f   :  { %v1600_v53 = vshra.s32 %v8517_v7, 16  ;;  %v1953_v11 = vsel %vm1951_vm4, %v8386_v51, 16 }
 0x630   :  { %v8536_v50 = vsel %vm1078_vm13, %v1953_v11, 2147483647 }
 0x631   :  { %v8521_v58 = vcvt.s32.f32 %v1600_v53 }
 0x633   :  { %v8523_v13 = vpop.xlane.xlu0 %1094  ;;  %1603 = vmin.xlane.f32.xlu1 %v8521_v58 }
 0x634   :  { %vm1096_vm3 = vcmp.eq.f32.partialorder %v8406_v4, %v8523_v13  ;;  %v1957_v4 = vshra.s32 %v8536_v50, 16 }
 0x635   :  { %v1097_v61 = vsel %vm1096_vm3, %v1092_v2, inf  ;;  %v1229_v2 = vcvt.s32.f32 %v1227_v0 }
 0x636   :  { %1098 = vmin.xlane.f32.xlu0 %v1097_v61 }
 0x63b   :  { %v1950_v41 = vpop.xlane.xlu0 %1949 }
 0x63c   :  { %vm1952_vm6 = vcmp.le.f32.partialorder %v8410_v8, %v1950_v41 }
 0x63d   :  { %v1954_v14 = vsel %vm1952_vm6, %v8386_v51, 16 }
 0x63e   :  { %v8551_v40 = vsel %vm1078_vm13, %v1954_v14, 2147483647  ;;  %v1460_v14 = vand.u32 65535, %v8454_v6  ;;  %v1475_v6 = vand.u32 65535, %v8469_v28  ;;  %v1708_v28 = vand.u32 65535, %v8487_v59 }
 0x63f   :  { %v1723_v59 = vand.u32 65535, %v8505_v23  ;;  %v1101_v23 = vcvt.f32.s32 %v8523_v13 }
 0x671   :  { %v8531_v42 = vpop.xlane.xlu2 %1216 }
 0x672   :  { %vm1218_vm5 = vcmp.eq.f32.partialorder %v8420_v25, %v8531_v42  ;;  %v8547_v25 = vcvt.s32.f32 %v1957_v4  ;;  %v1223_v13 = vcvt.f32.s32 %v8531_v42 }
 0x673   :  { %v1219_v5 = vsel %vm1218_vm5, %v1214_v63, inf }
 0x674   :  { %1220 = vmin.xlane.f32.xlu2 %v1219_v5 }
 0x679   :  { %v8542_v53 = vpop.xlane.xlu1 %1231  ;;  %v1823_v56 = vpop.xlane.xlu2 %1822 }
 0x67a   :  { %vm1827_vm7 = vcmp.le.f32.partialorder %v8430_v44, %v1823_v56  ;;  %vm1233_vm8 = vcmp.eq.f32.partialorder %v8434_v55, %v8542_v53  ;;  %v1105_v44 = vand.u32 65535, %v8439_v57  ;;  %v1972_v55 = vshra.s32 %v8551_v40, 16 }
 0x67b   :  { %v1829_v61 = vsel %vm1827_vm7, %v8386_v51, 16  ;;  %v1234_v8 = vsel %vm1233_vm8, %v1229_v2, inf }
 0x67c   :  { %1235 = vmin.xlane.f32.xlu1 %v1234_v8  ;;  %1960 = vmin.xlane.f32.xlu2 %v8547_v25  ;;  %v8555_v16 = vsel %vm1078_vm13, %v1829_v61, 2147483647  ;;  %v1107_v5 = vcvt.s32.f32 %v1105_v44  ;;  %v8566_v0 = vcvt.s32.f32 %v1972_v55 }
 0x67d   :  { %v1833_v9 = vshra.s32 %v8555_v16, 16 }
 0x67f   :  { %v8560_v11 = vcvt.s32.f32 %v1833_v9  ;;  %v1336_v9 = vand.u32 65535, %v8464_v12 }
 0x681   :  { %v1826_v63 = vpop.xlane.xlu1 %1825  ;;  %1836 = vmin.xlane.f32.xlu0 %v8560_v11  ;;  %v8563_v41 = vpop.xlane.xlu2 %1109  ;;  %v1338_v55 = vcvt.s32.f32 %v1336_v9 }
 0x682   :  { %vm1828_vm9 = vcmp.le.f32.partialorder %v8444_v60, %v1826_v63  ;;  %vm1111_vm10 = vcmp.eq.f32.partialorder %v8446_v62, %v8563_v41  ;;  %v1462_v60 = vcvt.s32.f32 %v1460_v14 }
 0x683   :  { %v1830_v4 = vsel %vm1828_vm9, %v8386_v51, 16  ;;  %v1112_v57 = vsel %vm1111_vm10, %v1107_v5, inf }
 0x684   :  { %1975 = vmin.xlane.f32.xlu1 %v8566_v0  ;;  %1113 = vmin.xlane.f32.xlu2 %v1112_v57  ;;  %v8574_v56 = vsel %vm1078_vm13, %v1830_v4, 2147483647  ;;  %v1351_v4 = vand.u32 65535, %v8482_v54  ;;  %v1584_v54 = vand.u32 65535, %v8500_v39  ;;  %v1599_v39 = vand.u32 65535, %v8517_v7 }
 0x685   :  { %v1848_v2 = vshra.s32 %v8574_v56, 16 }
 0x686   :  { %v1353_v14 = vcvt.s32.f32 %v1351_v4  ;;  %v1586_v9 = vcvt.s32.f32 %v1584_v54  ;;  %v1102_v4 = vshll.u32 %v1101_v23, 16  ;;  %v1956_v54 = vand.u32 65535, %v8536_v50 }
 0x687   :  { %v8581_v8 = vcvt.s32.f32 %v1848_v2  ;;  %v1832_v50 = vand.u32 65535, %v8555_v16 }
 0x688   :  { %v8577_v61 = vpop.xlane.xlu0 %1464 }
 0x689   :  { %vm1466_vm14 = vcmp.eq.f32.partialorder %v8457_v10, %v8577_v61  ;;  %v1477_v10 = vcvt.s32.f32 %v1475_v6 }
 0x68a   :  { %v1467_v62 = vsel %vm1466_vm14, %v1462_v60, inf  ;;  %v1710_v60 = vcvt.s32.f32 %v1708_v28 }
 0x68b   :  { %1468 = vmin.xlane.f32.xlu0 %v1467_v62 }
 0x68c   :  { %1851 = vmin.xlane.f32.xlu2 %v8581_v8 }
 0x68e   :  { %v8586_v44 = vpop.xlane.xlu2 %1340 }
 0x68f   :  { %vm1342_vm15 = vcmp.eq.f32.partialorder %v8471_v30, %v8586_v44 }
 0x690   :  { %v8590_v63 = vpop.xlane.xlu1 %1479  ;;  %v1343_v5 = vsel %vm1342_vm15, %v1338_v55, inf  ;;  %v1725_v55 = vcvt.s32.f32 %v1723_v59  ;;  %v1238_v59 = vcvt.f32.s32 %v8542_v53 }
 0x691   :  { %1344 = vmin.xlane.f32.xlu1 %v1343_v5  ;;  %vm1481_vm3 = vcmp.eq.f32.partialorder %v8475_v49, %v8590_v63 }
 0x692   :  { %v1482_v12 = vsel %vm1481_vm3, %v1477_v10, inf  ;;  %v1601_v10 = vcvt.s32.f32 %v1599_v39  ;;  %v1239_v42 = vshll.u32 %v1238_v59, 16 }
 0x693   :  { %1483 = vmin.xlane.f32.xlu0 %v1482_v12 }
 0x696   :  { %v8596_v57 = vpop.xlane.xlu0 %1355 }
 0x697   :  { %vm1357_vm4 = vcmp.eq.f32.partialorder %v8489_v1, %v8596_v57 }
 0x698   :  { %v8600_v30 = vpop.xlane.xlu2 %1712  ;;  %v1358_v2 = vsel %vm1357_vm4, %v1353_v14, inf }
 0x699   :  { %1359 = vmin.xlane.f32.xlu2 %v1358_v2  ;;  %vm1714_vm5 = vcmp.eq.f32.partialorder %v8493_v3, %v8600_v30  ;;  %v1224_v2 = vshll.u32 %v1223_v13, 16 }
 0x69a   :  { %v1715_v49 = vsel %vm1714_vm5, %v1710_v60, inf }
 0x69b   :  { %1716 = vmin.xlane.f32.xlu1 %v1715_v49 }
 0x69e   :  { %v8606_v62 = vpop.xlane.xlu1 %1588 }
 0x69f   :  { %vm1590_vm6 = vcmp.eq.f32.partialorder %v8507_v26, %v8606_v62 }
 0x6a0   :  { %v8610_v1 = vpop.xlane.xlu0 %1727  ;;  %v1591_v6 = vsel %vm1590_vm6, %v1586_v9, inf }
 0x6a1   :  { %1592 = vmin.xlane.f32.xlu0 %v1591_v6  ;;  %vm1729_vm7 = vcmp.eq.f32.partialorder %v8511_v52, %v8610_v1  ;;  %v7651_v52 = vmov 0.0  }
 0x6a2   :  { %v1730_v3 = vsel %vm1729_vm7, %v1725_v55, inf }
 0x6a3   :  { %1731 = vmin.xlane.f32.xlu2 %v1730_v3  ;;  %v1958_v3 = vcvt.s32.f32 %v1956_v54 }
 0x6a6   :  { %v8616_v5 = vpop.xlane.xlu1 %1603 }
 0x6a7   :  { %vm1605_vm8 = vcmp.eq.f32.partialorder %v8521_v58, %v8616_v5 }
 0x6a8   :  { %v1606_v26 = vsel %vm1605_vm8, %v1601_v10, inf  ;;  %v1971_v10 = vand.u32 65535, %v8551_v40 }
 0x6a9   :  { %v1099_v12 = vpop.xlane.xlu0 %1098  ;;  %1607 = vmin.xlane.f32.xlu1 %v1606_v26  ;;  %v1116_v26 = vcvt.f32.s32 %v8563_v41 }
 0x6aa   :  { %v1100_v28 = vcvt.f32.s32 %v1099_v12  ;;  %v1973_v40 = vcvt.s32.f32 %v1971_v10 }
 0x6ac   :  { %v1103_v14 = vadd.s32 %v1102_v4, %v1100_v28  ;;  %v1834_v4 = vcvt.s32.f32 %v1832_v50 }
 0x6ae   :  { %vm1119_vm9 = vcmp.eq.s32.totalorder %v8386_v51, %v1103_v14 }
 0x6af   :  { %v6105_v7 = vsel %vm1119_vm9, 1.0, %v7651_v52 }
 0x6b0   :  { %6107 = vmatmul.msk.f32.vlgmr.msra.gmra.mxu0 %vm1078_vm13, %v6105_v7  ;;  %v1117_v7 = vshll.u32 %v1116_v26, 16  ;;  %v1362_v26 = vcvt.f32.s32 %v8596_v57 }
 0x6b1   :  { %1639 = vmatpush.msra.mxu0 %v8195_v17 }
 0x6b3   :  { %1640 = vmatpush.msra.mxu0 %v8204_v19 }
 0x6e7   :  { %v1221_v58 = vpop.xlane.xlu2 %1220 }
 0x6e8   :  { %v1222_v60 = vcvt.f32.s32 %v1221_v58 }
 0x6ea   :  { %v1225_v49 = vadd.s32 %v1224_v2, %v1222_v60  ;;  %v1471_v2 = vcvt.f32.s32 %v8577_v61 }
 0x6ec   :  { %vm1241_vm10 = vcmp.eq.s32.totalorder %v8386_v51, %v1225_v49  ;;  %v1472_v54 = vshll.u32 %v1471_v2, 16 }
 0x6ed   :  { %v6113_v9 = vsel %vm1241_vm10, 1.0, %v7651_v52 }
 0x6ee   :  { %6115 = vmatmul.msk.f32.vlgmr.msrb.gmra.mxu2 %vm1078_vm13, %v6113_v9 }
 0x6ef   :  { %v1236_v6 = vpop.xlane.xlu1 %1235  ;;  %v8631_v55 = vpop.xlane.xlu2 %1960  ;;  %1763 = vmatpush.msrb.mxu2 %v8195_v17 }
 0x6f0   :  { %v1237_v39 = vcvt.f32.s32 %v1236_v6  ;;  %vm1962_vm14 = vcmp.eq.f32.partialorder %v8547_v25, %v8631_v55 }
 0x6f1   :  { %v1963_v53 = vsel %vm1962_vm14, %v1958_v3, inf  ;;  %1764 = vmatpush.msrb.mxu2 %v8204_v19 }
 0x6f2   :  { %v1240_v23 = vadd.s32 %v1239_v42, %v1237_v39  ;;  %1964 = vmin.xlane.f32.xlu0 %v1963_v53 }
 0x6f4   :  { %v8640_v12 = vpop.xlane.xlu0 %1836  ;;  %vm1242_vm15 = vcmp.eq.s32.totalorder %v8386_v51, %v1240_v23 }
 0x6f5   :  { %v6114_v28 = vsel %vm1242_vm15, 1.0, %v7651_v52  ;;  %vm1838_vm3 = vcmp.eq.f32.partialorder %v8560_v11, %v8640_v12  ;;  %v1847_v11 = vand.u32 65535, %v8574_v56  ;;  %v1486_v56 = vcvt.f32.s32 %v8590_v63 }
 0x6f6   :  { %6116 = vmatmul.msk.f32.gmra.mxu2 %vm1078_vm13, %v6114_v28  ;;  %v1839_v25 = vsel %vm1838_vm3, %v1834_v4, inf  ;;  %v1719_v28 = vcvt.f32.s32 %v8600_v30  ;;  %v1595_v30 = vcvt.f32.s32 %v8606_v62 }
 0x6f7   :  { %v8647_v16 = vpop.xlane.xlu1 %1975  ;;  %1840 = vmin.xlane.f32.xlu2 %v1839_v25  ;;  %v1114_v14 = vpop.xlane.xlu2 %1113  ;;  %v1849_v6 = vcvt.s32.f32 %v1847_v11 }
 0x6f8   :  { %v1115_v41 = vcvt.f32.s32 %v1114_v14  ;;  %vm1977_vm4 = vcmp.eq.f32.partialorder %v8566_v0, %v8647_v16  ;;  %v1347_v0 = vcvt.f32.s32 %v8586_v44 }
 0x6f9   :  { %v1978_v13 = vsel %vm1977_vm4, %v1973_v40, inf  ;;  %v1363_v40 = vshll.u32 %v1362_v26, 16  ;;  %v1843_v26 = vcvt.f32.s32 %v8640_v12 }
 0x6fa   :  { %v1118_v58 = vadd.s32 %v1117_v7, %v1115_v41  ;;  %1979 = vmin.xlane.f32.xlu1 %v1978_v13  ;;  %v1348_v50 = vshll.u32 %v1347_v0, 16  ;;  %v1720_v41 = vshll.u32 %v1719_v28, 16 }
 0x6fc   :  { %vm1120_vm5 = vcmp.eq.s32.totalorder %v8386_v51, %v1118_v58 }
 0x6fd   :  { %v6106_v60 = vsel %vm1120_vm5, 1.0, %v7651_v52 }
 0x6fe   :  { %6108 = vmatmul.msk.f32.gmra.mxu0 %vm1078_vm13, %v6106_v60  ;;  %v1469_v49 = vpop.xlane.xlu0 %1468  ;;  %v1734_v60 = vcvt.f32.s32 %v8610_v1 }
 0x6ff   :  { %v1470_v59 = vcvt.f32.s32 %v1469_v49  ;;  %v8656_v9 = vpop.xlane.xlu2 %1851 }
 0x700   :  { %vm1853_vm6 = vcmp.eq.f32.partialorder %v8581_v8, %v8656_v9  ;;  %v1487_v8 = vshll.u32 %v1486_v56, 16  ;;  %v1735_v62 = vshll.u32 %v1734_v60, 16 }
 0x701   :  { %v1473_v61 = vadd.s32 %v1472_v54, %v1470_v59  ;;  %v1854_v3 = vsel %vm1853_vm6, %v1849_v6, inf }
 0x702   :  { %1855 = vmin.xlane.f32.xlu0 %v1854_v3 }
 0x703   :  { %vm1489_vm7 = vcmp.eq.s32.totalorder %v8386_v51, %v1473_v61  ;;  %v1610_v61 = vcvt.f32.s32 %v8616_v5 }
 0x704   :  { %v1345_v42 = vpop.xlane.xlu1 %1344  ;;  %v6129_v39 = vsel %vm1489_vm7, 1.0, %v7651_v52 }
 0x705   :  { %v1346_v53 = vcvt.f32.s32 %v1345_v42  ;;  %6131 = vmatmul.msk.f32.vlgmr.msra.gmra.mxu2 %vm1078_vm13, %v6129_v39  ;;  %v1611_v39 = vshll.u32 %v1610_v61, 16 }
 0x706   :  { %v1484_v23 = vpop.xlane.xlu0 %1483  ;;  %2011 = vmatpush.msra.mxu2 %v8195_v17 }
 0x707   :  { %v1349_v10 = vadd.s32 %v1348_v50, %v1346_v53  ;;  %v1485_v44 = vcvt.f32.s32 %v1484_v23  ;;  %v1967_v23 = vcvt.f32.s32 %v8631_v55 }
 0x708   :  { %2012 = vmatpush.msra.mxu2 %v8204_v19 }
 0x709   :  { %vm1365_vm8 = vcmp.eq.s32.totalorder %v8386_v51, %v1349_v10  ;;  %v1488_v63 = vadd.s32 %v1487_v8, %v1485_v44  ;;  %v1968_v10 = vshll.u32 %v1967_v23, 16  ;;  %v2119_v23 = vld [vmem:[%s10153_s28 + $0x10] sm:$0xff] }
 0x70a   :  { %v6121_v4 = vsel %vm1365_vm8, 1.0, %v7651_v52 }
 0x70b   :  { %6123 = vmatmul.msk.f32.vlgmr.msrb.gmra.mxu0 %vm1078_vm13, %v6121_v4  ;;  %vm1490_vm9 = vcmp.eq.s32.totalorder %v8386_v51, %v1488_v63  ;;  %v1982_v4 = vcvt.f32.s32 %v8647_v16  ;;  %v1858_v16 = vcvt.f32.s32 %v8656_v9 }
 0x70c   :  { %v1360_v25 = vpop.xlane.xlu2 %1359  ;;  %v6130_v14 = vsel %vm1490_vm9, 1.0, %v7651_v52  ;;  %1887 = vmatpush.msrb.mxu0 %v8195_v17  ;;  %vm2094_vm9 = vcmask 97280  }
 0x70d   :  { %v1361_v7 = vcvt.f32.s32 %v1360_v25  ;;  %6132 = vmatmul.msk.f32.gmra.mxu2 %vm1078_vm13, %v6130_v14  ;;  %v1844_v25 = vshll.u32 %v1843_v26, 16  ;;  %v1983_v55 = vshll.u32 %v1982_v4, 16 }
 0x70e   :  { %v1717_v57 = vpop.xlane.xlu1 %1716  ;;  %1888 = vmatpush.msrb.mxu0 %v8204_v19  ;;  %v1596_v19 = vshll.u32 %v1595_v30, 16 }
 0x70f   :  { %v1364_v13 = vadd.s32 %v1363_v40, %v1361_v7  ;;  %v1718_v58 = vcvt.f32.s32 %v1717_v57 }
 0x711   :  { %v1721_v2 = vadd.s32 %v1720_v41, %v1718_v58  ;;  %vm1366_vm10 = vcmp.eq.s32.totalorder %v8386_v51, %v1364_v13 }
 0x712   :  { %v6122_v11 = vsel %vm1366_vm10, 1.0, %v7651_v52  ;;  %vm2099_vm10 = vcmask 162816  }
 0x713   :  { %vm1737_vm14 = vcmp.eq.s32.totalorder %v8386_v51, %v1721_v2  ;;  %6124 = vmatmul.msk.f32.gmra.mxu0 %vm1078_vm13, %v6122_v11  ;;  %v1859_v11 = vshll.u32 %v1858_v16, 16 }
 0x714   :  { %v1593_v17 = vpop.xlane.xlu0 %1592  ;;  %v6145_v49 = vsel %vm1737_vm14, 1.0, %v7651_v52  ;;  %vm2104_vm14 = vcmask 228352  }
 0x715   :  { %v1594_v54 = vcvt.f32.s32 %v1593_v17  ;;  %6147 = vmatmul.msk.f32.vlgmr.msrb.gmra.mxu2 %vm1078_vm13, %v6145_v49 }
 0x716   :  { %v1732_v59 = vpop.xlane.xlu2 %1731 }
 0x717   :  { %v1597_v6 = vadd.s32 %v1596_v19, %v1594_v54  ;;  %v1733_v0 = vcvt.f32.s32 %v1732_v59 }
 0x719   :  { %vm1613_vm15 = vcmp.eq.s32.totalorder %v8386_v51, %v1597_v6  ;;  %v1736_v1 = vadd.s32 %v1735_v62, %v1733_v0 }
 0x71a   :  { %v6137_v3 = vsel %vm1613_vm15, 1.0, %v7651_v52  ;;  %vm2195_vm15 = vcmask 1043456  }
 0x71b   :  { %6139 = vmatmul.msk.f32.vlgmr.msra.gmra.mxu0 %vm1078_vm13, %v6137_v3  ;;  %vm1738_vm3 = vcmp.eq.s32.totalorder %v8386_v51, %v1736_v1 }
 0x71c   :  { %v1608_v56 = vpop.xlane.xlu1 %1607  ;;  %v6146_v42 = vsel %vm1738_vm3, 1.0, %v7651_v52  ;;  %vm2329_vm3 = vcmask 1040384  }
 0x71d   :  { %v1609_v50 = vcvt.f32.s32 %v1608_v56  ;;  %6148 = vmatmul.msk.f32.gmra.mxu2 %vm1078_vm13, %v6146_v42 }
 0x71f   :  { %v1612_v53 = vadd.s32 %v1611_v39, %v1609_v50 }
 0x721   :  { %vm1614_vm4 = vcmp.eq.s32.totalorder %v8386_v51, %v1612_v53 }
 0x722   :  { %v6138_v5 = vsel %vm1614_vm4, 1.0, %v7651_v52 }
 0x723   :  { %6140 = vmatmul.msk.f32.gmra.mxu0 %vm1078_vm13, %v6138_v5  ;;  %v2120_v5 = vld [vmem:[%s10153_s28 + $0x18] sm:$0xff] }
 0x724   :  { %2143 = vmatpush.msra.mxu3 %v2120_v5 }
 0x726   :  { %2144 = vmatpush.msra.mxu3 %v2119_v23 }
 0x72d   :  { %v8711_v17 = vpop.f32.mrf.mxu0 }
 0x765   :  { %v1965_v8 = vpop.xlane.xlu0 %1964 }
 0x766   :  { %v1966_v44 = vcvt.f32.s32 %v1965_v8  ;;  %v2118_v8 = vld [vmem:[%s10153_s28 + $0x8] sm:$0xff] }
 0x767   :  { %2145 = vmatpush.msra.mxu3 %v2118_v8 }
 0x768   :  { %v1969_v63 = vadd.s32 %v1968_v10, %v1966_v44  ;;  %v2117_v10 = vld [vmem:[%s10153_s28] sm:$0xff]  ;;  %s5993_s28 = sshll.u32 %s7963_s20, 4  ;;  %s5994_s28 = int_to_ptr.hbm [resolvable:$true] %s5993_s28 }
 0x769   :  { %2146 = vmatpush.msra.mxu3 %v2117_v10 }
 0x76a   :  { %vm1985_vm5 = vcmp.eq.s32.totalorder %v8386_v51, %v1969_v63  ;;  %v1841_v28 = vpop.xlane.xlu2 %1840 }
 0x76b   :  { %v1842_v14 = vcvt.f32.s32 %v1841_v28  ;;  %v6161_v40 = vsel %vm1985_vm5, 1.0, %v7651_v52 }
 0x76c   :  { %6163 = vmatmul.msk.f32.vlgmr.msra.gmra.mxu2 %vm1078_vm13, %v6161_v40 }
 0x76d   :  { %v1845_v7 = vadd.s32 %v1844_v25, %v1842_v14  ;;  %v1980_v57 = vpop.xlane.xlu1 %1979 }
 0x76e   :  { %v1981_v41 = vcvt.f32.s32 %v1980_v57 }
 0x76f   :  { %vm1861_vm6 = vcmp.eq.s32.totalorder %v8386_v51, %v1845_v7 }
 0x770   :  { %v1984_v13 = vadd.s32 %v1983_v55, %v1981_v41  ;;  %v6153_v12 = vsel %vm1861_vm6, 1.0, %v7651_v52 }
 0x771   :  { %v8703_v58 = vpop.f32.mrf.mxu2  ;;  %6155 = vmatmul.msk.f32.vlgmr.msrb.gmra.mxu0 %vm1078_vm13, %v6153_v12 }
 0x772   :  { %10147 = vst [vmem:[#allocation114_spill] sm:$0xff] %v8703_v58  ;;  %2036 = vrot.lane.b32.xlu2 %v8703_v58, %s7652_s18  ;;  %vm1986_vm7 = vcmp.eq.s32.totalorder %v8386_v51, %v1984_v13 }
 0x773   :  { %v6162_v30 = vsel %vm1986_vm7, 1.0, %v7651_v52 }
 0x774   :  { %6164 = vmatmul.msk.f32.gmra.mxu2 %vm1078_vm13, %v6162_v30 }
 0x775   :  { %v1856_v2 = vpop.xlane.xlu0 %1855 }
 0x776   :  { %v1857_v60 = vcvt.f32.s32 %v1856_v2 }
 0x778   :  { %v1860_v49 = vadd.s32 %v1859_v11, %v1857_v60 }
 0x779   :  { %v8713_v19 = vpop.f32.mrf.mxu2 }
 0x77a   :  { %2038 = vrot.lane.b32.xlu0 %v8713_v19, %s7652_s18  ;;  %vm1862_vm8 = vcmp.eq.s32.totalorder %v8386_v51, %v1860_v49  ;;  %s10176_s18 = sld [smem:[#allocation70_spill]] }
 0x77b   :  { %v6154_v9 = vsel %vm1862_vm8, 1.0, %v7651_v52  ;;  %v8719_v54 = vpop.f32.mrf.mxu0  ;;  %vm2400_vm8 = vcmask 57344  }
 0x77c   :  { %6156 = vmatmul.msk.f32.gmra.mxu0 %vm1078_vm13, %v6154_v9 }
 0x788   :  { %v8721_v59 = vpop.f32.mrf.mxu0  ;;  %v8723_v62 = vpop.f32.mrf.mxu2 }
 0x789   :  { %10148 = vst [vmem:[#allocation115_spill] sm:$0xff] %v8721_v59  ;;  %2044 = vrot.lane.b32.xlu1 %v8721_v59, %s7628_s7  ;;  %2052 = vrot.lane.b32.xlu0 %v8723_v62, %s7653_s29 }
 0x790   :  { %v8728_v6 = vpop.f32.mrf.mxu0  ;;  %v8730_v0 = vpop.f32.mrf.mxu2 }
 0x791   :  { %10149 = vst [vmem:[#allocation116_spill] sm:$0xff] %v8728_v6  ;;  %2046 = vrot.lane.b32.xlu1 %v8728_v6, %s7628_s7 }
 0x792   :  { %10150 = vst [vmem:[#allocation117_spill] sm:$0xff] %v8730_v0 }
 0x798   :  { %v8734_v61 = vpop.f32.mrf.mxu0  ;;  %v8736_v1 = vpop.f32.mrf.mxu2 }
 0x799   :  { %10151 = vst [vmem:[#allocation118_spill] sm:$0xff] %v8734_v61  ;;  %2068 = vrot.lane.b32.xlu0 %v8736_v1, %s7654_s5  ;;  %2060 = vrot.lane.b32.xlu2 %v8734_v61, %s7614_s30 }
 0x79a   :  { %10152 = vst [vmem:[#allocation119_spill] sm:$0xff] %v8736_v1 }
 0x7a0   :  { %v8741_v3 = vpop.f32.mrf.mxu0  ;;  %v8746_v56 = vpop.f32.mrf.mxu2 }
 0x7a1   :  { %2054 = vrot.lane.b32.xlu2 %v8730_v0, %s7653_s29  ;;  %2062 = vrot.lane.b32.xlu0 %v8741_v3, %s7614_s30  ;;  %10154 = vst [vmem:[#allocation120_spill] sm:$0xff] %v8746_v56  ;;  %s10177_s29 = sld [smem:[#allocation76_spill]] }
 0x7cc   :  { %v2037_v44 = vpop.permute.xlu2 %2036 }
 0x7cd   :  { %v2090_v14 = vsel %vm1033_vm12, %v8711_v17, %v2037_v44 }
 0x7ec   :  { %v2039_v26 = vpop.permute.xlu0 %2038 }
 0x7ed   :  { %v2091_v60 = vsel %vm1033_vm12, %v8719_v54, %v2039_v26 }
 0x7ee   :  { %v8748_v42 = vpop.f32.mrf.mxu0 }
 0x7ef   :  { %v8750_v39 = vpop.f32.mrf.mxu2  ;;  %2076 = vrot.lane.b32.xlu1 %v8748_v42, %s7655_s2 }
 0x7f0   :  { %10155 = vst [vmem:[#allocation121_spill] sm:$0xff] %v8750_v39  ;;  %2084 = vrot.lane.b32.xlu2 %v8750_v39, %s7656_s1 }
 0x7f3   :  { %v2061_v4 = vpop.permute.xlu2 %2060 }
 0x7f7   :  { %v8755_v50 = vpop.f32.mrf.mxu2  ;;  %2070 = vrot.lane.b32.xlu1 %v8746_v56, %s7654_s5  ;;  %s10178_s5 = sld [smem:[#allocation78_spill]] }
 0x7f8   :  { %2086 = vrot.lane.b32.xlu0 %v8755_v50, %s7656_s1 }
 0x7f9   :  { %v8759_v53 = vpop.f32.mrf.mxu0 }
 0x7fa   :  { %10156 = vst [vmem:[#allocation122_spill] sm:$0xff] %v8759_v53  ;;  %2078 = vrot.lane.b32.xlu2 %v8759_v53, %s7655_s2 }
 0x7fb   :  { %v2045_v63 = vpop.permute.xlu1 %2044  ;;  %v2053_v28 = vpop.permute.xlu0 %2052 }
 0x7fc   :  { %v2092_v7 = vsel %vm836_vm0, %v2090_v14, %v2045_v63  ;;  %v2055_v57 = vpop.permute.xlu2 %2054  ;;  %v2156_v14 = vld [vmem:[#allocation44] sm:$0xff] }
 0x7fd   :  { %v2095_v55 = vsel %vm2094_vm9, %v2092_v7, %v2053_v28  ;;  %v2157_v28 = vld [vmem:[#allocation44 + $0x8] sm:$0xf]  ;;  %v2155_v7 = vld [vmem:[%s10158_s11 + $0x8] sm:$0xff] }
 0x7fe   :  { %v2097_v41 = vsel %vm1078_vm13, %v2095_v55, %v2061_v4  ;;  %v2159_v4 = vld [vmem:[%s10157_s9 + $0x8] sm:$0xff]  ;;  %6169 = vmatpush.msk.msra.mxu1 %vm2195_vm15, %v2157_v28  ;;  %v2290_v28 = vld [vmem:[%s10160_s15 + $0x18] sm:$0xff] }
 0x7ff   :  { %2180 = vmatpush.msra.mxu0 %v2159_v4  ;;  %v8803_v4 = vld [vmem:[#allocation14] sm:$0xff]  ;;  %2313 = vmatpush.msrb.mxu3 %v2290_v28 }
 0x800   :  { %2214 = vmatpush.msra.mxu1 %v2156_v14  ;;  %v2287_v28 = vld [vmem:[%s10160_s15] sm:$0xff] }
 0x802   :  { %2425 = vmatpush.msrb.mxu1 %v8803_v4 }
 0x803   :  { %v2047_v40 = vpop.permute.xlu1 %2046 }
 0x804   :  { %v2093_v49 = vsel %vm836_vm0, %v2091_v60, %v2047_v40  ;;  %v2154_v40 = vld [vmem:[%s10158_s11] sm:$0xff]  ;;  %v2249_v60 = vld [vmem:[%s7953_s27 + $0x18] sm:$0xff] }
 0x805   :  { %v2096_v9 = vsel %vm2094_vm9, %v2093_v49, %v2055_v57  ;;  %6170 = vmatmul.msk.f32.vlgmr.msra.gmra.mxu1 %vm2094_vm9, %v2154_v40  ;;  %v6565_v57 = vld [vmem:[#allocation23] ss:$0 sm:$0xff]  ;;  %v2248_v49 = vld [vmem:[%s7953_s27 + $0x10] sm:$0xff] }
 0x806   :  { %2569 = vmatpush.msra.mxu1 %v8803_v4 }
 0x80b   :  { %v2069_v25 = vpop.permute.xlu0 %2068 }
 0x80c   :  { %v2100_v13 = vsel %vm2099_vm10, %v2097_v41, %v2069_v25  ;;  %v2158_v25 = vld [vmem:[%s10157_s9] sm:$0xff]  ;;  %s7490_s9 = scalar_lea.hbm %s7963_s20, 1 }
 0x80d   :  { %2181 = vmatpush.msra.mxu0 %v2158_v25  ;;  %6171 = vmatmul.msk.f32.gmra.mxu1 %vm2094_vm9, %v2155_v7  ;;  %v2289_v25 = vld [vmem:[%s10160_s15 + $0x10] sm:$0xff]  ;;  %vm2402_vm9 = vcmask 58369  }
 0x80e   :  { %2314 = vmatpush.msrb.mxu3 %v2289_v25  ;;  %v8819_v25 = vld [vmem:[#allocation12] ss:$0 sm:$0xff] }
 0x80f   :  { %2352 = vmatpush.msrb.mxu0 %v8803_v4 }
 0x813   :  { %v2063_v16 = vpop.permute.xlu0 %2062 }
 0x814   :  { %v2098_v5 = vsel %vm1078_vm13, %v2096_v9, %v2063_v16  ;;  %v2253_v16 = vld [vmem:[%s7953_s27 + $0x38] sm:$0xff]  ;;  %v2247_v9 = vld [vmem:[%s7953_s27 + $0x8] sm:$0xff] }
 0x815   :  { %2272 = vmatpush.msrb.mxu2 %v2253_v16 }
 0x84a   :  { %v2085_v30 = vpop.permute.xlu2 %2084 }
 0x854   :  { %v2079_v8 = vpop.permute.xlu2 %2078 }
 0x861   :  { %v2077_v12 = vpop.permute.xlu1 %2076 }
 0x862   :  { %v2102_v2 = vsel %vm635_vm1, %v2100_v13, %v2077_v12 }
 0x863   :  { %v2105_v11 = vsel %vm2104_vm14, %v2102_v2, %v2085_v30  ;;  %v2252_v30 = vld [vmem:[%s7953_s27 + $0x30] sm:$0xff]  ;;  %v2251_v2 = vld [vmem:[%s7953_s27 + $0x28] sm:$0xff] }
 0x864   :  { %6165 = vmatmul.msk.f32.vlgmr.msra.gmra.mxu3 %vm667_vm2, %v2105_v11  ;;  %2273 = vmatpush.msrb.mxu2 %v2252_v30  ;;  %v2250_v11 = vld [vmem:[%s7953_s27 + $0x20] sm:$0xff] }
 0x866   :  { %2274 = vmatpush.msrb.mxu2 %v2251_v2 }
 0x868   :  { %2275 = vmatpush.msrb.mxu2 %v2250_v11 }
 0x869   :  { %v2071_v23 = vpop.permute.xlu1 %2070 }
 0x86a   :  { %v2101_v10 = vsel %vm2099_vm10, %v2098_v5, %v2071_v23  ;;  %v2087_v44 = vpop.permute.xlu0 %2086  ;;  %2276 = vmatpush.msrb.mxu2 %v2249_v60  ;;  %v2246_v5 = vld [vmem:[%s7953_s27] sm:$0xff]  ;;  %s10162_s27 = sld [smem:[#allocation87_spill]] }
 0x86b   :  { %v2103_v63 = vsel %vm635_vm1, %v2101_v10, %v2079_v8  ;;  %v6566_v8 = vld [vmem:[%s10159_s10] ss:$0 sm:$0xff] }
 0x86c   :  { %v2106_v26 = vsel %vm2104_vm14, %v2103_v63, %v2087_v44  ;;  %2277 = vmatpush.msrb.mxu2 %v2248_v49 }
 0x86d   :  { %6166 = vmatmul.msk.f32.gmra.mxu3 %vm667_vm2, %v2106_v26 }
 0x86e   :  { %2278 = vmatpush.msrb.mxu2 %v2247_v9 }
 0x870   :  { %2279 = vmatpush.msrb.mxu2 %v2246_v5 }
 0x872   :  { %2641 = vmatpush.msra.mxu2 %v8803_v4 }
 0x882   :  { %v2216_v23 = vpop.f32.mrf.mxu1 }
 0x88a   :  { %v2219_v40 = vpop.f32.mrf.mxu1 }
 0x8e7   :  { %v2148_v55 = vpop.f32.mrf.mxu3 }
 0x8e8   :  { %v2149_v41 = vadd.f32 %v6565_v57, %v2148_v55 }
 0x8ea   :  { %6167 = vmatmul.msk.f32.vlgmr.msra.gmra.mxu0 %vm1078_vm13, %v2149_v41 }
 0x8eb   :  { %2497 = vmatpush.msra.mxu0 %v8803_v4 }
 0x8f0   :  { %v2151_v13 = vpop.f32.mrf.mxu3 }
 0x8f1   :  { %v2152_v12 = vadd.f32 %v6565_v57, %v2151_v13 }
 0x8f3   :  { %6168 = vmatmul.msk.f32.gmra.mxu0 %vm1078_vm13, %v2152_v12 }
 0x8fb   :  { %2353 = vmatmul.f32.vlgmr.msrb.gmra.mxu0 %v7651_v52 }
 0x8fc   :  { %2785 = vmatpush.msrb.mxu0 %v8803_v4 }
 0x967   :  { %v2183_v10 = vpop.f32.mrf.mxu0 }
 0x968   :  { %v2217_v44 = vadd.f32 %v2216_v23, %v2183_v10 }
 0x96a   :  { %v2226_v63 = vadd.f32 %v6566_v8, %v2217_v44 }
 0x96c   :  { %v2228_v26 = vmul.f32 %v2226_v63, %v2226_v63 }
 0x96e   :  { %v2230_v14 = vmul.f32 %v2228_v26, %v2226_v63  ;;  %v2288_v26 = vld [vmem:[%s10160_s15 + $0x8] sm:$0xff] }
 0x96f   :  { %2315 = vmatpush.msrb.mxu3 %v2288_v26 }
 0x970   :  { %v2232_v7 = vmul.f32 0.044715, %v2230_v14  ;;  %v2186_v57 = vpop.f32.mrf.mxu0 }
 0x971   :  { %v2220_v55 = vadd.f32 %v2219_v40, %v2186_v57  ;;  %2316 = vmatpush.msrb.mxu3 %v2287_v28  ;;  %v6567_v40 = vld [vmem:[%s7948_s6] ss:$0 sm:$0xff]  ;;  %s10161_s6 = sld [smem:[#allocation96_spill]] }
 0x972   :  { %v2234_v41 = vadd.f32 %v2232_v7, %v2226_v63 }
 0x973   :  { %v2227_v13 = vadd.f32 %v6566_v8, %v2220_v55  ;;  %2713 = vmatpush.msra.mxu3 %v8803_v4 }
 0x974   :  { %v2236_v12 = vmul.f32 0.7978846, %v2234_v41 }
 0x975   :  { %v2229_v16 = vmul.f32 %v2227_v13, %v2227_v13 }
 0x976   :  { %6610 = vtanh.f32 %v2236_v12  ;;  %v6569_v12 = vld [vmem:[#allocation15] ss:$0 sm:$0xff] }
 0x977   :  { %v2231_v52 = vmul.f32 %v2229_v16, %v2227_v13 }
 0x978   :  { %v2354_v14 = vpop.f32.mrf.mxu0 }
 0x979   :  { %v2233_v30 = vmul.f32 0.044715, %v2231_v52 }
 0x97b   :  { %v2235_v2 = vadd.f32 %v2233_v30, %v2227_v13 }
 0x97c   :  { %v6611_v11 = vpop.eup %6610 }
 0x97d   :  { %v2240_v60 = vadd.f32 1.0, %v6611_v11  ;;  %v2237_v49 = vmul.f32 0.7978846, %v2235_v2 }
 0x97f   :  { %v2242_v9 = vmul.f32 0.5, %v2240_v60  ;;  %6612 = vtanh.f32 %v2237_v49 }
 0x981   :  { %v2244_v5 = vmul.f32 %v2242_v9, %v2226_v63  ;;  %v2355_v63 = vadd.f32 %v8819_v25, %v2354_v14 }
 0x983   :  { %6172 = vmatmul.msk.f32.vlgmr.msrb.gmra.mxu2 %vm797_vm11, %v2244_v5  ;;  %2378 = vrot.lane.b32.xlu1 %v2355_v63, %s7650_s26 }
 0x985   :  { %v6613_v23 = vpop.eup %6612 }
 0x986   :  { %v2241_v10 = vadd.f32 1.0, %v6613_v23 }
 0x988   :  { %v2243_v8 = vmul.f32 0.5, %v2241_v10 }
 0x98a   :  { %v2245_v44 = vmul.f32 %v2243_v8, %v2227_v13 }
 0x98c   :  { %6173 = vmatmul.msk.f32.gmra.mxu2 %vm797_vm11, %v2245_v44 }
 0xa06   :  { %v2281_v7 = vpop.f32.mrf.mxu2 }
 0xa07   :  { %v8824_v57 = vadd.f32 %v6567_v40, %v2281_v7 }
 0xa09   :  { %6174 = vmatmul.msk.f32.vlgmr.msrb.gmra.mxu3 %vm667_vm2, %v8824_v57 }
 0xa0f   :  { %v2284_v55 = vpop.f32.mrf.mxu2 }
 0xa10   :  { %v8828_v41 = vadd.f32 %v6567_v40, %v2284_v55 }
 0xa12   :  { %6175 = vmatmul.msk.f32.gmra.mxu3 %vm667_vm2, %v8828_v41 }
 0xa8c   :  { %v2318_v13 = vpop.f32.mrf.mxu3 }
 0xa8d   :  { %v2319_v16 = vadd.f32 %v6569_v12, %v2318_v13 }
 0xa8f   :  { %v2405_v2 = vrot.slane %v2319_v16, 1  ;;  %v2475_v11 = vrot.slane %v2319_v16, 2  ;;  %v2547_v60 = vrot.slane %v2319_v16, 3  ;;  %v2619_v49 = vrot.slane %v2319_v16, 4 }
 0xa90   :  { %v2691_v9 = vrot.slane %v2319_v16, 5  ;;  %v2763_v5 = vrot.slane %v2319_v16, 6 }
 0xa95   :  { %v2321_v52 = vpop.f32.mrf.mxu3 }
 0xa96   :  { %v2322_v30 = vadd.f32 %v6569_v12, %v2321_v52  ;;  %v2835_v12 = vrot.slane %v2319_v16, 7 }
 0xa98   :  { %v2327_v23 = vrot.slane %v2322_v30, 7  ;;  %v8833_v10 = vsel %vm2329_vm3, %v2405_v2, %v2322_v30  ;;  %v2477_v8 = vrot.slane %v2322_v30, 1  ;;  %v2549_v44 = vrot.slane %v2322_v30, 2 }
 0xa99   :  { %v2621_v26 = vrot.slane %v2322_v30, 3  ;;  %v2693_v28 = vrot.slane %v2322_v30, 4  ;;  %v2765_v14 = vrot.slane %v2322_v30, 5  ;;  %v2837_v40 = vrot.slane %v2322_v30, 6 }
 0xa9a   :  { %v2330_v7 = vsel %vm2329_vm3, %v2319_v16, %v2327_v23  ;;  %v8837_v55 = vsel %vm2329_vm3, %v2475_v11, %v2477_v8  ;;  %v8840_v13 = vsel %vm2329_vm3, %v2547_v60, %v2549_v44 }
 0xa9b   :  { %v2357_v52 = vadd.f32 %v2355_v63, %v2330_v7  ;;  %v8843_v39 = vsel %vm2329_vm3, %v2619_v49, %v2621_v26  ;;  %v8846_v2 = vsel %vm2329_vm3, %v2691_v9, %v2693_v28  ;;  %v8849_v46 = vsel %vm2329_vm3, %v2763_v5, %v2765_v14  ;;  %v2379_v28 = vpop.permute.xlu1 %2378 }
 0xa9c   :  { %v8852_v30 = vsel %vm2329_vm3, %v2835_v12, %v2837_v40 }
 0xa9d   :  { %v6176_v23 = vmul.f32 -1.442695, %v2357_v52 }
 0xa9f   :  { %6614 = vpow2.f32 %v6176_v23 }
 0xaa5   :  { %v6615_v11 = vpop.eup %6614 }
 0xaa6   :  { %v2361_v8 = vadd.f32 1.0, %v6615_v11 }
 0xaa8   :  { %6616 = vrcp.f32 %v2361_v8  ;;  %v2373_v44 = vand.u32 2147483648, %v2361_v8  ;;  %v2371_v26 = vand.u32 2147483647, %v2361_v8  ;;  %vm2367_vm5 = vweird.f32 %v2361_v8 }
 0xaaa   :  { %v2374_v5 = vor.u32 1.1754944e-38, %v2373_v44  ;;  %vm2372_vm7 = vcmp.eq.f32.partialorder %v2371_v26, 8.507059e+37 }
 0xaae   :  { %v6617_v60 = vpop.eup %6616 }
 0xaaf   :  { %v2363_v16 = vmul.f32 %v6617_v60, %v2361_v8  ;;  %vm2368_vm4 = vweird.f32 %v6617_v60 }
 0xab0   :  { %vm2369_vm6 = vmor %vm2367_vm5, %vm2368_vm4 }
 0xab1   :  { %v2364_v63 = vsub.f32 1.0, %v2363_v16 }
 0xab3   :  { %v2365_v49 = vmul.f32 %v6617_v60, %v2364_v63 }
 0xab5   :  { %v2366_v9 = vadd.f32 %v6617_v60, %v2365_v49 }
 0xab7   :  { %v2370_v14 = vsel %vm2369_vm6, %v6617_v60, %v2366_v9 }
 0xab8   :  { %v2375_v40 = vsel %vm2372_vm7, %v2374_v5, %v2370_v14 }
 0xab9   :  { %v2381_v12 = vmul.f32 %v2379_v28, %v2375_v40  ;;  %v2388_v16 = vsub.f32 1.0, %v2375_v40  ;;  %v2394_v53 = vmul.f32 0.0, %v2375_v40 }
 0xabb   :  { %2383 = vrot.lane.b32.xlu2 %v2381_v12, %s7614_s30 }
 0xb15   :  { %v2384_v52 = vpop.permute.xlu2 %2383 }
 0xb16   :  { %v2386_v23 = vadd.f32 %v2384_v52, %v2330_v7 }
 0xb18   :  { %6618 = vtanh.f32 %v2386_v23 }
 0xb1e   :  { %v6619_v11 = vpop.eup %6618 }
 0xb1f   :  { %2390 = vrot.lane.b32.xlu0 %v6619_v11, %s7645_s23 }
 0xb91   :  { %v2391_v63 = vpop.permute.xlu0 %2390 }
 0xb92   :  { %v2393_v49 = vmul.f32 %v2391_v63, %v2388_v16 }
 0xb94   :  { %v2395_v8 = vadd.f32 %v2394_v53, %v2393_v49 }
 0xb96   :  { %2397 = vrot.lane.b32.xlu1 %v2395_v8, %s7645_s23 }
 0xc08   :  { %v2398_v60 = vpop.permute.xlu1 %2397 }
 0xc09   :  { %2401 = vst.msk [vmem:[#allocation2] sm:$0x1] %vm2400_vm8, %v2398_v60  ;;  %6177 = vmatmul.msk.f32.vlgmr.msrb.gmra.mxu1 %vm836_vm0, %v2398_v60 }
 0xc0a   :  { %2403 = vst.msk [vmem:[#allocation2 + $0x7] sm:$0x2] %vm2402_vm9, %v2398_v60  ;;  %2857 = vmatpush.msrb.mxu1 %v8803_v4 }
 0xc86   :  { %v2427_v7 = vpop.f32.mrf.mxu1 }
 0xc87   :  { %v2428_v44 = vadd.f32 %v8819_v25, %v2427_v7 }
 0xc89   :  { %2451 = vrot.lane.b32.xlu2 %v2428_v44, %s7650_s26  ;;  %v2430_v53 = vadd.f32 %v2428_v44, %v8833_v10 }
 0xc8b   :  { %v6178_v26 = vmul.f32 -1.442695, %v2430_v53 }
 0xc8d   :  { %6620 = vpow2.f32 %v6178_v26 }
 0xc93   :  { %v6621_v9 = vpop.eup %6620 }
 0xc94   :  { %v2434_v28 = vadd.f32 1.0, %v6621_v9 }
 0xc96   :  { %6622 = vrcp.f32 %v2434_v28  ;;  %v2446_v23 = vand.u32 2147483648, %v2434_v28  ;;  %vm2440_vm14 = vweird.f32 %v2434_v28  ;;  %v2444_v4 = vand.u32 2147483647, %v2434_v28 }
 0xc98   :  { %v2447_v16 = vor.u32 1.1754944e-38, %v2446_v23  ;;  %vm2445_vm4 = vcmp.eq.f32.partialorder %v2444_v4, 8.507059e+37 }
 0xc9c   :  { %v6623_v5 = vpop.eup %6622 }
 0xc9d   :  { %v2436_v14 = vmul.f32 %v6623_v5, %v2434_v28  ;;  %vm2441_vm10 = vweird.f32 %v6623_v5 }
 0xc9e   :  { %vm2442_vm3 = vmor %vm2440_vm14, %vm2441_vm10 }
 0xc9f   :  { %v2437_v40 = vsub.f32 1.0, %v2436_v14 }
 0xca1   :  { %v2438_v12 = vmul.f32 %v6623_v5, %v2437_v40 }
 0xca3   :  { %v2439_v52 = vadd.f32 %v6623_v5, %v2438_v12 }
 0xca5   :  { %v2443_v11 = vsel %vm2442_vm3, %v6623_v5, %v2439_v52 }
 0xca6   :  { %v2448_v49 = vsel %vm2445_vm4, %v2447_v16, %v2443_v11 }
 0xca7   :  { %v2461_v26 = vsub.f32 1.0, %v2448_v49  ;;  %v2467_v14 = vmul.f32 %v2448_v49, %v2395_v8 }
 0xce3   :  { %v2452_v63 = vpop.permute.xlu2 %2451 }
 0xce4   :  { %v2454_v60 = vmul.f32 %v2452_v63, %v2448_v49 }
 0xce6   :  { %2456 = vrot.lane.b32.xlu0 %v2454_v60, %s7614_s30 }
 0xd58   :  { %v2457_v7 = vpop.permute.xlu0 %2456 }
 0xd59   :  { %v2459_v44 = vadd.f32 %v2457_v7, %v8833_v10 }
 0xd5b   :  { %6624 = vtanh.f32 %v2459_v44 }
 0xd61   :  { %v6625_v53 = vpop.eup %6624 }
 0xd62   :  { %2463 = vrot.lane.b32.xlu1 %v6625_v53, %s7645_s23 }
 0xdd4   :  { %v2464_v9 = vpop.permute.xlu1 %2463 }
 0xdd5   :  { %v2466_v28 = vmul.f32 %v2464_v9, %v2461_v26 }
 0xdd7   :  { %v2468_v40 = vadd.f32 %v2467_v14, %v2466_v28 }
 0xdd9   :  { %2470 = vrot.lane.b32.xlu2 %v2468_v40, %s7645_s23 }
 0xe33   :  { %v2471_v5 = vpop.permute.xlu2 %2470 }
 0xe34   :  { %2473 = vst.msk [vmem:[#allocation2 + $0x1] sm:$0x1] %vm2400_vm8, %v2471_v5  ;;  %6179 = vmatmul.msk.f32.vlgmr.msra.gmra.mxu0 %vm836_vm0, %v2471_v5 }
 0xe35   :  { %2474 = vst.msk [vmem:[#allocation2 + $0x8] sm:$0x2] %vm2402_vm9, %v2471_v5 }
 0xeb1   :  { %v2499_v12 = vpop.f32.mrf.mxu0 }
 0xeb2   :  { %v2500_v10 = vadd.f32 %v8819_v25, %v2499_v12 }
 0xeb4   :  { %2523 = vrot.lane.b32.xlu0 %v2500_v10, %s7650_s26  ;;  %v2502_v52 = vadd.f32 %v2500_v10, %v8837_v55 }
 0xeb6   :  { %v6180_v23 = vmul.f32 -1.442695, %v2502_v52 }
 0xeb8   :  { %6626 = vpow2.f32 %v6180_v23 }
 0xebe   :  { %v6627_v8 = vpop.eup %6626 }
 0xebf   :  { %v2506_v4 = vadd.f32 1.0, %v6627_v8 }
 0xec1   :  { %6628 = vrcp.f32 %v2506_v4  ;;  %v2518_v7 = vand.u32 2147483648, %v2506_v4  ;;  %vm2512_vm6 = vweird.f32 %v2506_v4  ;;  %v2516_v44 = vand.u32 2147483647, %v2506_v4 }
 0xec3   :  { %v2519_v26 = vor.u32 1.1754944e-38, %v2518_v7  ;;  %vm2517_vm10 = vcmp.eq.f32.partialorder %v2516_v44, 8.507059e+37 }
 0xec7   :  { %v6629_v11 = vpop.eup %6628 }
 0xec8   :  { %v2508_v16 = vmul.f32 %v6629_v11, %v2506_v4  ;;  %vm2513_vm5 = vweird.f32 %v6629_v11 }
 0xec9   :  { %vm2514_vm7 = vmor %vm2512_vm6, %vm2513_vm5 }
 0xeca   :  { %v2509_v63 = vsub.f32 1.0, %v2508_v16 }
 0xecc   :  { %v2510_v49 = vmul.f32 %v6629_v11, %v2509_v63 }
 0xece   :  { %v2511_v60 = vadd.f32 %v6629_v11, %v2510_v49 }
 0xed0   :  { %v2515_v53 = vsel %vm2514_vm7, %v6629_v11, %v2511_v60 }
 0xed1   :  { %v2520_v14 = vsel %vm2517_vm10, %v2519_v26, %v2515_v53 }
 0xed2   :  { %v2533_v52 = vsub.f32 1.0, %v2520_v14  ;;  %v2539_v8 = vmul.f32 %v2520_v14, %v2468_v40 }
 0xf26   :  { %v2524_v9 = vpop.permute.xlu0 %2523 }
 0xf27   :  { %v2526_v28 = vmul.f32 %v2524_v9, %v2520_v14 }
 0xf29   :  { %2528 = vrot.lane.b32.xlu1 %v2526_v28, %s7614_s30 }
 0xf9b   :  { %v2529_v5 = vpop.permute.xlu1 %2528 }
 0xf9c   :  { %v2531_v12 = vadd.f32 %v2529_v5, %v8837_v55 }
 0xf9e   :  { %6630 = vtanh.f32 %v2531_v12 }
 0xfa4   :  { %v6631_v10 = vpop.eup %6630 }
 0xfa5   :  { %2535 = vrot.lane.b32.xlu2 %v6631_v10, %s7645_s23 }
 0xfff   :  { %v2536_v23 = vpop.permute.xlu2 %2535 }
0x1000   :  { %v2538_v4 = vmul.f32 %v2536_v23, %v2533_v52 }
0x1002   :  { %v2540_v16 = vadd.f32 %v2539_v8, %v2538_v4 }
0x1004   :  { %2542 = vrot.lane.b32.xlu0 %v2540_v16, %s7645_s23 }
0x1076   :  { %v2543_v11 = vpop.permute.xlu0 %2542 }
0x1077   :  { %2545 = vst.msk [vmem:[#allocation2 + $0x2] sm:$0x1] %vm2400_vm8, %v2543_v11  ;;  %6181 = vmatmul.msk.f32.vlgmr.msra.gmra.mxu1 %vm836_vm0, %v2543_v11 }
0x1078   :  { %2546 = vst.msk [vmem:[#allocation2 + $0x9] sm:$0x2] %vm2402_vm9, %v2543_v11 }
0x10f4   :  { %v2571_v63 = vpop.f32.mrf.mxu1 }
0x10f5   :  { %v2572_v55 = vadd.f32 %v8819_v25, %v2571_v63 }
0x10f7   :  { %2595 = vrot.lane.b32.xlu1 %v2572_v55, %s7650_s26  ;;  %v2574_v49 = vadd.f32 %v2572_v55, %v8840_v13 }
0x10f9   :  { %v6182_v60 = vmul.f32 -1.442695, %v2574_v49 }
0x10fb   :  { %6632 = vpow2.f32 %v6182_v60 }
0x1101   :  { %v6633_v40 = vpop.eup %6632 }
0x1102   :  { %v2578_v7 = vadd.f32 1.0, %v6633_v40 }
0x1104   :  { %6634 = vrcp.f32 %v2578_v7  ;;  %v2590_v28 = vand.u32 2147483648, %v2578_v7  ;;  %vm2584_vm3 = vweird.f32 %v2578_v7  ;;  %v2588_v5 = vand.u32 2147483647, %v2578_v7 }
0x1106   :  { %v2591_v10 = vor.u32 1.1754944e-38, %v2590_v28  ;;  %vm2589_vm5 = vcmp.eq.f32.partialorder %v2588_v5, 8.507059e+37 }
0x110a   :  { %v6635_v44 = vpop.eup %6634 }
0x110b   :  { %v2580_v53 = vmul.f32 %v6635_v44, %v2578_v7  ;;  %vm2585_vm14 = vweird.f32 %v6635_v44 }
0x110c   :  { %vm2586_vm4 = vmor %vm2584_vm3, %vm2585_vm14 }
0x110d   :  { %v2581_v26 = vsub.f32 1.0, %v2580_v53 }
0x110f   :  { %v2582_v9 = vmul.f32 %v6635_v44, %v2581_v26 }
0x1111   :  { %v2583_v14 = vadd.f32 %v6635_v44, %v2582_v9 }
0x1113   :  { %v2587_v12 = vsel %vm2586_vm4, %v6635_v44, %v2583_v14 }
0x1114   :  { %v2592_v23 = vsel %vm2589_vm5, %v2591_v10, %v2587_v12 }
0x1115   :  { %v2605_v55 = vsub.f32 1.0, %v2592_v23  ;;  %v2611_v60 = vmul.f32 %v2592_v23, %v2540_v16 }
0x1169   :  { %v2596_v52 = vpop.permute.xlu1 %2595 }
0x116a   :  { %v2598_v8 = vmul.f32 %v2596_v52, %v2592_v23 }
0x116c   :  { %2600 = vrot.lane.b32.xlu2 %v2598_v8, %s7614_s30 }
0x11c6   :  { %v2601_v4 = vpop.permute.xlu2 %2600 }
0x11c7   :  { %v2603_v11 = vadd.f32 %v2601_v4, %v8840_v13 }
0x11c9   :  { %6636 = vtanh.f32 %v2603_v11 }
0x11cf   :  { %v6637_v63 = vpop.eup %6636 }
0x11d0   :  { %2607 = vrot.lane.b32.xlu0 %v6637_v63, %s7645_s23 }
0x1242   :  { %v2608_v49 = vpop.permute.xlu0 %2607 }
0x1243   :  { %v2610_v40 = vmul.f32 %v2608_v49, %v2605_v55 }
0x1245   :  { %v2612_v7 = vadd.f32 %v2611_v60, %v2610_v40 }
0x1247   :  { %2614 = vrot.lane.b32.xlu1 %v2612_v7, %s7645_s23 }
0x12b9   :  { %v2615_v44 = vpop.permute.xlu1 %2614 }
0x12ba   :  { %2617 = vst.msk [vmem:[#allocation2 + $0x3] sm:$0x1] %vm2400_vm8, %v2615_v44  ;;  %6183 = vmatmul.msk.f32.vlgmr.msra.gmra.mxu2 %vm836_vm0, %v2615_v44 }
0x12bb   :  { %2618 = vst.msk [vmem:[#allocation2 + $0xa] sm:$0x2] %vm2402_vm9, %v2615_v44 }
0x133d   :  { %v2643_v53 = vpop.f32.mrf.mxu2 }
0x133e   :  { %v2644_v13 = vadd.f32 %v8819_v25, %v2643_v53 }
0x1340   :  { %2667 = vrot.lane.b32.xlu2 %v2644_v13, %s7650_s26  ;;  %v2646_v26 = vadd.f32 %v2644_v13, %v8843_v39 }
0x1342   :  { %v6184_v9 = vmul.f32 -1.442695, %v2646_v26 }
0x1344   :  { %6638 = vpow2.f32 %v6184_v9 }
0x134a   :  { %v6639_v16 = vpop.eup %6638 }
0x134b   :  { %v2650_v14 = vadd.f32 1.0, %v6639_v16 }
0x134d   :  { %6640 = vrcp.f32 %v2650_v14  ;;  %v2662_v23 = vand.u32 2147483648, %v2650_v14  ;;  %vm2656_vm7 = vweird.f32 %v2650_v14  ;;  %v2660_v8 = vand.u32 2147483647, %v2650_v14 }
0x134f   :  { %v2663_v11 = vor.u32 1.1754944e-38, %v2662_v23  ;;  %vm2661_vm14 = vcmp.eq.f32.partialorder %v2660_v8, 8.507059e+37 }
0x1353   :  { %v6641_v28 = vpop.eup %6640 }
0x1354   :  { %v2652_v5 = vmul.f32 %v6641_v28, %v2650_v14  ;;  %vm2657_vm6 = vweird.f32 %v6641_v28 }
0x1355   :  { %vm2658_vm10 = vmor %vm2656_vm7, %vm2657_vm6 }
0x1356   :  { %v2653_v12 = vsub.f32 1.0, %v2652_v5 }
0x1358   :  { %v2654_v10 = vmul.f32 %v6641_v28, %v2653_v12 }
0x135a   :  { %v2655_v52 = vadd.f32 %v6641_v28, %v2654_v10 }
0x135c   :  { %v2659_v4 = vsel %vm2658_vm10, %v6641_v28, %v2655_v52 }
0x135d   :  { %v2664_v55 = vsel %vm2661_vm14, %v2663_v11, %v2659_v4 }
0x135e   :  { %v2677_v53 = vsub.f32 1.0, %v2664_v55  ;;  %v2683_v26 = vmul.f32 %v2664_v55, %v2612_v7 }
0x139a   :  { %v2668_v63 = vpop.permute.xlu2 %2667 }
0x139b   :  { %v2670_v49 = vmul.f32 %v2668_v63, %v2664_v55 }
0x139d   :  { %2672 = vrot.lane.b32.xlu0 %v2670_v49, %s7614_s30 }
0x140f   :  { %v2673_v60 = vpop.permute.xlu0 %2672 }
0x1410   :  { %v2675_v40 = vadd.f32 %v2673_v60, %v8843_v39 }
0x1412   :  { %6642 = vtanh.f32 %v2675_v40 }
0x1418   :  { %v6643_v44 = vpop.eup %6642 }
0x1419   :  { %2679 = vrot.lane.b32.xlu1 %v6643_v44, %s7645_s23 }
0x148b   :  { %v2680_v13 = vpop.permute.xlu1 %2679 }
0x148c   :  { %v2682_v9 = vmul.f32 %v2680_v13, %v2677_v53 }
0x148e   :  { %v2684_v16 = vadd.f32 %v2683_v26, %v2682_v9 }
0x1490   :  { %2686 = vrot.lane.b32.xlu2 %v2684_v16, %s7645_s23 }
0x14ea   :  { %v2687_v14 = vpop.permute.xlu2 %2686 }
0x14eb   :  { %2689 = vst.msk [vmem:[#allocation2 + $0x4] sm:$0x1] %vm2400_vm8, %v2687_v14  ;;  %6185 = vmatmul.msk.f32.vlgmr.msra.gmra.mxu3 %vm836_vm0, %v2687_v14 }
0x14ec   :  { %2690 = vst.msk [vmem:[#allocation2 + $0xb] sm:$0x2] %vm2402_vm9, %v2687_v14 }
0x156e   :  { %v2715_v28 = vpop.f32.mrf.mxu3 }
0x156f   :  { %v2716_v39 = vadd.f32 %v8819_v25, %v2715_v28 }
0x1571   :  { %2739 = vrot.lane.b32.xlu0 %v2716_v39, %s7650_s26  ;;  %v2718_v5 = vadd.f32 %v2716_v39, %v8846_v2 }
0x1573   :  { %v6186_v12 = vmul.f32 -1.442695, %v2718_v5 }
0x1575   :  { %6644 = vpow2.f32 %v6186_v12 }
0x157b   :  { %v6645_v7 = vpop.eup %6644 }
0x157c   :  { %v2722_v10 = vadd.f32 1.0, %v6645_v7 }
0x157e   :  { %6646 = vrcp.f32 %v2722_v10  ;;  %v2734_v63 = vand.u32 2147483648, %v2722_v10  ;;  %vm2728_vm4 = vweird.f32 %v2722_v10  ;;  %v2732_v55 = vand.u32 2147483647, %v2722_v10 }
0x1580   :  { %v2735_v60 = vor.u32 1.1754944e-38, %v2734_v63  ;;  %vm2733_vm6 = vcmp.eq.f32.partialorder %v2732_v55, 8.507059e+37 }
0x1584   :  { %v6647_v52 = vpop.eup %6646 }
0x1585   :  { %v2724_v23 = vmul.f32 %v6647_v52, %v2722_v10  ;;  %vm2729_vm3 = vweird.f32 %v6647_v52 }
0x1586   :  { %vm2730_vm5 = vmor %vm2728_vm4, %vm2729_vm3 }
0x1587   :  { %v2725_v8 = vsub.f32 1.0, %v2724_v23 }
0x1589   :  { %v2726_v4 = vmul.f32 %v6647_v52, %v2725_v8 }
0x158b   :  { %v2727_v11 = vadd.f32 %v6647_v52, %v2726_v4 }
0x158d   :  { %v2731_v49 = vsel %vm2730_vm5, %v6647_v52, %v2727_v11 }
0x158e   :  { %v2736_v44 = vsel %vm2733_vm6, %v2735_v60, %v2731_v49 }
0x158f   :  { %v2749_v14 = vsub.f32 1.0, %v2736_v44  ;;  %v2755_v39 = vmul.f32 %v2736_v44, %v2684_v16 }
0x15e3   :  { %v2740_v40 = vpop.permute.xlu0 %2739 }
0x15e4   :  { %v2742_v53 = vmul.f32 %v2740_v40, %v2736_v44 }
0x15e6   :  { %2744 = vrot.lane.b32.xlu1 %v2742_v53, %s7614_s30 }
0x1658   :  { %v2745_v13 = vpop.permute.xlu1 %2744 }
0x1659   :  { %v2747_v26 = vadd.f32 %v2745_v13, %v8846_v2 }
0x165b   :  { %6648 = vtanh.f32 %v2747_v26 }
0x1661   :  { %v6649_v9 = vpop.eup %6648 }
0x1662   :  { %2751 = vrot.lane.b32.xlu2 %v6649_v9, %s7645_s23 }
0x16bc   :  { %v2752_v28 = vpop.permute.xlu2 %2751 }
0x16bd   :  { %v2754_v5 = vmul.f32 %v2752_v28, %v2749_v14 }
0x16bf   :  { %v2756_v12 = vadd.f32 %v2755_v39, %v2754_v5 }
0x16c1   :  { %2758 = vrot.lane.b32.xlu0 %v2756_v12, %s7645_s23 }
0x1733   :  { %v2759_v7 = vpop.permute.xlu0 %2758 }
0x1734   :  { %2761 = vst.msk [vmem:[#allocation2 + $0x5] sm:$0x1] %vm2400_vm8, %v2759_v7  ;;  %6187 = vmatmul.msk.f32.vlgmr.msrb.gmra.mxu0 %vm836_vm0, %v2759_v7 }
0x1735   :  { %2762 = vst.msk [vmem:[#allocation2 + $0xc] sm:$0x2] %vm2402_vm9, %v2759_v7 }
0x17b1   :  { %v2787_v10 = vpop.f32.mrf.mxu0 }
0x17b2   :  { %v2788_v2 = vadd.f32 %v8819_v25, %v2787_v10 }
0x17b4   :  { %2811 = vrot.lane.b32.xlu1 %v2788_v2, %s7650_s26  ;;  %v2790_v52 = vadd.f32 %v2788_v2, %v8849_v46 }
0x17b6   :  { %v6188_v23 = vmul.f32 -1.442695, %v2790_v52 }
0x17b8   :  { %6650 = vpow2.f32 %v6188_v23 }
0x17be   :  { %v6651_v16 = vpop.eup %6650 }
0x17bf   :  { %v2794_v8 = vadd.f32 1.0, %v6651_v16 }
0x17c1   :  { %6652 = vrcp.f32 %v2794_v8  ;;  %v2806_v60 = vand.u32 2147483648, %v2794_v8  ;;  %vm2800_vm10 = vweird.f32 %v2794_v8  ;;  %v2804_v40 = vand.u32 2147483647, %v2794_v8 }
0x17c3   :  { %v2807_v53 = vor.u32 1.1754944e-38, %v2806_v60  ;;  %vm2805_vm3 = vcmp.eq.f32.partialorder %v2804_v40, 8.507059e+37 }
0x17c7   :  { %v6653_v4 = vpop.eup %6652 }
0x17c8   :  { %v2796_v11 = vmul.f32 %v6653_v4, %v2794_v8  ;;  %vm2801_vm7 = vweird.f32 %v6653_v4 }
0x17c9   :  { %vm2802_vm14 = vmor %vm2800_vm10, %vm2801_vm7 }
0x17ca   :  { %v2797_v63 = vsub.f32 1.0, %v2796_v11 }
0x17cc   :  { %v2798_v55 = vmul.f32 %v6653_v4, %v2797_v63 }
0x17ce   :  { %v2799_v49 = vadd.f32 %v6653_v4, %v2798_v55 }
0x17d0   :  { %v2803_v44 = vsel %vm2802_vm14, %v6653_v4, %v2799_v49 }
0x17d1   :  { %v2808_v26 = vsel %vm2805_vm3, %v2807_v53, %v2803_v44 }
0x17d2   :  { %v2821_v5 = vsub.f32 1.0, %v2808_v26  ;;  %v2827_v10 = vmul.f32 %v2808_v26, %v2756_v12 }
0x1826   :  { %v2812_v13 = vpop.permute.xlu1 %2811 }
0x1827   :  { %v2814_v9 = vmul.f32 %v2812_v13, %v2808_v26 }
0x1829   :  { %2816 = vrot.lane.b32.xlu2 %v2814_v9, %s7614_s30 }
0x1883   :  { %v2817_v14 = vpop.permute.xlu2 %2816 }
0x1884   :  { %v2819_v28 = vadd.f32 %v2817_v14, %v8849_v46 }
0x1886   :  { %6654 = vtanh.f32 %v2819_v28 }
0x188c   :  { %v6655_v39 = vpop.eup %6654 }
0x188d   :  { %2823 = vrot.lane.b32.xlu0 %v6655_v39, %s7645_s23 }
0x18ff   :  { %v2824_v7 = vpop.permute.xlu0 %2823 }
0x1900   :  { %v2826_v2 = vmul.f32 %v2824_v7, %v2821_v5 }
0x1902   :  { %v2828_v52 = vadd.f32 %v2827_v10, %v2826_v2 }
0x1904   :  { %2830 = vrot.lane.b32.xlu1 %v2828_v52, %s7645_s23 }
0x1976   :  { %v2831_v23 = vpop.permute.xlu1 %2830 }
0x1977   :  { %2833 = vst.msk [vmem:[#allocation2 + $0x6] sm:$0x1] %vm2400_vm8, %v2831_v23  ;;  %6189 = vmatmul.msk.f32.vlgmr.msrb.gmra.mxu1 %vm836_vm0, %v2831_v23 }
0x1978   :  { %2834 = vst.msk [vmem:[#allocation2 + $0xd] sm:$0x2] %vm2402_vm9, %v2831_v23 }
0x19f4   :  { %v2859_v16 = vpop.f32.mrf.mxu1 }
0x19f5   :  { %v2860_v46 = vadd.f32 %v8819_v25, %v2859_v16 }
0x19f7   :  { %2883 = vrot.lane.b32.xlu2 %v2860_v46, %s7650_s26  ;;  %v2862_v8 = vadd.f32 %v2860_v46, %v8852_v30  ;;  %v2909_v46 = vld [vmem:[#allocation18] sm:$0xff] }
0x19f8   :  { %2931 = vmatpush.msrb.mxu2 %v2909_v46 }
0x19f9   :  { %v6190_v4 = vmul.f32 -1.442695, %v2862_v8 }
0x19fb   :  { %6656 = vpow2.f32 %v6190_v4 }
0x1a01   :  { %v6657_v12 = vpop.eup %6656 }
0x1a02   :  { %v2866_v11 = vadd.f32 1.0, %v6657_v12  ;;  %v6570_v12 = vld [vmem:[#allocation17] ss:$0 sm:$0xff] }
0x1a04   :  { %6658 = vrcp.f32 %v2866_v11  ;;  %v2878_v44 = vand.u32 2147483648, %v2866_v11  ;;  %vm2872_vm5 = vweird.f32 %v2866_v11  ;;  %v2876_v53 = vand.u32 2147483647, %v2866_v11 }
0x1a06   :  { %v2879_v13 = vor.u32 1.1754944e-38, %v2878_v44  ;;  %vm2877_vm7 = vcmp.eq.f32.partialorder %v2876_v53, 8.507059e+37 }
0x1a0a   :  { %v6659_v63 = vpop.eup %6658 }
0x1a0b   :  { %v2868_v55 = vmul.f32 %v6659_v63, %v2866_v11  ;;  %vm2873_vm4 = vweird.f32 %v6659_v63 }
0x1a0c   :  { %vm2874_vm6 = vmor %vm2872_vm5, %vm2873_vm4  ;;  %vm3132_vm5 = vcmp.ge.s32.totalorder %v8386_v51, 8 }
0x1a0d   :  { %v2869_v49 = vsub.f32 1.0, %v2868_v55 }
0x1a0f   :  { %v2870_v60 = vmul.f32 %v6659_v63, %v2869_v49 }
0x1a11   :  { %v2871_v40 = vadd.f32 %v6659_v63, %v2870_v60 }
0x1a13   :  { %v2875_v25 = vsel %vm2874_vm6, %v6659_v63, %v2871_v40  ;;  %vm3134_vm6 = vcmp.ge.s32.totalorder %v8386_v51, 16 }
0x1a14   :  { %v2880_v9 = vsel %vm2877_vm7, %v2879_v13, %v2875_v25  ;;  %vm3137_vm7 = vcmp.ge.s32.totalorder %v8386_v51, 24 }
0x1a15   :  { %v2893_v7 = vsub.f32 1.0, %v2880_v9  ;;  %v2899_v2 = vmul.f32 %v2880_v9, %v2828_v52 }
0x1a51   :  { %v2884_v26 = vpop.permute.xlu2 %2883 }
0x1a52   :  { %v2886_v14 = vmul.f32 %v2884_v26, %v2880_v9 }
0x1a54   :  { %2888 = vrot.lane.b32.xlu0 %v2886_v14, %s7614_s30 }
0x1ac6   :  { %v2889_v28 = vpop.permute.xlu0 %2888 }
0x1ac7   :  { %v2891_v39 = vadd.f32 %v2889_v28, %v8852_v30 }
0x1ac9   :  { %6660 = vtanh.f32 %v2891_v39 }
0x1acf   :  { %v6661_v5 = vpop.eup %6660 }
0x1ad0   :  { %2895 = vrot.lane.b32.xlu1 %v6661_v5, %s7645_s23  ;;  %v3273_v5 = vld [vmem:[%s10161_s6 + $0x18] sm:$0xff] }
0x1ad1   :  { %3296 = vmatpush.msrb.mxu3 %v3273_v5 }
0x1b42   :  { %v2896_v10 = vpop.permute.xlu1 %2895 }
0x1b43   :  { %v2898_v23 = vmul.f32 %v2896_v10, %v2893_v7  ;;  %v3272_v7 = vld [vmem:[%s10161_s6 + $0x10] sm:$0xff]  ;;  %v3271_v10 = vld [vmem:[%s10161_s6 + $0x8] sm:$0xff] }
0x1b44   :  { %3297 = vmatpush.msrb.mxu3 %v3272_v7 }
0x1b45   :  { %v2900_v16 = vadd.f32 %v2899_v2, %v2898_v23  ;;  %v3270_v2 = vld [vmem:[%s10161_s6] sm:$0xff] }
0x1b46   :  { %3298 = vmatpush.msrb.mxu3 %v3271_v10 }
0x1b47   :  { %2902 = vrot.lane.b32.xlu2 %v2900_v16, %s7645_s23 }
0x1b48   :  { %3299 = vmatpush.msrb.mxu3 %v3270_v2 }
0x1ba1   :  { %v2903_v8 = vpop.permute.xlu2 %2902 }
0x1ba2   :  { %2905 = vst.msk [vmem:[#allocation2 + $0x7] sm:$0x1] %vm2400_vm8, %v2903_v8 }
0x1ba3   :  { %2906 = vst.msk [vmem:[#allocation2 + $0xe] sm:$0x2] %vm2402_vm9, %v2903_v8 }
0x1ba9   :  { %v2907_v4 = vld [vmem:[#allocation2] sm:$0xff] }
0x1baa   :  { %6191 = vmatmul.msk.f32.vlgmr.msrb.gmra.mxu2 %vm836_vm0, %v2907_v4  ;;  %v2908_v30 = vld [vmem:[#allocation2 + $0x8] sm:$0xff] }
0x1bb2   :  { %6192 = vmatmul.msk.f32.gmra.mxu2 %vm836_vm0, %v2908_v30 }
0x1c2d   :  { %v2933_v11 = vpop.f32.mrf.mxu2 }
0x1c2e   :  { %v2939_v52 = vadd.f32 %v2933_v11, %v8824_v57 }
0x1c30   :  { %v8933_v63 = vadd.f32 %v6570_v12, %v2939_v52 }
0x1c32   :  { %v3216_v55 = vsel %vm667_vm2, %v8933_v63, 0.0 }
0x1c33   :  { %3217 = vadd.xlane.f32.xlu0 %v3216_v55 }
0x1c35   :  { %v2936_v49 = vpop.f32.mrf.mxu2 }
0x1c36   :  { %v2940_v60 = vadd.f32 %v2936_v49, %v8828_v41 }
0x1c38   :  { %v8938_v40 = vadd.f32 %v6570_v12, %v2940_v60 }
0x1c3a   :  { %v3219_v44 = vsel %vm667_vm2, %v8938_v40, 0.0 }
0x1c3b   :  { %3220 = vadd.xlane.f32.xlu1 %v3219_v44 }
0x1ca6   :  { %v3218_v53 = vpop.xlane.xlu0 %3217 }
0x1ca7   :  { %v3222_v57 = vmul.f32 %v3218_v53, %v8142_v36 }
0x1ca9   :  { %v3224_v25 = vsub.f32 %v8933_v63, %v3222_v57  ;;  %v6571_v57 = vld [vmem:[#allocation24] ss:$0 sm:$0xff] }
0x1cab   :  { %v3226_v13 = vmul.f32 %v3224_v25, %v3224_v25 }
0x1cad   :  { %v3228_v26 = vsel %vm667_vm2, %v3226_v13, 0.0 }
0x1cae   :  { %3229 = vadd.xlane.f32.xlu2 %v3228_v26  ;;  %v3221_v41 = vpop.xlane.xlu1 %3220 }
0x1caf   :  { %v3223_v9 = vmul.f32 %v3221_v41, %v8142_v36 }
0x1cb1   :  { %v3225_v14 = vsub.f32 %v8938_v40, %v3223_v9  ;;  %v6572_v9 = vld [vmem:[%s10162_s27] ss:$0 sm:$0xff] }
0x1cb3   :  { %v3227_v28 = vmul.f32 %v3225_v14, %v3225_v14 }
0x1cb5   :  { %v3231_v39 = vsel %vm667_vm2, %v3227_v28, 0.0 }
0x1cb6   :  { %3232 = vadd.xlane.f32.xlu0 %v3231_v39 }
0x1d21   :  { %v3230_v23 = vpop.xlane.xlu2 %3229 }
0x1d22   :  { %v3234_v16 = vmul.f32 %v3230_v23, %v8142_v36 }
0x1d24   :  { %v3236_v46 = vadd.f32 1e-05, %v3234_v16 }
0x1d26   :  { %6662 = vrsqrt.f32 %v3236_v46  ;;  %vm3244_vm9 = vweird.f32 %v3236_v46 }
0x1d29   :  { %v3233_v8 = vpop.xlane.xlu0 %3232 }
0x1d2a   :  { %v3235_v4 = vmul.f32 %v3233_v8, %v8142_v36  ;;  %v6573_v8 = vld [vmem:[#allocation39] ss:$0 sm:$0xff] }
0x1d2c   :  { %v6663_v30 = vpop.eup %6662  ;;  %v3237_v12 = vadd.f32 1e-05, %v3235_v4 }
0x1d2d   :  { %v3239_v11 = vmul.f32 %v6663_v30, %v3236_v46  ;;  %vm3245_vm8 = vweird.f32 %v6663_v30 }
0x1d2e   :  { %6664 = vrsqrt.f32 %v3237_v12  ;;  %vm3246_vm10 = vmor %vm3244_vm9, %vm3245_vm8  ;;  %vm3254_vm3 = vweird.f32 %v3237_v12  ;;  %vm2961_vm8 = vcmask 392192   ;;  %vm3140_vm9 = vcmp.ge.s32.totalorder %v8386_v51, 32 }
0x1d2f   :  { %v3240_v52 = vmul.f32 %v6663_v30, %v3239_v11 }
0x1d31   :  { %v3241_v55 = vmul.f32 0.5, %v3240_v52 }
0x1d33   :  { %v3242_v49 = vsub.f32 1.5, %v3241_v55 }
0x1d34   :  { %v6665_v60 = vpop.eup %6664 }
0x1d35   :  { %v3243_v44 = vmul.f32 %v6663_v30, %v3242_v49  ;;  %v3249_v53 = vmul.f32 %v6665_v60, %v3237_v12  ;;  %vm3255_vm14 = vweird.f32 %v6665_v60 }
0x1d36   :  { %vm3256_vm4 = vmor %vm3254_vm3, %vm3255_vm14  ;;  %vm3146_vm14 = vcmp.ge.s32.totalorder %v8386_v51, 48 }
0x1d37   :  { %v3247_v13 = vsel %vm3246_vm10, %v6663_v30, %v3243_v44  ;;  %v3250_v26 = vmul.f32 %v6665_v60, %v3249_v53  ;;  %v6574_v53 = vld [vmem:[%s10163_s25] ss:$0 sm:$0xff]  ;;  %vm3143_vm10 = vcmp.ge.s32.totalorder %v8386_v51, 40 }
0x1d38   :  { %v3258_v41 = vmul.f32 %v3247_v13, %v3224_v25 }
0x1d39   :  { %v3251_v28 = vmul.f32 0.5, %v3250_v26 }
0x1d3a   :  { %v3263_v39 = vmul.f32 %v6571_v57, %v3258_v41 }
0x1d3b   :  { %v3252_v5 = vsub.f32 1.5, %v3251_v28 }
0x1d3c   :  { %v3268_v7 = vadd.f32 %v6572_v9, %v3263_v39 }
0x1d3d   :  { %v3253_v10 = vmul.f32 %v6665_v60, %v3252_v5  ;;  %v2947_v5 = vld [vmem:[%s10163_s25] sm:$0x1] }
0x1d3e   :  { %6209 = vmatmul.msk.f32.vlgmr.msrb.gmra.mxu3 %vm667_vm2, %v3268_v7 }
0x1d3f   :  { %v3257_v2 = vsel %vm3256_vm4, %v6665_v60, %v3253_v10  ;;  %v10056_v10 = vmov 0   ;;  %vm3149_vm4 = vcmp.ge.s32.totalorder %v8386_v51, 56 }
0x1d40   :  { %v3259_v23 = vmul.f32 %v3257_v2, %v3225_v14  ;;  %v3133_v2 = vsel %vm3132_vm5, 1, %v10056_v10 }
0x1d42   :  { %v3264_v16 = vmul.f32 %v6571_v57, %v3259_v23  ;;  %v3135_v23 = vsel %vm3134_vm6, 1, %v10056_v10 }
0x1d44   :  { %v3269_v46 = vadd.f32 %v6572_v9, %v3264_v16 }
0x1d46   :  { %6210 = vmatmul.msk.f32.gmra.mxu3 %vm667_vm2, %v3269_v46  ;;  %v3136_v46 = vadd.s32 %v3135_v23, %v3133_v2 }
0x1dc1   :  { %v3301_v4 = vpop.f32.mrf.mxu3 }
0x1dc2   :  { %v8957_v25 = vadd.f32 %v6573_v8, %v3301_v4 }
0x1dc4   :  { %3317 = vrot.lane.b32.xlu2 %v8957_v25, %s7648_s12 }
0x1dc9   :  { %v3304_v30 = vpop.f32.mrf.mxu3 }
0x1dca   :  { %v8961_v11 = vadd.f32 %v6573_v8, %v3304_v30  ;;  %v9035_v8 = vsel %vm3137_vm7, 1, %v10056_v10 }
0x1dcc   :  { %3309 = vrot.lane.b32.xlu2 %v8957_v25, %s7645_s23  ;;  %3315 = vrot.lane.b32.xlu0 %v8961_v11, %s7650_s26 }
0x1dcd   :  { %3319 = vrot.lane.b32.xlu1 %v8961_v11, %s7648_s12 }
0x1dd4   :  { %3311 = vrot.lane.b32.xlu0 %v8961_v11, %s7645_s23 }
0x1dd5   :  { %3313 = vrot.lane.b32.xlu1 %v8957_v25, %s7650_s26 }
0x1e1e   :  { %v8973_v14 = vpop.permute.xlu2 %3317 }
0x1e1f   :  { %3333 = vrot.lane.b32.xlu0 %v8973_v14, %s7657_s17 }
0x1e26   :  { %v8985_v55 = vpop.permute.xlu2 %3309 }
0x1e3e   :  { %v8977_v12 = vpop.permute.xlu0 %3315 }
0x1e3f   :  { %v8979_v52 = vpop.permute.xlu1 %3319  ;;  %3331 = vrot.lane.b32.xlu2 %v8977_v12, %s7657_s17 }
0x1e40   :  { %3335 = vrot.lane.b32.xlu1 %v8979_v52, %s7657_s17 }
0x1e46   :  { %v8987_v49 = vpop.permute.xlu0 %3311 }
0x1e47   :  { %v8989_v60 = vpop.permute.xlu1 %3313  ;;  %3325 = vrot.lane.b32.xlu2 %v8985_v55, %s7657_s17  ;;  %3327 = vrot.lane.b32.xlu0 %v8987_v49, %s7657_s17 }
0x1e48   :  { %3329 = vrot.lane.b32.xlu1 %v8989_v60, %s7657_s17 }
0x1e4f   :  { %3321 = vrot.lane.b32.xlu0 %v8957_v25, %s7657_s17  ;;  %2950 = vrot.lane.b32.xlu2 %v6574_v53, %s7614_s30 }
0x1e50   :  { %3323 = vrot.lane.b32.xlu1 %v8961_v11, %s7657_s17 }
0x1e57   :  { %2956 = vrot.lane.b32.xlu0 %v6574_v53, %s7659_s0 }
0x1e58   :  { %2953 = vrot.lane.b32.xlu1 %v6574_v53, %s7658_s3 }
0x1e91   :  { %v3334_v57 = vpop.permute.xlu0 %3333 }
0x1e99   :  { %v3332_v13 = vpop.permute.xlu2 %3331 }
0x1ea1   :  { %v3326_v9 = vpop.permute.xlu2 %3325 }
0x1ea9   :  { %v2951_v7 = vpop.permute.xlu2 %2950 }
0x1eaa   :  { %v2959_v16 = vsel %vm1078_vm13, %v2947_v5, %v2951_v7  ;;  %v3150_v7 = vsel %vm3149_vm4, 1, %v10056_v10 }
0x1eb2   :  { %v3336_v44 = vpop.permute.xlu1 %3335 }
0x1eb3   :  { %6211 = vmatpush.xpose.msk.msra.mxu0 %vm836_vm0, %v3336_v44  ;;  %v3139_v44 = vadd.s32 %v9035_v8, %v3136_v46 }
0x1eb7   :  { %6212 = vmatpush.xpose.msk.msra.mxu0 %vm836_vm0, %v3334_v57  ;;  %v3141_v57 = vsel %vm3140_vm9, 1, %v10056_v10 }
0x1eb9   :  { %v3328_v41 = vpop.permute.xlu0 %3327 }
0x1eba   :  { %v3330_v26 = vpop.permute.xlu1 %3329 }
0x1ebb   :  { %6213 = vmatpush.xpose.msk.msra.mxu0 %vm836_vm0, %v3332_v13 }
0x1ebf   :  { %6214 = vmatpush.xpose.msk.msra.mxu0 %vm836_vm0, %v3330_v26  ;;  %v3142_v26 = vadd.s32 %v3141_v57, %v3139_v44 }
0x1ec1   :  { %v3322_v39 = vpop.permute.xlu0 %3321 }
0x1ec2   :  { %v3324_v28 = vpop.permute.xlu1 %3323 }
0x1ec3   :  { %6215 = vmatpush.xpose.msk.msra.mxu0 %vm836_vm0, %v3328_v41  ;;  %v3144_v41 = vsel %vm3143_vm10, 1, %v10056_v10 }
0x1ec7   :  { %6216 = vmatpush.xpose.msk.msra.mxu0 %vm836_vm0, %v3326_v9  ;;  %v3145_v9 = vadd.s32 %v3144_v41, %v3142_v26 }
0x1ec9   :  { %v2957_v30 = vpop.permute.xlu0 %2956 }
0x1eca   :  { %v2954_v4 = vpop.permute.xlu1 %2953 }
0x1ecb   :  { %6217 = vmatpush.xpose.msk.msra.mxu0 %vm836_vm0, %v3324_v28  ;;  %v2960_v53 = vsel %vm667_vm2, %v2959_v16, %v2954_v4  ;;  %v3147_v28 = vsel %vm3146_vm14, 1, %v10056_v10 }
0x1ecc   :  { %v2962_v13 = vsel %vm2961_vm8, %v2960_v53, %v2957_v30  ;;  %v10063_v30 = vmov -1e+09  }
0x1ecd   :  { %vm3160_vm3 = vcmp.gt.f32.partialorder %v2962_v13, 0.5 }
0x1ece   :  { %v3161_v5 = vsel %vm3160_vm3, 1, %v10056_v10 }
0x1ecf   :  { %6218 = vmatpush.xpose.msk.msra.mxu0 %vm836_vm0, %v3322_v39  ;;  %v3148_v39 = vadd.s32 %v3147_v28, %v3145_v9  ;;  %v3162_v2 = vperm.slane %v3161_v5, 0 }
0x1ed1   :  { %v3151_v23 = vadd.s32 %v3150_v7, %v3148_v39  ;;  %vm9049_vm5 = vcmp.eq.s32.totalorder %v3162_v2, 1 }
0x1ed2   :  { %6219 = vmatmul.msk.f32.vlgmr.msra.gmra.mxu0 %vm836_vm0, %v8957_v25 }
0x1ed3   :  { %vm6200_vm6 = vcmp.eq.s32.totalorder %v3151_v23, 7  ;;  %vm6193_vm9 = vcmp.eq.s32.totalorder %v3151_v23, 0  ;;  %vm6194_vm14 = vcmp.eq.s32.totalorder %v3151_v23, 1  ;;  %vm6195_vm4 = vcmp.eq.s32.totalorder %v3151_v23, 2 }
0x1ed4   :  { %vm9055_vm7 = vmand %vm6200_vm6, %vm9049_vm5 }
0x1ed5   :  { %vm3164_vm10 = vmand %vm6193_vm9, %vm9049_vm5  ;;  %vm6196_vm9 = vcmp.eq.s32.totalorder %v3151_v23, 3 }
0x1ed6   :  { %v9062_v44 = vsel %vm3164_vm10, 0.0, %v10063_v30  ;;  %vm3165_vm3 = vmand %vm6194_vm14, %vm9049_vm5  ;;  %vm6197_vm14 = vcmp.eq.s32.totalorder %v3151_v23, 4 }
0x1ed7   :  { %v9072_v9 = vsel %vm3165_vm3, 0.0, %v10063_v30  ;;  %vm3166_vm6 = vmand %vm6195_vm4, %vm9049_vm5  ;;  %vm6198_vm4 = vcmp.eq.s32.totalorder %v3151_v23, 5 }
0x1ed8   :  { %v9082_v2 = vsel %vm3166_vm6, 0.0, %v10063_v30  ;;  %vm3167_vm10 = vmand %vm6196_vm9, %vm9049_vm5  ;;  %vm6199_vm9 = vcmp.eq.s32.totalorder %v3151_v23, 6 }
0x1ed9   :  { %vm3168_vm3 = vmand %vm6197_vm14, %vm9049_vm5 }
0x1eda   :  { %6220 = vmatmul.msk.f32.gmra.mxu0 %vm836_vm0, %v8961_v11  ;;  %v9099_v10 = vsel %vm3168_vm3, 0.0, %v10063_v30  ;;  %vm3169_vm6 = vmand %vm6198_vm4, %vm9049_vm5 }
0x1edb   :  { %v9109_v56 = vsel %vm3169_vm6, 0.0, %v10063_v30 }
0x1ee2   :  { %6221 = vmatmul.msk.f32.gmra.mxu0 %vm836_vm0, %v8985_v55 }
0x1eea   :  { %6222 = vmatmul.msk.f32.gmra.mxu0 %vm836_vm0, %v8987_v49 }
0x1ef2   :  { %6223 = vmatmul.msk.f32.gmra.mxu0 %vm836_vm0, %v8989_v60 }
0x1efa   :  { %6224 = vmatmul.msk.f32.gmra.mxu0 %vm836_vm0, %v8977_v12 }
0x1f02   :  { %6225 = vmatmul.msk.f32.gmra.mxu0 %vm836_vm0, %v8973_v14 }
0x1f0a   :  { %6226 = vmatmul.msk.f32.gmra.mxu0 %vm836_vm0, %v8979_v52 }
0x1f4f   :  { %v3386_v4 = vpop.f32.mrf.mxu0 }
0x1f50   :  { %v3410_v53 = vmul.f32 0.35355338, %v3386_v4 }
0x1f52   :  { %v9065_v57 = vadd.f32 %v3410_v53, %v9062_v44 }
0x1f54   :  { %v3426_v13 = vsel %vm797_vm11, %v9065_v57, -inf }
0x1f55   :  { %3427 = vmax.xlane.f32.xlu2 %v3426_v13 }
0x1f57   :  { %v3389_v26 = vpop.f32.mrf.mxu0 }
0x1f58   :  { %v3411_v41 = vmul.f32 0.35355338, %v3389_v26 }
0x1f5a   :  { %v9075_v28 = vadd.f32 %v3411_v41, %v9072_v9  ;;  %v9089_v41 = vsel %vm3167_vm10, 0.0, %v10063_v30  ;;  %vm3170_vm10 = vmand %vm6199_vm9, %vm9049_vm5 }
0x1f5c   :  { %v3429_v39 = vsel %vm797_vm11, %v9075_v28, -inf }
0x1f5d   :  { %3430 = vmax.xlane.f32.xlu1 %v3429_v39 }
0x1f5f   :  { %v3392_v5 = vpop.f32.mrf.mxu0 }
0x1f60   :  { %v3412_v7 = vmul.f32 0.35355338, %v3392_v5 }
0x1f62   :  { %v3420_v4 = vadd.f32 %v3412_v7, %v9082_v2 }
0x1f64   :  { %v3432_v53 = vsel %vm797_vm11, %v3420_v4, -inf }
0x1f65   :  { %3433 = vmax.xlane.f32.xlu0 %v3432_v53 }
0x1f67   :  { %v3395_v13 = vpop.f32.mrf.mxu0 }
0x1f68   :  { %v3413_v26 = vmul.f32 0.35355338, %v3395_v13 }
0x1f6a   :  { %v9092_v39 = vadd.f32 %v3413_v26, %v9089_v41 }
0x1f6c   :  { %v3435_v5 = vsel %vm797_vm11, %v9092_v39, -inf }
0x1f6d   :  { %3436 = vmax.xlane.f32.xlu2 %v3435_v5 }
0x1f6f   :  { %v3398_v7 = vpop.f32.mrf.mxu0 }
0x1f70   :  { %v3414_v53 = vmul.f32 0.35355338, %v3398_v7 }
0x1f72   :  { %v9102_v13 = vadd.f32 %v3414_v53, %v9099_v10 }
0x1f74   :  { %v3438_v26 = vsel %vm797_vm11, %v9102_v13, -inf }
0x1f75   :  { %3439 = vmax.xlane.f32.xlu1 %v3438_v26  ;;  %v9116_v26 = vsel %vm3170_vm10, 0.0, %v10063_v30 }
0x1f77   :  { %v3401_v5 = vpop.f32.mrf.mxu0 }
0x1f78   :  { %v3415_v47 = vmul.f32 0.35355338, %v3401_v5 }
0x1f7a   :  { %v3423_v7 = vadd.f32 %v3415_v47, %v9109_v56  ;;  %v6489_v47 = vpack.i.bf16 %v8989_v60, %v8977_v12 }
0x1f7c   :  { %v3441_v24 = vsel %vm797_vm11, %v3423_v7, -inf }
0x1f7d   :  { %3442 = vmax.xlane.f32.xlu0 %v3441_v24  ;;  %v6484_v24 = vpack.i.bf16 %v8973_v14, %v8979_v52  ;;  %v6499_v52 = vpack.i.bf16 %v8957_v25, %v8961_v11 }
0x1f7f   :  { %v3404_v53 = vpop.f32.mrf.mxu0 }
0x1f80   :  { %v3416_v1 = vmul.f32 0.35355338, %v3404_v53 }
0x1f82   :  { %v3424_v38 = vadd.f32 %v3416_v1, %v9116_v26  ;;  %v9129_v1 = vsel %vm9055_vm7, 0.0, %v10063_v30 }
0x1f84   :  { %v3444_v5 = vsel %vm797_vm11, %v3424_v38, -inf }
0x1f85   :  { %3445 = vmax.xlane.f32.xlu2 %v3444_v5 }
0x1f87   :  { %v3407_v23 = vpop.f32.mrf.mxu0 }
0x1f88   :  { %v3417_v16 = vmul.f32 0.35355338, %v3407_v23 }
0x1f8a   :  { %v9132_v53 = vadd.f32 %v3417_v16, %v9129_v1 }
0x1f8c   :  { %v3447_v12 = vsel %vm797_vm11, %v9132_v53, -inf }
0x1f91   :  { %6490 = vrot.lane.b32.xlu0 %v6489_v47, %s7662_s16 }
0x1f9d   :  { %6485 = vrot.lane.b32.xlu2 %v6484_v24, %s7662_s16 }
0x1fbb   :  { %3448 = vmax.xlane.f32.xlu0 %v3447_v12 }
0x1fc8   :  { %v3428_v60 = vpop.xlane.xlu2 %3427 }
0x1fc9   :  { %v3450_v5 = vsub.f32 %v9065_v57, %v3428_v60 }
0x1fcb   :  { %v3458_v14 = vmul.f32 1.442695, %v3450_v5 }
0x1fcd   :  { %6666 = vpow2.f32 %v3458_v14 }
0x1fcf   :  { %6500 = vrot.lane.b32.xlu0 %v6499_v52, %s7662_s16 }
0x1fd0   :  { %v3431_v46 = vpop.xlane.xlu1 %3430 }
0x1fd1   :  { %v3451_v47 = vsub.f32 %v9075_v28, %v3431_v46 }
0x1fd3   :  { %v9141_v24 = vpop.eup %6666  ;;  %v3460_v23 = vmul.f32 1.442695, %v3451_v47 }
0x1fd4   :  { %v3474_v16 = vsel %vm797_vm11, %v9141_v24, 0.0 }
0x1fd5   :  { %6668 = vpow2.f32 %v3460_v23  ;;  %3475 = vadd.xlane.f32.xlu1 %v3474_v16  ;;  %v6494_v16 = vpack.i.bf16 %v8985_v55, %v8987_v49 }
0x1fd8   :  { %v3434_v12 = vpop.xlane.xlu0 %3433 }
0x1fd9   :  { %v3452_v57 = vsub.f32 %v3420_v4, %v3434_v12 }
0x1fdb   :  { %v9145_v60 = vpop.eup %6668  ;;  %v3462_v5 = vmul.f32 1.442695, %v3452_v57 }
0x1fdc   :  { %v3477_v25 = vsel %vm797_vm11, %v9145_v60, 0.0 }
0x1fdd   :  { %6670 = vpow2.f32 %v3462_v5  ;;  %3478 = vadd.xlane.f32.xlu1 %v3477_v25 }
0x1fe0   :  { %v3437_v28 = vpop.xlane.xlu2 %3436 }
0x1fe1   :  { %v3453_v52 = vsub.f32 %v9092_v39, %v3437_v28 }
0x1fe3   :  { %v9149_v11 = vpop.eup %6670  ;;  %v3464_v46 = vmul.f32 1.442695, %v3453_v52 }
0x1fe4   :  { %v3480_v14 = vsel %vm797_vm11, %v9149_v11, 0.0 }
0x1fe5   :  { %3481 = vadd.xlane.f32.xlu2 %v3480_v14  ;;  %6672 = vpow2.f32 %v3464_v46 }
0x1feb   :  { %v9156_v12 = vpop.eup %6672 }
0x1fec   :  { %v3483_v5 = vsel %vm797_vm11, %v9156_v12, 0.0 }
0x1ff0   :  { %v3443_v4 = vpop.xlane.xlu0 %3442 }
0x1ff1   :  { %v3455_v47 = vsub.f32 %v3423_v7, %v3443_v4 }
0x1ff3   :  { %v3468_v23 = vmul.f32 1.442695, %v3455_v47 }
0x1ff5   :  { %6674 = vpow2.f32 %v3468_v23  ;;  %v3440_v23 = vpop.xlane.xlu1 %3439 }
0x1ff6   :  { %6495 = vrot.lane.b32.xlu1 %v6494_v16, %s7662_s16  ;;  %v3454_v16 = vsub.f32 %v9102_v13, %v3440_v23 }
0x1ff8   :  { %v3446_v57 = vpop.xlane.xlu2 %3445 }
0x1ff9   :  { %v3456_v25 = vsub.f32 %v3424_v38, %v3446_v57  ;;  %3484 = vadd.xlane.f32.xlu0 %v3483_v5  ;;  %v3466_v57 = vmul.f32 1.442695, %v3454_v16 }
0x1ffb   :  { %v9161_v39 = vpop.eup %6674  ;;  %v3470_v28 = vmul.f32 1.442695, %v3456_v25 }
0x1ffc   :  { %v3489_v7 = vsel %vm797_vm11, %v9161_v39, 0.0 }
0x1ffd   :  { %6676 = vpow2.f32 %v3470_v28  ;;  %3490 = vadd.xlane.f32.xlu2 %v3489_v7 }
0x1ffe   :  { %6678 = vpow2.f32 %v3466_v57 }
0x2000   :  { %v6486_v55 = vpop.permute.xlu2 %6485 }
0x2001   :  { %v6487_v49 = vunpack.i.l.bf16 %v6486_v55  ;;  %v6488_v52 = vunpack.i.h.bf16 %v6486_v55 }
0x2003   :  { %v9165_v14 = vpop.eup %6676  ;;  %v6491_v46 = vpop.permute.xlu0 %6490  ;;  %3674 = vmatpush.msra.mxu1 %v6487_v49 }
0x2004   :  { %v6492_v4 = vunpack.i.l.bf16 %v6491_v46  ;;  %v3492_v38 = vsel %vm797_vm11, %v9165_v14, 0.0  ;;  %v6493_v47 = vunpack.i.h.bf16 %v6491_v46  ;;  %v9170_v5 = vpop.eup %6678 }
0x2005   :  { %3493 = vadd.xlane.f32.xlu2 %v3492_v38  ;;  %3675 = vmatpush.msra.mxu1 %v6488_v52  ;;  %v3486_v25 = vsel %vm797_vm11, %v9170_v5, 0.0 }
0x2007   :  { %3676 = vmatpush.msra.mxu1 %v6492_v4 }
0x2009   :  { %3677 = vmatpush.msra.mxu1 %v6493_v47 }
0x2020   :  { %3487 = vadd.xlane.f32.xlu1 %v3486_v25 }
0x202e   :  { %v3449_v28 = vpop.xlane.xlu0 %3448 }
0x202f   :  { %v3457_v7 = vsub.f32 %v9132_v53, %v3449_v28 }
0x2031   :  { %v3472_v55 = vmul.f32 1.442695, %v3457_v7 }
0x2033   :  { %6680 = vpow2.f32 %v3472_v55 }
0x2039   :  { %v9175_v49 = vpop.eup %6680 }
0x203a   :  { %v3495_v52 = vsel %vm797_vm11, %v9175_v49, 0.0 }
0x203b   :  { %3496 = vadd.xlane.f32.xlu0 %v3495_v52 }
0x2041   :  { %v6501_v25 = vpop.permute.xlu0 %6500 }
0x2042   :  { %v6502_v59 = vunpack.i.l.bf16 %v6501_v25  ;;  %v6503_v58 = vunpack.i.h.bf16 %v6501_v25 }
0x2048   :  { %v3476_v13 = vpop.xlane.xlu1 %3475 }
0x2049   :  { %6682 = vrcp.f32 %v3476_v13  ;;  %v3509_v30 = vand.u32 2147483648, %v3476_v13  ;;  %vm3503_vm7 = vweird.f32 %v3476_v13  ;;  %v3507_v52 = vand.u32 2147483647, %v3476_v13 }
0x204b   :  { %vm3508_vm3 = vcmp.eq.f32.partialorder %v3507_v52, 8.507059e+37 }
0x204f   :  { %v6683_v4 = vpop.eup %6682 }
0x2050   :  { %v3479_v46 = vpop.xlane.xlu1 %3478  ;;  %v3499_v38 = vmul.f32 %v6683_v4, %v3476_v13  ;;  %vm3504_vm5 = vweird.f32 %v6683_v4 }
0x2051   :  { %6684 = vrcp.f32 %v3479_v46  ;;  %vm3505_vm14 = vmor %vm3503_vm7, %vm3504_vm5  ;;  %v3524_v13 = vand.u32 2147483648, %v3479_v46  ;;  %vm3518_vm6 = vweird.f32 %v3479_v46 }
0x2052   :  { %v3500_v47 = vsub.f32 1.0, %v3499_v38  ;;  %v3510_v38 = vor.u32 1.1754944e-38, %v3509_v30 }
0x2054   :  { %v3501_v57 = vmul.f32 %v6683_v4, %v3500_v47 }
0x2056   :  { %v3502_v28 = vadd.f32 %v6683_v4, %v3501_v57 }
0x2057   :  { %v6685_v16 = vpop.eup %6684 }
0x2058   :  { %v3482_v23 = vpop.xlane.xlu2 %3481  ;;  %v3514_v53 = vmul.f32 %v6685_v16, %v3479_v46  ;;  %v3506_v0 = vsel %vm3505_vm14, %v6683_v4, %v3502_v28  ;;  %vm3519_vm4 = vweird.f32 %v6685_v16  ;;  %v3522_v4 = vand.u32 2147483647, %v3479_v46 }
0x2059   :  { %6686 = vrcp.f32 %v3482_v23  ;;  %v3511_v57 = vsel %vm3508_vm3, %v3510_v38, %v3506_v0  ;;  %vm3520_vm9 = vmor %vm3518_vm6, %vm3519_vm4  ;;  %v3525_v28 = vor.u32 1.1754944e-38, %v3524_v13  ;;  %vm3533_vm7 = vweird.f32 %v3482_v23 }
0x205a   :  { %v3515_v7 = vsub.f32 1.0, %v3514_v53  ;;  %v3512_v31 = vmul.f32 %v9141_v24, %v3511_v57  ;;  %vm3523_vm10 = vcmp.eq.f32.partialorder %v3522_v4, 8.507059e+37  ;;  %v3537_v24 = vand.u32 2147483647, %v3482_v23 }
0x205c   :  { %v3516_v6 = vmul.f32 %v6685_v16, %v3515_v7  ;;  %vm3538_vm3 = vcmp.eq.f32.partialorder %v3537_v24, 8.507059e+37 }
0x205e   :  { %v3517_v35 = vadd.f32 %v6685_v16, %v3516_v6 }
0x205f   :  { %v6687_v55 = vpop.eup %6686 }
0x2060   :  { %v3529_v37 = vmul.f32 %v6687_v55, %v3482_v23  ;;  %vm3534_vm5 = vweird.f32 %v6687_v55 }
0x2061   :  { %vm3535_vm14 = vmor %vm3533_vm7, %vm3534_vm5 }
0x2062   :  { %v3530_v53 = vsub.f32 1.0, %v3529_v37 }
0x2068   :  { %v6496_v61 = vpop.permute.xlu1 %6495 }
0x2069   :  { %v6497_v18 = vunpack.i.l.bf16 %v6496_v61  ;;  %v6498_v33 = vunpack.i.h.bf16 %v6496_v61  ;;  %v3531_v61 = vmul.f32 %v6687_v55, %v3530_v53 }
0x206b   :  { %3678 = vmatpush.msra.mxu1 %v6497_v18  ;;  %v3521_v18 = vsel %vm3520_vm9, %v6685_v16, %v3517_v35  ;;  %v3532_v0 = vadd.f32 %v6687_v55, %v3531_v61 }
0x206c   :  { %v3485_v47 = vpop.xlane.xlu0 %3484  ;;  %v3526_v37 = vsel %vm3523_vm10, %v3525_v28, %v3521_v18 }
0x206d   :  { %6688 = vrcp.f32 %v3485_v47  ;;  %3679 = vmatpush.msra.mxu1 %v6498_v33  ;;  %v3527_v25 = vmul.f32 %v9145_v60, %v3526_v37  ;;  %v3554_v7 = vand.u32 2147483648, %v3485_v47  ;;  %vm3548_vm6 = vweird.f32 %v3485_v47 }
0x206e   :  { %v3552_v38 = vand.u32 2147483647, %v3485_v47 }
0x206f   :  { %3680 = vmatpush.msra.mxu1 %v6502_v59  ;;  %v3539_v59 = vand.u32 2147483648, %v3482_v23  ;;  %v3555_v23 = vor.u32 1.1754944e-38, %v3554_v7 }
0x2070   :  { %vm3553_vm10 = vcmp.eq.f32.partialorder %v3552_v38, 8.507059e+37  ;;  %v3491_v53 = vpop.xlane.xlu2 %3490 }
0x2071   :  { %3681 = vmatpush.msra.mxu1 %v6503_v58  ;;  %v3536_v58 = vsel %vm3535_vm14, %v6687_v55, %v3532_v0  ;;  %v3540_v35 = vor.u32 1.1754944e-38, %v3539_v59  ;;  %6690 = vrcp.f32 %v3491_v53 }
0x2072   :  { %6227 = vmatmul.msk.f32.vlgmr.msra.gmra.mxu1 %vm797_vm11, %v3512_v31 }
0x2073   :  { %v6689_v30 = vpop.eup %6688  ;;  %v3541_v46 = vsel %vm3538_vm3, %v3540_v35, %v3536_v58 }
0x2074   :  { %v3544_v33 = vmul.f32 %v6689_v30, %v3485_v47  ;;  %vm3549_vm4 = vweird.f32 %v6689_v30  ;;  %v3542_v52 = vmul.f32 %v9149_v11, %v3541_v46 }
0x2075   :  { %vm3550_vm9 = vmor %vm3548_vm6, %vm3549_vm4  ;;  %vm3578_vm6 = vweird.f32 %v3491_v53 }
0x2076   :  { %v3545_v6 = vsub.f32 1.0, %v3544_v33 }
0x2077   :  { %v6691_v13 = vpop.eup %6690 }
0x2078   :  { %v3546_v31 = vmul.f32 %v6689_v30, %v3545_v6  ;;  %v3494_v4 = vpop.xlane.xlu2 %3493  ;;  %v3574_v11 = vmul.f32 %v6691_v13, %v3491_v53  ;;  %vm3579_vm3 = vweird.f32 %v6691_v13 }
0x207a   :  { %6228 = vmatmul.msk.f32.gmra.mxu1 %vm797_vm11, %v3527_v25  ;;  %v3547_v16 = vadd.f32 %v6689_v30, %v3546_v31  ;;  %v3575_v61 = vsub.f32 1.0, %v3574_v11 }
0x207c   :  { %v3551_v60 = vsel %vm3550_vm9, %v6689_v30, %v3547_v16  ;;  %v3576_v6 = vmul.f32 %v6691_v13, %v3575_v61  ;;  %v3584_v16 = vand.u32 2147483648, %v3491_v53  ;;  %vm3580_vm9 = vmor %vm3578_vm6, %vm3579_vm3 }
0x207d   :  { %v3556_v57 = vsel %vm3553_vm10, %v3555_v23, %v3551_v60 }
0x207e   :  { %v3557_v55 = vmul.f32 %v9156_v12, %v3556_v57  ;;  %v3577_v35 = vadd.f32 %v6691_v13, %v3576_v6  ;;  %v3585_v23 = vor.u32 1.1754944e-38, %v3584_v16 }
0x2080   :  { %v3581_v38 = vsel %vm3580_vm9, %v6691_v13, %v3577_v35 }
0x2082   :  { %6229 = vmatmul.msk.f32.gmra.mxu1 %vm797_vm11, %v3542_v52  ;;  %v3582_v52 = vand.u32 2147483647, %v3491_v53 }
0x2084   :  { %vm3583_vm10 = vcmp.eq.f32.partialorder %v3582_v52, 8.507059e+37  ;;  %v3740_v52 = vld [vmem:[#allocation42 + $0x18] sm:$0xff] }
0x2085   :  { %v3586_v57 = vsel %vm3583_vm10, %v3585_v23, %v3581_v38  ;;  %v3739_v38 = vld [vmem:[#allocation42 + $0x10] sm:$0xff]  ;;  %3759 = vmatpush.msra.mxu2 %v3740_v52  ;;  %v3737_v23 = vld [vmem:[#allocation42] sm:$0xff] }
0x2086   :  { %v3587_v11 = vmul.f32 %v9161_v39, %v3586_v57  ;;  %v3874_v57 = vld [vmem:[%s10168_s4 + $0x18] sm:$0xff] }
0x2087   :  { %3760 = vmatpush.msra.mxu2 %v3739_v38 }
0x208a   :  { %6230 = vmatmul.msk.f32.gmra.mxu1 %vm797_vm11, %v3557_v55 }
0x2093   :  { %v3488_v18 = vpop.xlane.xlu1 %3487 }
0x2094   :  { %6692 = vrcp.f32 %v3488_v18  ;;  %v3569_v37 = vand.u32 2147483648, %v3488_v18  ;;  %v3567_v12 = vand.u32 2147483647, %v3488_v18  ;;  %vm3563_vm7 = vweird.f32 %v3488_v18 }
0x2095   :  { %6694 = vrcp.f32 %v3494_v4 }
0x2096   :  { %v3570_v24 = vor.u32 1.1754944e-38, %v3569_v37  ;;  %vm3568_vm4 = vcmp.eq.f32.partialorder %v3567_v12, 8.507059e+37 }
0x209a   :  { %v6693_v47 = vpop.eup %6692 }
0x209b   :  { %v3559_v28 = vmul.f32 %v6693_v47, %v3488_v18  ;;  %v6695_v33 = vpop.eup %6694  ;;  %vm3564_vm5 = vweird.f32 %v6693_v47  ;;  %v3599_v18 = vand.u32 2147483648, %v3494_v4 }
0x209c   :  { %v3589_v0 = vmul.f32 %v6695_v33, %v3494_v4  ;;  %vm3565_vm14 = vmor %vm3563_vm7, %vm3564_vm5  ;;  %vm3594_vm5 = vweird.f32 %v6695_v33  ;;  %vm3593_vm7 = vweird.f32 %v3494_v4 }
0x209d   :  { %v3560_v30 = vsub.f32 1.0, %v3559_v28  ;;  %v3600_v53 = vor.u32 1.1754944e-38, %v3599_v18  ;;  %v3872_v18 = vld [vmem:[%s10168_s4 + $0x8] sm:$0xff] }
0x209e   :  { %v3590_v58 = vsub.f32 1.0, %v3589_v0 }
0x209f   :  { %v3561_v59 = vmul.f32 %v6693_v47, %v3560_v30 }
0x20a0   :  { %v3591_v60 = vmul.f32 %v6695_v33, %v3590_v58 }
0x20a1   :  { %v3562_v25 = vadd.f32 %v6693_v47, %v3561_v59 }
0x20a2   :  { %v3592_v55 = vadd.f32 %v6695_v33, %v3591_v60  ;;  %v3738_v60 = vld [vmem:[#allocation42 + $0x8] sm:$0xff] }
0x20a3   :  { %v3566_v31 = vsel %vm3565_vm14, %v6693_v47, %v3562_v25  ;;  %v3597_v47 = vand.u32 2147483647, %v3494_v4  ;;  %vm3595_vm14 = vmor %vm3593_vm7, %vm3594_vm5  ;;  %3761 = vmatpush.msra.mxu2 %v3738_v60 }
0x20a4   :  { %v3571_v46 = vsel %vm3568_vm4, %v3570_v24, %v3566_v31 }
0x20a5   :  { %v3572_v7 = vmul.f32 %v9170_v5, %v3571_v46  ;;  %v3596_v5 = vsel %vm3595_vm14, %v6695_v33, %v3592_v55  ;;  %vm3598_vm3 = vcmp.eq.f32.partialorder %v3597_v47, 8.507059e+37  ;;  %3762 = vmatpush.msra.mxu2 %v3737_v23  ;;  %v3873_v55 = vld [vmem:[%s10168_s4 + $0x10] sm:$0xff]  ;;  %v3837_v23 = vld [vmem:[%s10171_s8 + $0x18] sm:$0xff] }
0x20a6   :  { %v3601_v13 = vsel %vm3598_vm3, %v3600_v53, %v3596_v5  ;;  %3860 = vmatpush.msra.mxu3 %v3837_v23  ;;  %v6578_v23 = vld [vmem:[#allocation26] ss:$0 sm:$0xff] }
0x20a7   :  { %6231 = vmatmul.msk.f32.gmra.mxu1 %vm797_vm11, %v3572_v7  ;;  %v3602_v30 = vmul.f32 %v9165_v14, %v3601_v13  ;;  %3897 = vmatpush.msrb.mxu2 %v3874_v57  ;;  %v3836_v57 = vld [vmem:[%s10171_s8 + $0x10] sm:$0xff] }
0x20a8   :  { %3861 = vmatpush.msra.mxu3 %v3836_v57 }
0x20a9   :  { %3898 = vmatpush.msrb.mxu2 %v3873_v55  ;;  %v3835_v55 = vld [vmem:[%s10171_s8 + $0x8] sm:$0xff] }
0x20aa   :  { %3862 = vmatpush.msra.mxu3 %v3835_v55 }
0x20ab   :  { %3899 = vmatpush.msrb.mxu2 %v3872_v18  ;;  %v3834_v18 = vld [vmem:[%s10171_s8] sm:$0xff] }
0x20ac   :  { %3863 = vmatpush.msra.mxu3 %v3834_v18 }
0x20ae   :  { %v3497_v61 = vpop.xlane.xlu0 %3496 }
0x20af   :  { %6696 = vrcp.f32 %v3497_v61  ;;  %6232 = vmatmul.msk.f32.gmra.mxu1 %vm797_vm11, %v3587_v11  ;;  %v3614_v0 = vand.u32 2147483648, %v3497_v61  ;;  %v3612_v4 = vand.u32 2147483647, %v3497_v61  ;;  %vm3608_vm6 = vweird.f32 %v3497_v61  ;;  %v3871_v11 = vld [vmem:[%s10168_s4] sm:$0xff] }
0x20b0   :  { %3900 = vmatpush.msrb.mxu2 %v3871_v11 }
0x20b1   :  { %v3615_v12 = vor.u32 1.1754944e-38, %v3614_v0  ;;  %vm3613_vm10 = vcmp.eq.f32.partialorder %v3612_v4, 8.507059e+37 }
0x20b5   :  { %v6697_v28 = vpop.eup %6696 }
0x20b6   :  { %v3604_v37 = vmul.f32 %v6697_v28, %v3497_v61  ;;  %vm3609_vm4 = vweird.f32 %v6697_v28 }
0x20b7   :  { %6233 = vmatmul.msk.f32.gmra.mxu1 %vm797_vm11, %v3602_v30  ;;  %vm3610_vm9 = vmor %vm3608_vm6, %vm3609_vm4 }
0x20b8   :  { %v3605_v6 = vsub.f32 1.0, %v3604_v37 }
0x20ba   :  { %v3606_v39 = vmul.f32 %v6697_v28, %v3605_v6 }
0x20bc   :  { %v3607_v59 = vadd.f32 %v6697_v28, %v3606_v39  ;;  %v6562_v39 = vld [vmem:[#allocation33] ss:$0 sm:$0xff] }
0x20be   :  { %v3611_v25 = vsel %vm3610_vm9, %v6697_v28, %v3607_v59  ;;  %vm3180_vm9 = vcmp.ge.s32.totalorder %v8386_v51, 6 }
0x20bf   :  { %v3616_v33 = vsel %vm3613_vm10, %v3615_v12, %v3611_v25  ;;  %v822_v12 = vadd.f32 %v6562_v39, %v8224_v20  ;;  %vm3182_vm10 = vcmp.ge.s32.totalorder %v8386_v51, 12 }
0x20c0   :  { %v3617_v24 = vmul.f32 %v9175_v49, %v3616_v33  ;;  %v825_v33 = vadd.f32 %v6562_v39, %v8226_v22 }
0x20c1   :  { %v9215_v25 = vadd.f32 %v822_v12, %v8126_v15 }
0x20c2   :  { %6234 = vmatmul.msk.f32.gmra.mxu1 %vm797_vm11, %v3617_v24  ;;  %v9221_v24 = vadd.f32 %v825_v33, %v8133_v21 }
0x20ef   :  { %v3683_v14 = vpop.f32.mrf.mxu1 }
0x20f7   :  { %v3686_v58 = vpop.f32.mrf.mxu1 }
0x20ff   :  { %v3689_v31 = vpop.f32.mrf.mxu1 }
0x2100   :  { %3709 = vrot.lane.b32.xlu1 %v3689_v31, %s7628_s7 }
0x2107   :  { %v3692_v35 = vpop.f32.mrf.mxu1 }
0x2124   :  { %v3695_v46 = vpop.f32.mrf.mxu1 }
0x2125   :  { %3717 = vrot.lane.b32.xlu2 %v3695_v46, %s7614_s30 }
0x212c   :  { %v3698_v16 = vpop.f32.mrf.mxu1 }
0x212d   :  { %3719 = vrot.lane.b32.xlu2 %v3698_v16, %s7614_s30 }
0x2134   :  { %v3701_v7 = vpop.f32.mrf.mxu1 }
0x2135   :  { %3725 = vrot.lane.b32.xlu0 %v3701_v7, %s7655_s2 }
0x213d   :  { %3711 = vrot.lane.b32.xlu0 %v3692_v35, %s7628_s7 }
0x213f   :  { %v3704_v49 = vpop.f32.mrf.mxu1 }
0x2140   :  { %3727 = vrot.lane.b32.xlu1 %v3704_v49, %s7655_s2 }
0x2172   :  { %v3710_v47 = vpop.permute.xlu1 %3709 }
0x2173   :  { %v3731_v5 = vsel %vm836_vm0, %v3683_v14, %v3710_v47  ;;  %v6575_v14 = vld [vmem:[%s10169_s14] ss:$0 sm:$0xff] }
0x217f   :  { %v3718_v61 = vpop.permute.xlu2 %3717 }
0x2180   :  { %v3733_v53 = vsel %vm1078_vm13, %v3731_v5, %v3718_v61 }
0x2187   :  { %v3720_v37 = vpop.permute.xlu2 %3719 }
0x21a7   :  { %v3726_v13 = vpop.permute.xlu0 %3725 }
0x21a8   :  { %v3735_v28 = vsel %vm635_vm1, %v3733_v53, %v3726_v13 }
0x21a9   :  { %6235 = vmatmul.msk.f32.vlgmr.msra.gmra.mxu2 %vm667_vm2, %v3735_v28 }
0x21af   :  { %v3712_v30 = vpop.permute.xlu0 %3711 }
0x21b0   :  { %v3732_v6 = vsel %vm836_vm0, %v3686_v58, %v3712_v30 }
0x21b1   :  { %v3734_v0 = vsel %vm1078_vm13, %v3732_v6, %v3720_v37 }
0x21b2   :  { %v3728_v4 = vpop.permute.xlu1 %3727 }
0x21b3   :  { %v3736_v59 = vsel %vm635_vm1, %v3734_v0, %v3728_v4 }
0x21b4   :  { %6236 = vmatmul.msk.f32.gmra.mxu2 %vm667_vm2, %v3736_v59 }
0x21bc   :  { %6239 = vmatmul.msk.f32.vlgmr.msrb.gmra.mxu2 %vm667_vm2, %v9215_v25 }
0x21c4   :  { %6240 = vmatmul.msk.f32.gmra.mxu2 %vm667_vm2, %v9221_v24 }
0x222c   :  { %v3764_v58 = vpop.f32.mrf.mxu2 }
0x222d   :  { %v3770_v31 = vadd.f32 %v3764_v58, %v8933_v63  ;;  %v6576_v63 = vld [vmem:[%s10170_s22] ss:$0 sm:$0xff] }
0x222f   :  { %v9227_v20 = vadd.f32 %v6575_v14, %v3770_v31 }
0x2231   :  { %v3780_v15 = vsel %vm667_vm2, %v9227_v20, 0.0 }
0x2232   :  { %3781 = vadd.xlane.f32.xlu0 %v3780_v15 }
0x2237   :  { %v3767_v35 = vpop.f32.mrf.mxu2 }
0x2238   :  { %v3771_v22 = vadd.f32 %v3767_v35, %v8938_v40 }
0x223a   :  { %v9232_v21 = vadd.f32 %v6575_v14, %v3771_v22 }
0x223c   :  { %v3783_v46 = vsel %vm667_vm2, %v9232_v21, 0.0 }
0x223d   :  { %3784 = vadd.xlane.f32.xlu2 %v3783_v46 }
0x223f   :  { %v3902_v16 = vpop.f32.mrf.mxu2 }
0x2240   :  { %v9237_v7 = vadd.f32 %v6576_v63, %v3902_v16  ;;  %v6577_v16 = vld [vmem:[#allocation27] ss:$0 sm:$0xff] }
0x2242   :  { %v3924_v40 = vrot.slane %v9237_v7, 4 }
0x2247   :  { %v3905_v49 = vpop.f32.mrf.mxu2 }
0x2248   :  { %v9239_v52 = vadd.f32 %v6576_v63, %v3905_v49 }
0x224a   :  { %v3925_v38 = vrot.slane %v9239_v52, 4 }
0x224c   :  { %v3926_v60 = vsel %vm2195_vm15, %v3924_v40, %v3925_v38 }
0x224d   :  { %3939 = vrot.lane.b32.xlu0 %v3926_v60, %s7648_s12 }
0x2255   :  { %3932 = vrot.lane.b32.xlu0 %v9237_v7, %s7650_s26 }
0x225d   :  { %3927 = vrot.lane.b32.xlu0 %v3924_v40, %s7645_s23 }
0x22a5   :  { %v3782_v11 = vpop.xlane.xlu0 %3781 }
0x22a6   :  { %v3786_v47 = vmul.f32 %v3782_v11, %v8142_v36 }
0x22a8   :  { %v3788_v61 = vsub.f32 %v9227_v20, %v3786_v47 }
0x22aa   :  { %v3790_v5 = vmul.f32 %v3788_v61, %v3788_v61 }
0x22ac   :  { %v3792_v53 = vsel %vm667_vm2, %v3790_v5, 0.0 }
0x22ad   :  { %3793 = vadd.xlane.f32.xlu1 %v3792_v53 }
0x22b0   :  { %v3785_v13 = vpop.xlane.xlu2 %3784 }
0x22b1   :  { %v3787_v28 = vmul.f32 %v3785_v13, %v8142_v36 }
0x22b3   :  { %v3789_v30 = vsub.f32 %v9232_v21, %v3787_v28 }
0x22b5   :  { %v3791_v37 = vmul.f32 %v3789_v30, %v3789_v30 }
0x22b7   :  { %v3795_v6 = vsel %vm667_vm2, %v3791_v37, 0.0 }
0x22b8   :  { %3796 = vadd.xlane.f32.xlu2 %v3795_v6 }
0x22bf   :  { %v9258_v0 = vpop.permute.xlu0 %3939 }
0x22c0   :  { %6241 = vmatpush.xpose.msk.msrb.mxu3 %vm836_vm0, %v9258_v0 }
0x22c6   :  { %3934 = vrot.lane.b32.xlu1 %v9239_v52, %s7650_s26 }
0x22c7   :  { %v9268_v38 = vpop.permute.xlu0 %3932 }
0x22ce   :  { %3929 = vrot.lane.b32.xlu1 %v3926_v60, %s7645_s23 }
0x22cf   :  { %v3928_v6 = vpop.permute.xlu0 %3927 }
0x22d0   :  { %3937 = vrot.lane.b32.xlu2 %v3924_v40, %s7648_s12 }
0x2320   :  { %v3794_v39 = vpop.xlane.xlu1 %3793 }
0x2321   :  { %v3798_v4 = vmul.f32 %v3794_v39, %v8142_v36 }
0x2323   :  { %v3800_v59 = vadd.f32 1e-05, %v3798_v4 }
0x2325   :  { %6698 = vrsqrt.f32 %v3800_v59  ;;  %vm3808_vm7 = vweird.f32 %v3800_v59 }
0x232b   :  { %v6699_v12 = vpop.eup %6698  ;;  %v3797_v33 = vpop.xlane.xlu2 %3796 }
0x232c   :  { %v3803_v14 = vmul.f32 %v6699_v12, %v3800_v59  ;;  %v3799_v58 = vmul.f32 %v3797_v33, %v8142_v36  ;;  %vm3809_vm5 = vweird.f32 %v6699_v12  ;;  %v9284_v59 = vsel %vm2195_vm15, %v9239_v52, %v3928_v6  ;;  %v6579_v33 = vld [vmem:[%s10172_s21] ss:$0 sm:$0xff] }
0x232d   :  { %vm3810_vm14 = vmor %vm3808_vm7, %vm3809_vm5  ;;  %vm3185_vm5 = vcmp.ge.s32.totalorder %v8386_v51, 18  ;;  %vm3189_vm7 = vcmp.ge.s32.totalorder %v8386_v51, 30 }
0x232e   :  { %v3804_v31 = vmul.f32 %v6699_v12, %v3803_v14  ;;  %v3801_v15 = vadd.f32 1e-05, %v3799_v58 }
0x2330   :  { %v3805_v35 = vmul.f32 0.5, %v3804_v31  ;;  %6700 = vrsqrt.f32 %v3801_v15  ;;  %vm3818_vm4 = vweird.f32 %v3801_v15 }
0x2332   :  { %v3806_v22 = vsub.f32 1.5, %v3805_v35 }
0x2333   :  { %v3938_v57 = vpop.permute.xlu2 %3937 }
0x2334   :  { %v3807_v46 = vmul.f32 %v6699_v12, %v3806_v22 }
0x2336   :  { %v6701_v63 = vpop.eup %6700  ;;  %v3811_v49 = vsel %vm3810_vm14, %v6699_v12, %v3807_v46  ;;  %vm3192_vm14 = vcmp.ge.s32.totalorder %v8386_v51, 36 }
0x2337   :  { %v3822_v40 = vmul.f32 %v3811_v49, %v3788_v61  ;;  %v3813_v60 = vmul.f32 %v6701_v63, %v3801_v15  ;;  %vm3819_vm3 = vweird.f32 %v6701_v63  ;;  %v10173_v15 = vmov 0  }
0x2338   :  { %v3935_v55 = vpop.permute.xlu1 %3934  ;;  %vm3820_vm6 = vmor %vm3818_vm4, %vm3819_vm3  ;;  %v3181_v35 = vsel %vm3180_vm9, 1, %v10173_v15  ;;  %v3183_v22 = vsel %vm3182_vm10, 1, %v10173_v15  ;;  %vm3195_vm3 = vcmp.ge.s32.totalorder %v8386_v51, 42 }
0x2339   :  { %v3827_v18 = vmul.f32 %v6577_v16, %v3822_v40  ;;  %v3814_v11 = vmul.f32 %v6701_v63, %v3813_v60  ;;  %v9271_v47 = vsel %vm2195_vm15, %v3935_v55, %v3938_v57  ;;  %v3184_v46 = vadd.s32 %v3183_v22, %v3181_v35 }
0x233a   :  { %6242 = vmatpush.xpose.msk.msrb.mxu3 %vm836_vm0, %v9271_v47  ;;  %v3190_v40 = vsel %vm3189_vm7, 1, %v10173_v15  ;;  %v3196_v55 = vsel %vm3195_vm3, 1, %v10173_v15 }
0x233b   :  { %v3815_v5 = vmul.f32 0.5, %v3814_v11  ;;  %v3832_v53 = vadd.f32 %v6578_v23, %v3827_v18 }
0x233d   :  { %v3816_v13 = vsub.f32 1.5, %v3815_v5  ;;  %6237 = vmatmul.msk.f32.vlgmr.msra.gmra.mxu3 %vm667_vm2, %v3832_v53 }
0x233e   :  { %6243 = vmatpush.xpose.msk.msrb.mxu3 %vm836_vm0, %v9268_v38 }
0x233f   :  { %v3817_v61 = vmul.f32 %v6701_v63, %v3816_v13 }
0x2340   :  { %v9278_v28 = vpop.permute.xlu1 %3929 }
0x2341   :  { %v3821_v37 = vsel %vm3820_vm6, %v6701_v63, %v3817_v61 }
0x2342   :  { %6244 = vmatpush.xpose.msk.msrb.mxu3 %vm836_vm0, %v9278_v28  ;;  %v3823_v39 = vmul.f32 %v3821_v37, %v3789_v30 }
0x2344   :  { %v3828_v4 = vmul.f32 %v6577_v16, %v3823_v39  ;;  %v3186_v16 = vsel %vm3185_vm5, 1, %v10173_v15 }
0x2345   :  { %v3187_v63 = vadd.s32 %v3186_v16, %v3184_v46 }
0x2346   :  { %6245 = vmatpush.xpose.msk.msrb.mxu3 %vm836_vm0, %v9284_v59  ;;  %v3833_v12 = vadd.f32 %v6578_v23, %v3828_v4  ;;  %v3193_v23 = vsel %vm3192_vm14, 1, %v10173_v15 }
0x2347   :  { %v3188_v49 = vadd.s32 %v3187_v63, %v9035_v8  ;;  %v10174_v8 = vmov -1e+09  }
0x2348   :  { %6238 = vmatmul.msk.f32.gmra.mxu3 %vm667_vm2, %v3833_v12 }
0x2349   :  { %v3191_v60 = vadd.s32 %v3190_v40, %v3188_v49 }
0x234a   :  { %6246 = vmatpush.xpose.msk.msrb.mxu3 %vm836_vm0, %v9237_v7 }
0x234b   :  { %v3194_v57 = vadd.s32 %v3193_v23, %v3191_v60 }
0x234d   :  { %v9314_v11 = vadd.s32 %v3196_v55, %v3194_v57 }
0x234f   :  { %vm6201_vm4 = vcmp.eq.s32.totalorder %v9314_v11, 0  ;;  %vm6202_vm6 = vcmp.eq.s32.totalorder %v9314_v11, 1  ;;  %vm6203_vm9 = vcmp.eq.s32.totalorder %v9314_v11, 2  ;;  %vm6204_vm10 = vcmp.eq.s32.totalorder %v9314_v11, 3 }
0x2350   :  { %v9319_v5 = vsel %vm6201_vm4, 0.0, %v10174_v8  ;;  %v9327_v39 = vsel %vm6202_vm6, 0.0, %v10174_v8  ;;  %v9341_v49 = vsel %vm6204_vm10, 0.0, %v10174_v8  ;;  %vm6205_vm5 = vcmp.eq.s32.totalorder %v9314_v11, 4 }
0x2351   :  { %vm6206_vm7 = vcmp.eq.s32.totalorder %v9314_v11, 5  ;;  %vm6207_vm14 = vcmp.eq.s32.totalorder %v9314_v11, 6  ;;  %vm6208_vm3 = vcmp.eq.s32.totalorder %v9314_v11, 7 }
0x23c0   :  { %v3865_v14 = vpop.f32.mrf.mxu3 }
0x23c1   :  { %v3866_v58 = vadd.f32 %v6579_v33, %v3865_v14 }
0x23c3   :  { %3910 = vrot.lane.b32.xlu2 %v3866_v58, %s7645_s23  ;;  %3914 = vrot.lane.b32.xlu0 %v3866_v58, %s7650_s26 }
0x23c4   :  { %6247 = vmatmul.msk.f32.vlgmr.msrb.gmra.mxu3 %vm836_vm0, %v3866_v58 }
0x23cb   :  { %v3868_v52 = vpop.f32.mrf.mxu3 }
0x23cc   :  { %v3869_v30 = vadd.f32 %v6579_v33, %v3868_v52 }
0x23ce   :  { %3916 = vrot.lane.b32.xlu2 %v3869_v30, %s7650_s26  ;;  %3912 = vrot.lane.b32.xlu1 %v3869_v30, %s7645_s23 }
0x23cf   :  { %3920 = vrot.lane.b32.xlu0 %v3869_v30, %s7648_s12  ;;  %6248 = vmatmul.msk.f32.gmra.mxu3 %vm836_vm0, %v3869_v30  ;;  %v9335_v30 = vsel %vm6203_vm9, 0.0, %v10174_v8 }
0x23d6   :  { %3918 = vrot.lane.b32.xlu1 %v3866_v58, %s7648_s12 }
0x241d   :  { %v3911_v31 = vpop.permute.xlu2 %3910 }
0x241e   :  { %6249 = vmatmul.msk.f32.gmra.mxu3 %vm836_vm0, %v3911_v31 }
0x2428   :  { %v3917_v6 = vpop.permute.xlu2 %3916 }
0x2435   :  { %v3915_v13 = vpop.permute.xlu0 %3914 }
0x2440   :  { %v3913_v18 = vpop.permute.xlu1 %3912 }
0x2441   :  { %6250 = vmatmul.msk.f32.gmra.mxu3 %vm836_vm0, %v3913_v18  ;;  %v3921_v52 = vpop.permute.xlu0 %3920 }
0x2447   :  { %v3991_v53 = vpop.f32.mrf.mxu3 }
0x2448   :  { %v4015_v61 = vmul.f32 0.35355338, %v3991_v53  ;;  %v3919_v58 = vpop.permute.xlu1 %3918 }
0x2449   :  { %6251 = vmatmul.msk.f32.gmra.mxu3 %vm836_vm0, %v3915_v13 }
0x244a   :  { %v4023_v51 = vadd.f32 %v4015_v61, %v9319_v5 }
0x244c   :  { %v4031_v37 = vsel %vm2961_vm8, %v4023_v51, -inf }
0x244d   :  { %4032 = vmax.xlane.f32.xlu2 %v4031_v37 }
0x2451   :  { %6252 = vmatmul.msk.f32.gmra.mxu3 %vm836_vm0, %v3917_v6 }
0x2452   :  { %v3994_v4 = vpop.f32.mrf.mxu3 }
0x2453   :  { %v4016_v12 = vmul.f32 0.35355338, %v3994_v4 }
0x2455   :  { %v4024_v33 = vadd.f32 %v4016_v12, %v9327_v39 }
0x2457   :  { %v4034_v14 = vsel %vm2961_vm8, %v4024_v33, -inf }
0x2458   :  { %4035 = vmax.xlane.f32.xlu1 %v4034_v14  ;;  %v9357_v14 = vsel %vm6206_vm7, 0.0, %v10174_v8 }
0x2459   :  { %6253 = vmatmul.msk.f32.gmra.mxu3 %vm836_vm0, %v3919_v58 }
0x2461   :  { %6254 = vmatmul.msk.f32.gmra.mxu3 %vm836_vm0, %v3921_v52 }
0x24a1   :  { %v3997_v31 = vpop.f32.mrf.mxu3 }
0x24a2   :  { %v4017_v15 = vmul.f32 0.35355338, %v3997_v31 }
0x24a4   :  { %v4025_v35 = vadd.f32 %v4017_v15, %v9335_v30 }
0x24a6   :  { %v4037_v22 = vsel %vm2961_vm8, %v4025_v35, -inf }
0x24a7   :  { %4038 = vmax.xlane.f32.xlu0 %v4037_v22 }
0x24c0   :  { %v4033_v46 = vpop.xlane.xlu2 %4032 }
0x24c1   :  { %v4055_v16 = vsub.f32 %v4023_v51, %v4033_v46  ;;  %v9351_v51 = vsel %vm6205_vm5, 0.0, %v10174_v8  ;;  %v9367_v46 = vsel %vm6207_vm14, 0.0, %v10174_v8 }
0x24c3   :  { %v4063_v63 = vmul.f32 1.442695, %v4055_v16 }
0x24c4   :  { %v4000_v40 = vpop.f32.mrf.mxu3 }
0x24c5   :  { %6702 = vpow2.f32 %v4063_v63  ;;  %v4018_v60 = vmul.f32 0.35355338, %v4000_v40 }
0x24c7   :  { %v4026_v23 = vadd.f32 %v4018_v60, %v9341_v49 }
0x24c9   :  { %v4040_v57 = vsel %vm2961_vm8, %v4026_v23, -inf }
0x24ca   :  { %4041 = vmax.xlane.f32.xlu2 %v4040_v57  ;;  %v9373_v57 = vsel %vm6208_vm3, 0.0, %v10174_v8 }
0x24cb   :  { %v9346_v55 = vpop.eup %6702  ;;  %v4036_v18 = vpop.xlane.xlu1 %4035 }
0x24cc   :  { %v4056_v53 = vsub.f32 %v4024_v33, %v4036_v18  ;;  %v4079_v13 = vsel %vm2961_vm8, %v9346_v55, 0.0  ;;  %v4003_v61 = vpop.f32.mrf.mxu3 }
0x24cd   :  { %4080 = vadd.xlane.f32.xlu1 %v4079_v13  ;;  %v4019_v37 = vmul.f32 0.35355338, %v4003_v61 }
0x24ce   :  { %v4065_v6 = vmul.f32 1.442695, %v4056_v53 }
0x24cf   :  { %v4027_v4 = vadd.f32 %v4019_v37, %v9351_v51  ;;  %v6504_v37 = vpack.i.bf16 %v9271_v47, %v9258_v0  ;;  %v6514_v0 = vpack.i.bf16 %v9237_v7, %v9284_v59 }
0x24d0   :  { %6704 = vpow2.f32 %v4065_v6  ;;  %v6509_v6 = vpack.i.bf16 %v9278_v28, %v9268_v38 }
0x24d1   :  { %v4043_v12 = vsel %vm2961_vm8, %v4027_v4, -inf }
0x24d4   :  { %v4006_v33 = vpop.f32.mrf.mxu3 }
0x24d5   :  { %4044 = vmax.xlane.f32.xlu1 %v4043_v12  ;;  %v4020_v58 = vmul.f32 0.35355338, %v4006_v33 }
0x24d6   :  { %v9359_v52 = vpop.eup %6704 }
0x24d7   :  { %v4028_v31 = vadd.f32 %v4020_v58, %v9357_v14  ;;  %v4082_v15 = vsel %vm2961_vm8, %v9359_v52, 0.0 }
0x24d8   :  { %4083 = vadd.xlane.f32.xlu2 %v4082_v15 }
0x24d9   :  { %v4046_v22 = vsel %vm2961_vm8, %v4028_v31, -inf }
0x24da   :  { %4047 = vmax.xlane.f32.xlu0 %v4046_v22 }
0x24dc   :  { %v4009_v16 = vpop.f32.mrf.mxu3 }
0x24dd   :  { %v4021_v63 = vmul.f32 0.35355338, %v4009_v16 }
0x24df   :  { %v4029_v40 = vadd.f32 %v4021_v63, %v9367_v46 }
0x24e1   :  { %v4049_v60 = vsel %vm2961_vm8, %v4029_v40, -inf }
0x24e2   :  { %4050 = vmax.xlane.f32.xlu2 %v4049_v60 }
0x24e4   :  { %v4012_v18 = vpop.f32.mrf.mxu3 }
0x24e5   :  { %v4022_v53 = vmul.f32 0.35355338, %v4012_v18 }
0x24e7   :  { %v4030_v13 = vadd.f32 %v4022_v53, %v9373_v57 }
0x24e9   :  { %v4052_v61 = vsel %vm2961_vm8, %v4030_v13, -inf }
0x24ea   :  { %4053 = vmax.xlane.f32.xlu0 %v4052_v61 }
0x24ee   :  { %6505 = vrot.lane.b32.xlu1 %v6504_v37, %s7657_s17 }
0x24fe   :  { %6510 = vrot.lane.b32.xlu0 %v6509_v6, %s7657_s17 }
0x251a   :  { %v4039_v11 = vpop.xlane.xlu0 %4038 }
0x251b   :  { %v4057_v8 = vsub.f32 %v4025_v35, %v4039_v11 }
0x251d   :  { %v4067_v12 = vmul.f32 1.442695, %v4057_v8 }
0x251f   :  { %6706 = vpow2.f32 %v4067_v12 }
0x2525   :  { %v9383_v33 = vpop.eup %6706 }
0x2526   :  { %v4085_v58 = vsel %vm2961_vm8, %v9383_v33, 0.0 }
0x2527   :  { %4086 = vadd.xlane.f32.xlu2 %v4085_v58 }
0x253d   :  { %v4042_v47 = vpop.xlane.xlu2 %4041 }
0x253e   :  { %v4058_v15 = vsub.f32 %v4026_v23, %v4042_v47 }
0x253f   :  { %6515 = vrot.lane.b32.xlu2 %v6514_v0, %s7657_s17 }
0x2540   :  { %v4069_v38 = vmul.f32 1.442695, %v4058_v15  ;;  %v9390_v28 = vpop.xlane.xlu1 %4080 }
0x2541   :  { %vm4108_vm6 = vweird.f32 %v9390_v28 }
0x2542   :  { %6708 = vpow2.f32 %v4069_v38 }
0x2548   :  { %v9392_v35 = vpop.eup %6708  ;;  %v4045_v22 = vpop.xlane.xlu1 %4044 }
0x2549   :  { %v4059_v16 = vsub.f32 %v4027_v4, %v4045_v22  ;;  %v4088_v63 = vsel %vm2961_vm8, %v9392_v35, 0.0 }
0x254a   :  { %4089 = vadd.xlane.f32.xlu0 %v4088_v63 }
0x254b   :  { %v4071_v60 = vmul.f32 1.442695, %v4059_v16  ;;  %v9396_v18 = vpop.xlane.xlu2 %4083 }
0x254c   :  { %vm4123_vm7 = vweird.f32 %v9396_v18 }
0x254d   :  { %6710 = vpow2.f32 %v4071_v60  ;;  %v4048_v59 = vpop.xlane.xlu0 %4047 }
0x254e   :  { %v4060_v61 = vsub.f32 %v4028_v31, %v4048_v59 }
0x2550   :  { %v4073_v4 = vmul.f32 1.442695, %v4060_v61 }
0x2553   :  { %v9398_v7 = vpop.eup %6710 }
0x2554   :  { %v4091_v23 = vsel %vm2961_vm8, %v9398_v7, 0.0 }
0x2555   :  { %4092 = vadd.xlane.f32.xlu1 %v4091_v23  ;;  %v4051_v53 = vpop.xlane.xlu2 %4050 }
0x2556   :  { %v4061_v37 = vsub.f32 %v4029_v40, %v4051_v53 }
0x2558   :  { %v4075_v6 = vmul.f32 1.442695, %v4061_v37 }
0x255a   :  { %6712 = vpow2.f32 %v4075_v6 }
0x255b   :  { %6714 = vpow2.f32 %v4073_v4 }
0x255d   :  { %v4054_v11 = vpop.xlane.xlu0 %4053 }
0x255e   :  { %v4062_v8 = vsub.f32 %v4030_v13, %v4054_v11 }
0x2560   :  { %v9402_v12 = vpop.eup %6712  ;;  %v4077_v58 = vmul.f32 1.442695, %v4062_v8  ;;  %v6506_v0 = vpop.permute.xlu1 %6505 }
0x2561   :  { %v6507_v47 = vunpack.i.l.bf16 %v6506_v0  ;;  %v4097_v15 = vsel %vm2961_vm8, %v9402_v12, 0.0  ;;  %v6508_v38 = vunpack.i.h.bf16 %v6506_v0  ;;  %v9406_v31 = vpop.eup %6714  ;;  %v4112_v0 = vand.u32 2147483647, %v9390_v28 }
0x2562   :  { %6716 = vpow2.f32 %v4077_v58  ;;  %4098 = vadd.xlane.f32.xlu0 %v4097_v15  ;;  %v4094_v40 = vsel %vm2961_vm8, %v9406_v31, 0.0  ;;  %v4114_v58 = vand.u32 2147483648, %v9390_v28 }
0x2563   :  { %4275 = vmatpush.msra.mxu2 %v6507_v47  ;;  %6718 = vrcp.f32 %v9390_v28  ;;  %vm4113_vm10 = vcmp.eq.f32.partialorder %v4112_v0, 8.507059e+37 }
0x2564   :  { %6720 = vrcp.f32 %v9396_v18 }
0x2565   :  { %4276 = vmatpush.msra.mxu2 %v6508_v38 }
0x2568   :  { %v9410_v22 = vpop.eup %6716  ;;  %4095 = vadd.xlane.f32.xlu2 %v4094_v40  ;;  %v4115_v40 = vor.u32 1.1754944e-38, %v4114_v58 }
0x2569   :  { %v4100_v13 = vsel %vm2961_vm8, %v9410_v22, 0.0  ;;  %v6719_v59 = vpop.eup %6718 }
0x256a   :  { %4101 = vadd.xlane.f32.xlu1 %v4100_v13  ;;  %v4104_v23 = vmul.f32 %v6719_v59, %v9390_v28  ;;  %v6721_v61 = vpop.eup %6720  ;;  %vm4109_vm4 = vweird.f32 %v6719_v59  ;;  %v4127_v28 = vand.u32 2147483647, %v9396_v18 }
0x256b   :  { %v4119_v6 = vmul.f32 %v6721_v61, %v9396_v18  ;;  %vm4110_vm9 = vmor %vm4108_vm6, %vm4109_vm4  ;;  %vm4124_vm5 = vweird.f32 %v6721_v61 }
0x256c   :  { %v4105_v53 = vsub.f32 1.0, %v4104_v23  ;;  %vm4125_vm14 = vmor %vm4123_vm7, %vm4124_vm5  ;;  %vm4128_vm3 = vcmp.eq.f32.partialorder %v4127_v28, 8.507059e+37 }
0x256d   :  { %v4120_v8 = vsub.f32 1.0, %v4119_v6 }
0x256e   :  { %v4106_v37 = vmul.f32 %v6719_v59, %v4105_v53 }
0x256f   :  { %v4121_v15 = vmul.f32 %v6721_v61, %v4120_v8 }
0x2570   :  { %v6511_v16 = vpop.permute.xlu0 %6510  ;;  %v4107_v11 = vadd.f32 %v6719_v59, %v4106_v37  ;;  %v4129_v37 = vand.u32 2147483648, %v9396_v18 }
0x2571   :  { %v6512_v63 = vunpack.i.l.bf16 %v6511_v16  ;;  %v6513_v60 = vunpack.i.h.bf16 %v6511_v16  ;;  %v4122_v23 = vadd.f32 %v6721_v61, %v4121_v15 }
0x2572   :  { %v4111_v47 = vsel %vm4110_vm9, %v6719_v59, %v4107_v11  ;;  %v4130_v58 = vor.u32 1.1754944e-38, %v4129_v37 }
0x2573   :  { %4277 = vmatpush.msra.mxu2 %v6512_v63  ;;  %v4116_v63 = vsel %vm4113_vm10, %v4115_v40, %v4111_v47  ;;  %v4126_v8 = vsel %vm4125_vm14, %v6721_v61, %v4122_v23 }
0x2574   :  { %v4117_v59 = vmul.f32 %v9346_v55, %v4116_v63  ;;  %v4131_v0 = vsel %vm4128_vm3, %v4130_v58, %v4126_v8 }
0x2575   :  { %4278 = vmatpush.msra.mxu2 %v6513_v60 }
0x259a   :  { %v4087_v4 = vpop.xlane.xlu2 %4086 }
0x259b   :  { %6722 = vrcp.f32 %v4087_v4  ;;  %v4144_v15 = vand.u32 2147483648, %v4087_v4  ;;  %vm4138_vm6 = vweird.f32 %v4087_v4  ;;  %v4142_v40 = vand.u32 2147483647, %v4087_v4 }
0x259d   :  { %v4145_v18 = vor.u32 1.1754944e-38, %v4144_v15  ;;  %vm4143_vm10 = vcmp.eq.f32.partialorder %v4142_v40, 8.507059e+37 }
0x25a1   :  { %v6723_v38 = vpop.eup %6722 }
0x25a2   :  { %v4134_v13 = vmul.f32 %v6723_v38, %v4087_v4  ;;  %v6516_v16 = vpop.permute.xlu2 %6515  ;;  %vm4139_vm4 = vweird.f32 %v6723_v38 }
0x25a3   :  { %v6517_v60 = vunpack.i.l.bf16 %v6516_v16  ;;  %v6518_v6 = vunpack.i.h.bf16 %v6516_v16  ;;  %vm4140_vm9 = vmor %vm4138_vm6, %vm4139_vm4 }
0x25a4   :  { %v4135_v53 = vsub.f32 1.0, %v4134_v13  ;;  %v4132_v13 = vmul.f32 %v9359_v52, %v4131_v0 }
0x25a5   :  { %4279 = vmatpush.msra.mxu2 %v6517_v60 }
0x25a6   :  { %v4136_v11 = vmul.f32 %v6723_v38, %v4135_v53 }
0x25a7   :  { %4280 = vmatpush.msra.mxu2 %v6518_v6 }
0x25a8   :  { %6255 = vmatmul.msk.f32.vlgmr.msra.gmra.mxu2 %vm2961_vm8, %v4117_v59  ;;  %v4137_v47 = vadd.f32 %v6723_v38, %v4136_v11 }
0x25aa   :  { %v4141_v55 = vsel %vm4140_vm9, %v6723_v38, %v4137_v47 }
0x25ab   :  { %v4146_v16 = vsel %vm4143_vm10, %v4145_v18, %v4141_v55 }
0x25ac   :  { %v4147_v63 = vmul.f32 %v9383_v33, %v4146_v16 }
0x25b0   :  { %6256 = vmatmul.msk.f32.gmra.mxu2 %vm2961_vm8, %v4132_v13 }
0x25b8   :  { %6257 = vmatmul.msk.f32.gmra.mxu2 %vm2961_vm8, %v4147_v63 }
0x25bd   :  { %v4090_v61 = vpop.xlane.xlu0 %4089 }
0x25be   :  { %6724 = vrcp.f32 %v4090_v61  ;;  %v4159_v37 = vand.u32 2147483648, %v4090_v61  ;;  %v4157_v52 = vand.u32 2147483647, %v4090_v61  ;;  %vm4153_vm7 = vweird.f32 %v4090_v61 }
0x25c0   :  { %v4160_v38 = vor.u32 1.1754944e-38, %v4159_v37  ;;  %vm4158_vm3 = vcmp.eq.f32.partialorder %v4157_v52, 8.507059e+37 }
0x25c4   :  { %v6725_v60 = vpop.eup %6724 }
0x25c5   :  { %v4149_v23 = vmul.f32 %v6725_v60, %v4090_v61  ;;  %vm4154_vm5 = vweird.f32 %v6725_v60 }
0x25c6   :  { %vm4155_vm14 = vmor %vm4153_vm7, %vm4154_vm5 }
0x25c7   :  { %v4150_v53 = vsub.f32 1.0, %v4149_v23 }
0x25c8   :  { %v4093_v4 = vpop.xlane.xlu1 %4092 }
0x25c9   :  { %v4151_v6 = vmul.f32 %v6725_v60, %v4150_v53  ;;  %6726 = vrcp.f32 %v4093_v4  ;;  %v4174_v47 = vand.u32 2147483648, %v4093_v4  ;;  %v4172_v40 = vand.u32 2147483647, %v4093_v4 }
0x25ca   :  { %vm4168_vm6 = vweird.f32 %v4093_v4 }
0x25cb   :  { %v4152_v28 = vadd.f32 %v6725_v60, %v4151_v6  ;;  %v4175_v18 = vor.u32 1.1754944e-38, %v4174_v47  ;;  %vm4173_vm10 = vcmp.eq.f32.partialorder %v4172_v40, 8.507059e+37 }
0x25cd   :  { %v4156_v59 = vsel %vm4155_vm14, %v6725_v60, %v4152_v28 }
0x25ce   :  { %v4161_v33 = vsel %vm4158_vm3, %v4160_v38, %v4156_v59 }
0x25cf   :  { %v6727_v11 = vpop.eup %6726  ;;  %v4162_v8 = vmul.f32 %v9392_v35, %v4161_v33 }
0x25d0   :  { %v4164_v58 = vmul.f32 %v6727_v11, %v4093_v4  ;;  %vm4169_vm4 = vweird.f32 %v6727_v11 }
0x25d1   :  { %6258 = vmatmul.msk.f32.gmra.mxu2 %vm2961_vm8, %v4162_v8  ;;  %vm4170_vm9 = vmor %vm4168_vm6, %vm4169_vm4 }
0x25d2   :  { %v4165_v0 = vsub.f32 1.0, %v4164_v58 }
0x25d4   :  { %v4166_v15 = vmul.f32 %v6727_v11, %v4165_v0 }
0x25d5   :  { %v4099_v13 = vpop.xlane.xlu0 %4098 }
0x25d6   :  { %v4167_v55 = vadd.f32 %v6727_v11, %v4166_v15  ;;  %6728 = vrcp.f32 %v4099_v13  ;;  %v4204_v40 = vand.u32 2147483648, %v4099_v13  ;;  %vm4198_vm6 = vweird.f32 %v4099_v13 }
0x25d8   :  { %v4171_v16 = vsel %vm4170_vm9, %v6727_v11, %v4167_v55 }
0x25d9   :  { %v4176_v63 = vsel %vm4173_vm10, %v4175_v18, %v4171_v16  ;;  %v4202_v18 = vand.u32 2147483647, %v4099_v13 }
0x25da   :  { %v4177_v61 = vmul.f32 %v9398_v7, %v4176_v63 }
0x25db   :  { %v4096_v35 = vpop.xlane.xlu2 %4095  ;;  %vm4203_vm10 = vcmp.eq.f32.partialorder %v4202_v18, 8.507059e+37 }
0x25dc   :  { %v6729_v60 = vpop.eup %6728  ;;  %6730 = vrcp.f32 %v4096_v35  ;;  %6259 = vmatmul.msk.f32.gmra.mxu2 %vm2961_vm8, %v4177_v61  ;;  %v4187_v38 = vand.u32 2147483647, %v4096_v35  ;;  %v4189_v59 = vand.u32 2147483648, %v4096_v35  ;;  %vm4183_vm7 = vweird.f32 %v4096_v35 }
0x25dd   :  { %v4102_v23 = vpop.xlane.xlu1 %4101  ;;  %v4194_v53 = vmul.f32 %v6729_v60, %v4099_v13  ;;  %vm4199_vm14 = vweird.f32 %v6729_v60 }
0x25de   :  { %6732 = vrcp.f32 %v4102_v23  ;;  %v4190_v58 = vor.u32 1.1754944e-38, %v4189_v59  ;;  %vm4188_vm4 = vcmp.eq.f32.partialorder %v4187_v38, 8.507059e+37  ;;  %vm4200_vm9 = vmor %vm4198_vm6, %vm4199_vm14 }
0x25df   :  { %v4195_v6 = vsub.f32 1.0, %v4194_v53  ;;  %v4205_v53 = vor.u32 1.1754944e-38, %v4204_v40 }
0x25e1   :  { %v4196_v33 = vmul.f32 %v6729_v60, %v4195_v6 }
0x25e2   :  { %v6731_v37 = vpop.eup %6730 }
0x25e3   :  { %v4179_v52 = vmul.f32 %v6731_v37, %v4096_v35  ;;  %vm4184_vm5 = vweird.f32 %v6731_v37  ;;  %v4197_v0 = vadd.f32 %v6729_v60, %v4196_v33 }
0x25e4   :  { %v6733_v4 = vpop.eup %6732  ;;  %vm4185_vm3 = vmor %vm4183_vm7, %vm4184_vm5  ;;  %vm4213_vm7 = vweird.f32 %v4102_v23 }
0x25e5   :  { %v4180_v28 = vsub.f32 1.0, %v4179_v52  ;;  %v4209_v8 = vmul.f32 %v6733_v4, %v4102_v23  ;;  %v4201_v61 = vsel %vm4200_vm9, %v6729_v60, %v4197_v0  ;;  %vm4214_vm5 = vweird.f32 %v6733_v4  ;;  %v4337_v0 = vld [vmem:[%s10175_s19 + $0x8] sm:$0xff] }
0x25e6   :  { %v4206_v35 = vsel %vm4203_vm10, %v4205_v53, %v4201_v61  ;;  %v4219_v52 = vand.u32 2147483648, %v4102_v23 }
0x25e7   :  { %v4181_v11 = vmul.f32 %v6731_v37, %v4180_v28  ;;  %v4210_v47 = vsub.f32 1.0, %v4209_v8  ;;  %v4217_v28 = vand.u32 2147483647, %v4102_v23 }
0x25e9   :  { %v4182_v7 = vadd.f32 %v6731_v37, %v4181_v11  ;;  %v4211_v63 = vmul.f32 %v6733_v4, %v4210_v47  ;;  %vm4218_vm14 = vcmp.eq.f32.partialorder %v4217_v28, 8.507059e+37  ;;  %v4336_v47 = vld [vmem:[%s10175_s19] sm:$0xff] }
0x25eb   :  { %v4186_v15 = vsel %vm4185_vm3, %v6731_v37, %v4182_v7  ;;  %v4212_v6 = vadd.f32 %v6733_v4, %v4211_v63  ;;  %v4207_v37 = vmul.f32 %v9402_v12, %v4206_v35  ;;  %vm4215_vm3 = vmor %vm4213_vm7, %vm4214_vm5  ;;  %v4339_v7 = vld [vmem:[%s10175_s19 + $0x18] sm:$0xff] }
0x25ec   :  { %v4191_v55 = vsel %vm4188_vm4, %v4190_v58, %v4186_v15  ;;  %4358 = vmatpush.msrb.mxu1 %v4339_v7  ;;  %v4338_v58 = vld [vmem:[%s10175_s19 + $0x10] sm:$0xff] }
0x25ed   :  { %v4192_v16 = vmul.f32 %v9406_v31, %v4191_v55  ;;  %v4216_v13 = vsel %vm4215_vm3, %v6733_v4, %v4212_v6  ;;  %v4220_v31 = vor.u32 1.1754944e-38, %v4219_v52 }
0x25ee   :  { %4359 = vmatpush.msrb.mxu1 %v4338_v58 }
0x25ef   :  { %6260 = vmatmul.msk.f32.gmra.mxu2 %vm2961_vm8, %v4192_v16  ;;  %v4221_v38 = vsel %vm4218_vm14, %v4220_v31, %v4216_v13 }
0x25f0   :  { %v4222_v59 = vmul.f32 %v9410_v22, %v4221_v38  ;;  %4360 = vmatpush.msrb.mxu1 %v4337_v0 }
0x25f2   :  { %4361 = vmatpush.msrb.mxu1 %v4336_v47 }
0x25f7   :  { %6261 = vmatmul.msk.f32.gmra.mxu2 %vm2961_vm8, %v4207_v37  ;;  %v6580_v37 = vld [vmem:[%s10176_s18] ss:$0 sm:$0xff] }
0x25ff   :  { %6262 = vmatmul.msk.f32.gmra.mxu2 %vm2961_vm8, %v4222_v59 }
0x262b   :  { %v4282_v60 = vpop.f32.mrf.mxu2 }
0x2633   :  { %v4285_v33 = vpop.f32.mrf.mxu2 }
0x263b   :  { %v4288_v11 = vpop.f32.mrf.mxu2 }
0x263c   :  { %4308 = vrot.lane.b32.xlu0 %v4288_v11, %s7628_s7 }
0x2654   :  { %v4291_v12 = vpop.f32.mrf.mxu2 }
0x2655   :  { %4310 = vrot.lane.b32.xlu0 %v4291_v12, %s7628_s7 }
0x265f   :  { %v4294_v23 = vpop.f32.mrf.mxu2 }
0x2660   :  { %4316 = vrot.lane.b32.xlu1 %v4294_v23, %s7614_s30 }
0x2672   :  { %v4297_v4 = vpop.f32.mrf.mxu2 }
0x2673   :  { %4318 = vrot.lane.b32.xlu0 %v4297_v4, %s7614_s30 }
0x267a   :  { %v4300_v22 = vpop.f32.mrf.mxu2 }
0x267b   :  { %4324 = vrot.lane.b32.xlu2 %v4300_v22, %s7655_s2 }
0x2682   :  { %v4303_v8 = vpop.f32.mrf.mxu2 }
0x2683   :  { %4326 = vrot.lane.b32.xlu1 %v4303_v8, %s7655_s2 }
0x26ae   :  { %v4309_v15 = vpop.permute.xlu0 %4308 }
0x26af   :  { %v4330_v55 = vsel %vm836_vm0, %v4282_v60, %v4309_v15  ;;  %v4436_v15 = vld [vmem:[%s10177_s29 + $0x18] sm:$0xff] }
0x26b0   :  { %4459 = vmatpush.msrb.mxu0 %v4436_v15 }
0x26c7   :  { %v4311_v61 = vpop.permute.xlu0 %4310 }
0x26c8   :  { %v4331_v35 = vsel %vm836_vm0, %v4285_v33, %v4311_v61 }
0x26d2   :  { %v4317_v40 = vpop.permute.xlu1 %4316 }
0x26d3   :  { %v4332_v18 = vsel %vm1078_vm13, %v4330_v55, %v4317_v40  ;;  %v4435_v40 = vld [vmem:[%s10177_s29 + $0x10] sm:$0xff]  ;;  %v4434_v55 = vld [vmem:[%s10177_s29 + $0x8] sm:$0xff] }
0x26d4   :  { %4460 = vmatpush.msrb.mxu0 %v4435_v40 }
0x26d5   :  { %v4325_v16 = vpop.permute.xlu2 %4324 }
0x26d6   :  { %v4334_v63 = vsel %vm635_vm1, %v4332_v18, %v4325_v16  ;;  %v4433_v18 = vld [vmem:[%s10177_s29] sm:$0xff]  ;;  %4461 = vmatpush.msrb.mxu0 %v4434_v55 }
0x26d7   :  { %6263 = vmatmul.msk.f32.vlgmr.msrb.gmra.mxu1 %vm667_vm2, %v4334_v63 }
0x26d8   :  { %4462 = vmatpush.msrb.mxu0 %v4433_v18 }
0x26e5   :  { %v4319_v53 = vpop.permute.xlu0 %4318 }
0x26e6   :  { %v4333_v6 = vsel %vm1078_vm13, %v4331_v35, %v4319_v53 }
0x26f5   :  { %v4327_v52 = vpop.permute.xlu1 %4326 }
0x26f6   :  { %v4335_v28 = vsel %vm635_vm1, %v4333_v6, %v4327_v52 }
0x26f7   :  { %6264 = vmatmul.msk.f32.gmra.mxu1 %vm667_vm2, %v4335_v28 }
0x2754   :  { %v4363_v13 = vpop.f32.mrf.mxu1 }
0x2755   :  { %v4369_v31 = vadd.f32 %v4363_v13, %v9227_v20  ;;  %v6581_v13 = vld [vmem:[#allocation30] ss:$0 sm:$0xff] }
0x2757   :  { %v9460_v38 = vadd.f32 %v6580_v37, %v4369_v31 }
0x2759   :  { %v4379_v59 = vsel %vm667_vm2, %v9460_v38, 0.0 }
0x275a   :  { %4380 = vadd.xlane.f32.xlu2 %v4379_v59  ;;  %v6582_v59 = vld [vmem:[#allocation29] ss:$0 sm:$0xff] }
0x2774   :  { %v4366_v60 = vpop.f32.mrf.mxu1 }
0x2775   :  { %v4370_v33 = vadd.f32 %v4366_v60, %v9232_v21 }
0x2777   :  { %v9465_v11 = vadd.f32 %v6580_v37, %v4370_v33 }
0x2779   :  { %v4382_v12 = vsel %vm667_vm2, %v9465_v11, 0.0 }
0x277a   :  { %4383 = vadd.xlane.f32.xlu0 %v4382_v12 }
0x27cd   :  { %v4381_v23 = vpop.xlane.xlu2 %4380 }
0x27ce   :  { %v4385_v20 = vmul.f32 %v4381_v23, %v8142_v36  ;;  %v4503_v23 = vld [vmem:[%s10178_s5 + $0x78] sm:$0xff] }
0x27cf   :  { %4504 = vmatpush.msra.mxu3 %v4503_v23  ;;  %v6583_v23 = vld [vmem:[#allocation9] ss:$0 sm:$0xff] }
0x27d0   :  { %v4387_v4 = vsub.f32 %v9460_v38, %v4385_v20  ;;  %v4502_v20 = vld [vmem:[%s10178_s5 + $0x70] sm:$0xff] }
0x27d1   :  { %4505 = vmatpush.msra.mxu3 %v4502_v20 }
0x27d2   :  { %v4389_v22 = vmul.f32 %v4387_v4, %v4387_v4 }
0x27d4   :  { %v4391_v8 = vsel %vm667_vm2, %v4389_v22, 0.0  ;;  %v4501_v22 = vld [vmem:[%s10178_s5 + $0x68] sm:$0xff] }
0x27d5   :  { %4392 = vadd.xlane.f32.xlu1 %v4391_v8  ;;  %4506 = vmatpush.msra.mxu3 %v4501_v22 }
0x27ed   :  { %v4384_v21 = vpop.xlane.xlu0 %4383 }
0x27ee   :  { %v4386_v7 = vmul.f32 %v4384_v21, %v8142_v36 }
0x27f0   :  { %v4388_v58 = vsub.f32 %v9465_v11, %v4386_v7 }
0x27f2   :  { %v4390_v0 = vmul.f32 %v4388_v58, %v4388_v58 }
0x27f4   :  { %v4394_v47 = vsel %vm667_vm2, %v4390_v0, 0.0 }
0x27f5   :  { %4395 = vadd.xlane.f32.xlu2 %v4394_v47 }
0x2848   :  { %v4393_v16 = vpop.xlane.xlu1 %4392 }
0x2849   :  { %v4397_v63 = vmul.f32 %v4393_v16, %v8142_v36 }
0x284b   :  { %v4399_v61 = vadd.f32 1e-05, %v4397_v63 }
0x284d   :  { %6734 = vrsqrt.f32 %v4399_v61  ;;  %vm4407_vm6 = vweird.f32 %v4399_v61 }
0x2853   :  { %v6735_v53 = vpop.eup %6734 }
0x2854   :  { %v4402_v35 = vmul.f32 %v6735_v53, %v4399_v61  ;;  %vm4408_vm4 = vweird.f32 %v6735_v53 }
0x2855   :  { %vm4409_vm9 = vmor %vm4407_vm6, %vm4408_vm4 }
0x2856   :  { %v4403_v6 = vmul.f32 %v6735_v53, %v4402_v35  ;;  %v4499_v35 = vld [vmem:[%s10178_s5 + $0x58] sm:$0xff] }
0x2858   :  { %v4404_v52 = vmul.f32 0.5, %v4403_v6  ;;  %v4498_v6 = vld [vmem:[%s10178_s5 + $0x50] sm:$0xff] }
0x285a   :  { %v4405_v28 = vsub.f32 1.5, %v4404_v52  ;;  %v4497_v52 = vld [vmem:[%s10178_s5 + $0x48] sm:$0xff] }
0x285c   :  { %v4406_v37 = vmul.f32 %v6735_v53, %v4405_v28  ;;  %v4495_v28 = vld [vmem:[%s10178_s5 + $0x38] sm:$0xff] }
0x285e   :  { %v4410_v31 = vsel %vm4409_vm9, %v6735_v53, %v4406_v37  ;;  %v4500_v53 = vld [vmem:[%s10178_s5 + $0x60] sm:$0xff]  ;;  %v4494_v37 = vld [vmem:[%s10178_s5 + $0x30] sm:$0xff] }
0x285f   :  { %v4421_v60 = vmul.f32 %v4410_v31, %v4387_v4  ;;  %4507 = vmatpush.msra.mxu3 %v4500_v53  ;;  %v4492_v31 = vld [vmem:[%s10178_s5 + $0x20] sm:$0xff] }
0x2861   :  { %v4426_v33 = vmul.f32 %v6581_v13, %v4421_v60  ;;  %4508 = vmatpush.msra.mxu3 %v4499_v35  ;;  %v4490_v60 = vld [vmem:[%s10178_s5 + $0x10] sm:$0xff] }
0x2863   :  { %v4431_v12 = vadd.f32 %v6582_v59, %v4426_v33  ;;  %4509 = vmatpush.msra.mxu3 %v4498_v6  ;;  %v4489_v33 = vld [vmem:[%s10178_s5 + $0x8] sm:$0xff] }
0x2865   :  { %6265 = vmatmul.msk.f32.vlgmr.msrb.gmra.mxu0 %vm667_vm2, %v4431_v12  ;;  %4510 = vmatpush.msra.mxu3 %v4497_v52  ;;  %v4488_v12 = vld [vmem:[%s10178_s5] sm:$0xff] }
0x2868   :  { %v4396_v8 = vpop.xlane.xlu2 %4395 }
0x2869   :  { %v4398_v21 = vmul.f32 %v4396_v8, %v8142_v36 }
0x286b   :  { %v4400_v7 = vadd.f32 1e-05, %v4398_v21 }
0x286d   :  { %6736 = vrsqrt.f32 %v4400_v7  ;;  %vm4417_vm5 = vweird.f32 %v4400_v7 }
0x2873   :  { %v6737_v0 = vpop.eup %6736 }
0x2874   :  { %v4412_v47 = vmul.f32 %v6737_v0, %v4400_v7  ;;  %vm4418_vm10 = vweird.f32 %v6737_v0 }
0x2875   :  { %vm4419_vm7 = vmor %vm4417_vm5, %vm4418_vm10 }
0x2876   :  { %v4413_v4 = vmul.f32 %v6737_v0, %v4412_v47 }
0x2878   :  { %v4414_v15 = vmul.f32 0.5, %v4413_v4 }
0x287a   :  { %v4415_v40 = vsub.f32 1.5, %v4414_v15 }
0x287c   :  { %v4416_v55 = vmul.f32 %v6737_v0, %v4415_v40 }
0x287e   :  { %v4420_v18 = vsel %vm4419_vm7, %v6737_v0, %v4416_v55 }
0x287f   :  { %v4422_v16 = vmul.f32 %v4420_v18, %v4388_v58  ;;  %v4496_v58 = vld [vmem:[%s10178_s5 + $0x40] sm:$0xff] }
0x2880   :  { %4511 = vmatpush.msra.mxu3 %v4496_v58 }
0x2881   :  { %v4427_v63 = vmul.f32 %v6581_v13, %v4422_v16  ;;  %v4493_v13 = vld [vmem:[%s10178_s5 + $0x28] sm:$0xff] }
0x2882   :  { %4512 = vmatpush.msra.mxu3 %v4495_v28 }
0x2883   :  { %v4432_v61 = vadd.f32 %v6582_v59, %v4427_v63  ;;  %v4491_v59 = vld [vmem:[%s10178_s5 + $0x18] sm:$0xff] }
0x2884   :  { %4513 = vmatpush.msra.mxu3 %v4494_v37 }
0x2885   :  { %6266 = vmatmul.msk.f32.gmra.mxu0 %vm667_vm2, %v4432_v61 }
0x2886   :  { %4514 = vmatpush.msra.mxu3 %v4493_v13  ;;  %v6584_v13 = vld [vmem:[#allocation11] ss:$0 sm:$0xff] }
0x2888   :  { %4515 = vmatpush.msra.mxu3 %v4492_v31 }
0x288a   :  { %4516 = vmatpush.msra.mxu3 %v4491_v59 }
0x288c   :  { %4517 = vmatpush.msra.mxu3 %v4490_v60 }
0x288e   :  { %4518 = vmatpush.msra.mxu3 %v4489_v33 }
0x2890   :  { %4519 = vmatpush.msra.mxu3 %v4488_v12 }
0x28e2   :  { %v4464_v20 = vpop.f32.mrf.mxu0 }
0x28e3   :  { %v4465_v22 = vadd.f32 %v6583_v23, %v4464_v20 }
0x28e5   :  { %v4470_v8 = vmul.f32 %v4465_v22, %v4465_v22 }
0x28e7   :  { %v4472_v21 = vmul.f32 %v4470_v8, %v4465_v22 }
0x28e9   :  { %v4474_v7 = vmul.f32 0.044715, %v4472_v21 }
0x28eb   :  { %v4476_v0 = vadd.f32 %v4474_v7, %v4465_v22 }
0x28ed   :  { %v4478_v47 = vmul.f32 0.7978846, %v4476_v0 }
0x28ef   :  { %6738 = vtanh.f32 %v4478_v47 }
0x28f5   :  { %v6739_v4 = vpop.eup %6738 }
0x28f6   :  { %v4482_v15 = vadd.f32 1.0, %v6739_v4 }
0x28f8   :  { %v4484_v40 = vmul.f32 0.5, %v4482_v15 }
0x28fa   :  { %v4486_v55 = vmul.f32 %v4484_v40, %v4465_v22 }
0x28fc   :  { %4520 = vmatmul.f32.vlgmr.msra.gmra.mxu3 %v4486_v55  ;;  %v6271_v55 = vld [vmem:[%s10161_s6 + $0x38] sm:$0xff] }
0x28fd   :  { %4621 = vmatpush.msra.mxu1 %v6271_v55 }
0x2902   :  { %v4467_v18 = vpop.f32.mrf.mxu0 }
0x2903   :  { %v4468_v16 = vadd.f32 %v6583_v23, %v4467_v18  ;;  %v6270_v18 = vld [vmem:[%s10161_s6 + $0x30] sm:$0xff] }
0x2904   :  { %4622 = vmatpush.msra.mxu1 %v6270_v18 }
0x2905   :  { %v4471_v63 = vmul.f32 %v4468_v16, %v4468_v16 }
0x2907   :  { %v4473_v61 = vmul.f32 %v4471_v63, %v4468_v16  ;;  %v6268_v63 = vld [vmem:[%s10161_s6 + $0x20] sm:$0xff] }
0x2909   :  { %v4475_v53 = vmul.f32 0.044715, %v4473_v61 }
0x290b   :  { %v4477_v35 = vadd.f32 %v4475_v53, %v4468_v16 }
0x290d   :  { %v4479_v6 = vmul.f32 0.7978846, %v4477_v35 }
0x290f   :  { %6740 = vtanh.f32 %v4479_v6 }
0x2915   :  { %v6741_v52 = vpop.eup %6740 }
0x2916   :  { %v4483_v58 = vadd.f32 1.0, %v6741_v52 }
0x2918   :  { %v4485_v28 = vmul.f32 0.5, %v4483_v58 }
0x291a   :  { %v4487_v37 = vmul.f32 %v4485_v28, %v4468_v16  ;;  %v6269_v16 = vld [vmem:[%s10161_s6 + $0x28] sm:$0xff] }
0x291b   :  { %4623 = vmatpush.msra.mxu1 %v6269_v16 }
0x291c   :  { %4523 = vmatmul.f32.gmra.mxu3 %v4487_v37 }
0x291d   :  { %4624 = vmatpush.msra.mxu1 %v6268_v63 }
0x297f   :  { %v4521_v31 = vpop.f32.mrf.mxu3 }
0x2980   :  { %v4527_v59 = vadd.f32 %v4521_v31, %v9460_v38  ;;  %v6585_v31 = vld [vmem:[#allocation24 + $0x1] ss:$0 sm:$0xff] }
0x2982   :  { %v9500_v60 = vadd.f32 %v6584_v13, %v4527_v59 }
0x2984   :  { %v4539_v33 = vsel %vm667_vm2, %v9500_v60, 0.0 }
0x2985   :  { %4540 = vadd.xlane.f32.xlu0 %v4539_v33  ;;  %v6586_v33 = vld [vmem:[%s10162_s27 + $0x1] ss:$0 sm:$0xff] }
0x299f   :  { %v4524_v12 = vpop.f32.mrf.mxu3 }
0x29a0   :  { %v4528_v23 = vadd.f32 %v4524_v12, %v9465_v11 }
0x29a2   :  { %v9505_v20 = vadd.f32 %v6584_v13, %v4528_v23 }
0x29a4   :  { %v4542_v22 = vsel %vm667_vm2, %v9505_v20, 0.0 }
0x29a5   :  { %4543 = vadd.xlane.f32.xlu1 %v4542_v22 }
0x29f8   :  { %v4541_v8 = vpop.xlane.xlu0 %4540 }
0x29f9   :  { %v4545_v38 = vmul.f32 %v4541_v8, %v8142_v36 }
0x29fb   :  { %v4547_v21 = vsub.f32 %v9500_v60, %v4545_v38 }
0x29fd   :  { %v4549_v7 = vmul.f32 %v4547_v21, %v4547_v21 }
0x29ff   :  { %v4551_v0 = vsel %vm667_vm2, %v4549_v7, 0.0 }
0x2a00   :  { %4552 = vadd.xlane.f32.xlu2 %v4551_v0 }
0x2a18   :  { %v4544_v11 = vpop.xlane.xlu1 %4543 }
0x2a19   :  { %v4546_v47 = vmul.f32 %v4544_v11, %v8142_v36 }
0x2a1b   :  { %v4548_v4 = vsub.f32 %v9505_v20, %v4546_v47 }
0x2a1d   :  { %v4550_v15 = vmul.f32 %v4548_v4, %v4548_v4 }
0x2a1f   :  { %v4554_v40 = vsel %vm667_vm2, %v4550_v15, 0.0 }
0x2a20   :  { %4555 = vadd.xlane.f32.xlu0 %v4554_v40 }
0x2a73   :  { %v4553_v61 = vpop.xlane.xlu2 %4552 }
0x2a74   :  { %v4557_v53 = vmul.f32 %v4553_v61, %v8142_v36  ;;  %v6587_v61 = vld [vmem:[#allocation39 + $0x1] ss:$0 sm:$0xff] }
0x2a76   :  { %v4559_v35 = vadd.f32 1e-05, %v4557_v53 }
0x2a78   :  { %6742 = vrsqrt.f32 %v4559_v35  ;;  %vm4567_vm14 = vweird.f32 %v4559_v35 }
0x2a7e   :  { %v6743_v6 = vpop.eup %6742 }
0x2a7f   :  { %v4562_v52 = vmul.f32 %v6743_v6, %v4559_v35  ;;  %vm4568_vm3 = vweird.f32 %v6743_v6 }
0x2a80   :  { %vm4569_vm4 = vmor %vm4567_vm14, %vm4568_vm3 }
0x2a81   :  { %v4563_v58 = vmul.f32 %v6743_v6, %v4562_v52 }
0x2a83   :  { %v4564_v28 = vmul.f32 0.5, %v4563_v58 }
0x2a85   :  { %v4565_v37 = vsub.f32 1.5, %v4564_v28 }
0x2a87   :  { %v4566_v13 = vmul.f32 %v6743_v6, %v4565_v37 }
0x2a89   :  { %v4570_v59 = vsel %vm4569_vm4, %v6743_v6, %v4566_v13 }
0x2a8a   :  { %v4581_v12 = vmul.f32 %v4570_v59, %v4547_v21 }
0x2a8c   :  { %v4586_v23 = vmul.f32 %v6585_v31, %v4581_v12 }
0x2a8e   :  { %v4591_v22 = vadd.f32 %v6586_v33, %v4586_v23 }
0x2a90   :  { %6272 = vmatmul.msk.f32.vlgmr.msra.gmra.mxu1 %vm667_vm2, %v4591_v22 }
0x2a93   :  { %v4556_v8 = vpop.xlane.xlu0 %4555 }
0x2a94   :  { %v4558_v38 = vmul.f32 %v4556_v8, %v8142_v36 }
0x2a96   :  { %v4560_v7 = vadd.f32 1e-05, %v4558_v38 }
0x2a98   :  { %6744 = vrsqrt.f32 %v4560_v7  ;;  %vm4577_vm9 = vweird.f32 %v4560_v7 }
0x2a9e   :  { %v6745_v0 = vpop.eup %6744 }
0x2a9f   :  { %v4572_v11 = vmul.f32 %v6745_v0, %v4560_v7  ;;  %vm4578_vm6 = vweird.f32 %v6745_v0 }
0x2aa0   :  { %vm4579_vm10 = vmor %vm4577_vm9, %vm4578_vm6 }
0x2aa1   :  { %v4573_v47 = vmul.f32 %v6745_v0, %v4572_v11 }
0x2aa3   :  { %v4574_v15 = vmul.f32 0.5, %v4573_v47 }
0x2aa5   :  { %v4575_v40 = vsub.f32 1.5, %v4574_v15 }
0x2aa7   :  { %v4576_v55 = vmul.f32 %v6745_v0, %v4575_v40 }
0x2aa9   :  { %v4580_v18 = vsel %vm4579_vm10, %v6745_v0, %v4576_v55 }
0x2aaa   :  { %v4582_v21 = vmul.f32 %v4580_v18, %v4548_v4 }
0x2aac   :  { %v4587_v16 = vmul.f32 %v6585_v31, %v4582_v21 }
0x2aae   :  { %v4592_v63 = vadd.f32 %v6586_v33, %v4587_v16 }
0x2ab0   :  { %6273 = vmatmul.msk.f32.gmra.mxu1 %vm667_vm2, %v4592_v63 }
0x2b0d   :  { %v4626_v53 = vpop.f32.mrf.mxu1 }
0x2b0e   :  { %v9524_v35 = vadd.f32 %v6587_v61, %v4626_v53 }
0x2b10   :  { %4642 = vrot.lane.b32.xlu2 %v9524_v35, %s7648_s12 }
0x2b18   :  { %4638 = vrot.lane.b32.xlu2 %v9524_v35, %s7650_s26 }
0x2b2d   :  { %v4629_v6 = vpop.f32.mrf.mxu1 }
0x2b2e   :  { %v9530_v52 = vadd.f32 %v6587_v61, %v4629_v6 }
0x2b30   :  { %4640 = vrot.lane.b32.xlu0 %v9530_v52, %s7650_s26  ;;  %4644 = vrot.lane.b32.xlu1 %v9530_v52, %s7648_s12 }
0x2b38   :  { %4634 = vrot.lane.b32.xlu0 %v9524_v35, %s7645_s23  ;;  %4636 = vrot.lane.b32.xlu1 %v9530_v52, %s7645_s23 }
0x2b6a   :  { %v9540_v4 = vpop.permute.xlu2 %4642 }
0x2b6b   :  { %4658 = vrot.lane.b32.xlu1 %v9540_v4, %s7657_s17 }
0x2b72   :  { %v9552_v37 = vpop.permute.xlu2 %4638 }
0x2ba2   :  { %v9544_v58 = vpop.permute.xlu0 %4640  ;;  %v9546_v28 = vpop.permute.xlu1 %4644 }
0x2ba3   :  { %4656 = vrot.lane.b32.xlu0 %v9544_v58, %s7657_s17  ;;  %4660 = vrot.lane.b32.xlu2 %v9546_v28, %s7657_s17 }
0x2baa   :  { %v9554_v13 = vpop.permute.xlu0 %4634  ;;  %v9556_v31 = vpop.permute.xlu1 %4636 }
0x2bab   :  { %4650 = vrot.lane.b32.xlu0 %v9554_v13, %s7657_s17  ;;  %4654 = vrot.lane.b32.xlu2 %v9552_v37, %s7657_s17 }
0x2bac   :  { %4652 = vrot.lane.b32.xlu1 %v9556_v31, %s7657_s17 }
0x2bb3   :  { %4648 = vrot.lane.b32.xlu2 %v9530_v52, %s7657_s17 }
0x2bb4   :  { %4646 = vrot.lane.b32.xlu1 %v9524_v35, %s7657_s17 }
0x2bdd   :  { %v4659_v33 = vpop.permute.xlu1 %4658 }
0x2bfd   :  { %v4661_v59 = vpop.permute.xlu2 %4660 }
0x2bfe   :  { %6274 = vmatpush.xpose.msk.msrb.mxu2 %vm836_vm0, %v4661_v59 }
0x2c02   :  { %6275 = vmatpush.xpose.msk.msrb.mxu2 %vm836_vm0, %v4659_v33 }
0x2c05   :  { %v4655_v23 = vpop.permute.xlu2 %4654 }
0x2c0d   :  { %v4649_v38 = vpop.permute.xlu2 %4648 }
0x2c15   :  { %v4657_v12 = vpop.permute.xlu0 %4656 }
0x2c16   :  { %6276 = vmatpush.xpose.msk.msrb.mxu2 %vm836_vm0, %v4657_v12 }
0x2c1a   :  { %6277 = vmatpush.xpose.msk.msrb.mxu2 %vm836_vm0, %v4655_v23 }
0x2c1d   :  { %v4651_v8 = vpop.permute.xlu0 %4650 }
0x2c1e   :  { %v4653_v22 = vpop.permute.xlu1 %4652 }
0x2c1f   :  { %6278 = vmatpush.xpose.msk.msrb.mxu2 %vm836_vm0, %v4653_v22 }
0x2c23   :  { %6279 = vmatpush.xpose.msk.msrb.mxu2 %vm836_vm0, %v4651_v8 }
0x2c26   :  { %v4647_v7 = vpop.permute.xlu1 %4646 }
0x2c27   :  { %6280 = vmatpush.xpose.msk.msrb.mxu2 %vm836_vm0, %v4649_v38 }
0x2c2b   :  { %6281 = vmatpush.xpose.msk.msrb.mxu2 %vm836_vm0, %v4647_v7 }
0x2c2e   :  { %6282 = vmatmul.msk.f32.vlgmr.msrb.gmra.mxu2 %vm836_vm0, %v9524_v35 }
0x2c36   :  { %6283 = vmatmul.msk.f32.gmra.mxu2 %vm836_vm0, %v9530_v52 }
0x2c3e   :  { %6284 = vmatmul.msk.f32.gmra.mxu2 %vm836_vm0, %v9554_v13 }
0x2c46   :  { %6285 = vmatmul.msk.f32.gmra.mxu2 %vm836_vm0, %v9556_v31 }
0x2c4e   :  { %6286 = vmatmul.msk.f32.gmra.mxu2 %vm836_vm0, %v9552_v37 }
0x2c56   :  { %6287 = vmatmul.msk.f32.gmra.mxu2 %vm836_vm0, %v9544_v58 }
0x2c5e   :  { %6288 = vmatmul.msk.f32.gmra.mxu2 %vm836_vm0, %v9540_v4 }
0x2c66   :  { %6289 = vmatmul.msk.f32.gmra.mxu2 %vm836_vm0, %v9546_v28 }
0x2cb1   :  { %v4711_v0 = vpop.f32.mrf.mxu2 }
0x2cb2   :  { %v4735_v11 = vmul.f32 0.35355338, %v4711_v0 }
0x2cb4   :  { %v4743_v47 = vadd.f32 %v4735_v11, %v9062_v44 }
0x2cb6   :  { %v4751_v15 = vsel %vm797_vm11, %v4743_v47, -inf }
0x2cb7   :  { %4752 = vmax.xlane.f32.xlu0 %v4751_v15 }
0x2cb9   :  { %v4714_v40 = vpop.f32.mrf.mxu2 }
0x2cba   :  { %v4736_v55 = vmul.f32 0.35355338, %v4714_v40  ;;  %v6519_v40 = vpack.i.bf16 %v9540_v4, %v9546_v28 }
0x2cbc   :  { %v4744_v18 = vadd.f32 %v4736_v55, %v9072_v9 }
0x2cbe   :  { %v4754_v21 = vsel %vm797_vm11, %v4744_v18, -inf }
0x2cbf   :  { %4755 = vmax.xlane.f32.xlu2 %v4754_v21 }
0x2cc1   :  { %v4717_v16 = vpop.f32.mrf.mxu2 }
0x2cc2   :  { %v4737_v63 = vmul.f32 0.35355338, %v4717_v16 }
0x2cc4   :  { %v4745_v61 = vadd.f32 %v4737_v63, %v9082_v2 }
0x2cc6   :  { %v4757_v53 = vsel %vm797_vm11, %v4745_v61, -inf }
0x2cc7   :  { %4758 = vmax.xlane.f32.xlu1 %v4757_v53 }
0x2cc9   :  { %v4720_v6 = vpop.f32.mrf.mxu2 }
0x2cca   :  { %v4738_v59 = vmul.f32 0.35355338, %v4720_v6 }
0x2ccc   :  { %v9599_v44 = vadd.f32 %v4738_v59, %v9089_v41 }
0x2cce   :  { %v4760_v33 = vsel %vm797_vm11, %v9599_v44, -inf }
0x2ccf   :  { %4761 = vmax.xlane.f32.xlu0 %v4760_v33 }
0x2cd1   :  { %v4723_v9 = vpop.f32.mrf.mxu2 }
0x2cd2   :  { %v4739_v12 = vmul.f32 0.35355338, %v4723_v9 }
0x2cd4   :  { %v4747_v23 = vadd.f32 %v4739_v12, %v9099_v10  ;;  %v6524_v10 = vpack.i.bf16 %v9552_v37, %v9544_v58 }
0x2cd6   :  { %v4763_v22 = vsel %vm797_vm11, %v4747_v23, -inf }
0x2cd7   :  { %4764 = vmax.xlane.f32.xlu2 %v4763_v22 }
0x2cd9   :  { %v4726_v2 = vpop.f32.mrf.mxu2 }
0x2cda   :  { %v4740_v8 = vmul.f32 0.35355338, %v4726_v2 }
0x2cdc   :  { %v4748_v38 = vadd.f32 %v4740_v8, %v9109_v56 }
0x2cde   :  { %v4766_v7 = vsel %vm797_vm11, %v4748_v38, -inf }
0x2cdf   :  { %4767 = vmax.xlane.f32.xlu1 %v4766_v7  ;;  %v6529_v7 = vpack.i.bf16 %v9554_v13, %v9556_v31 }
0x2ce1   :  { %v4729_v41 = vpop.f32.mrf.mxu2 }
0x2ce2   :  { %v4741_v0 = vmul.f32 0.35355338, %v4729_v41 }
0x2ce4   :  { %v4749_v11 = vadd.f32 %v4741_v0, %v9116_v26 }
0x2ce6   :  { %v4769_v15 = vsel %vm797_vm11, %v4749_v11, -inf }
0x2ce7   :  { %4770 = vmax.xlane.f32.xlu0 %v4769_v15 }
0x2ce9   :  { %v4732_v56 = vpop.f32.mrf.mxu2 }
0x2cea   :  { %v4742_v55 = vmul.f32 0.35355338, %v4732_v56 }
0x2cec   :  { %v9616_v21 = vadd.f32 %v4742_v55, %v9129_v1  ;;  %v6534_v1 = vpack.i.bf16 %v9524_v35, %v9530_v52 }
0x2cee   :  { %v4772_v26 = vsel %vm797_vm11, %v9616_v21, -inf }
0x2cf8   :  { %6525 = vrot.lane.b32.xlu1 %v6524_v10, %s7662_s16 }
0x2cfb   :  { %6520 = vrot.lane.b32.xlu0 %v6519_v40, %s7662_s16 }
0x2d22   :  { %4773 = vmax.xlane.f32.xlu1 %v4772_v26 }
0x2d2a   :  { %v4753_v16 = vpop.xlane.xlu0 %4752 }
0x2d2b   :  { %v4775_v63 = vsub.f32 %v4743_v47, %v4753_v16 }
0x2d2d   :  { %v4783_v53 = vmul.f32 1.442695, %v4775_v63 }
0x2d2f   :  { %6746 = vpow2.f32 %v4783_v53 }
0x2d32   :  { %v4756_v58 = vpop.xlane.xlu2 %4755 }
0x2d33   :  { %v4776_v37 = vsub.f32 %v4744_v18, %v4756_v58 }
0x2d35   :  { %v9620_v6 = vpop.eup %6746  ;;  %v4785_v4 = vmul.f32 1.442695, %v4776_v37 }
0x2d36   :  { %v4799_v28 = vsel %vm797_vm11, %v9620_v6, 0.0 }
0x2d37   :  { %6748 = vpow2.f32 %v4785_v4  ;;  %4800 = vadd.xlane.f32.xlu2 %v4799_v28 }
0x2d3a   :  { %v4759_v59 = vpop.xlane.xlu1 %4758 }
0x2d3b   :  { %v4777_v33 = vsub.f32 %v4745_v61, %v4759_v59  ;;  %6535 = vrot.lane.b32.xlu1 %v6534_v1, %s7662_s16 }
0x2d3d   :  { %v9627_v47 = vpop.eup %6748  ;;  %v4787_v9 = vmul.f32 1.442695, %v4777_v33 }
0x2d3e   :  { %v4802_v18 = vsel %vm797_vm11, %v9627_v47, 0.0 }
0x2d3f   :  { %6750 = vpow2.f32 %v4787_v9  ;;  %4803 = vadd.xlane.f32.xlu2 %v4802_v18 }
0x2d42   :  { %v4762_v35 = vpop.xlane.xlu0 %4761 }
0x2d43   :  { %v4778_v26 = vsub.f32 %v9599_v44, %v4762_v35 }
0x2d45   :  { %v9631_v12 = vpop.eup %6750  ;;  %v4789_v58 = vmul.f32 1.442695, %v4778_v26 }
0x2d46   :  { %v4805_v22 = vsel %vm797_vm11, %v9631_v12, 0.0 }
0x2d47   :  { %4806 = vadd.xlane.f32.xlu0 %v4805_v22 }
0x2d4a   :  { %v4765_v2 = vpop.xlane.xlu2 %4764 }
0x2d4b   :  { %v4779_v61 = vsub.f32 %v4747_v23, %v4765_v2 }
0x2d4d   :  { %v4791_v0 = vmul.f32 1.442695, %v4779_v61 }
0x2d52   :  { %v4768_v52 = vpop.xlane.xlu1 %4767 }
0x2d53   :  { %v4780_v8 = vsub.f32 %v4748_v38, %v4768_v52 }
0x2d55   :  { %v4793_v41 = vmul.f32 1.442695, %v4780_v8 }
0x2d57   :  { %6752 = vpow2.f32 %v4793_v41  ;;  %6530 = vrot.lane.b32.xlu2 %v6529_v7, %s7662_s16 }
0x2d58   :  { %6754 = vpow2.f32 %v4791_v0 }
0x2d5a   :  { %v4771_v15 = vpop.xlane.xlu0 %4770 }
0x2d5b   :  { %v4781_v10 = vsub.f32 %v4749_v11, %v4771_v15 }
0x2d5d   :  { %v9638_v40 = vpop.eup %6752  ;;  %v4795_v56 = vmul.f32 1.442695, %v4781_v10 }
0x2d5e   :  { %v4814_v55 = vsel %vm797_vm11, %v9638_v40, 0.0  ;;  %v9642_v23 = vpop.eup %6754 }
0x2d5f   :  { %6756 = vpow2.f32 %v4795_v56  ;;  %4815 = vadd.xlane.f32.xlu0 %v4814_v55  ;;  %v4811_v13 = vsel %vm797_vm11, %v9642_v23, 0.0 }
0x2d60   :  { %6758 = vpow2.f32 %v4789_v58 }
0x2d65   :  { %v9646_v31 = vpop.eup %6756  ;;  %4812 = vadd.xlane.f32.xlu1 %v4811_v13 }
0x2d66   :  { %v4817_v38 = vsel %vm797_vm11, %v9646_v31, 0.0  ;;  %v9651_v28 = vpop.eup %6758 }
0x2d67   :  { %4818 = vadd.xlane.f32.xlu0 %v4817_v38  ;;  %v4808_v1 = vsel %vm797_vm11, %v9651_v28, 0.0 }
0x2d6a   :  { %v6526_v63 = vpop.permute.xlu1 %6525 }
0x2d6b   :  { %v6527_v37 = vunpack.i.l.bf16 %v6526_v63  ;;  %v6528_v4 = vunpack.i.h.bf16 %v6526_v63 }
0x2d6d   :  { %v6521_v11 = vpop.permute.xlu0 %6520 }
0x2d6e   :  { %v6522_v16 = vunpack.i.l.bf16 %v6521_v11  ;;  %v6523_v53 = vunpack.i.h.bf16 %v6521_v11 }
0x2d70   :  { %4999 = vmatpush.msra.mxu0 %v6522_v16 }
0x2d72   :  { %5000 = vmatpush.msra.mxu0 %v6523_v53 }
0x2d74   :  { %5001 = vmatpush.msra.mxu0 %v6527_v37 }
0x2d76   :  { %5002 = vmatpush.msra.mxu0 %v6528_v4 }
0x2d80   :  { %4809 = vadd.xlane.f32.xlu2 %v4808_v1 }
0x2d95   :  { %v4774_v59 = vpop.xlane.xlu1 %4773 }
0x2d96   :  { %v4782_v44 = vsub.f32 %v9616_v21, %v4774_v59 }
0x2d98   :  { %v4797_v33 = vmul.f32 1.442695, %v4782_v44 }
0x2d9a   :  { %6760 = vpow2.f32 %v4797_v33 }
0x2da0   :  { %v9656_v9 = vpop.eup %6760 }
0x2da1   :  { %v4820_v18 = vsel %vm797_vm11, %v9656_v9, 0.0 }
0x2da2   :  { %4821 = vadd.xlane.f32.xlu2 %v4820_v18 }
0x2daa   :  { %v4801_v22 = vpop.xlane.xlu2 %4800 }
0x2dab   :  { %6762 = vrcp.f32 %v4801_v22  ;;  %v4834_v21 = vand.u32 2147483648, %v4801_v22  ;;  %vm4828_vm7 = vweird.f32 %v4801_v22  ;;  %v4832_v0 = vand.u32 2147483647, %v4801_v22 }
0x2dad   :  { %v6536_v38 = vpop.permute.xlu1 %6535  ;;  %v4835_v26 = vor.u32 1.1754944e-38, %v4834_v21  ;;  %vm4833_vm14 = vcmp.eq.f32.partialorder %v4832_v0, 8.507059e+37 }
0x2dae   :  { %v6537_v58 = vunpack.i.l.bf16 %v6536_v38  ;;  %v6538_v1 = vunpack.i.h.bf16 %v6536_v38 }
0x2db1   :  { %v6763_v2 = vpop.eup %6762 }
0x2db2   :  { %v4824_v35 = vmul.f32 %v6763_v2, %v4801_v22  ;;  %v4804_v52 = vpop.xlane.xlu2 %4803  ;;  %vm4829_vm5 = vweird.f32 %v6763_v2 }
0x2db3   :  { %6764 = vrcp.f32 %v4804_v52  ;;  %vm4830_vm3 = vmor %vm4828_vm7, %vm4829_vm5  ;;  %v4849_v59 = vand.u32 2147483648, %v4804_v52  ;;  %vm4843_vm6 = vweird.f32 %v4804_v52  ;;  %v4847_v33 = vand.u32 2147483647, %v4804_v52 }
0x2db4   :  { %v4825_v61 = vsub.f32 1.0, %v4824_v35 }
0x2db5   :  { %v4850_v35 = vor.u32 1.1754944e-38, %v4849_v59  ;;  %vm4848_vm10 = vcmp.eq.f32.partialorder %v4847_v33, 8.507059e+37 }
0x2db6   :  { %v4826_v8 = vmul.f32 %v6763_v2, %v4825_v61 }
0x2db8   :  { %v4827_v7 = vadd.f32 %v6763_v2, %v4826_v8 }
0x2db9   :  { %v6765_v41 = vpop.eup %6764 }
0x2dba   :  { %v4839_v15 = vmul.f32 %v6765_v41, %v4804_v52  ;;  %v6531_v10 = vpop.permute.xlu2 %6530  ;;  %v4807_v56 = vpop.xlane.xlu0 %4806  ;;  %v4831_v13 = vsel %vm4830_vm3, %v6763_v2, %v4827_v7  ;;  %vm4844_vm4 = vweird.f32 %v6765_v41 }
0x2dbb   :  { %v6532_v55 = vunpack.i.l.bf16 %v6531_v10  ;;  %6766 = vrcp.f32 %v4807_v56  ;;  %v6533_v16 = vunpack.i.h.bf16 %v6531_v10  ;;  %v4836_v53 = vsel %vm4833_vm14, %v4835_v26, %v4831_v13  ;;  %vm4845_vm9 = vmor %vm4843_vm6, %vm4844_vm4 }
0x2dbc   :  { %v4840_v11 = vsub.f32 1.0, %v4839_v15  ;;  %v4837_v44 = vmul.f32 %v9620_v6, %v4836_v53  ;;  %v4864_v21 = vand.u32 2147483648, %v4807_v56  ;;  %vm4858_vm7 = vweird.f32 %v4807_v56 }
0x2dbd   :  { %5003 = vmatpush.msra.mxu0 %v6532_v55  ;;  %v4862_v0 = vand.u32 2147483647, %v4807_v56 }
0x2dbe   :  { %v4841_v63 = vmul.f32 %v6765_v41, %v4840_v11  ;;  %v4865_v15 = vor.u32 1.1754944e-38, %v4864_v21 }
0x2dbf   :  { %5004 = vmatpush.msra.mxu0 %v6533_v16  ;;  %vm4863_vm14 = vcmp.eq.f32.partialorder %v4862_v0, 8.507059e+37 }
0x2dc0   :  { %v4842_v37 = vadd.f32 %v6765_v41, %v4841_v63 }
0x2dc1   :  { %v6767_v4 = vpop.eup %6766  ;;  %5005 = vmatpush.msra.mxu0 %v6537_v58 }
0x2dc2   :  { %v4854_v18 = vmul.f32 %v6767_v4, %v4807_v56  ;;  %v4846_v2 = vsel %vm4845_vm9, %v6765_v41, %v4842_v37  ;;  %vm4859_vm5 = vweird.f32 %v6767_v4 }
0x2dc3   :  { %5006 = vmatpush.msra.mxu0 %v6538_v1  ;;  %v4851_v8 = vsel %vm4848_vm10, %v4850_v35, %v4846_v2  ;;  %vm4860_vm3 = vmor %vm4858_vm7, %vm4859_vm5 }
0x2dc4   :  { %v4855_v22 = vsub.f32 1.0, %v4854_v18  ;;  %6290 = vmatmul.msk.f32.vlgmr.msra.gmra.mxu0 %vm797_vm11, %v4837_v44  ;;  %v4852_v6 = vmul.f32 %v9627_v47, %v4851_v8 }
0x2dc6   :  { %v4856_v61 = vmul.f32 %v6767_v4, %v4855_v22 }
0x2dc8   :  { %v4857_v7 = vadd.f32 %v6767_v4, %v4856_v61 }
0x2dca   :  { %v4861_v52 = vsel %vm4860_vm3, %v6767_v4, %v4857_v7 }
0x2dcb   :  { %v4866_v10 = vsel %vm4863_vm14, %v4865_v15, %v4861_v52 }
0x2dcc   :  { %6291 = vmatmul.msk.f32.gmra.mxu0 %vm797_vm11, %v4852_v6  ;;  %v4867_v41 = vmul.f32 %v9631_v12, %v4866_v10 }
0x2dd2   :  { %v4816_v13 = vpop.xlane.xlu0 %4815 }
0x2dd4   :  { %6292 = vmatmul.msk.f32.gmra.mxu0 %vm797_vm11, %v4867_v41 }
0x2dd8   :  { %v4813_v55 = vpop.xlane.xlu1 %4812 }
0x2dd9   :  { %6768 = vrcp.f32 %v4813_v55  ;;  %v4894_v61 = vand.u32 2147483648, %v4813_v55  ;;  %vm4888_vm7 = vweird.f32 %v4813_v55  ;;  %v4892_v7 = vand.u32 2147483647, %v4813_v55 }
0x2dda   :  { %v4819_v63 = vpop.xlane.xlu0 %4818 }
0x2ddb   :  { %v4895_v15 = vor.u32 1.1754944e-38, %v4894_v61  ;;  %vm4893_vm14 = vcmp.eq.f32.partialorder %v4892_v7, 8.507059e+37 }
0x2ddf   :  { %v6769_v11 = vpop.eup %6768 }
0x2de0   :  { %v4884_v56 = vmul.f32 %v6769_v11, %v4813_v55  ;;  %vm4889_vm10 = vweird.f32 %v6769_v11 }
0x2de1   :  { %vm4890_vm3 = vmor %vm4888_vm7, %vm4889_vm10  ;;  %vm4918_vm7 = vweird.f32 %v4819_v63 }
0x2de2   :  { %v4885_v16 = vsub.f32 1.0, %v4884_v56  ;;  %v4909_v56 = vand.u32 2147483648, %v4816_v13 }
0x2de4   :  { %v4886_v12 = vmul.f32 %v6769_v11, %v4885_v16 }
0x2de6   :  { %v4887_v22 = vadd.f32 %v6769_v11, %v4886_v12 }
0x2de8   :  { %v4891_v52 = vsel %vm4890_vm3, %v6769_v11, %v4887_v22 }
0x2de9   :  { %v4896_v10 = vsel %vm4893_vm14, %v4895_v15, %v4891_v52 }
0x2dea   :  { %v4897_v16 = vmul.f32 %v9642_v23, %v4896_v10 }
0x2df3   :  { %v4810_v38 = vpop.xlane.xlu2 %4809 }
0x2df4   :  { %6770 = vrcp.f32 %v4810_v38  ;;  %v4879_v4 = vand.u32 2147483648, %v4810_v38  ;;  %v4877_v59 = vand.u32 2147483647, %v4810_v38  ;;  %vm4873_vm6 = vweird.f32 %v4810_v38 }
0x2df5   :  { %6772 = vrcp.f32 %v4816_v13 }
0x2df6   :  { %6774 = vrcp.f32 %v4819_v63  ;;  %v4880_v18 = vor.u32 1.1754944e-38, %v4879_v4  ;;  %vm4878_vm5 = vcmp.eq.f32.partialorder %v4877_v59, 8.507059e+37  ;;  %v4922_v4 = vand.u32 2147483647, %v4819_v63 }
0x2df8   :  { %vm4923_vm14 = vcmp.eq.f32.partialorder %v4922_v4, 8.507059e+37 }
0x2dfa   :  { %v6771_v47 = vpop.eup %6770 }
0x2dfb   :  { %v6773_v26 = vpop.eup %6772  ;;  %v4869_v53 = vmul.f32 %v6771_v47, %v4810_v38  ;;  %vm4874_vm4 = vweird.f32 %v6771_v47 }
0x2dfc   :  { %v4899_v37 = vmul.f32 %v6773_v26, %v4816_v13  ;;  %vm4875_vm9 = vmor %vm4873_vm6, %vm4874_vm4  ;;  %v6775_v35 = vpop.eup %6774  ;;  %vm4904_vm4 = vweird.f32 %v6773_v26  ;;  %vm4903_vm6 = vweird.f32 %v4816_v13 }
0x2dfd   :  { %v4870_v58 = vsub.f32 1.0, %v4869_v53  ;;  %v4914_v6 = vmul.f32 %v6775_v35, %v4819_v63  ;;  %v4910_v53 = vor.u32 1.1754944e-38, %v4909_v56  ;;  %v5064_v56 = vld [vmem:[#allocation42 + $0x28] sm:$0xff] }
0x2dfe   :  { %v4900_v33 = vsub.f32 1.0, %v4899_v37  ;;  %v4924_v37 = vand.u32 2147483648, %v4819_v63 }
0x2dff   :  { %v4871_v1 = vmul.f32 %v6771_v47, %v4870_v58  ;;  %v4915_v38 = vsub.f32 1.0, %v4914_v6 }
0x2e00   :  { %v4901_v0 = vmul.f32 %v6773_v26, %v4900_v33 }
0x2e01   :  { %v4872_v44 = vadd.f32 %v6771_v47, %v4871_v1  ;;  %v4916_v55 = vmul.f32 %v6775_v35, %v4915_v38  ;;  %v5065_v38 = vld [vmem:[#allocation42 + $0x30] sm:$0xff] }
0x2e02   :  { %v4902_v41 = vadd.f32 %v6773_v26, %v4901_v0 }
0x2e03   :  { %v4876_v2 = vsel %vm4875_vm9, %v6771_v47, %v4872_v44  ;;  %v4907_v47 = vand.u32 2147483647, %v4816_v13  ;;  %vm4905_vm9 = vmor %vm4903_vm6, %vm4904_vm4  ;;  %v4917_v11 = vadd.f32 %v6775_v35, %v4916_v55  ;;  %v4925_v13 = vor.u32 1.1754944e-38, %v4924_v37  ;;  %v6310_v55 = vld [vmem:[%s10168_s4 + $0x30] sm:$0xff] }
0x2e04   :  { %v4881_v8 = vsel %vm4878_vm5, %v4880_v18, %v4876_v2  ;;  %vm4919_vm5 = vweird.f32 %v6775_v35 }
0x2e05   :  { %v4882_v21 = vmul.f32 %v9651_v28, %v4881_v8  ;;  %v4906_v28 = vsel %vm4905_vm9, %v6773_v26, %v4902_v41  ;;  %vm4908_vm10 = vcmp.eq.f32.partialorder %v4907_v47, 8.507059e+37  ;;  %vm4920_vm3 = vmor %vm4918_vm7, %vm4919_vm5  ;;  %v5066_v41 = vld [vmem:[#allocation42 + $0x38] sm:$0xff]  ;;  %v5063_v47 = vld [vmem:[#allocation42 + $0x20] sm:$0xff] }
0x2e06   :  { %v4911_v58 = vsel %vm4908_vm10, %v4910_v53, %v4906_v28  ;;  %v4921_v23 = vsel %vm4920_vm3, %v6775_v35, %v4917_v11  ;;  %5085 = vmatpush.msrb.mxu1 %v5066_v41  ;;  %v6309_v53 = vld [vmem:[%s10168_s4 + $0x28] sm:$0xff]  ;;  %v6303_v41 = vld [vmem:[%s10171_s8 + $0x30] sm:$0xff] }
0x2e07   :  { %6293 = vmatmul.msk.f32.gmra.mxu0 %vm797_vm11, %v4882_v21  ;;  %v4912_v1 = vmul.f32 %v9638_v40, %v4911_v58  ;;  %v4926_v59 = vsel %vm4923_vm14, %v4925_v13, %v4921_v23 }
0x2e08   :  { %v4927_v33 = vmul.f32 %v9646_v31, %v4926_v59  ;;  %5086 = vmatpush.msrb.mxu1 %v5065_v38 }
0x2e0a   :  { %5087 = vmatpush.msrb.mxu1 %v5064_v56  ;;  %v6302_v56 = vld [vmem:[%s10171_s8 + $0x28] sm:$0xff] }
0x2e0c   :  { %5088 = vmatpush.msrb.mxu1 %v5063_v47 }
0x2e0f   :  { %6294 = vmatmul.msk.f32.gmra.mxu0 %vm797_vm11, %v4897_v16  ;;  %v6311_v16 = vld [vmem:[%s10168_s4 + $0x38] sm:$0xff] }
0x2e10   :  { %5224 = vmatpush.msra.mxu1 %v6311_v16  ;;  %v6301_v16 = vld [vmem:[%s10171_s8 + $0x20] sm:$0xff] }
0x2e12   :  { %5225 = vmatpush.msra.mxu1 %v6310_v55 }
0x2e14   :  { %5226 = vmatpush.msra.mxu1 %v6309_v53 }
0x2e15   :  { %v4822_v12 = vpop.xlane.xlu2 %4821 }
0x2e16   :  { %6776 = vrcp.f32 %v4822_v12  ;;  %v4939_v22 = vand.u32 2147483648, %v4822_v12  ;;  %v4937_v2 = vand.u32 2147483647, %v4822_v12  ;;  %vm4933_vm6 = vweird.f32 %v4822_v12 }
0x2e17   :  { %6295 = vmatmul.msk.f32.gmra.mxu0 %vm797_vm11, %v4912_v1 }
0x2e18   :  { %v4940_v61 = vor.u32 1.1754944e-38, %v4939_v22  ;;  %vm4938_vm10 = vcmp.eq.f32.partialorder %v4937_v2, 8.507059e+37 }
0x2e1c   :  { %v6777_v26 = vpop.eup %6776 }
0x2e1d   :  { %v4929_v44 = vmul.f32 %v6777_v26, %v4822_v12  ;;  %vm4934_vm4 = vweird.f32 %v6777_v26  ;;  %v6308_v12 = vld [vmem:[%s10168_s4 + $0x20] sm:$0xff] }
0x2e1e   :  { %vm4935_vm9 = vmor %vm4933_vm6, %vm4934_vm4  ;;  %5227 = vmatpush.msra.mxu1 %v6308_v12 }
0x2e1f   :  { %v4930_v18 = vsub.f32 1.0, %v4929_v44  ;;  %6296 = vmatmul.msk.f32.gmra.mxu0 %vm797_vm11, %v4927_v33 }
0x2e21   :  { %v4931_v63 = vmul.f32 %v6777_v26, %v4930_v18  ;;  %v6588_v18 = vld [vmem:[%s10169_s14 + $0x1] ss:$0 sm:$0xff] }
0x2e23   :  { %v4932_v40 = vadd.f32 %v6777_v26, %v4931_v63 }
0x2e25   :  { %v4936_v35 = vsel %vm4935_vm9, %v6777_v26, %v4932_v40 }
0x2e26   :  { %v4941_v8 = vsel %vm4938_vm10, %v4940_v61, %v4936_v35 }
0x2e27   :  { %v4942_v7 = vmul.f32 %v9656_v9, %v4941_v8 }
0x2e29   :  { %6297 = vmatmul.msk.f32.gmra.mxu0 %vm797_vm11, %v4942_v7 }
0x2e41   :  { %v5008_v21 = vpop.f32.mrf.mxu0 }
0x2e49   :  { %v5011_v31 = vpop.f32.mrf.mxu0 }
0x2e51   :  { %v5014_v0 = vpop.f32.mrf.mxu0 }
0x2e52   :  { %5034 = vrot.lane.b32.xlu0 %v5014_v0, %s7628_s7 }
0x2e84   :  { %v5017_v6 = vpop.f32.mrf.mxu0 }
0x2e85   :  { %5036 = vrot.lane.b32.xlu0 %v5017_v6, %s7628_s7 }
0x2e8c   :  { %v5020_v52 = vpop.f32.mrf.mxu0 }
0x2e8d   :  { %5042 = vrot.lane.b32.xlu1 %v5020_v52, %s7614_s30 }
0x2e94   :  { %v5023_v15 = vpop.f32.mrf.mxu0 }
0x2e95   :  { %5044 = vrot.lane.b32.xlu1 %v5023_v15, %s7614_s30 }
0x2e9c   :  { %v5026_v10 = vpop.f32.mrf.mxu0 }
0x2e9d   :  { %5050 = vrot.lane.b32.xlu2 %v5026_v10, %s7655_s2 }
0x2ea6   :  { %v5029_v9 = vpop.f32.mrf.mxu0 }
0x2ea7   :  { %5052 = vrot.lane.b32.xlu0 %v5029_v9, %s7655_s2  ;;  %v6304_v9 = vld [vmem:[%s10171_s8 + $0x38] sm:$0xff] }
0x2ea8   :  { %5191 = vmatpush.msrb.mxu3 %v6304_v9 }
0x2eaa   :  { %5192 = vmatpush.msrb.mxu3 %v6303_v41 }
0x2eac   :  { %5193 = vmatpush.msrb.mxu3 %v6302_v56 }
0x2eae   :  { %5194 = vmatpush.msrb.mxu3 %v6301_v16 }
0x2ec4   :  { %v5035_v28 = vpop.permute.xlu0 %5034 }
0x2ec5   :  { %v5056_v58 = vsel %vm836_vm0, %v5008_v21, %v5035_v28 }
0x2ef7   :  { %v5051_v37 = vpop.permute.xlu2 %5050  ;;  %v5037_v23 = vpop.permute.xlu0 %5036 }
0x2ef8   :  { %v5057_v59 = vsel %vm836_vm0, %v5011_v31, %v5037_v23 }
0x2eff   :  { %v5043_v11 = vpop.permute.xlu1 %5042 }
0x2f00   :  { %v5058_v4 = vsel %vm1078_vm13, %v5056_v58, %v5043_v11 }
0x2f01   :  { %v5060_v1 = vsel %vm635_vm1, %v5058_v4, %v5051_v37 }
0x2f02   :  { %6298 = vmatmul.msk.f32.vlgmr.msrb.gmra.mxu1 %vm667_vm2, %v5060_v1 }
0x2f07   :  { %v5045_v13 = vpop.permute.xlu1 %5044 }
0x2f08   :  { %v5059_v26 = vsel %vm1078_vm13, %v5057_v59, %v5045_v13 }
0x2f19   :  { %v5053_v44 = vpop.permute.xlu0 %5052 }
0x2f1a   :  { %v5061_v33 = vsel %vm635_vm1, %v5059_v26, %v5053_v44 }
0x2f1b   :  { %6299 = vmatmul.msk.f32.gmra.mxu1 %vm667_vm2, %v5061_v33 }
0x2f23   :  { %6313 = vmatmul.msk.f32.vlgmr.msra.gmra.mxu1 %vm667_vm2, %v9215_v25 }
0x2f2b   :  { %6314 = vmatmul.msk.f32.gmra.mxu1 %vm667_vm2, %v9221_v24 }
0x2f7f   :  { %v5090_v22 = vpop.f32.mrf.mxu1 }
0x2f80   :  { %v5096_v63 = vadd.f32 %v5090_v22, %v9500_v60  ;;  %v6589_v60 = vld [vmem:[%s10170_s22 + $0x1] ss:$0 sm:$0xff] }
0x2f82   :  { %v9700_v2 = vadd.f32 %v6588_v18, %v5096_v63  ;;  %v6591_v63 = vld [vmem:[#allocation26 + $0x1] ss:$0 sm:$0xff] }
0x2f84   :  { %v5109_v40 = vsel %vm667_vm2, %v9700_v2, 0.0 }
0x2f85   :  { %5110 = vadd.xlane.f32.xlu2 %v5109_v40 }
0x2f98   :  { %v5093_v61 = vpop.f32.mrf.mxu1 }
0x2f99   :  { %v5097_v35 = vadd.f32 %v5093_v61, %v9505_v20 }
0x2f9b   :  { %v9705_v8 = vadd.f32 %v6588_v18, %v5097_v35  ;;  %v6590_v18 = vld [vmem:[#allocation27 + $0x1] ss:$0 sm:$0xff] }
0x2f9d   :  { %v5112_v25 = vsel %vm667_vm2, %v9705_v8, 0.0 }
0x2f9e   :  { %5113 = vadd.xlane.f32.xlu1 %v5112_v25 }
0x2fa0   :  { %v5229_v24 = vpop.f32.mrf.mxu1 }
0x2fa1   :  { %v9712_v31 = vadd.f32 %v6589_v60, %v5229_v24 }
0x2fa3   :  { %v5251_v20 = vrot.slane %v9712_v31, 4 }
0x2fa8   :  { %v5232_v7 = vpop.f32.mrf.mxu1 }
0x2fa9   :  { %v9710_v21 = vadd.f32 %v6589_v60, %v5232_v7 }
0x2fab   :  { %v5252_v0 = vrot.slane %v9710_v21, 4 }
0x2fad   :  { %v5253_v6 = vsel %vm2195_vm15, %v5251_v20, %v5252_v0 }
0x2fb7   :  { %5266 = vrot.lane.b32.xlu1 %v5253_v6, %s7648_s12 }
0x2fbf   :  { %5256 = vrot.lane.b32.xlu1 %v5253_v6, %s7645_s23 }
0x2ff8   :  { %v5111_v52 = vpop.xlane.xlu2 %5110 }
0x2ff9   :  { %v5115_v15 = vmul.f32 %v5111_v52, %v8142_v36 }
0x2ffb   :  { %v5117_v10 = vsub.f32 %v9700_v2, %v5115_v15 }
0x2ffd   :  { %v5119_v38 = vmul.f32 %v5117_v10, %v5117_v10 }
0x2fff   :  { %v5121_v47 = vsel %vm667_vm2, %v5119_v38, 0.0 }
0x3000   :  { %5122 = vadd.xlane.f32.xlu0 %v5121_v47 }
0x3011   :  { %v5114_v55 = vpop.xlane.xlu1 %5113 }
0x3012   :  { %v5116_v28 = vmul.f32 %v5114_v55, %v8142_v36 }
0x3014   :  { %v5118_v53 = vsub.f32 %v9705_v8, %v5116_v28  ;;  %5261 = vrot.lane.b32.xlu0 %v9710_v21, %s7650_s26 }
0x3016   :  { %v5120_v58 = vmul.f32 %v5118_v53, %v5118_v53 }
0x3018   :  { %v5124_v11 = vsel %vm667_vm2, %v5120_v58, 0.0 }
0x3019   :  { %5125 = vadd.xlane.f32.xlu2 %v5124_v11 }
0x301c   :  { %5259 = vrot.lane.b32.xlu0 %v9712_v31, %s7650_s26 }
0x3029   :  { %v9733_v37 = vpop.permute.xlu1 %5266 }
0x302a   :  { %6315 = vmatpush.xpose.msk.msra.mxu3 %vm836_vm0, %v9733_v37 }
0x3031   :  { %5264 = vrot.lane.b32.xlu2 %v5251_v20, %s7648_s12  ;;  %v9751_v41 = vpop.permute.xlu1 %5256 }
0x3039   :  { %5254 = vrot.lane.b32.xlu2 %v5251_v20, %s7645_s23 }
0x3073   :  { %v5123_v4 = vpop.xlane.xlu0 %5122 }
0x3074   :  { %v5127_v12 = vmul.f32 %v5123_v4, %v8142_v36  ;;  %v6592_v4 = vld [vmem:[%s10172_s21 + $0x1] ss:$0 sm:$0xff] }
0x3076   :  { %v5129_v1 = vadd.f32 1e-05, %v5127_v12 }
0x3078   :  { %6778 = vrsqrt.f32 %v5129_v1  ;;  %vm5137_vm5 = vweird.f32 %v5129_v1 }
0x307e   :  { %v6779_v23 = vpop.eup %6778 }
0x307f   :  { %v5132_v13 = vmul.f32 %v6779_v23, %v5129_v1  ;;  %vm5138_vm11 = vweird.f32 %v6779_v23 }
0x3080   :  { %vm5139_vm7 = vmor %vm5137_vm5, %vm5138_vm11 }
0x3081   :  { %v5133_v59 = vmul.f32 %v6779_v23, %v5132_v13 }
0x3083   :  { %v5134_v26 = vmul.f32 0.5, %v5133_v59 }
0x3085   :  { %v5135_v44 = vsub.f32 1.5, %v5134_v26 }
0x3086   :  { %v5262_v7 = vpop.permute.xlu0 %5261 }
0x3087   :  { %v5136_v33 = vmul.f32 %v6779_v23, %v5135_v44 }
0x3089   :  { %v5140_v22 = vsel %vm5139_vm7, %v6779_v23, %v5136_v33 }
0x308a   :  { %v5151_v40 = vmul.f32 %v5140_v22, %v5117_v10 }
0x308c   :  { %v5156_v61 = vmul.f32 %v6590_v18, %v5151_v40  ;;  %v5126_v35 = vpop.xlane.xlu2 %5125 }
0x308d   :  { %v5128_v25 = vmul.f32 %v5126_v35, %v8142_v36 }
0x308e   :  { %v5161_v24 = vadd.f32 %v6591_v63, %v5156_v61  ;;  %v9747_v15 = vpop.permute.xlu0 %5259 }
0x308f   :  { %v5130_v60 = vadd.f32 1e-05, %v5128_v25 }
0x3090   :  { %6306 = vmatmul.msk.f32.vlgmr.msrb.gmra.mxu3 %vm667_vm2, %v5161_v24 }
0x3091   :  { %6780 = vrsqrt.f32 %v5130_v60  ;;  %vm5147_vm14 = vweird.f32 %v5130_v60 }
0x3094   :  { %v5265_v0 = vpop.permute.xlu2 %5264 }
0x3095   :  { %v9743_v20 = vsel %vm2195_vm15, %v5262_v7, %v5265_v0 }
0x3096   :  { %6316 = vmatpush.xpose.msk.msra.mxu3 %vm836_vm0, %v9743_v20 }
0x3097   :  { %v6781_v6 = vpop.eup %6780 }
0x3098   :  { %v5142_v52 = vmul.f32 %v6781_v6, %v5130_v60  ;;  %vm5148_vm3 = vweird.f32 %v6781_v6 }
0x3099   :  { %vm5149_vm4 = vmor %vm5147_vm14, %vm5148_vm3 }
0x309a   :  { %v5143_v10 = vmul.f32 %v6781_v6, %v5142_v52  ;;  %6317 = vmatpush.xpose.msk.msra.mxu3 %vm836_vm0, %v9747_v15 }
0x309c   :  { %v5144_v9 = vmul.f32 0.5, %v5143_v10  ;;  %v5255_v56 = vpop.permute.xlu2 %5254 }
0x309d   :  { %v9757_v16 = vsel %vm2195_vm15, %v9710_v21, %v5255_v56 }
0x309e   :  { %v5145_v38 = vsub.f32 1.5, %v5144_v9  ;;  %6318 = vmatpush.xpose.msk.msra.mxu3 %vm836_vm0, %v9751_v41 }
0x30a0   :  { %v5146_v47 = vmul.f32 %v6781_v6, %v5145_v38 }
0x30a2   :  { %v5150_v55 = vsel %vm5149_vm4, %v6781_v6, %v5146_v47  ;;  %6319 = vmatpush.xpose.msk.msra.mxu3 %vm836_vm0, %v9757_v16 }
0x30a3   :  { %v5152_v28 = vmul.f32 %v5150_v55, %v5118_v53 }
0x30a5   :  { %v5157_v58 = vmul.f32 %v6590_v18, %v5152_v28 }
0x30a6   :  { %6320 = vmatpush.xpose.msk.msra.mxu3 %vm836_vm0, %v9712_v31 }
0x30a7   :  { %v5162_v11 = vadd.f32 %v6591_v63, %v5157_v58 }
0x30a9   :  { %6307 = vmatmul.msk.f32.gmra.mxu3 %vm667_vm2, %v5162_v11 }
0x3113   :  { %v5196_v12 = vpop.f32.mrf.mxu3 }
0x3114   :  { %v5197_v1 = vadd.f32 %v6592_v4, %v5196_v12 }
0x3116   :  { %5241 = vrot.lane.b32.xlu2 %v5197_v1, %s7650_s26  ;;  %5237 = vrot.lane.b32.xlu0 %v5197_v1, %s7645_s23 }
0x3117   :  { %6321 = vmatmul.msk.f32.vlgmr.msra.gmra.mxu3 %vm836_vm0, %v5197_v1 }
0x312c   :  { %v5199_v21 = vpop.f32.mrf.mxu3 }
0x312d   :  { %v5200_v23 = vadd.f32 %v6592_v4, %v5199_v21 }
0x312f   :  { %5239 = vrot.lane.b32.xlu1 %v5200_v23, %s7645_s23  ;;  %5247 = vrot.lane.b32.xlu2 %v5200_v23, %s7648_s12  ;;  %s10198_s23 = sld [smem:[#allocation84_spill]] }
0x3130   :  { %5243 = vrot.lane.b32.xlu0 %v5200_v23, %s7650_s26  ;;  %6322 = vmatmul.msk.f32.gmra.mxu3 %vm836_vm0, %v5200_v23 }
0x3137   :  { %5245 = vrot.lane.b32.xlu1 %v5197_v1, %s7648_s12  ;;  %s7663_s12 = smov [#allocation46]  }
0x3138   :  { %s5991_s26 = sshll.u32 %s7663_s12, 4  ;;  %s5992_s26 = int_to_ptr.vmem [resolvable:$true] %s5991_s26 }
0x3170   :  { %v5242_v18 = vpop.permute.xlu2 %5241 }
0x3188   :  { %v5238_v53 = vpop.permute.xlu0 %5237 }
0x3189   :  { %6323 = vmatmul.msk.f32.gmra.mxu3 %vm836_vm0, %v5238_v53 }
0x319a   :  { %v5318_v13 = vpop.f32.mrf.mxu3 }
0x319b   :  { %v5342_v59 = vmul.f32 0.35355338, %v5318_v13 }
0x319d   :  { %v5350_v26 = vadd.f32 %v5342_v59, %v9319_v5  ;;  %v5248_v5 = vpop.permute.xlu2 %5247 }
0x319f   :  { %v5358_v44 = vsel %vm2961_vm8, %v5350_v26, -inf }
0x31a0   :  { %5359 = vmax.xlane.f32.xlu0 %v5358_v44 }
0x31a1   :  { %v5240_v33 = vpop.permute.xlu1 %5239 }
0x31a2   :  { %6324 = vmatmul.msk.f32.gmra.mxu3 %vm836_vm0, %v5240_v33  ;;  %v5244_v22 = vpop.permute.xlu0 %5243 }
0x31a9   :  { %v5246_v25 = vpop.permute.xlu1 %5245 }
0x31aa   :  { %6325 = vmatmul.msk.f32.gmra.mxu3 %vm836_vm0, %v5242_v18 }
0x31b2   :  { %6326 = vmatmul.msk.f32.gmra.mxu3 %vm836_vm0, %v5244_v22 }
0x31b3   :  { %v5321_v63 = vpop.f32.mrf.mxu3 }
0x31b4   :  { %v5343_v40 = vmul.f32 0.35355338, %v5321_v63 }
0x31b6   :  { %v5351_v61 = vadd.f32 %v5343_v40, %v9327_v39 }
0x31b8   :  { %v5361_v35 = vsel %vm2961_vm8, %v5351_v61, -inf }
0x31b9   :  { %5362 = vmax.xlane.f32.xlu1 %v5361_v35 }
0x31ba   :  { %6327 = vmatmul.msk.f32.gmra.mxu3 %vm836_vm0, %v5246_v25 }
0x31c2   :  { %6328 = vmatmul.msk.f32.gmra.mxu3 %vm836_vm0, %v5248_v5 }
0x320c   :  { %v5324_v24 = vpop.f32.mrf.mxu3 }
0x320d   :  { %v5344_v7 = vmul.f32 0.35355338, %v5324_v24 }
0x320f   :  { %v5352_v60 = vadd.f32 %v5344_v7, %v9335_v30 }
0x3211   :  { %v5364_v0 = vsel %vm2961_vm8, %v5352_v60, -inf }
0x3212   :  { %5365 = vmax.xlane.f32.xlu2 %v5364_v0 }
0x3213   :  { %v5360_v6 = vpop.xlane.xlu0 %5359 }
0x3214   :  { %v5382_v52 = vsub.f32 %v5350_v26, %v5360_v6 }
0x3216   :  { %v5390_v10 = vmul.f32 1.442695, %v5382_v52 }
0x3218   :  { %6782 = vpow2.f32 %v5390_v10 }
0x321e   :  { %v9785_v39 = vpop.eup %6782 }
0x321f   :  { %v5406_v9 = vsel %vm2961_vm8, %v9785_v39, 0.0 }
0x3220   :  { %5407 = vadd.xlane.f32.xlu1 %v5406_v9 }
0x3225   :  { %v5327_v38 = vpop.f32.mrf.mxu3 }
0x3226   :  { %v5345_v56 = vmul.f32 0.35355338, %v5327_v38 }
0x3228   :  { %v5353_v47 = vadd.f32 %v5345_v56, %v9341_v49 }
0x322a   :  { %v5367_v55 = vsel %vm2961_vm8, %v5353_v47, -inf }
0x322b   :  { %5368 = vmax.xlane.f32.xlu0 %v5367_v55 }
0x322c   :  { %v5363_v30 = vpop.xlane.xlu1 %5362 }
0x322d   :  { %v5383_v28 = vsub.f32 %v5351_v61, %v5363_v30  ;;  %v5330_v58 = vpop.f32.mrf.mxu3  ;;  %v6544_v61 = vpack.i.bf16 %v9751_v41, %v9747_v15  ;;  %v6549_v15 = vpack.i.bf16 %v9712_v31, %v9757_v16 }
0x322e   :  { %v5346_v11 = vmul.f32 0.35355338, %v5330_v58 }
0x322f   :  { %v5392_v4 = vmul.f32 1.442695, %v5383_v28 }
0x3230   :  { %v5354_v12 = vadd.f32 %v5346_v11, %v9351_v51 }
0x3231   :  { %6784 = vpow2.f32 %v5392_v4 }
0x3232   :  { %v5370_v1 = vsel %vm2961_vm8, %v5354_v12, -inf }
0x3233   :  { %5371 = vmax.xlane.f32.xlu1 %v5370_v1 }
0x3235   :  { %v5333_v21 = vpop.f32.mrf.mxu3 }
0x3236   :  { %v5347_v23 = vmul.f32 0.35355338, %v5333_v21 }
0x3237   :  { %v9793_v53 = vpop.eup %6784 }
0x3238   :  { %v5355_v49 = vadd.f32 %v5347_v23, %v9357_v14  ;;  %v5409_v13 = vsel %vm2961_vm8, %v9793_v53, 0.0  ;;  %v6539_v14 = vpack.i.bf16 %v9743_v20, %v9733_v37 }
0x3239   :  { %5410 = vadd.xlane.f32.xlu0 %v5409_v13 }
0x323a   :  { %v5373_v59 = vsel %vm2961_vm8, %v5355_v49, -inf }
0x323b   :  { %5374 = vmax.xlane.f32.xlu2 %v5373_v59 }
0x323d   :  { %v5336_v26 = vpop.f32.mrf.mxu3 }
0x323e   :  { %v5348_v44 = vmul.f32 0.35355338, %v5336_v26 }
0x3240   :  { %v5356_v51 = vadd.f32 %v5348_v44, %v9367_v46 }
0x3242   :  { %v5376_v33 = vsel %vm2961_vm8, %v5356_v51, -inf }
0x3243   :  { %5377 = vmax.xlane.f32.xlu0 %v5376_v33 }
0x3245   :  { %v5339_v18 = vpop.f32.mrf.mxu3 }
0x3246   :  { %v5349_v22 = vmul.f32 0.35355338, %v5339_v18 }
0x3248   :  { %v5357_v63 = vadd.f32 %v5349_v22, %v9373_v57 }
0x324a   :  { %v5379_v40 = vsel %vm2961_vm8, %v5357_v63, -inf }
0x324b   :  { %5380 = vmax.xlane.f32.xlu2 %v5379_v40 }
0x324c   :  { %6540 = vrot.lane.b32.xlu1 %v6539_v14, %s7657_s17 }
0x3263   :  { %6545 = vrot.lane.b32.xlu2 %v6544_v61, %s7657_s17 }
0x3285   :  { %v5366_v46 = vpop.xlane.xlu2 %5365 }
0x3286   :  { %v5384_v35 = vsub.f32 %v5352_v60, %v5366_v46 }
0x3288   :  { %v5394_v25 = vmul.f32 1.442695, %v5384_v35 }
0x328a   :  { %6786 = vpow2.f32 %v5394_v25 }
0x3290   :  { %v9809_v5 = vpop.eup %6786 }
0x3291   :  { %v5412_v57 = vsel %vm2961_vm8, %v9809_v5, 0.0 }
0x3292   :  { %5413 = vadd.xlane.f32.xlu0 %v5412_v57 }
0x3293   :  { %v9813_v37 = vpop.xlane.xlu1 %5407 }
0x3294   :  { %vm5435_vm6 = vweird.f32 %v9813_v37 }
0x329e   :  { %v5369_v20 = vpop.xlane.xlu0 %5368 }
0x329f   :  { %v5385_v24 = vsub.f32 %v5353_v47, %v5369_v20  ;;  %v5441_v20 = vand.u32 2147483648, %v9813_v37 }
0x32a1   :  { %v5396_v7 = vmul.f32 1.442695, %v5385_v24  ;;  %v5439_v24 = vand.u32 2147483647, %v9813_v37 }
0x32a3   :  { %6788 = vpow2.f32 %v5396_v7  ;;  %vm5440_vm10 = vcmp.eq.f32.partialorder %v5439_v24, 8.507059e+37 }
0x32a6   :  { %6550 = vrot.lane.b32.xlu0 %v6549_v15, %s7657_s17  ;;  %v5372_v41 = vpop.xlane.xlu1 %5371 }
0x32a7   :  { %v5386_v60 = vsub.f32 %v5354_v12, %v5372_v41 }
0x32a9   :  { %v9818_v0 = vpop.eup %6788  ;;  %v5398_v6 = vmul.f32 1.442695, %v5386_v60  ;;  %v5442_v60 = vor.u32 1.1754944e-38, %v5441_v20 }
0x32aa   :  { %v5415_v52 = vsel %vm2961_vm8, %v9818_v0, 0.0 }
0x32ab   :  { %6790 = vpow2.f32 %v5398_v6  ;;  %5416 = vadd.xlane.f32.xlu2 %v5415_v52 }
0x32ac   :  { %v9822_v10 = vpop.xlane.xlu0 %5410 }
0x32ad   :  { %vm5450_vm5 = vweird.f32 %v9822_v10 }
0x32ae   :  { %v5375_v31 = vpop.xlane.xlu2 %5374 }
0x32af   :  { %v5387_v55 = vsub.f32 %v5355_v49, %v5375_v31 }
0x32b1   :  { %v9824_v9 = vpop.eup %6790  ;;  %v5400_v21 = vmul.f32 1.442695, %v5387_v55 }
0x32b2   :  { %v5418_v38 = vsel %vm2961_vm8, %v9824_v9, 0.0 }
0x32b3   :  { %5419 = vadd.xlane.f32.xlu1 %v5418_v38 }
0x32b6   :  { %v5378_v16 = vpop.xlane.xlu0 %5377 }
0x32b7   :  { %v5388_v56 = vsub.f32 %v5356_v51, %v5378_v16 }
0x32b9   :  { %v5402_v47 = vmul.f32 1.442695, %v5388_v56  ;;  %v5456_v56 = vand.u32 2147483648, %v9822_v10 }
0x32bb   :  { %6792 = vpow2.f32 %v5402_v47 }
0x32be   :  { %v5381_v30 = vpop.xlane.xlu2 %5380  ;;  %v6541_v28 = vpop.permute.xlu1 %6540 }
0x32bf   :  { %v5389_v58 = vsub.f32 %v5357_v63, %v5381_v30  ;;  %v6542_v11 = vunpack.i.l.bf16 %v6541_v28  ;;  %v6543_v1 = vunpack.i.h.bf16 %v6541_v28 }
0x32c1   :  { %v9828_v4 = vpop.eup %6792  ;;  %v5404_v12 = vmul.f32 1.442695, %v5389_v58  ;;  %5602 = vmatpush.msrb.mxu1 %v6542_v11  ;;  %v5457_v11 = vor.u32 1.1754944e-38, %v5456_v56 }
0x32c2   :  { %v5424_v23 = vsel %vm2961_vm8, %v9828_v4, 0.0 }
0x32c3   :  { %6794 = vpow2.f32 %v5404_v12  ;;  %5603 = vmatpush.msrb.mxu1 %v6543_v1  ;;  %5425 = vadd.xlane.f32.xlu2 %v5424_v23 }
0x32c4   :  { %6796 = vpow2.f32 %v5400_v21 }
0x32c5   :  { %6798 = vrcp.f32 %v9813_v37 }
0x32c6   :  { %v6546_v13 = vpop.permute.xlu2 %6545  ;;  %6800 = vrcp.f32 %v9822_v10 }
0x32c7   :  { %v6547_v59 = vunpack.i.l.bf16 %v6546_v13  ;;  %v6548_v26 = vunpack.i.h.bf16 %v6546_v13 }
0x32c9   :  { %v9832_v49 = vpop.eup %6794  ;;  %5604 = vmatpush.msrb.mxu1 %v6547_v59 }
0x32ca   :  { %v5427_v44 = vsel %vm2961_vm8, %v9832_v49, 0.0  ;;  %v9836_v51 = vpop.eup %6796 }
0x32cb   :  { %5428 = vadd.xlane.f32.xlu1 %v5427_v44  ;;  %5605 = vmatpush.msrb.mxu1 %v6548_v26  ;;  %v5421_v33 = vsel %vm2961_vm8, %v9836_v51, 0.0  ;;  %v6799_v18 = vpop.eup %6798 }
0x32cc   :  { %v5431_v22 = vmul.f32 %v6799_v18, %v9813_v37  ;;  %v6801_v40 = vpop.eup %6800  ;;  %vm5436_vm15 = vweird.f32 %v6799_v18  ;;  %v5454_v37 = vand.u32 2147483647, %v9822_v10 }
0x32cd   :  { %v5446_v46 = vmul.f32 %v6801_v40, %v9822_v10  ;;  %vm5437_vm9 = vmor %vm5435_vm6, %vm5436_vm15  ;;  %vm5451_vm11 = vweird.f32 %v6801_v40 }
0x32ce   :  { %v5432_v63 = vsub.f32 1.0, %v5431_v22  ;;  %vm5452_vm7 = vmor %vm5450_vm5, %vm5451_vm11  ;;  %vm5455_vm3 = vcmp.eq.f32.partialorder %v5454_v37, 8.507059e+37 }
0x32cf   :  { %v5447_v25 = vsub.f32 1.0, %v5446_v46 }
0x32d0   :  { %5422 = vadd.xlane.f32.xlu0 %v5421_v33  ;;  %v5433_v61 = vmul.f32 %v6799_v18, %v5432_v63 }
0x32d1   :  { %v5448_v15 = vmul.f32 %v6801_v40, %v5447_v25 }
0x32d2   :  { %v5434_v35 = vadd.f32 %v6799_v18, %v5433_v61 }
0x32d3   :  { %v5449_v31 = vadd.f32 %v6801_v40, %v5448_v15 }
0x32d4   :  { %v5438_v7 = vsel %vm5437_vm9, %v6799_v18, %v5434_v35 }
0x32d5   :  { %v5443_v52 = vsel %vm5440_vm10, %v5442_v60, %v5438_v7  ;;  %v5453_v58 = vsel %vm5452_vm7, %v6801_v40, %v5449_v31 }
0x32d6   :  { %v5444_v55 = vmul.f32 %v9785_v39, %v5443_v52  ;;  %v5458_v12 = vsel %vm5455_vm3, %v5457_v11, %v5453_v58 }
0x32d7   :  { %v5459_v23 = vmul.f32 %v9793_v53, %v5458_v12 }
0x3305   :  { %v5414_v14 = vpop.xlane.xlu0 %5413 }
0x3306   :  { %6802 = vrcp.f32 %v5414_v14  ;;  %v5471_v21 = vand.u32 2147483648, %v5414_v14  ;;  %vm5465_vm4 = vweird.f32 %v5414_v14  ;;  %v5469_v39 = vand.u32 2147483647, %v5414_v14 }
0x3308   :  { %v5472_v44 = vor.u32 1.1754944e-38, %v5471_v21  ;;  %vm5470_vm6 = vcmp.eq.f32.partialorder %v5469_v39, 8.507059e+37 }
0x330c   :  { %v6803_v57 = vpop.eup %6802 }
0x330d   :  { %v5461_v41 = vmul.f32 %v6803_v57, %v5414_v14  ;;  %vm5466_vm14 = vweird.f32 %v6803_v57 }
0x330e   :  { %vm5467_vm15 = vmor %vm5465_vm4, %vm5466_vm14 }
0x330f   :  { %v5462_v16 = vsub.f32 1.0, %v5461_v41 }
0x3311   :  { %v5463_v30 = vmul.f32 %v6803_v57, %v5462_v16 }
0x3313   :  { %v5464_v1 = vadd.f32 %v6803_v57, %v5463_v30 }
0x3315   :  { %v5468_v26 = vsel %vm5467_vm15, %v6803_v57, %v5464_v1 }
0x3316   :  { %v5473_v18 = vsel %vm5470_vm6, %v5472_v44, %v5468_v26 }
0x3317   :  { %v5474_v53 = vmul.f32 %v9809_v5, %v5473_v18 }
0x3318   :  { %v6551_v6 = vpop.permute.xlu0 %6550 }
0x3319   :  { %v6552_v38 = vunpack.i.l.bf16 %v6551_v6  ;;  %v6553_v47 = vunpack.i.h.bf16 %v6551_v6 }
0x331b   :  { %5606 = vmatpush.msrb.mxu1 %v6552_v38 }
0x331d   :  { %5607 = vmatpush.msrb.mxu1 %v6553_v47 }
0x331e   :  { %v5417_v28 = vpop.xlane.xlu2 %5416  ;;  %6329 = vmatmul.msk.f32.vlgmr.msrb.gmra.mxu1 %vm2961_vm8, %v5444_v55 }
0x331f   :  { %6804 = vrcp.f32 %v5417_v28  ;;  %v5486_v63 = vand.u32 2147483648, %v5417_v28  ;;  %vm5480_vm10 = vweird.f32 %v5417_v28  ;;  %v5484_v14 = vand.u32 2147483647, %v5417_v28 }
0x3321   :  { %v5487_v25 = vor.u32 1.1754944e-38, %v5486_v63  ;;  %vm5485_vm5 = vcmp.eq.f32.partialorder %v5484_v14, 8.507059e+37 }
0x3325   :  { %v6805_v13 = vpop.eup %6804 }
0x3326   :  { %v5476_v10 = vmul.f32 %v6805_v13, %v5417_v28  ;;  %v5420_v59 = vpop.xlane.xlu1 %5419  ;;  %6330 = vmatmul.msk.f32.gmra.mxu1 %vm2961_vm8, %v5459_v23  ;;  %vm5481_vm9 = vweird.f32 %v6805_v13 }
0x3327   :  { %6806 = vrcp.f32 %v5420_v59  ;;  %vm5482_vm11 = vmor %vm5480_vm10, %vm5481_vm9  ;;  %v5501_v7 = vand.u32 2147483648, %v5420_v59  ;;  %vm5495_vm3 = vweird.f32 %v5420_v59  ;;  %v5499_v41 = vand.u32 2147483647, %v5420_v59 }
0x3328   :  { %v5477_v33 = vsub.f32 1.0, %v5476_v10 }
0x3329   :  { %v5502_v6 = vor.u32 1.1754944e-38, %v5501_v7  ;;  %vm5500_vm4 = vcmp.eq.f32.partialorder %v5499_v41, 8.507059e+37 }
0x332a   :  { %v5478_v22 = vmul.f32 %v6805_v13, %v5477_v33 }
0x332c   :  { %v5479_v40 = vadd.f32 %v6805_v13, %v5478_v22 }
0x332d   :  { %v6807_v61 = vpop.eup %6806 }
0x332e   :  { %v5491_v46 = vmul.f32 %v6807_v61, %v5420_v59  ;;  %6331 = vmatmul.msk.f32.gmra.mxu1 %vm2961_vm8, %v5474_v53  ;;  %v5483_v35 = vsel %vm5482_vm11, %v6805_v13, %v5479_v40  ;;  %vm5496_vm7 = vweird.f32 %v6807_v61 }
0x332f   :  { %v5488_v20 = vsel %vm5485_vm5, %v5487_v25, %v5483_v35  ;;  %vm5497_vm14 = vmor %vm5495_vm3, %vm5496_vm7 }
0x3330   :  { %v5492_v57 = vsub.f32 1.0, %v5491_v46  ;;  %v5489_v60 = vmul.f32 %v9818_v0, %v5488_v20 }
0x3332   :  { %v5493_v24 = vmul.f32 %v6807_v61, %v5492_v57 }
0x3334   :  { %v5494_v15 = vadd.f32 %v6807_v61, %v5493_v24 }
0x3336   :  { %6332 = vmatmul.msk.f32.gmra.mxu1 %vm2961_vm8, %v5489_v60  ;;  %v5498_v5 = vsel %vm5497_vm14, %v6807_v61, %v5494_v15  ;;  %v5426_v38 = vpop.xlane.xlu2 %5425 }
0x3337   :  { %v5503_v52 = vsel %vm5500_vm4, %v5502_v6, %v5498_v5  ;;  %6808 = vrcp.f32 %v5426_v38  ;;  %v5531_v26 = vand.u32 2147483648, %v5426_v38  ;;  %vm5525_vm5 = vweird.f32 %v5426_v38  ;;  %v6340_v6 = vld [vmem:[%s10175_s19 + $0x38] sm:$0xff] }
0x3338   :  { %v5504_v31 = vmul.f32 %v9824_v9, %v5503_v52  ;;  %v5529_v33 = vand.u32 2147483647, %v5426_v38  ;;  %5686 = vmatpush.msrb.mxu0 %v6340_v6  ;;  %v6339_v52 = vld [vmem:[%s10175_s19 + $0x30] sm:$0xff] }
0x3339   :  { %v5532_v40 = vor.u32 1.1754944e-38, %v5531_v26 }
0x333a   :  { %vm5530_vm3 = vcmp.eq.f32.partialorder %v5529_v33, 8.507059e+37  ;;  %5687 = vmatpush.msrb.mxu0 %v6339_v52  ;;  %v10183_v52 = vld [vmem:[#allocation106_spill] sm:$0xff] }
0x333d   :  { %v6809_v16 = vpop.eup %6808 }
0x333e   :  { %6333 = vmatmul.msk.f32.gmra.mxu1 %vm2961_vm8, %v5504_v31  ;;  %v5429_v56 = vpop.xlane.xlu1 %5428  ;;  %v5521_v55 = vmul.f32 %v6809_v16, %v5426_v38  ;;  %vm5526_vm9 = vweird.f32 %v6809_v16  ;;  %v6338_v38 = vld [vmem:[%s10175_s19 + $0x28] sm:$0xff]  ;;  %v6337_v31 = vld [vmem:[%s10175_s19 + $0x20] sm:$0xff] }
0x333f   :  { %vm5527_vm7 = vmor %vm5525_vm5, %vm5526_vm9  ;;  %v5546_v61 = vand.u32 2147483648, %v5429_v56  ;;  %vm5540_vm4 = vweird.f32 %v5429_v56  ;;  %v5544_v46 = vand.u32 2147483647, %v5429_v56  ;;  %5688 = vmatpush.msrb.mxu0 %v6338_v38  ;;  %v10184_v38 = vld [vmem:[#allocation116_spill] sm:$0xff] }
0x3340   :  { %v5522_v37 = vsub.f32 1.0, %v5521_v55 }
0x3341   :  { %5689 = vmatpush.msrb.mxu0 %v6337_v31  ;;  %v1403_v31 = vsub.f32 %v10184_v38, %v10183_v52 }
0x3342   :  { %v5523_v11 = vmul.f32 %v6809_v16, %v5522_v37 }
0x3343   :  { %v5423_v47 = vpop.xlane.xlu0 %5422 }
0x3344   :  { %6810 = vrcp.f32 %v5423_v47  ;;  %v5516_v12 = vand.u32 2147483648, %v5423_v47  ;;  %v5514_v9 = vand.u32 2147483647, %v5423_v47  ;;  %vm5510_vm6 = vweird.f32 %v5423_v47 }
0x3345   :  { %6812 = vrcp.f32 %v5429_v56  ;;  %v5524_v13 = vadd.f32 %v6809_v16, %v5523_v11 }
0x3346   :  { %v5517_v23 = vor.u32 1.1754944e-38, %v5516_v12  ;;  %vm5515_vm11 = vcmp.eq.f32.partialorder %v5514_v9, 8.507059e+37 }
0x3347   :  { %v5528_v63 = vsel %vm5527_vm7, %v6809_v16, %v5524_v13 }
0x3348   :  { %v5533_v14 = vsel %vm5530_vm3, %v5532_v40, %v5528_v63 }
0x3349   :  { %v5534_v35 = vmul.f32 %v9828_v4, %v5533_v14 }
0x334a   :  { %v6811_v0 = vpop.eup %6810 }
0x334b   :  { %v5506_v30 = vmul.f32 %v6811_v0, %v5423_v47  ;;  %v6813_v28 = vpop.eup %6812  ;;  %vm5511_vm15 = vweird.f32 %v6811_v0 }
0x334c   :  { %v5536_v1 = vmul.f32 %v6813_v28, %v5429_v56  ;;  %vm5512_vm10 = vmor %vm5510_vm6, %vm5511_vm15  ;;  %vm5541_vm14 = vweird.f32 %v6813_v28  ;;  %vm5545_vm6 = vcmp.eq.f32.partialorder %v5544_v46, 8.507059e+37 }
0x334d   :  { %v5507_v58 = vsub.f32 1.0, %v5506_v30  ;;  %vm5542_vm15 = vmor %vm5540_vm4, %vm5541_vm14 }
0x334e   :  { %v5537_v10 = vsub.f32 1.0, %v5536_v1 }
0x334f   :  { %v5508_v21 = vmul.f32 %v6811_v0, %v5507_v58 }
0x3350   :  { %v5538_v22 = vmul.f32 %v6813_v28, %v5537_v10 }
0x3351   :  { %v5509_v39 = vadd.f32 %v6811_v0, %v5508_v21  ;;  %v6593_v21 = vld [vmem:[%s10176_s18 + $0x1] ss:$0 sm:$0xff] }
0x3352   :  { %v5539_v53 = vadd.f32 %v6813_v28, %v5538_v22 }
0x3353   :  { %v5513_v59 = vsel %vm5512_vm10, %v6811_v0, %v5509_v39  ;;  %vm2115_vm10 = vcmask 0  }
0x3354   :  { %v5518_v44 = vsel %vm5515_vm11, %v5517_v23, %v5513_v59  ;;  %v5543_v25 = vsel %vm5542_vm15, %v6813_v28, %v5539_v53 }
0x3355   :  { %v5519_v18 = vmul.f32 %v9836_v51, %v5518_v44  ;;  %v5547_v51 = vor.u32 1.1754944e-38, %v5546_v61  ;;  %v1154_v44 = vsub.f32 %v8711_v17, %v8230_v27  ;;  %v1651_v27 = vsub.f32 %v8741_v3, %v8312_v43 }
0x3357   :  { %6334 = vmatmul.msk.f32.gmra.mxu1 %vm2961_vm8, %v5519_v18  ;;  %v5548_v57 = vsel %vm5545_vm6, %v5547_v51, %v5543_v25  ;;  %v1156_v18 = vmul.f32 %v1154_v44, %v1154_v44  ;;  %v1653_v53 = vmul.f32 %v1651_v27, %v1651_v27  ;;  %v10191_v44 = vld [vmem:[#allocation111_spill] sm:$0xff] }
0x3358   :  { %v5549_v20 = vmul.f32 %v9832_v49, %v5548_v57 }
0x3359   :  { %v1158_v22 = vsel %vm1033_vm12, %v1156_v18, 0.0 }
0x335f   :  { %6335 = vmatmul.msk.f32.gmra.mxu1 %vm2961_vm8, %v5534_v35 }
0x3367   :  { %6336 = vmatmul.msk.f32.gmra.mxu1 %vm2961_vm8, %v5549_v20 }
0x339b   :  { %v5609_v24 = vpop.f32.mrf.mxu1 }
0x33a3   :  { %v5612_v7 = vpop.f32.mrf.mxu1 }
0x33ab   :  { %v5615_v15 = vpop.f32.mrf.mxu1 }
0x33ac   :  { %5635 = vrot.lane.b32.xlu2 %v5615_v15, %s7628_s7  ;;  %v10180_v15 = vld [vmem:[#allocation114_spill] sm:$0xff] }
0x33b3   :  { %v5618_v4 = vpop.f32.mrf.mxu1 }
0x33bb   :  { %v5621_v41 = vpop.f32.mrf.mxu1 }
0x33bc   :  { %5643 = vrot.lane.b32.xlu0 %v5621_v41, %s7614_s30  ;;  %v10181_v41 = vld [vmem:[#allocation107_spill] sm:$0xff] }
0x33c4   :  { %5637 = vrot.lane.b32.xlu0 %v5618_v4, %s7628_s7 }
0x33d4   :  { %v5624_v60 = vpop.f32.mrf.mxu1 }
0x33d5   :  { %5645 = vrot.lane.b32.xlu2 %v5624_v60, %s7614_s30  ;;  %v10182_v60 = vld [vmem:[#allocation115_spill] sm:$0xff]  ;;  %s10197_s30 = sld [smem:[#allocation83_spill]] }
0x33dc   :  { %v5627_v49 = vpop.f32.mrf.mxu1 }
0x33dd   :  { %5651 = vrot.lane.b32.xlu1 %v5627_v49, %s7655_s2 }
0x33e4   :  { %v5630_v5 = vpop.f32.mrf.mxu1 }
0x33e5   :  { %5653 = vrot.lane.b32.xlu1 %v5630_v5, %s7655_s2  ;;  %s7486_s2 = sshra.s32 %s5994_s28, 4  ;;  %s7487_s2 = int_to_ptr.hbm [resolvable:$true] %s7486_s2 }
0x33e6   :  { %s7488_s1 = scalar_lea.hbm %s7487_s2, 1  ;;  %p7491_p10 = scmp.lt.s32.totalorder %s7487_s2, %s7963_s20 }
0x33e7   :  { %p7489_p9 = scmp.ne.s32.totalorder %s7487_s2, %s7488_s1  ;;  %p7492_p11 = scmp.lt.s32.totalorder %s7490_s9, %s7488_s1 }
0x33e9   :  { %p7493_p12 = por %p7492_p11, %p7491_p10 }
0x33eb   :  { %p7494_p13 = pnand %p7493_p12, %p7489_p9 }
0x3406   :  { %v5636_v56 = vpop.permute.xlu2 %5635 }
0x3407   :  { %v5657_v47 = vsel %vm836_vm0, %v5609_v24, %v5636_v56  ;;  %v10186_v56 = vld [vmem:[#allocation117_spill] sm:$0xff] }
0x342e   :  { %v5644_v16 = vpop.permute.xlu0 %5643 }
0x342f   :  { %v5659_v55 = vsel %vm1078_vm13, %v5657_v47, %v5644_v16  ;;  %v5646_v58 = vpop.permute.xlu2 %5645  ;;  %v10185_v16 = vld [vmem:[#allocation108_spill] sm:$0xff] }
0x3430   :  { %v1527_v47 = vsub.f32 %v10186_v56, %v10185_v16 }
0x3436   :  { %v5638_v30 = vpop.permute.xlu0 %5637 }
0x3437   :  { %v5658_v28 = vsel %vm836_vm0, %v5612_v7, %v5638_v30  ;;  %v10179_v7 = vld [vmem:[#allocation105_spill] sm:$0xff]  ;;  %v1529_v30 = vmul.f32 %v1527_v47, %v1527_v47 }
0x3438   :  { %v5660_v11 = vsel %vm1078_vm13, %v5658_v28, %v5646_v58  ;;  %v1278_v4 = vsub.f32 %v10180_v15, %v10179_v7  ;;  %v1405_v28 = vmul.f32 %v1403_v31, %v1403_v31  ;;  %v10187_v58 = vld [vmem:[#allocation109_spill] sm:$0xff]  ;;  %v6594_v31 = vld [vmem:[#allocation30 + $0x1] ss:$0 sm:$0xff] }
0x343a   :  { %v1280_v6 = vmul.f32 %v1278_v4, %v1278_v4 }
0x344f   :  { %v5652_v0 = vpop.permute.xlu1 %5651 }
0x3450   :  { %v5661_v37 = vsel %vm635_vm1, %v5659_v55, %v5652_v0  ;;  %v1282_v0 = vsel %vm1033_vm12, %v1280_v6, 0.0 }
0x3451   :  { %6341 = vmatmul.msk.f32.vlgmr.msrb.gmra.mxu0 %vm667_vm2, %v5661_v37  ;;  %v6347_v37 = vld [vmem:[%s10177_s29 + $0x38] sm:$0xff] }
0x3452   :  { %5792 = vmatpush.msra.mxu2 %v6347_v37 }
0x3457   :  { %v5654_v12 = vpop.permute.xlu1 %5653 }
0x3458   :  { %v5662_v1 = vsel %vm635_vm1, %v5660_v11, %v5654_v12  ;;  %v10188_v11 = vld [vmem:[#allocation118_spill] sm:$0xff] }
0x3459   :  { %6342 = vmatmul.msk.f32.gmra.mxu0 %vm667_vm2, %v5662_v1  ;;  %v1650_v12 = vsub.f32 %v10188_v11, %v10187_v58  ;;  %v10189_v1 = vld [vmem:[#allocation110_spill] sm:$0xff] }
0x34ce   :  { %v5691_v9 = vpop.f32.mrf.mxu0 }
0x34cf   :  { %v5697_v39 = vadd.f32 %v5691_v9, %v9700_v2  ;;  %v1279_v2 = vsub.f32 %v8713_v19, %v8271_v32  ;;  %v1898_v32 = vsub.f32 %v8748_v42, %v8322_v45  ;;  %v1657_v19 = vsel %vm1033_vm12, %v1653_v53, 0.0  ;;  %v10196_v53 = vld [vmem:[#allocation121_spill] sm:$0xff] }
0x34d0   :  { %v1155_v42 = vsub.f32 %v8719_v54, %v8241_v29  ;;  %v1402_v29 = vsub.f32 %v10182_v60, %v10181_v41 }
0x34d1   :  { %v9886_v23 = vadd.f32 %v6593_v21, %v5697_v39  ;;  %v1281_v63 = vmul.f32 %v1279_v2, %v1279_v2  ;;  %v1900_v61 = vmul.f32 %v1898_v32, %v1898_v32  ;;  %v1533_v39 = vsel %vm1033_vm12, %v1529_v30, 0.0  ;;  %v10193_v2 = vld [vmem:[#allocation113_spill] sm:$0xff] }
0x34d2   :  { %v1157_v20 = vmul.f32 %v1155_v42, %v1155_v42  ;;  %v1404_v5 = vmul.f32 %v1402_v29, %v1402_v29 }
0x34d3   :  { %v5710_v13 = vsel %vm667_vm2, %v9886_v23, 0.0  ;;  %v1285_v40 = vsel %vm1033_vm12, %v1281_v63, 0.0 }
0x34d4   :  { %5711 = vadd.xlane.f32.xlu0 %v5710_v13  ;;  %v1161_v54 = vsel %vm1033_vm12, %v1157_v20, 0.0  ;;  %v1406_v55 = vsel %vm1033_vm12, %v1404_v5, 0.0  ;;  %v1409_v13 = vsel %vm1033_vm12, %v1405_v28, 0.0 }
0x34d6   :  { %v5694_v10 = vpop.f32.mrf.mxu0 }
0x34d7   :  { %v5698_v59 = vadd.f32 %v5694_v10, %v9705_v8  ;;  %v1526_v8 = vsub.f32 %v8723_v62, %v8277_v34  ;;  %v2023_v34 = vsub.f32 %v8755_v50, %v8332_v48  ;;  %v1902_v62 = vsel %vm1033_vm12, %v1900_v61, 0.0 }
0x34d9   :  { %v9891_v26 = vadd.f32 %v6593_v21, %v5698_v59  ;;  %v1528_v14 = vmul.f32 %v1526_v8, %v1526_v8  ;;  %v2025_v46 = vmul.f32 %v2023_v34, %v2023_v34  ;;  %v10190_v21 = vld [vmem:[#allocation119_spill] sm:$0xff]  ;;  %v1652_v59 = vmul.f32 %v1650_v12, %v1650_v12 }
0x34da   :  { %v1774_v9 = vsub.f32 %v10190_v21, %v10189_v1 }
0x34db   :  { %v5713_v33 = vsel %vm667_vm2, %v9891_v26, 0.0  ;;  %v1530_v17 = vsel %vm1033_vm12, %v1528_v14, 0.0  ;;  %v2029_v43 = vsel %vm1033_vm12, %v2025_v46, 0.0  ;;  %v6346_v46 = vld [vmem:[%s10177_s29 + $0x30] sm:$0xff] }
0x34dc   :  { %5714 = vadd.xlane.f32.xlu2 %v5713_v33  ;;  %v1776_v10 = vmul.f32 %v1774_v9, %v1774_v9  ;;  %v10192_v33 = vld [vmem:[#allocation120_spill] sm:$0xff]  ;;  %5793 = vmatpush.msra.mxu2 %v6346_v46  ;;  %v6365_v9 = vld [vmem:[%s10178_s5 + $0xf8] sm:$0xff] }
0x34dd   :  { %v1775_v18 = vsub.f32 %v10192_v33, %v10191_v44  ;;  %5838 = vmatpush.msra.mxu0 %v6365_v9 }
0x34de   :  { %v1778_v8 = vsel %vm1033_vm12, %v1776_v10, 0.0 }
0x34df   :  { %v1777_v27 = vmul.f32 %v1775_v18, %v1775_v18 }
0x34e1   :  { %v1781_v61 = vsel %vm1033_vm12, %v1777_v27, 0.0 }
0x34e4   :  { %1159 = vadd.xlane.f32.xlu2 %v1158_v22  ;;  %v10194_v22 = vld [vmem:[#allocation122_spill] sm:$0xff] }
0x34e5   :  { %v1899_v63 = vsub.f32 %v10194_v22, %v10193_v2 }
0x34e7   :  { %v1901_v14 = vmul.f32 %v1899_v63, %v1899_v63 }
0x34ec   :  { %1286 = vadd.xlane.f32.xlu2 %v1285_v40  ;;  %v1654_v40 = vsel %vm1033_vm12, %v1652_v59, 0.0  ;;  %v6363_v59 = vld [vmem:[%s10178_s5 + $0xe8] sm:$0xff] }
0x34f4   :  { %1531 = vadd.xlane.f32.xlu2 %v1530_v17  ;;  %v10195_v17 = vld [vmem:[#allocation112_spill] sm:$0xff] }
0x34f5   :  { %v2022_v32 = vsub.f32 %v10196_v53, %v10195_v17 }
0x34f7   :  { %v2024_v34 = vmul.f32 %v2022_v32, %v2022_v32 }
0x34fc   :  { %1658 = vadd.xlane.f32.xlu2 %v1657_v19  ;;  %v1905_v19 = vsel %vm1033_vm12, %v1901_v14, 0.0 }
0x3504   :  { %1903 = vadd.xlane.f32.xlu2 %v1902_v62  ;;  %v2026_v62 = vsel %vm1033_vm12, %v2024_v34, 0.0 }
0x350c   :  { %2030 = vadd.xlane.f32.xlu2 %v2029_v43  ;;  %v6345_v43 = vld [vmem:[%s10177_s29 + $0x28] sm:$0xff] }
0x350d   :  { %5794 = vmatpush.msra.mxu2 %v6345_v43 }
0x3547   :  { %v5712_v3 = vpop.xlane.xlu0 %5711 }
0x3548   :  { %v5716_v35 = vmul.f32 %v5712_v3, %v8142_v36 }
0x354a   :  { %v9915_v25 = vsub.f32 %v9886_v23, %v5716_v35  ;;  %v6344_v35 = vld [vmem:[%s10177_s29 + $0x20] sm:$0xff] }
0x354b   :  { %5795 = vmatpush.msra.mxu2 %v6344_v35 }
0x354c   :  { %v5720_v45 = vmul.f32 %v9915_v25, %v9915_v25 }
0x354e   :  { %v5722_v48 = vsel %vm667_vm2, %v5720_v45, 0.0 }
0x354f   :  { %5723 = vadd.xlane.f32.xlu1 %v5722_v48  ;;  %v5715_v50 = vpop.xlane.xlu2 %5714 }
0x3550   :  { %v5717_v51 = vmul.f32 %v5715_v50, %v8142_v36 }
0x3552   :  { %v9924_v57 = vsub.f32 %v9891_v26, %v5717_v51 }
0x3554   :  { %v5721_v24 = vmul.f32 %v9924_v57, %v9924_v57 }
0x3556   :  { %v5725_v49 = vsel %vm667_vm2, %v5721_v24, 0.0 }
0x3557   :  { %1162 = vadd.xlane.f32.xlu1 %v1161_v54  ;;  %5726 = vadd.xlane.f32.xlu0 %v5725_v49  ;;  %v1160_v3 = vpop.xlane.xlu2 %1159 }
0x355f   :  { %1407 = vadd.xlane.f32.xlu1 %v1406_v55  ;;  %1283 = vadd.xlane.f32.xlu0 %v1282_v0  ;;  %v1287_v50 = vpop.xlane.xlu2 %1286 }
0x3567   :  { %1534 = vadd.xlane.f32.xlu1 %v1533_v39  ;;  %1410 = vadd.xlane.f32.xlu0 %v1409_v13  ;;  %v1532_v49 = vpop.xlane.xlu2 %1531  ;;  %v6364_v39 = vld [vmem:[%s10178_s5 + $0xf0] sm:$0xff] }
0x3568   :  { %5839 = vmatpush.msra.mxu0 %v6364_v39 }
0x356a   :  { %5840 = vmatpush.msra.mxu0 %v6363_v59 }
0x356f   :  { %1779 = vadd.xlane.f32.xlu1 %v1778_v8  ;;  %1655 = vadd.xlane.f32.xlu0 %v1654_v40  ;;  %v1659_v11 = vpop.xlane.xlu2 %1658 }
0x3577   :  { %1906 = vadd.xlane.f32.xlu1 %v1905_v19  ;;  %1782 = vadd.xlane.f32.xlu0 %v1781_v61  ;;  %v1904_v40 = vpop.xlane.xlu2 %1903 }
0x357f   :  { %2027 = vadd.xlane.f32.xlu0 %v2026_v62  ;;  %v2031_v34 = vpop.xlane.xlu2 %2030 }
0x35c2   :  { %v5724_v45 = vpop.xlane.xlu1 %5723 }
0x35c3   :  { %v5728_v42 = vmul.f32 %v5724_v45, %v8142_v36 }
0x35c5   :  { %v5730_v48 = vadd.f32 1e-05, %v5728_v42 }
0x35c7   :  { %6814 = vrsqrt.f32 %v5730_v48  ;;  %vm5738_vm1 = vweird.f32 %v5730_v48 }
0x35ca   :  { %v5727_v51 = vpop.xlane.xlu0 %5726  ;;  %v1163_v20 = vpop.xlane.xlu1 %1162 }
0x35cb   :  { %v5729_v24 = vmul.f32 %v5727_v51, %v8142_v36  ;;  %v6595_v36 = vld [vmem:[#allocation29 + $0x1] ss:$0 sm:$0xff]  ;;  %v1289_v1 = vadd.f32 %v1287_v50, %v1163_v20 }
0x35cd   :  { %v6815_v7 = vpop.eup %6814  ;;  %v5731_v15 = vadd.f32 1e-05, %v5729_v24  ;;  %v6362_v24 = vld [vmem:[%s10178_s5 + $0xe0] sm:$0xff] }
0x35ce   :  { %v5733_v4 = vmul.f32 %v6815_v7, %v5730_v48  ;;  %vm5739_vm0 = vweird.f32 %v6815_v7  ;;  %5841 = vmatpush.msra.mxu0 %v6362_v24 }
0x35cf   :  { %6816 = vrsqrt.f32 %v5731_v15  ;;  %vm5740_vm12 = vmor %vm5738_vm1, %vm5739_vm0  ;;  %vm5748_vm8 = vweird.f32 %v5731_v15 }
0x35d0   :  { %v5734_v41 = vmul.f32 %v6815_v7, %v5733_v4  ;;  %v6359_v4 = vld [vmem:[%s10178_s5 + $0xc8] sm:$0xff] }
0x35d2   :  { %v5735_v60 = vmul.f32 0.5, %v5734_v41  ;;  %v1284_v29 = vpop.xlane.xlu0 %1283  ;;  %v1408_v54 = vpop.xlane.xlu1 %1407  ;;  %v6358_v41 = vld [vmem:[%s10178_s5 + $0xc0] sm:$0xff] }
0x35d3   :  { %v1288_v21 = vadd.f32 %v1284_v29, %v1160_v3  ;;  %v6356_v29 = vld [vmem:[%s10178_s5 + $0xb0] sm:$0xff] }
0x35d4   :  { %v5736_v5 = vsub.f32 1.5, %v5735_v60  ;;  %v6357_v60 = vld [vmem:[%s10178_s5 + $0xb8] sm:$0xff] }
0x35d5   :  { %v6817_v6 = vpop.eup %6816  ;;  %v1412_v33 = vadd.f32 %v1408_v54, %v1288_v21  ;;  %v6355_v54 = vld [vmem:[%s10178_s5 + $0xa8] sm:$0xff] }
0x35d6   :  { %v5737_v52 = vmul.f32 %v6815_v7, %v5736_v5  ;;  %v5743_v38 = vmul.f32 %v6817_v6, %v5731_v15  ;;  %vm5749_vm13 = vweird.f32 %v6817_v6  ;;  %v6360_v15 = vld [vmem:[%s10178_s5 + $0xd0] sm:$0xff]  ;;  %v6353_v5 = vld [vmem:[%s10178_s5 + $0x98] sm:$0xff] }
0x35d7   :  { %vm5750_vm9 = vmor %vm5748_vm8, %vm5749_vm13  ;;  %v1536_v8 = vadd.f32 %v1532_v49, %v1412_v33  ;;  %v6354_v49 = vld [vmem:[%s10178_s5 + $0xa0] sm:$0xff] }
0x35d8   :  { %v5741_v16 = vsel %vm5740_vm12, %v6815_v7, %v5737_v52  ;;  %v5744_v56 = vmul.f32 %v6817_v6, %v5743_v38  ;;  %v6361_v7 = vld [vmem:[%s10178_s5 + $0xd8] sm:$0xff]  ;;  %v6351_v52 = vld [vmem:[%s10178_s5 + $0x88] sm:$0xff]  ;;  %v6350_v38 = vld [vmem:[%s10178_s5 + $0x80] sm:$0xff] }
0x35d9   :  { %v5752_v47 = vmul.f32 %v5741_v16, %v9915_v25  ;;  %5842 = vmatpush.msra.mxu0 %v6361_v7 }
0x35da   :  { %v5745_v55 = vmul.f32 0.5, %v5744_v56  ;;  %v1411_v0 = vpop.xlane.xlu0 %1410  ;;  %v1535_v37 = vpop.xlane.xlu1 %1534 }
0x35db   :  { %v5757_v30 = vmul.f32 %v6594_v31, %v5752_v47  ;;  %v1413_v10 = vadd.f32 %v1411_v0, %v1289_v1  ;;  %5843 = vmatpush.msra.mxu0 %v6360_v15 }
0x35dc   :  { %v5746_v28 = vsub.f32 1.5, %v5745_v55 }
0x35dd   :  { %v5762_v58 = vadd.f32 %v6595_v36, %v5757_v30  ;;  %v1537_v22 = vadd.f32 %v1535_v37, %v1413_v10  ;;  %5844 = vmatpush.msra.mxu0 %v6359_v4 }
0x35de   :  { %v5747_v12 = vmul.f32 %v6817_v6, %v5746_v28 }
0x35df   :  { %6348 = vmatmul.msk.f32.vlgmr.msra.gmra.mxu2 %vm667_vm2, %v5762_v58  ;;  %v1661_v27 = vadd.f32 %v1659_v11, %v1537_v22  ;;  %5845 = vmatpush.msra.mxu0 %v6358_v41  ;;  %v5871_v22 = vld [vmem:[%s10197_s30 + $0x8] sm:$0xff] }
0x35e0   :  { %v5751_v25 = vsel %vm5750_vm9, %v6817_v6, %v5747_v12  ;;  %v6352_v6 = vld [vmem:[%s10178_s5 + $0x90] sm:$0xff] }
0x35e1   :  { %v5753_v13 = vmul.f32 %v5751_v25, %v9924_v57  ;;  %5846 = vmatpush.msra.mxu0 %v6357_v60 }
0x35e2   :  { %v1656_v44 = vpop.xlane.xlu0 %1655  ;;  %v1780_v2 = vpop.xlane.xlu1 %1779 }
0x35e3   :  { %v5758_v18 = vmul.f32 %v6594_v31, %v5753_v13  ;;  %v1660_v14 = vadd.f32 %v1656_v44, %v1536_v8  ;;  %5847 = vmatpush.msra.mxu0 %v6356_v29  ;;  %v6596_v31 = vld [vmem:[#allocation9 + $0x1] ss:$0 sm:$0xff] }
0x35e4   :  { %v5936_v8 = vld [vmem:[%s10198_s23 + $0x58] sm:$0xff] }
0x35e5   :  { %v5763_v63 = vadd.f32 %v6595_v36, %v5758_v18  ;;  %v1784_v32 = vadd.f32 %v1780_v2, %v1660_v14  ;;  %5848 = vmatpush.msra.mxu0 %v6355_v54  ;;  %v5873_v36 = vld [vmem:[%s10197_s30 + $0x18] sm:$0xff]  ;;  %v5872_v2 = vld [vmem:[%s10197_s30 + $0x10] sm:$0xff]  ;;  %5952 = vmatpush.msra.mxu1 %v5936_v8  ;;  %v5934_v14 = vld [vmem:[%s10198_s23 + $0x48] sm:$0xff] }
0x35e6   :  { %5896 = vmatpush.msrb.mxu2 %v5873_v36 }
0x35e7   :  { %6349 = vmatmul.msk.f32.gmra.mxu2 %vm667_vm2, %v5763_v63  ;;  %v1908_v61 = vadd.f32 %v1904_v40, %v1784_v32  ;;  %5849 = vmatpush.msra.mxu0 %v6354_v49  ;;  %v5870_v63 = vld [vmem:[%s10197_s30] sm:$0xff]  ;;  %v5935_v40 = vld [vmem:[%s10198_s23 + $0x50] sm:$0xff] }
0x35e8   :  { %5897 = vmatpush.msrb.mxu2 %v5872_v2  ;;  %5953 = vmatpush.msra.mxu1 %v5935_v40 }
0x35e9   :  { %5850 = vmatpush.msra.mxu0 %v6353_v5 }
0x35ea   :  { %v1783_v17 = vpop.xlane.xlu0 %1782  ;;  %v1907_v57 = vpop.xlane.xlu1 %1906  ;;  %5898 = vmatpush.msrb.mxu2 %v5871_v22  ;;  %5954 = vmatpush.msra.mxu1 %v5934_v14 }
0x35eb   :  { %v1785_v53 = vadd.f32 %v1783_v17, %v1661_v27  ;;  %5851 = vmatpush.msra.mxu0 %v6352_v6  ;;  %v6597_v27 = vld [vmem:[#allocation11 + $0x1] ss:$0 sm:$0xff] }
0x35ec   :  { %5899 = vmatpush.msrb.mxu2 %v5870_v63 }
0x35ed   :  { %v1909_v19 = vadd.f32 %v1907_v57, %v1785_v53  ;;  %5852 = vmatpush.msra.mxu0 %v6351_v52 }
0x35ef   :  { %v2033_v46 = vadd.f32 %v2031_v34, %v1909_v19  ;;  %5853 = vmatpush.msra.mxu0 %v6350_v38  ;;  %v5933_v34 = vld [vmem:[%s10198_s23 + $0x40] sm:$0xff] }
0x35f0   :  { %5955 = vmatpush.msra.mxu1 %v5933_v34 }
0x35f2   :  { %v2028_v62 = vpop.xlane.xlu0 %2027 }
0x35f3   :  { %v2032_v43 = vadd.f32 %v2028_v62, %v1908_v61  ;;  %v5932_v62 = vld [vmem:[%s10198_s23 + $0x38] sm:$0xff] }
0x35f4   :  { %5956 = vmatpush.msra.mxu1 %v5932_v62 }
0x35f5   :  { %v2107_v3 = vadd.f32 %v2033_v46, %v2032_v43  ;;  %v5931_v46 = vld [vmem:[%s10198_s23 + $0x30] sm:$0xff]  ;;  %v5929_v43 = vld [vmem:[%s10198_s23 + $0x20] sm:$0xff] }
0x35f6   :  { %5957 = vmatpush.msra.mxu1 %v5931_v46 }
0x35f7   :  { %v2108_v35 = vrot.slane %v2107_v3, 4 }
0x35f9   :  { %v2109_v45 = vadd.f32 %v2108_v35, %v2107_v3  ;;  %v5928_v3 = vld [vmem:[%s10198_s23 + $0x18] sm:$0xff]  ;;  %v5927_v35 = vld [vmem:[%s10198_s23 + $0x10] sm:$0xff] }
0x35fb   :  { %v2110_v42 = vrot.slane %v2109_v45, 2 }
0x35fd   :  { %v2111_v48 = vadd.f32 %v2110_v42, %v2109_v45  ;;  %v5925_v45 = vld [vmem:[%s10198_s23] sm:$0xff]  ;;  %v6598_v42 = vld [vmem:[#allocation20] ss:$0 sm:$0xff] }
0x35ff   :  { %v2112_v50 = vrot.slane %v2111_v48, 1 }
0x3601   :  { %v2113_v51 = vadd.f32 %v2112_v50, %v2111_v48 }
0x3603   :  { %v2114_v20 = vmul.f32 0.0024414063, %v2113_v51 }
0x3605   :  { %2116 = vst.msk [vmem:[#allocation46] sm:$0x1] %vm2115_vm10, %v2114_v20 }
0x3662   :  { %v5797_v16 = vpop.f32.mrf.mxu2 }
0x3663   :  { %v5798_v56 = vadd.f32 %v6596_v31, %v5797_v16 }
0x3665   :  { %v5803_v47 = vmul.f32 %v5798_v56, %v5798_v56 }
0x3667   :  { %v5805_v55 = vmul.f32 %v5803_v47, %v5798_v56 }
0x3669   :  { %v5807_v0 = vmul.f32 0.044715, %v5805_v55 }
0x366a   :  { %v5800_v37 = vpop.f32.mrf.mxu2 }
0x366b   :  { %v5809_v30 = vadd.f32 %v5807_v0, %v5798_v56  ;;  %v5801_v28 = vadd.f32 %v6596_v31, %v5800_v37 }
0x366d   :  { %v5811_v58 = vmul.f32 0.7978846, %v5809_v30  ;;  %v5804_v11 = vmul.f32 %v5801_v28, %v5801_v28 }
0x366f   :  { %6818 = vtanh.f32 %v5811_v58  ;;  %v5806_v12 = vmul.f32 %v5804_v11, %v5801_v28 }
0x3671   :  { %v5808_v1 = vmul.f32 0.044715, %v5806_v12 }
0x3673   :  { %v5810_v21 = vadd.f32 %v5808_v1, %v5801_v28 }
0x3675   :  { %v6819_v9 = vpop.eup %6818  ;;  %v5812_v39 = vmul.f32 0.7978846, %v5810_v21 }
0x3676   :  { %v5815_v25 = vadd.f32 1.0, %v6819_v9 }
0x3677   :  { %6820 = vtanh.f32 %v5812_v39 }
0x3678   :  { %v5817_v13 = vmul.f32 0.5, %v5815_v25 }
0x367a   :  { %v5819_v10 = vmul.f32 %v5817_v13, %v5798_v56 }
0x367c   :  { %5854 = vmatmul.f32.vlgmr.msra.gmra.mxu0 %v5819_v10 }
0x367d   :  { %v6821_v59 = vpop.eup %6820 }
0x367e   :  { %v5816_v44 = vadd.f32 1.0, %v6821_v59 }
0x3680   :  { %v5818_v33 = vmul.f32 0.5, %v5816_v44 }
0x3682   :  { %v5820_v18 = vmul.f32 %v5818_v33, %v5801_v28 }
0x3684   :  { %5857 = vmatmul.f32.gmra.mxu0 %v5820_v18 }
0x36f9   :  { %v5855_v17 = vpop.f32.mrf.mxu0 }
0x36fa   :  { %v5861_v53 = vadd.f32 %v5855_v17, %v9886_v23  ;;  %v5930_v23 = vld [vmem:[%s10198_s23 + $0x28] sm:$0xff] }
0x36fb   :  { %5958 = vmatpush.msra.mxu1 %v5930_v23 }
0x36fc   :  { %v5868_v32 = vadd.f32 %v6597_v27, %v5861_v53 }
0x36fd   :  { %5959 = vmatpush.msra.mxu1 %v5929_v43 }
0x36fe   :  { %6366 = vmatmul.msk.f32.vlgmr.msrb.gmra.mxu2 %vm667_vm2, %v5868_v32 }
0x36ff   :  { %5960 = vmatpush.msra.mxu1 %v5928_v3 }
0x3701   :  { %v5858_v57 = vpop.f32.mrf.mxu0  ;;  %5961 = vmatpush.msra.mxu1 %v5927_v35 }
0x3702   :  { %v5862_v19 = vadd.f32 %v5858_v57, %v9891_v26  ;;  %v5926_v26 = vld [vmem:[%s10198_s23 + $0x8] sm:$0xff] }
0x3703   :  { %5962 = vmatpush.msra.mxu1 %v5926_v26 }
0x3704   :  { %v5869_v61 = vadd.f32 %v6597_v27, %v5862_v19 }
0x3705   :  { %5963 = vmatpush.msra.mxu1 %v5925_v45 }
0x3706   :  { %6367 = vmatmul.msk.f32.gmra.mxu2 %vm667_vm2, %v5869_v61  ;;  %vm5941_vm2 = vcmask 785408  }
0x3781   :  { %v5901_v48 = vpop.f32.mrf.mxu2 }
0x3782   :  { %v5902_v50 = vadd.f32 %v6598_v42, %v5901_v48 }
0x3784   :  { %v5907_v51 = vmul.f32 %v5902_v50, %v5902_v50 }
0x3786   :  { %v5909_v20 = vmul.f32 %v5907_v51, %v5902_v50 }
0x3788   :  { %v5911_v24 = vmul.f32 0.044715, %v5909_v20 }
0x3789   :  { %v5904_v7 = vpop.f32.mrf.mxu2 }
0x378a   :  { %v5913_v15 = vadd.f32 %v5911_v24, %v5902_v50  ;;  %v5905_v4 = vadd.f32 %v6598_v42, %v5904_v7 }
0x378c   :  { %v5915_v41 = vmul.f32 0.7978846, %v5913_v15  ;;  %v5908_v60 = vmul.f32 %v5905_v4, %v5905_v4 }
0x378e   :  { %6822 = vtanh.f32 %v5915_v41  ;;  %v5910_v29 = vmul.f32 %v5908_v60, %v5905_v4 }
0x3790   :  { %v5912_v54 = vmul.f32 0.044715, %v5910_v29 }
0x3792   :  { %v5914_v49 = vadd.f32 %v5912_v54, %v5905_v4 }
0x3794   :  { %v6823_v5 = vpop.eup %6822  ;;  %v5916_v6 = vmul.f32 0.7978846, %v5914_v49 }
0x3795   :  { %v5919_v52 = vadd.f32 1.0, %v6823_v5 }
0x3796   :  { %6824 = vtanh.f32 %v5916_v6 }
0x3797   :  { %v5921_v38 = vmul.f32 0.5, %v5919_v52 }
0x3799   :  { %v5923_v31 = vmul.f32 %v5921_v38, %v5902_v50 }
0x379b   :  { %6368 = vmatmul.msk.f32.vlgmr.msra.gmra.mxu1 %vm5941_vm2, %v5923_v31 }
0x379c   :  { %v6825_v16 = vpop.eup %6824 }
0x379d   :  { %v5920_v56 = vadd.f32 1.0, %v6825_v16 }
0x379f   :  { %v5922_v36 = vmul.f32 0.5, %v5920_v56 }
0x37a1   :  { %v5924_v47 = vmul.f32 %v5922_v36, %v5905_v4 }
0x37a3   :  { %6369 = vmatmul.msk.f32.gmra.mxu1 %vm5941_vm2, %v5924_v47 }
0x37a4   :  { %7497 = shalt.err (!%p7494_p13)
}
0x37a5   :  { %5996 = dma.vmem_to_hbm [thread:$0]  %s5992_s26, 16, %s5994_s28, [#allocation47]   ;;  %v6599_v55 = vld [vmem:[#allocation21] ss:$0 sm:$0xff] }
0x37a6   :  { %s7664_s11 = smov [#allocation45]   ;;  %s5979_s15 = sshll.u32 %s7958_s13, 4  ;;  %s5980_s15 = int_to_ptr.hbm [resolvable:$true] %s5979_s15 }
0x37a7   :  { %s5977_s10 = sshll.u32 %s7664_s11, 4  ;;  %s7510_s20 = sshra.s32 %s5980_s15, 4  ;;  %s5978_s10 = int_to_ptr.vmem [resolvable:$true] %s5977_s10  ;;  %s7511_s20 = int_to_ptr.hbm [resolvable:$true] %s7510_s20 }
0x37a8   :  { %s7512_s6 = scalar_lea.hbm %s7511_s20, 16  ;;  %s7514_s27 = scalar_lea.hbm %s7958_s13, 16 }
0x37a9   :  { %p7513_p0 = scmp.ne.s32.totalorder %s7511_s20, %s7512_s6  ;;  %p7515_p1 = scmp.lt.s32.totalorder %s7511_s20, %s7958_s13 }
0x37aa   :  { %p7516_p2 = scmp.lt.s32.totalorder %s7514_s27, %s7512_s6 }
0x37ac   :  { %p7517_p3 = por %p7516_p2, %p7515_p1 }
0x37ae   :  { %p7518_p4 = pnand %p7517_p3, %p7513_p0 }
0x3818   :  { %v5965_v0 = vpop.f32.mrf.mxu1 }
0x3819   :  { %v5966_v37 = vadd.f32 %v6599_v55, %v5965_v0 }
0x381b   :  { %5971 = vst [vmem:[#allocation45] sm:$0xff] %v5966_v37 }
0x3820   :  { %v5968_v30 = vpop.f32.mrf.mxu1 }
0x3821   :  { %v5969_v28 = vadd.f32 %v6599_v55, %v5968_v30 }
0x3823   :  { %5972 = vst [vmem:[#allocation45 + $0x8] sm:$0xff] %v5969_v28 }
0x3824   :  { %7521 = shalt.err (!%p7518_p4)
}
0x3825   :  { %5985 = dma.vmem_to_hbm [thread:$0]  %s5978_s10, 256, %s5980_s15, [#allocation5], %s7627_s24, %s7627_s24, %s7628_s7  }
0x3826   :  { %7550 = dma.done.wait [#allocation5], 256  }
0x3827   :  { %7551 = vsyncadd [#allocation5], 4294967040 }
0x3828   :  { %7552 = dma.done.wait [#allocation47], 16  }
0x3829   :  { %7553 = vsyncadd [#allocation47], 4294967280 }
0x382a   :  { %6005 = vsyncpa [#allocation4], 1 }
0x382b   :  { %6006 = vsyncpa [#allocation7], 1 }
0x382c   :  { %6007 = vsyncpa [#allocation10], 1 }
0x382d   :  { %6008 = vsyncpa [#allocation13], 1 }
0x382e   :  { %6009 = vsyncpa [#allocation16], 1 }
0x382f   :  { %6010 = vsyncpa [#allocation19], 1 }
0x3830   :  { %6011 = vsyncpa [#allocation22], 1 }
0x3831   :  { %6012 = vsyncpa [#allocation25], 1 }
0x3832   :  { %6013 = vsyncpa [#allocation28], 1 }
0x3833   :  { %6014 = vsyncpa [#allocation31], 1 }
0x3834   :  { %6015 = vsyncpa [#allocation34], 1 }
0x3835   :  { %6016 = vsyncpa [#allocation37], 1 }
0x3836   :  { %6017 = vsyncpa [#allocation40], 1 }
0x3837   :  { %6018 = vsyncpa [#allocation43], 1 }
0x3838   :  { %6019 = vsyncpa [#allocation5], 1 }
0x3839   :  { %6020 = vsyncpa [#allocation47], 1 }

</bundles_post_ra>
